<compile_context>
chip_gen: v6e
topology: v6e:2x2x1
jax: 0.10.0
libtpu: 0.0.40
codegen_flags: <defaults>
</compile_context>

<pallas_src>
import functools

import jax
import jax.numpy as jnp
import numpy as np
from jax import lax
from jax.experimental import pallas as pl
from jax.experimental.pallas import tpu as pltpu


# ----------------------------------------------------------------------------- helpers
_DIL = (1, 3, 5)
_D_IDX = {1: 0, 3: 1, 5: 2}


def _lrelu(v, slope=0.2):
    return jnp.where(v >= 0, v, slope * v)


def _tap_offsets(d):
    return [(ih, iw) for ih in (-d, 0, d) for iw in (-d, 0, d)]


def _shift_mask(H, W, ih, iw):
    """0/1 (f32) mask over the flat H*W axis: 1 where the shifted tap is in-bounds."""
    i = np.arange(H)[:, None]
    j = np.arange(W)[None, :]
    ok = (i + ih >= 0) & (i + ih < H) & (j + iw >= 0) & (j + iw < W)
    return ok.astype(np.float32).reshape(H * W)


# ----------------------------------------------------------------------------- kernel
def _make_db_kernel(Cin, Coff, mid, H, W, PAD, Csrc, has_proj):
    HW = H * W
    F32 = jnp.float32

    def kernel(*refs):
        if has_proj:
            (x_ref, masks, w_off, b_off, w_msk, b_msk, w_dcn, b_dcn,
             w_sa, b_sa, m_ca, b_ca, w_gk, b_gk, w_cv, b_cv,
             w_f1, b_f1, w_f3, b_f3, w_f5, b_f5, w_fu, b_fu,
             pool_cat, poolT_cat,
             o_ref, src, patA, patB) = refs
        else:
            (x_ref, masks, w_off, b_off, w_msk, b_msk, w_dcn, b_dcn,
             w_sa, b_sa, m_ca, b_ca, w_gk, b_gk,
             w_f1, b_f1, w_f3, b_f3, w_f5, b_f5, w_fu, b_fu,
             pool_cat, poolT_cat,
             o_ref, src, patA, patB) = refs
            w_cv = b_cv = None

        # Zero ONLY the two halo stripes (the image region is always overwritten
        # before use; out-of-image tap reads land in these zeros or are masked).
        src[0:Csrc, 0:PAD] = jnp.zeros((Csrc, PAD), F32)
        src[0:Csrc, PAD + HW:2 * PAD + HW] = jnp.zeros((Csrc, PAD), F32)

        def mask_row(d, t):
            r = _D_IDX[d] * 9 + t
            return masks[r:r + 1, :]                       # (1, HW), from VMEM

        def taps_into(pat, xflat, C):
            """Write xflat and its 9 zero-padded (d=1) taps, tap-major, into pat."""
            src[0:C, PAD:PAD + HW] = xflat
            for t, (ih, iw) in enumerate(_tap_offsets(1)):
                s = ih * W + iw
                tap = src[0:C, PAD + s:PAD + s + HW]       # flat shift via halo
                if ih != 0 or iw != 0:
                    tap = tap * mask_row(1, t)
                pat[t * C:(t + 1) * C, :] = tap

        x = x_ref[0]                                        # (Cin, HW)

        # ---- generate_kernel: DCN(approx) -> lrelu -> SEKG -> 1x1 ------------
        taps_into(patA, x, Cin)                             # patA[0:9*Cin] = x taps
        xoff = _lrelu(jnp.dot(w_off[...], patA[0:9 * Cin, :],
                              preferred_element_type=F32) + b_off[...])
        taps_into(patB, xoff, Coff)
        m = jax.nn.sigmoid(jnp.dot(w_msk[...], patB[0:9 * Coff, :],
                                   preferred_element_type=F32) + b_msk[...])
        # in-place modulation of the x taps (bounds live vregs to ~1 tap)
        for t in range(9):
            patA[t * Cin:(t + 1) * Cin, :] = (patA[t * Cin:(t + 1) * Cin, :]
                                              * m[t * Cin:(t + 1) * Cin, :])
        g = _lrelu(jnp.dot(w_dcn[...], patA[0:9 * Cin, :],
                           preferred_element_type=F32) + b_dcn[...])

        # ---- SEKG --------------------------------------------------------------
        src[0:Cin, PAD:PAD + HW] = g
        wsav = w_sa[...]                                    # (Cin, 9), loaded once
        sa = jnp.zeros((Cin, HW), F32)
        for t, (ih, iw) in enumerate(_tap_offsets(1)):
            s = ih * W + iw
            tap = src[0:Cin, PAD + s:PAD + s + HW]
            if ih != 0 or iw != 0:
                tap = tap * mask_row(1, t)
            sa = sa + tap * wsav[:, t:t + 1]
        sa = sa + b_sa[...]
        pooled = jnp.mean(g, axis=1, keepdims=True)         # (Cin, 1)
        ca = jnp.dot(m_ca[...], pooled,
                     preferred_element_type=F32) + b_ca[...]
        sek = sa + ca                                       # (Cin, HW)

        # 1x1 conv -> per-pixel 3x3 kernels; rows are tap-major (t*mid + c)
        y = jnp.dot(w_gk[...], sek,
                    preferred_element_type=F32) + b_gk[...]

        # ---- project x to mid channels (1x1) -----------------------------------
        if has_proj:
            xm = jnp.dot(w_cv[...], x,
                         preferred_element_type=F32) + b_cv[...]
        else:
            xm = x

        # ---- DepthDC branches: taps read straight from the halo scratch --------
        src[0:mid, PAD:PAD + HW] = xm
        accs = []
        for d in _DIL:
            acc = jnp.zeros((mid, HW), F32)
            for t, (ih, iw) in enumerate(_tap_offsets(d)):
                s = ih * W + iw
                tap = src[0:mid, PAD + s:PAD + s + HW]
                if ih != 0 or iw != 0:
                    tap = tap * mask_row(d, t)
                acc = acc + tap * y[t * mid:(t + 1) * mid, :]
            accs.append(acc)

        # fuse convs (3x3, d=1) -> branch outputs  (patches only materialized here)
        branch = []
        for acc, w_f, b_f in zip(accs, (w_f1, w_f3, w_f5), (b_f1, b_f3, b_f5)):
            taps_into(patA, acc, mid)
            branch.append(_lrelu(jnp.dot(w_f[...], patA[0:9 * mid, :],
                                         preferred_element_type=F32) + b_f[...]))

        # ---- Attention over [xm, x1, x3, x5], blockwise (no concat / scratch) ---
        parts = [xm] + branch                               # 4 x (mid, HW)
        x_hw = [2.0 * jax.nn.sigmoid(jnp.mean(p, axis=1, keepdims=True)) * p
                for p in parts]
        ch_sum = x_hw[0].sum(axis=0, keepdims=True)
        for p in x_hw[1:]:
            ch_sum = ch_sum + p.sum(axis=0, keepdims=True)  # (1, HW)
        per = jnp.dot(ch_sum, pool_cat[...],
                      preferred_element_type=F32)           # (1, H+W), scales baked
        s_pos = jnp.dot(2.0 * jax.nn.sigmoid(per), poolT_cat[...],
                        preferred_element_type=F32)         # s_cw + s_ch, (1, HW)
        gate = 1.0 + s_pos

        # ---- fusion (1x1, split per channel block) + residual -------------------
        out = b_fu[...] + x
        for k, p in enumerate(x_hw):
            out = out + jnp.dot(w_fu[:, k * mid:(k + 1) * mid], p * gate,
                                preferred_element_type=F32)
        o_ref[0] = out.astype(o_ref.dtype)

    return kernel


# ----------------------------------------------------------------------------- wrapper
def db_pallas(x_nchw, params, *, mid_channels, offset_channels):
    x_nchw = x_nchw.astype(jnp.float32)
    N, Cin, H, W = x_nchw.shape
    mid, Coff = mid_channels, offset_channels
    HW = H * W
    has_proj = Cin != mid
    PAD = ((5 * (W + 1) + 127) // 128) * 128          # halo >= 5*W+5, lane aligned
    Csrc = max(Cin, Coff, mid)
    CpatA = max(Cin, mid)

    def w3(w):   # (Cout, Cin, 3, 3) -> (Cout, 9*Cin), tap-major, cin innermost
        co, ci = w.shape[0], w.shape[1]
        return jnp.transpose(w, (0, 2, 3, 1)).reshape(co, 9 * ci).astype(jnp.float32)

    def col(b):
        return jnp.reshape(b, (-1, 1)).astype(jnp.float32)

    # reorder generate_kernel's 1x1 output channels from torch (c*9+t) to
    # tap-major (t*mid+c) so the kernel uses contiguous row slices per tap.
    perm = np.array([c * 9 + t for t in range(9) for c in range(mid)], np.int32)
    w_gk = jnp.asarray(params["w_gk"], jnp.float32)[perm, :]
    b_gk = jnp.asarray(params["b_gk"], jnp.float32)[perm]

    # channel-attention conv1d (k=3, pad=1) folded into a (Cin, Cin) matrix
    eye = np.eye(Cin, dtype=np.float32)
    sup = np.eye(Cin, k=1, dtype=np.float32)    # @pooled -> pooled[c+1]
    sdn = np.eye(Cin, k=-1, dtype=np.float32)   # @pooled -> pooled[c-1]
    wca = jnp.reshape(params["w_ca"], (3,)).astype(jnp.float32)
    m_ca = (wca[0] * jnp.asarray(sdn) + wca[1] * jnp.asarray(eye)
            + wca[2] * jnp.asarray(sup))

    # packed 0/1 in-bounds masks for the flat-shift taps, row = d_idx*9 + t
    mask_rows = np.ones((27, HW), np.float32)
    for di, d in enumerate(_DIL):
        for t, (ih, iw) in enumerate(_tap_offsets(d)):
            mask_rows[di * 9 + t] = _shift_mask(H, W, ih, iw)

    # merged attention pooling matrices (1/(C4*W), 1/(C4*H) scales baked in)
    pp = np.arange(HW)
    C4 = 4 * mid
    rpool = np.zeros((HW, H), np.float32)
    rpool[pp, pp // W] = 1.0 / (C4 * W)
    cpool = np.zeros((HW, W), np.float32)
    cpool[pp, pp % W] = 1.0 / (C4 * H)
    pool_cat = np.concatenate([rpool, cpool], axis=1)          # (HW, H+W)
    rpoolT = np.zeros((H, HW), np.float32)
    rpoolT[pp // W, pp] = 1.0
    cpoolT = np.zeros((W, HW), np.float32)
    cpoolT[pp % W, pp] = 1.0
    poolT_cat = np.concatenate([rpoolT, cpoolT], axis=0)       # (H+W, HW)

    inputs = [x_nchw.reshape(N, Cin, HW),
              jnp.asarray(mask_rows),
              w3(params["w_off"]), col(params["b_off"]),
              w3(params["w_msk"]), col(params["b_msk"]),
              w3(params["w_dcn"]), col(params["b_dcn"]),
              jnp.reshape(params["w_sa"], (Cin, 9)).astype(jnp.float32),
              col(params["b_sa"]),
              m_ca, jnp.reshape(params["b_ca"], (1, 1)).astype(jnp.float32),
              w_gk, col(b_gk)]
    if has_proj:
        inputs += [jnp.asarray(params["w_cv"], jnp.float32), col(params["b_cv"])]
    inputs += [w3(params["w_f1"]), col(params["b_f1"]),
               w3(params["w_f3"]), col(params["b_f3"]),
               w3(params["w_f5"]), col(params["b_f5"]),
               jnp.asarray(params["w_fu"], jnp.float32), col(params["b_fu"]),
               jnp.asarray(pool_cat), jnp.asarray(poolT_cat)]

    in_specs = [pl.BlockSpec((1, Cin, HW), lambda n: (n, 0, 0))]
    for a in inputs[1:]:
        in_specs.append(pl.BlockSpec(a.shape, lambda n: (0, 0)))

    kernel = _make_db_kernel(Cin, Coff, mid, H, W, PAD, Csrc, has_proj)

    out = pl.pallas_call(
        kernel,
        out_shape=jax.ShapeDtypeStruct((N, Cin, HW), jnp.float32),
        grid=(N,),
        in_specs=in_specs,
        out_specs=pl.BlockSpec((1, Cin, HW), lambda n: (n, 0, 0)),
        scratch_shapes=[
            pltpu.VMEM((Csrc, 2 * PAD + HW), jnp.float32),   # zero-padded halo source
            pltpu.VMEM((9 * CpatA, HW), jnp.float32),        # im2col patches A
            pltpu.VMEM((9 * Coff, HW), jnp.float32),         # im2col patches B (xoff)
        ],
        compiler_params=pltpu.CompilerParams(
            dimension_semantics=("parallel",)),
    )(*inputs)
    return out.reshape(N, Cin, H, W)


# ----------------------------------------------------------------------------- pure-JAX reference
_P = lax.Precision.HIGHEST


def _conv3_ref(x, w, b, d):
    y = lax.conv_general_dilated(x, w, (1, 1), [(d, d), (d, d)],
                                 rhs_dilation=(d, d),
                                 dimension_numbers=("NCHW", "OIHW", "NCHW"),
                                 precision=_P)
    return y + b.reshape(1, -1, 1, 1)


def _dwconv3_ref(x, w, b):
    C = x.shape[1]
    y = lax.conv_general_dilated(x, w, (1, 1), [(1, 1), (1, 1)],
                                 dimension_numbers=("NCHW", "OIHW", "NCHW"),
                                 feature_group_count=C, precision=_P)
    return y + b.reshape(1, -1, 1, 1)


def _conv1x1_ref(x, w, b):
    return jnp.einsum("oc,nchw->nohw", w, x, precision=_P) + b.reshape(1, -1, 1, 1)


def _shift_ref(x, ih, iw):
    N, C, H, W = x.shape
    p = 6
    xp = jnp.pad(x, ((0, 0), (0, 0), (p, p), (p, p)))
    return xp[:, :, p + ih:p + ih + H, p + iw:p + iw + W]


def db_reference(x, params, *, mid_channels, offset_channels):
    N, Cin, H, W = x.shape
    mid = mid_channels
    lr = lambda v: jnp.where(v >= 0, v, 0.2 * v)
    taps1 = _tap_offsets(1)

    xoff = lr(_conv3_ref(x, params["w_off"], params["b_off"], 1))
    msk = jax.nn.sigmoid(_conv3_ref(xoff, params["w_msk"], params["b_msk"], 1))
    taps_x = jnp.concatenate([_shift_ref(x, ih, iw) for ih, iw in taps1], axis=1)
    wm = jnp.transpose(params["w_dcn"], (0, 2, 3, 1)).reshape(Cin, 9 * Cin)
    g = jnp.einsum("ok,nkhw->nohw", wm, taps_x * msk, precision=_P)
    g = lr(g + params["b_dcn"].reshape(1, -1, 1, 1))

    sa = _dwconv3_ref(g, params["w_sa"], params["b_sa"])
    pooled = jnp.mean(g, axis=(2, 3))
    pp = jnp.pad(pooled, ((0, 0), (1, 1)))
    wca = params["w_ca"].reshape(3)
    ca = (wca[0] * pp[:, :-2] + wca[1] * pp[:, 1:-1] + wca[2] * pp[:, 2:]
          + params["b_ca"].reshape(()))
    sek = sa + ca[:, :, None, None]
    y = _conv1x1_ref(sek, params["w_gk"], params["b_gk"])      # (N, mid*9, H, W)

    xm = _conv1x1_ref(x, params["w_cv"], params["b_cv"]) if Cin != mid else x
    kern = y.reshape(N, mid, 9, H, W)

    def branch(d, wf, bf):
        ux = jnp.stack([_shift_ref(xm, ih, iw) for ih, iw in _tap_offsets(d)], axis=2)
        o = (ux * kern).sum(axis=2)
        return lr(_conv3_ref(o, wf, bf, 1))

    x1 = branch(1, params["w_f1"], params["b_f1"])
    x3 = branch(3, params["w_f3"], params["b_f3"])
    x5 = branch(5, params["w_f5"], params["b_f5"])

    cat = jnp.concatenate([xm, x1, x3, x5], axis=1)
    s_hw = 2.0 * jax.nn.sigmoid(jnp.mean(cat, axis=(2, 3), keepdims=True))
    x_hw = s_hw * cat
    s_cw = 2.0 * jax.nn.sigmoid(jnp.mean(x_hw, axis=(1, 3), keepdims=True))
    s_ch = 2.0 * jax.nn.sigmoid(jnp.mean(x_hw, axis=(1, 2), keepdims=True))
    att = x_hw * (1.0 + s_cw + s_ch)
    return _conv1x1_ref(att, params["w_fu"], params["b_fu"]) + x


# ----------------------------------------------------------------------------- demo
if __name__ == "__main__":
    N, Cin, H, W = 2, 8, 16, 16
    mid, Coff = 4, 4          # in_channels != mid_channels -> exercises self.conv

    key = jax.random.PRNGKey(0)
    ks = jax.random.split(key, 24)

    def rn(k, shape, scale=0.1):
        return scale * jax.random.normal(k, shape, dtype=jnp.float32)

    x = jax.random.normal(ks[0], (N, Cin, H, W), dtype=jnp.float32)
    params = {
        "w_off": rn(ks[1], (Coff, Cin, 3, 3)), "b_off": rn(ks[2], (Coff,), 0.01),
        "w_msk": rn(ks[3], (9 * Cin, Coff, 3, 3)), "b_msk": rn(ks[4], (9 * Cin,), 0.01),
        "w_dcn": rn(ks[5], (Cin, Cin, 3, 3)), "b_dcn": rn(ks[6], (Cin,), 0.01),
        "w_sa": rn(ks[7], (Cin, 1, 3, 3)), "b_sa": rn(ks[8], (Cin,), 0.01),
        "w_ca": rn(ks[9], (1, 1, 3), 0.5), "b_ca": rn(ks[10], (1,), 0.01),
        "w_gk": rn(ks[11], (mid * 9, Cin)), "b_gk": rn(ks[12], (mid * 9,), 0.01),
        "w_cv": rn(ks[13], (mid, Cin)), "b_cv": rn(ks[14], (mid,), 0.01),
        "w_f1": rn(ks[15], (mid, mid, 3, 3)), "b_f1": rn(ks[16], (mid,), 0.01),
        "w_f3": rn(ks[17], (mid, mid, 3, 3)), "b_f3": rn(ks[18], (mid,), 0.01),
        "w_f5": rn(ks[19], (mid, mid, 3, 3)), "b_f5": rn(ks[20], (mid,), 0.01),
        "w_fu": rn(ks[21], (Cin, 4 * mid)), "b_fu": rn(ks[22], (Cin,), 0.01),
    }

    run = jax.jit(functools.partial(db_pallas, mid_channels=mid, offset_channels=Coff))
    out = jax.block_until_ready(run(x, params))

    ref = jax.block_until_ready(
        db_reference(x, params, mid_channels=mid, offset_channels=Coff))

    assert out.shape == (N, Cin, H, W)
    np.testing.assert_allclose(np.asarray(out), np.asarray(ref), atol=2e-3, rtol=2e-3)

    print("KERNEL_OK")
</pallas_src>

<mosaic_0001>
module attributes {stable_mosaic.version = 11 : i64} {
  func.func @kernel(%arg0: i32, %arg1: memref<1x8x256xf32, #tpu.memory_space<vmem>>, %arg2: memref<27x256xf32, #tpu.memory_space<vmem>>, %arg3: memref<4x72xf32, #tpu.memory_space<vmem>>, %arg4: memref<4x1xf32, #tpu.memory_space<vmem>>, %arg5: memref<72x36xf32, #tpu.memory_space<vmem>>, %arg6: memref<72x1xf32, #tpu.memory_space<vmem>>, %arg7: memref<8x72xf32, #tpu.memory_space<vmem>>, %arg8: memref<8x1xf32, #tpu.memory_space<vmem>>, %arg9: memref<8x9xf32, #tpu.memory_space<vmem>>, %arg10: memref<8x1xf32, #tpu.memory_space<vmem>>, %arg11: memref<8x8xf32, #tpu.memory_space<vmem>>, %arg12: memref<1x1xf32, #tpu.memory_space<vmem>>, %arg13: memref<36x8xf32, #tpu.memory_space<vmem>>, %arg14: memref<36x1xf32, #tpu.memory_space<vmem>>, %arg15: memref<4x8xf32, #tpu.memory_space<vmem>>, %arg16: memref<4x1xf32, #tpu.memory_space<vmem>>, %arg17: memref<4x36xf32, #tpu.memory_space<vmem>>, %arg18: memref<4x1xf32, #tpu.memory_space<vmem>>, %arg19: memref<4x36xf32, #tpu.memory_space<vmem>>, %arg20: memref<4x1xf32, #tpu.memory_space<vmem>>, %arg21: memref<4x36xf32, #tpu.memory_space<vmem>>, %arg22: memref<4x1xf32, #tpu.memory_space<vmem>>, %arg23: memref<8x16xf32, #tpu.memory_space<vmem>>, %arg24: memref<8x1xf32, #tpu.memory_space<vmem>>, %arg25: memref<256x32xf32, #tpu.memory_space<vmem>>, %arg26: memref<32x256xf32, #tpu.memory_space<vmem>>, %arg27: memref<1x8x256xf32, #tpu.memory_space<vmem>>, %arg28: memref<8x512xf32, #tpu.memory_space<vmem>>, %arg29: memref<72x256xf32, #tpu.memory_space<vmem>>, %arg30: memref<36x256xf32, #tpu.memory_space<vmem>>) attributes {dimension_semantics = [#tpu.dimension_semantics<parallel>], iteration_bounds = array<i64: 2>, scalar_prefetch = 0 : i64, scratch_operands = 3 : i64, tpu.core_type = #tpu.core_type<tc>, window_params = [{transform_indices = @transform_0, window_bounds = array<i64: 1, 8, 256>}, {pipeline_mode = #tpu.pipeline_mode<synchronous>, transform_indices = @transform_1, window_bounds = array<i64: 27, 256>}, {pipeline_mode = #tpu.pipeline_mode<synchronous>, transform_indices = @transform_2, window_bounds = array<i64: 4, 72>}, {pipeline_mode = #tpu.pipeline_mode<synchronous>, transform_indices = @transform_3, window_bounds = array<i64: 4, 1>}, {pipeline_mode = #tpu.pipeline_mode<synchronous>, transform_indices = @transform_4, window_bounds = array<i64: 72, 36>}, {pipeline_mode = #tpu.pipeline_mode<synchronous>, transform_indices = @transform_5, window_bounds = array<i64: 72, 1>}, {pipeline_mode = #tpu.pipeline_mode<synchronous>, transform_indices = @transform_6, window_bounds = array<i64: 8, 72>}, {pipeline_mode = #tpu.pipeline_mode<synchronous>, transform_indices = @transform_7, window_bounds = array<i64: 8, 1>}, {pipeline_mode = #tpu.pipeline_mode<synchronous>, transform_indices = @transform_8, window_bounds = array<i64: 8, 9>}, {pipeline_mode = #tpu.pipeline_mode<synchronous>, transform_indices = @transform_9, window_bounds = array<i64: 8, 1>}, {pipeline_mode = #tpu.pipeline_mode<synchronous>, transform_indices = @transform_10, window_bounds = array<i64: 8, 8>}, {pipeline_mode = #tpu.pipeline_mode<synchronous>, transform_indices = @transform_11, window_bounds = array<i64: 1, 1>}, {pipeline_mode = #tpu.pipeline_mode<synchronous>, transform_indices = @transform_12, window_bounds = array<i64: 36, 8>}, {pipeline_mode = #tpu.pipeline_mode<synchronous>, transform_indices = @transform_13, window_bounds = array<i64: 36, 1>}, {pipeline_mode = #tpu.pipeline_mode<synchronous>, transform_indices = @transform_14, window_bounds = array<i64: 4, 8>}, {pipeline_mode = #tpu.pipeline_mode<synchronous>, transform_indices = @transform_15, window_bounds = array<i64: 4, 1>}, {pipeline_mode = #tpu.pipeline_mode<synchronous>, transform_indices = @transform_16, window_bounds = array<i64: 4, 36>}, {pipeline_mode = #tpu.pipeline_mode<synchronous>, transform_indices = @transform_17, window_bounds = array<i64: 4, 1>}, {pipeline_mode = #tpu.pipeline_mode<synchronous>, transform_indices = @transform_18, window_bounds = array<i64: 4, 36>}, {pipeline_mode = #tpu.pipeline_mode<synchronous>, transform_indices = @transform_19, window_bounds = array<i64: 4, 1>}, {pipeline_mode = #tpu.pipeline_mode<synchronous>, transform_indices = @transform_20, window_bounds = array<i64: 4, 36>}, {pipeline_mode = #tpu.pipeline_mode<synchronous>, transform_indices = @transform_21, window_bounds = array<i64: 4, 1>}, {pipeline_mode = #tpu.pipeline_mode<synchronous>, transform_indices = @transform_22, window_bounds = array<i64: 8, 16>}, {pipeline_mode = #tpu.pipeline_mode<synchronous>, transform_indices = @transform_23, window_bounds = array<i64: 8, 1>}, {pipeline_mode = #tpu.pipeline_mode<synchronous>, transform_indices = @transform_24, window_bounds = array<i64: 256, 32>}, {pipeline_mode = #tpu.pipeline_mode<synchronous>, transform_indices = @transform_25, window_bounds = array<i64: 32, 256>}, {transform_indices = @transform_26, window_bounds = array<i64: 1, 8, 256>}]} {
    %cst = arith.constant 0.000000e+00 : f32
    %0 = vector.broadcast %cst : f32 to vector<8x128xf32>
    %c0 = arith.constant 0 : index
    %c0_0 = arith.constant 0 : index
    %1 = vector.load %arg28[%c0, %c0_0] : memref<8x512xf32, #tpu.memory_space<vmem>>, vector<8x128xf32>
    tpu.vector_store %arg28[%c0, %c0_0], %0 {strides = array<i32>} : memref<8x512xf32, #tpu.memory_space<vmem>>, vector<8x128xf32>,
    %cst_1 = arith.constant 0.000000e+00 : f32
    %2 = vector.broadcast %cst_1 : f32 to vector<8x128xf32>
    %c0_2 = arith.constant 0 : index
    %c384 = arith.constant 384 : index
    %3 = vector.load %arg28[%c0_2, %c384] : memref<8x512xf32, #tpu.memory_space<vmem>>, vector<8x128xf32>
    tpu.vector_store %arg28[%c0_2, %c384], %2 {strides = array<i32>} : memref<8x512xf32, #tpu.memory_space<vmem>>, vector<8x128xf32>,
    %c0_3 = arith.constant 0 : index
    %c0_4 = arith.constant 0 : index
    %c0_5 = arith.constant 0 : index
    %4 = vector.load %arg1[%c0_3, %c0_4, %c0_5] : memref<1x8x256xf32, #tpu.memory_space<vmem>>, vector<1x8x256xf32>
    %5 = vector.shape_cast %4 : vector<1x8x256xf32> to vector<8x256xf32>
    %c0_6 = arith.constant 0 : index
    %c128 = arith.constant 128 : index
    %6 = vector.load %arg28[%c0_6, %c128] : memref<8x512xf32, #tpu.memory_space<vmem>>, vector<8x256xf32>
    tpu.vector_store %arg28[%c0_6, %c128], %5 {strides = array<i32>} : memref<8x512xf32, #tpu.memory_space<vmem>>, vector<8x256xf32>,
    %c0_7 = arith.constant 0 : index
    %c111 = arith.constant 111 : index
    %7 = vector.load %arg28[%c0_7, %c111] : memref<8x512xf32, #tpu.memory_space<vmem>>, vector<8x256xf32>
    %c0_8 = arith.constant 0 : index
    %c0_9 = arith.constant 0 : index
    %8 = vector.load %arg2[%c0_8, %c0_9] : memref<27x256xf32, #tpu.memory_space<vmem>>, vector<1x256xf32>
    %9 = vector.broadcast %8 : vector<1x256xf32> to vector<8x256xf32>
    %10 = arith.mulf %7, %9 : vector<8x256xf32>
    %c0_10 = arith.constant 0 : index
    %c0_11 = arith.constant 0 : index
    %11 = vector.load %arg29[%c0_10, %c0_11] : memref<72x256xf32, #tpu.memory_space<vmem>>, vector<8x256xf32>
    tpu.vector_store %arg29[%c0_10, %c0_11], %10 {strides = array<i32>} : memref<72x256xf32, #tpu.memory_space<vmem>>, vector<8x256xf32>,
    %c0_12 = arith.constant 0 : index
    %c112 = arith.constant 112 : index
    %12 = vector.load %arg28[%c0_12, %c112] : memref<8x512xf32, #tpu.memory_space<vmem>>, vector<8x256xf32>
    %c1 = arith.constant 1 : index
    %c0_13 = arith.constant 0 : index
    %13 = vector.load %arg2[%c1, %c0_13] : memref<27x256xf32, #tpu.memory_space<vmem>>, vector<1x256xf32>
    %14 = vector.broadcast %13 : vector<1x256xf32> to vector<8x256xf32>
    %15 = arith.mulf %12, %14 : vector<8x256xf32>
    %c8 = arith.constant 8 : index
    %c0_14 = arith.constant 0 : index
    %16 = vector.load %arg29[%c8, %c0_14] : memref<72x256xf32, #tpu.memory_space<vmem>>, vector<8x256xf32>
    tpu.vector_store %arg29[%c8, %c0_14], %15 {strides = array<i32>} : memref<72x256xf32, #tpu.memory_space<vmem>>, vector<8x256xf32>,
    %c0_15 = arith.constant 0 : index
    %c113 = arith.constant 113 : index
    %17 = vector.load %arg28[%c0_15, %c113] : memref<8x512xf32, #tpu.memory_space<vmem>>, vector<8x256xf32>
    %c2 = arith.constant 2 : index
    %c0_16 = arith.constant 0 : index
    %18 = vector.load %arg2[%c2, %c0_16] : memref<27x256xf32, #tpu.memory_space<vmem>>, vector<1x256xf32>
    %19 = vector.broadcast %18 : vector<1x256xf32> to vector<8x256xf32>
    %20 = arith.mulf %17, %19 : vector<8x256xf32>
    %c16 = arith.constant 16 : index
    %c0_17 = arith.constant 0 : index
    %21 = vector.load %arg29[%c16, %c0_17] : memref<72x256xf32, #tpu.memory_space<vmem>>, vector<8x256xf32>
    tpu.vector_store %arg29[%c16, %c0_17], %20 {strides = array<i32>} : memref<72x256xf32, #tpu.memory_space<vmem>>, vector<8x256xf32>,
    %c0_18 = arith.constant 0 : index
    %c127 = arith.constant 127 : index
    %22 = vector.load %arg28[%c0_18, %c127] : memref<8x512xf32, #tpu.memory_space<vmem>>, vector<8x256xf32>
    %c3 = arith.constant 3 : index
    %c0_19 = arith.constant 0 : index
    %23 = vector.load %arg2[%c3, %c0_19] : memref<27x256xf32, #tpu.memory_space<vmem>>, vector<1x256xf32>
    %24 = vector.broadcast %23 : vector<1x256xf32> to vector<8x256xf32>
    %25 = arith.mulf %22, %24 : vector<8x256xf32>
    %c24 = arith.constant 24 : index
    %c0_20 = arith.constant 0 : index
    %26 = vector.load %arg29[%c24, %c0_20] : memref<72x256xf32, #tpu.memory_space<vmem>>, vector<8x256xf32>
    tpu.vector_store %arg29[%c24, %c0_20], %25 {strides = array<i32>} : memref<72x256xf32, #tpu.memory_space<vmem>>, vector<8x256xf32>,
    %c0_21 = arith.constant 0 : index
    %c128_22 = arith.constant 128 : index
    %27 = vector.load %arg28[%c0_21, %c128_22] : memref<8x512xf32, #tpu.memory_space<vmem>>, vector<8x256xf32>
    %c32 = arith.constant 32 : index
    %c0_23 = arith.constant 0 : index
    %28 = vector.load %arg29[%c32, %c0_23] : memref<72x256xf32, #tpu.memory_space<vmem>>, vector<8x256xf32>
    tpu.vector_store %arg29[%c32, %c0_23], %27 {strides = array<i32>} : memref<72x256xf32, #tpu.memory_space<vmem>>, vector<8x256xf32>,
    %c0_24 = arith.constant 0 : index
    %c129 = arith.constant 129 : index
    %29 = vector.load %arg28[%c0_24, %c129] : memref<8x512xf32, #tpu.memory_space<vmem>>, vector<8x256xf32>
    %c5 = arith.constant 5 : index
    %c0_25 = arith.constant 0 : index
    %30 = vector.load %arg2[%c5, %c0_25] : memref<27x256xf32, #tpu.memory_space<vmem>>, vector<1x256xf32>
    %31 = vector.broadcast %30 : vector<1x256xf32> to vector<8x256xf32>
    %32 = arith.mulf %29, %31 : vector<8x256xf32>
    %c40 = arith.constant 40 : index
    %c0_26 = arith.constant 0 : index
    %33 = vector.load %arg29[%c40, %c0_26] : memref<72x256xf32, #tpu.memory_space<vmem>>, vector<8x256xf32>
    tpu.vector_store %arg29[%c40, %c0_26], %32 {strides = array<i32>} : memref<72x256xf32, #tpu.memory_space<vmem>>, vector<8x256xf32>,
    %c0_27 = arith.constant 0 : index
    %c143 = arith.constant 143 : index
    %34 = vector.load %arg28[%c0_27, %c143] : memref<8x512xf32, #tpu.memory_space<vmem>>, vector<8x256xf32>
    %c6 = arith.constant 6 : index
    %c0_28 = arith.constant 0 : index
    %35 = vector.load %arg2[%c6, %c0_28] : memref<27x256xf32, #tpu.memory_space<vmem>>, vector<1x256xf32>
    %36 = vector.broadcast %35 : vector<1x256xf32> to vector<8x256xf32>
    %37 = arith.mulf %34, %36 : vector<8x256xf32>
    %c48 = arith.constant 48 : index
    %c0_29 = arith.constant 0 : index
    %38 = vector.load %arg29[%c48, %c0_29] : memref<72x256xf32, #tpu.memory_space<vmem>>, vector<8x256xf32>
    tpu.vector_store %arg29[%c48, %c0_29], %37 {strides = array<i32>} : memref<72x256xf32, #tpu.memory_space<vmem>>, vector<8x256xf32>,
    %c0_30 = arith.constant 0 : index
    %c144 = arith.constant 144 : index
    %39 = vector.load %arg28[%c0_30, %c144] : memref<8x512xf32, #tpu.memory_space<vmem>>, vector<8x256xf32>
    %c7 = arith.constant 7 : index
    %c0_31 = arith.constant 0 : index
    %40 = vector.load %arg2[%c7, %c0_31] : memref<27x256xf32, #tpu.memory_space<vmem>>, vector<1x256xf32>
    %41 = vector.broadcast %40 : vector<1x256xf32> to vector<8x256xf32>
    %42 = arith.mulf %39, %41 : vector<8x256xf32>
    %c56 = arith.constant 56 : index
    %c0_32 = arith.constant 0 : index
    %43 = vector.load %arg29[%c56, %c0_32] : memref<72x256xf32, #tpu.memory_space<vmem>>, vector<8x256xf32>
    tpu.vector_store %arg29[%c56, %c0_32], %42 {strides = array<i32>} : memref<72x256xf32, #tpu.memory_space<vmem>>, vector<8x256xf32>,
    %c0_33 = arith.constant 0 : index
    %c145 = arith.constant 145 : index
    %44 = vector.load %arg28[%c0_33, %c145] : memref<8x512xf32, #tpu.memory_space<vmem>>, vector<8x256xf32>
    %c8_34 = arith.constant 8 : index
    %c0_35 = arith.constant 0 : index
    %45 = vector.load %arg2[%c8_34, %c0_35] : memref<27x256xf32, #tpu.memory_space<vmem>>, vector<1x256xf32>
    %46 = vector.broadcast %45 : vector<1x256xf32> to vector<8x256xf32>
    %47 = arith.mulf %44, %46 : vector<8x256xf32>
    %c64 = arith.constant 64 : index
    %c0_36 = arith.constant 0 : index
    %48 = vector.load %arg29[%c64, %c0_36] : memref<72x256xf32, #tpu.memory_space<vmem>>, vector<8x256xf32>
    tpu.vector_store %arg29[%c64, %c0_36], %47 {strides = array<i32>} : memref<72x256xf32, #tpu.memory_space<vmem>>, vector<8x256xf32>,
    %c0_37 = arith.constant 0 : index
    %c0_38 = arith.constant 0 : index
    %49 = vector.load %arg3[%c0_37, %c0_38] : memref<4x72xf32, #tpu.memory_space<vmem>>, vector<4x72xf32>
    %c0_39 = arith.constant 0 : index
    %c0_40 = arith.constant 0 : index
    %50 = vector.load %arg29[%c0_39, %c0_40] : memref<72x256xf32, #tpu.memory_space<vmem>>, vector<72x256xf32>
    %cst_41 = arith.constant dense<0.000000e+00> : vector<4x256xf32>
    %51 = tpu.matmul %49, %50, %cst_41 {dimension_numbers = #tpu.dot_dimension_numbers<[1], [0], [0], [1], [0, 0, 1, 1], [], []>} : vector<4x72xf32>, vector<72x256xf32>, vector<4x256xf32> -> vector<4x256xf32>
    %c0_42 = arith.constant 0 : index
    %c0_43 = arith.constant 0 : index
    %52 = vector.load %arg4[%c0_42, %c0_43] : memref<4x1xf32, #tpu.memory_space<vmem>>, vector<4x1xf32>
    %53 = vector.broadcast %52 : vector<4x1xf32> to vector<4x256xf32>
    %54 = arith.addf %51, %53 : vector<4x256xf32>
    %cst_44 = arith.constant 0.000000e+00 : f32
    %55 = vector.broadcast %cst_44 : f32 to vector<4x256xf32>
    %56 = arith.cmpf oge, %54, %55 : vector<4x256xf32>
    %cst_45 = arith.constant 2.000000e-01 : f32
    %57 = vector.broadcast %cst_45 : f32 to vector<4x256xf32>
    %58 = arith.mulf %57, %54 : vector<4x256xf32>
    %59 = arith.select %56, %54, %58 : vector<4x256xi1>, vector<4x256xf32>
    %c0_46 = arith.constant 0 : index
    %c128_47 = arith.constant 128 : index
    %60 = vector.load %arg28[%c0_46, %c128_47] : memref<8x512xf32, #tpu.memory_space<vmem>>, vector<4x256xf32>
    tpu.vector_store %arg28[%c0_46, %c128_47], %59 {strides = array<i32>} : memref<8x512xf32, #tpu.memory_space<vmem>>, vector<4x256xf32>,
    %c0_48 = arith.constant 0 : index
    %c111_49 = arith.constant 111 : index
    %61 = vector.load %arg28[%c0_48, %c111_49] : memref<8x512xf32, #tpu.memory_space<vmem>>, vector<4x256xf32>
    %c0_50 = arith.constant 0 : index
    %c0_51 = arith.constant 0 : index
    %62 = vector.load %arg2[%c0_50, %c0_51] : memref<27x256xf32, #tpu.memory_space<vmem>>, vector<1x256xf32>
    %63 = vector.broadcast %62 : vector<1x256xf32> to vector<4x256xf32>
    %64 = arith.mulf %61, %63 : vector<4x256xf32>
    %c0_52 = arith.constant 0 : index
    %c0_53 = arith.constant 0 : index
    %65 = vector.load %arg30[%c0_52, %c0_53] : memref<36x256xf32, #tpu.memory_space<vmem>>, vector<4x256xf32>
    tpu.vector_store %arg30[%c0_52, %c0_53], %64 {strides = array<i32>} : memref<36x256xf32, #tpu.memory_space<vmem>>, vector<4x256xf32>,
    %c0_54 = arith.constant 0 : index
    %c112_55 = arith.constant 112 : index
    %66 = vector.load %arg28[%c0_54, %c112_55] : memref<8x512xf32, #tpu.memory_space<vmem>>, vector<4x256xf32>
    %c1_56 = arith.constant 1 : index
    %c0_57 = arith.constant 0 : index
    %67 = vector.load %arg2[%c1_56, %c0_57] : memref<27x256xf32, #tpu.memory_space<vmem>>, vector<1x256xf32>
    %68 = vector.broadcast %67 : vector<1x256xf32> to vector<4x256xf32>
    %69 = arith.mulf %66, %68 : vector<4x256xf32>
    %c4 = arith.constant 4 : index
    %c0_58 = arith.constant 0 : index
    %70 = vector.load %arg30[%c4, %c0_58] : memref<36x256xf32, #tpu.memory_space<vmem>>, vector<4x256xf32>
    tpu.vector_store %arg30[%c4, %c0_58], %69 {strides = array<i32>} : memref<36x256xf32, #tpu.memory_space<vmem>>, vector<4x256xf32>,
    %c0_59 = arith.constant 0 : index
    %c113_60 = arith.constant 113 : index
    %71 = vector.load %arg28[%c0_59, %c113_60] : memref<8x512xf32, #tpu.memory_space<vmem>>, vector<4x256xf32>
    %c2_61 = arith.constant 2 : index
    %c0_62 = arith.constant 0 : index
    %72 = vector.load %arg2[%c2_61, %c0_62] : memref<27x256xf32, #tpu.memory_space<vmem>>, vector<1x256xf32>
    %73 = vector.broadcast %72 : vector<1x256xf32> to vector<4x256xf32>
    %74 = arith.mulf %71, %73 : vector<4x256xf32>
    %c8_63 = arith.constant 8 : index
    %c0_64 = arith.constant 0 : index
    %75 = vector.load %arg30[%c8_63, %c0_64] : memref<36x256xf32, #tpu.memory_space<vmem>>, vector<4x256xf32>
    tpu.vector_store %arg30[%c8_63, %c0_64], %74 {strides = array<i32>} : memref<36x256xf32, #tpu.memory_space<vmem>>, vector<4x256xf32>,
    %c0_65 = arith.constant 0 : index
    %c127_66 = arith.constant 127 : index
    %76 = vector.load %arg28[%c0_65, %c127_66] : memref<8x512xf32, #tpu.memory_space<vmem>>, vector<4x256xf32>
    %c3_67 = arith.constant 3 : index
    %c0_68 = arith.constant 0 : index
    %77 = vector.load %arg2[%c3_67, %c0_68] : memref<27x256xf32, #tpu.memory_space<vmem>>, vector<1x256xf32>
    %78 = vector.broadcast %77 : vector<1x256xf32> to vector<4x256xf32>
    %79 = arith.mulf %76, %78 : vector<4x256xf32>
    %c12 = arith.constant 12 : index
    %c0_69 = arith.constant 0 : index
    %80 = vector.load %arg30[%c12, %c0_69] : memref<36x256xf32, #tpu.memory_space<vmem>>, vector<4x256xf32>
    tpu.vector_store %arg30[%c12, %c0_69], %79 {strides = array<i32>} : memref<36x256xf32, #tpu.memory_space<vmem>>, vector<4x256xf32>,
    %c0_70 = arith.constant 0 : index
    %c128_71 = arith.constant 128 : index
    %81 = vector.load %arg28[%c0_70, %c128_71] : memref<8x512xf32, #tpu.memory_space<vmem>>, vector<4x256xf32>
    %c16_72 = arith.constant 16 : index
    %c0_73 = arith.constant 0 : index
    %82 = vector.load %arg30[%c16_72, %c0_73] : memref<36x256xf32, #tpu.memory_space<vmem>>, vector<4x256xf32>
    tpu.vector_store %arg30[%c16_72, %c0_73], %81 {strides = array<i32>} : memref<36x256xf32, #tpu.memory_space<vmem>>, vector<4x256xf32>,
    %c0_74 = arith.constant 0 : index
    %c129_75 = arith.constant 129 : index
    %83 = vector.load %arg28[%c0_74, %c129_75] : memref<8x512xf32, #tpu.memory_space<vmem>>, vector<4x256xf32>
    %c5_76 = arith.constant 5 : index
    %c0_77 = arith.constant 0 : index
    %84 = vector.load %arg2[%c5_76, %c0_77] : memref<27x256xf32, #tpu.memory_space<vmem>>, vector<1x256xf32>
    %85 = vector.broadcast %84 : vector<1x256xf32> to vector<4x256xf32>
    %86 = arith.mulf %83, %85 : vector<4x256xf32>
    %c20 = arith.constant 20 : index
    %c0_78 = arith.constant 0 : index
    %87 = vector.load %arg30[%c20, %c0_78] : memref<36x256xf32, #tpu.memory_space<vmem>>, vector<4x256xf32>
    tpu.vector_store %arg30[%c20, %c0_78], %86 {strides = array<i32>} : memref<36x256xf32, #tpu.memory_space<vmem>>, vector<4x256xf32>,
    %c0_79 = arith.constant 0 : index
    %c143_80 = arith.constant 143 : index
    %88 = vector.load %arg28[%c0_79, %c143_80] : memref<8x512xf32, #tpu.memory_space<vmem>>, vector<4x256xf32>
    %c6_81 = arith.constant 6 : index
    %c0_82 = arith.constant 0 : index
    %89 = vector.load %arg2[%c6_81, %c0_82] : memref<27x256xf32, #tpu.memory_space<vmem>>, vector<1x256xf32>
    %90 = vector.broadcast %89 : vector<1x256xf32> to vector<4x256xf32>
    %91 = arith.mulf %88, %90 : vector<4x256xf32>
    %c24_83 = arith.constant 24 : index
    %c0_84 = arith.constant 0 : index
    %92 = vector.load %arg30[%c24_83, %c0_84] : memref<36x256xf32, #tpu.memory_space<vmem>>, vector<4x256xf32>
    tpu.vector_store %arg30[%c24_83, %c0_84], %91 {strides = array<i32>} : memref<36x256xf32, #tpu.memory_space<vmem>>, vector<4x256xf32>,
    %c0_85 = arith.constant 0 : index
    %c144_86 = arith.constant 144 : index
    %93 = vector.load %arg28[%c0_85, %c144_86] : memref<8x512xf32, #tpu.memory_space<vmem>>, vector<4x256xf32>
    %c7_87 = arith.constant 7 : index
    %c0_88 = arith.constant 0 : index
    %94 = vector.load %arg2[%c7_87, %c0_88] : memref<27x256xf32, #tpu.memory_space<vmem>>, vector<1x256xf32>
    %95 = vector.broadcast %94 : vector<1x256xf32> to vector<4x256xf32>
    %96 = arith.mulf %93, %95 : vector<4x256xf32>
    %c28 = arith.constant 28 : index
    %c0_89 = arith.constant 0 : index
    %97 = vector.load %arg30[%c28, %c0_89] : memref<36x256xf32, #tpu.memory_space<vmem>>, vector<4x256xf32>
    tpu.vector_store %arg30[%c28, %c0_89], %96 {strides = array<i32>} : memref<36x256xf32, #tpu.memory_space<vmem>>, vector<4x256xf32>,
    %c0_90 = arith.constant 0 : index
    %c145_91 = arith.constant 145 : index
    %98 = vector.load %arg28[%c0_90, %c145_91] : memref<8x512xf32, #tpu.memory_space<vmem>>, vector<4x256xf32>
    %c8_92 = arith.constant 8 : index
    %c0_93 = arith.constant 0 : index
    %99 = vector.load %arg2[%c8_92, %c0_93] : memref<27x256xf32, #tpu.memory_space<vmem>>, vector<1x256xf32>
    %100 = vector.broadcast %99 : vector<1x256xf32> to vector<4x256xf32>
    %101 = arith.mulf %98, %100 : vector<4x256xf32>
    %c32_94 = arith.constant 32 : index
    %c0_95 = arith.constant 0 : index
    %102 = vector.load %arg30[%c32_94, %c0_95] : memref<36x256xf32, #tpu.memory_space<vmem>>, vector<4x256xf32>
    tpu.vector_store %arg30[%c32_94, %c0_95], %101 {strides = array<i32>} : memref<36x256xf32, #tpu.memory_space<vmem>>, vector<4x256xf32>,
    %c0_96 = arith.constant 0 : index
    %c0_97 = arith.constant 0 : index
    %103 = vector.load %arg5[%c0_96, %c0_97] : memref<72x36xf32, #tpu.memory_space<vmem>>, vector<72x36xf32>
    %c0_98 = arith.constant 0 : index
    %c0_99 = arith.constant 0 : index
    %104 = vector.load %arg30[%c0_98, %c0_99] : memref<36x256xf32, #tpu.memory_space<vmem>>, vector<36x256xf32>
    %cst_100 = arith.constant dense<0.000000e+00> : vector<72x256xf32>
    %105 = tpu.matmul %103, %104, %cst_100 {dimension_numbers = #tpu.dot_dimension_numbers<[1], [0], [0], [1], [0, 0, 1, 1], [], []>} : vector<72x36xf32>, vector<36x256xf32>, vector<72x256xf32> -> vector<72x256xf32>
    %c0_101 = arith.constant 0 : index
    %c0_102 = arith.constant 0 : index
    %106 = vector.load %arg6[%c0_101, %c0_102] : memref<72x1xf32, #tpu.memory_space<vmem>>, vector<72x1xf32>
    %107 = vector.broadcast %106 : vector<72x1xf32> to vector<72x256xf32>
    %108 = arith.addf %105, %107 : vector<72x256xf32>
    %109 = arith.negf %108 : vector<72x256xf32>
    %110 = math.exp %109 : vector<72x256xf32>
    %cst_103 = arith.constant 1.000000e+00 : f32
    %111 = vector.broadcast %cst_103 : f32 to vector<72x256xf32>
    %112 = arith.addf %111, %110 : vector<72x256xf32>
    %113 = arith.divf %111, %112 : vector<72x256xf32>
    %c0_104 = arith.constant 0 : index
    %c0_105 = arith.constant 0 : index
    %114 = vector.load %arg29[%c0_104, %c0_105] : memref<72x256xf32, #tpu.memory_space<vmem>>, vector<8x256xf32>
    %115 = vector.extract_strided_slice %113 {offsets = [0, 0], sizes = [8, 256], strides = [1, 1]} : vector<72x256xf32> to vector<8x256xf32>
    %116 = arith.mulf %114, %115 : vector<8x256xf32>
    %c0_106 = arith.constant 0 : index
    %c0_107 = arith.constant 0 : index
    %117 = vector.load %arg29[%c0_106, %c0_107] : memref<72x256xf32, #tpu.memory_space<vmem>>, vector<8x256xf32>
    tpu.vector_store %arg29[%c0_106, %c0_107], %116 {strides = array<i32>} : memref<72x256xf32, #tpu.memory_space<vmem>>, vector<8x256xf32>,
    %c8_108 = arith.constant 8 : index
    %c0_109 = arith.constant 0 : index
    %118 = vector.load %arg29[%c8_108, %c0_109] : memref<72x256xf32, #tpu.memory_space<vmem>>, vector<8x256xf32>
    %119 = vector.extract_strided_slice %113 {offsets = [8, 0], sizes = [8, 256], strides = [1, 1]} : vector<72x256xf32> to vector<8x256xf32>
    %120 = arith.mulf %118, %119 : vector<8x256xf32>
    %c8_110 = arith.constant 8 : index
    %c0_111 = arith.constant 0 : index
    %121 = vector.load %arg29[%c8_110, %c0_111] : memref<72x256xf32, #tpu.memory_space<vmem>>, vector<8x256xf32>
    tpu.vector_store %arg29[%c8_110, %c0_111], %120 {strides = array<i32>} : memref<72x256xf32, #tpu.memory_space<vmem>>, vector<8x256xf32>,
    %c16_112 = arith.constant 16 : index
    %c0_113 = arith.constant 0 : index
    %122 = vector.load %arg29[%c16_112, %c0_113] : memref<72x256xf32, #tpu.memory_space<vmem>>, vector<8x256xf32>
    %123 = vector.extract_strided_slice %113 {offsets = [16, 0], sizes = [8, 256], strides = [1, 1]} : vector<72x256xf32> to vector<8x256xf32>
    %124 = arith.mulf %122, %123 : vector<8x256xf32>
    %c16_114 = arith.constant 16 : index
    %c0_115 = arith.constant 0 : index
    %125 = vector.load %arg29[%c16_114, %c0_115] : memref<72x256xf32, #tpu.memory_space<vmem>>, vector<8x256xf32>
    tpu.vector_store %arg29[%c16_114, %c0_115], %124 {strides = array<i32>} : memref<72x256xf32, #tpu.memory_space<vmem>>, vector<8x256xf32>,
    %c24_116 = arith.constant 24 : index
    %c0_117 = arith.constant 0 : index
    %126 = vector.load %arg29[%c24_116, %c0_117] : memref<72x256xf32, #tpu.memory_space<vmem>>, vector<8x256xf32>
    %127 = vector.extract_strided_slice %113 {offsets = [24, 0], sizes = [8, 256], strides = [1, 1]} : vector<72x256xf32> to vector<8x256xf32>
    %128 = arith.mulf %126, %127 : vector<8x256xf32>
    %c24_118 = arith.constant 24 : index
    %c0_119 = arith.constant 0 : index
    %129 = vector.load %arg29[%c24_118, %c0_119] : memref<72x256xf32, #tpu.memory_space<vmem>>, vector<8x256xf32>
    tpu.vector_store %arg29[%c24_118, %c0_119], %128 {strides = array<i32>} : memref<72x256xf32, #tpu.memory_space<vmem>>, vector<8x256xf32>,
    %c32_120 = arith.constant 32 : index
    %c0_121 = arith.constant 0 : index
    %130 = vector.load %arg29[%c32_120, %c0_121] : memref<72x256xf32, #tpu.memory_space<vmem>>, vector<8x256xf32>
    %131 = vector.extract_strided_slice %113 {offsets = [32, 0], sizes = [8, 256], strides = [1, 1]} : vector<72x256xf32> to vector<8x256xf32>
    %132 = arith.mulf %130, %131 : vector<8x256xf32>
    %c32_122 = arith.constant 32 : index
    %c0_123 = arith.constant 0 : index
    %133 = vector.load %arg29[%c32_122, %c0_123] : memref<72x256xf32, #tpu.memory_space<vmem>>, vector<8x256xf32>
    tpu.vector_store %arg29[%c32_122, %c0_123], %132 {strides = array<i32>} : memref<72x256xf32, #tpu.memory_space<vmem>>, vector<8x256xf32>,
    %c40_124 = arith.constant 40 : index
    %c0_125 = arith.constant 0 : index
    %134 = vector.load %arg29[%c40_124, %c0_125] : memref<72x256xf32, #tpu.memory_space<vmem>>, vector<8x256xf32>
    %135 = vector.extract_strided_slice %113 {offsets = [40, 0], sizes = [8, 256], strides = [1, 1]} : vector<72x256xf32> to vector<8x256xf32>
    %136 = arith.mulf %134, %135 : vector<8x256xf32>
    %c40_126 = arith.constant 40 : index
    %c0_127 = arith.constant 0 : index
    %137 = vector.load %arg29[%c40_126, %c0_127] : memref<72x256xf32, #tpu.memory_space<vmem>>, vector<8x256xf32>
    tpu.vector_store %arg29[%c40_126, %c0_127], %136 {strides = array<i32>} : memref<72x256xf32, #tpu.memory_space<vmem>>, vector<8x256xf32>,
    %c48_128 = arith.constant 48 : index
    %c0_129 = arith.constant 0 : index
    %138 = vector.load %arg29[%c48_128, %c0_129] : memref<72x256xf32, #tpu.memory_space<vmem>>, vector<8x256xf32>
    %139 = vector.extract_strided_slice %113 {offsets = [48, 0], sizes = [8, 256], strides = [1, 1]} : vector<72x256xf32> to vector<8x256xf32>
    %140 = arith.mulf %138, %139 : vector<8x256xf32>
    %c48_130 = arith.constant 48 : index
    %c0_131 = arith.constant 0 : index
    %141 = vector.load %arg29[%c48_130, %c0_131] : memref<72x256xf32, #tpu.memory_space<vmem>>, vector<8x256xf32>
    tpu.vector_store %arg29[%c48_130, %c0_131], %140 {strides = array<i32>} : memref<72x256xf32, #tpu.memory_space<vmem>>, vector<8x256xf32>,
    %c56_132 = arith.constant 56 : index
    %c0_133 = arith.constant 0 : index
    %142 = vector.load %arg29[%c56_132, %c0_133] : memref<72x256xf32, #tpu.memory_space<vmem>>, vector<8x256xf32>
    %143 = vector.extract_strided_slice %113 {offsets = [56, 0], sizes = [8, 256], strides = [1, 1]} : vector<72x256xf32> to vector<8x256xf32>
    %144 = arith.mulf %142, %143 : vector<8x256xf32>
    %c56_134 = arith.constant 56 : index
    %c0_135 = arith.constant 0 : index
    %145 = vector.load %arg29[%c56_134, %c0_135] : memref<72x256xf32, #tpu.memory_space<vmem>>, vector<8x256xf32>
    tpu.vector_store %arg29[%c56_134, %c0_135], %144 {strides = array<i32>} : memref<72x256xf32, #tpu.memory_space<vmem>>, vector<8x256xf32>,
    %c64_136 = arith.constant 64 : index
    %c0_137 = arith.constant 0 : index
    %146 = vector.load %arg29[%c64_136, %c0_137] : memref<72x256xf32, #tpu.memory_space<vmem>>, vector<8x256xf32>
    %147 = vector.extract_strided_slice %113 {offsets = [64, 0], sizes = [8, 256], strides = [1, 1]} : vector<72x256xf32> to vector<8x256xf32>
    %148 = arith.mulf %146, %147 : vector<8x256xf32>
    %c64_138 = arith.constant 64 : index
    %c0_139 = arith.constant 0 : index
    %149 = vector.load %arg29[%c64_138, %c0_139] : memref<72x256xf32, #tpu.memory_space<vmem>>, vector<8x256xf32>
    tpu.vector_store %arg29[%c64_138, %c0_139], %148 {strides = array<i32>} : memref<72x256xf32, #tpu.memory_space<vmem>>, vector<8x256xf32>,
    %c0_140 = arith.constant 0 : index
    %c0_141 = arith.constant 0 : index
    %150 = vector.load %arg7[%c0_140, %c0_141] : memref<8x72xf32, #tpu.memory_space<vmem>>, vector<8x72xf32>
    %c0_142 = arith.constant 0 : index
    %c0_143 = arith.constant 0 : index
    %151 = vector.load %arg29[%c0_142, %c0_143] : memref<72x256xf32, #tpu.memory_space<vmem>>, vector<72x256xf32>
    %cst_144 = arith.constant dense<0.000000e+00> : vector<8x256xf32>
    %152 = tpu.matmul %150, %151, %cst_144 {dimension_numbers = #tpu.dot_dimension_numbers<[1], [0], [0], [1], [0, 0, 1, 1], [], []>} : vector<8x72xf32>, vector<72x256xf32>, vector<8x256xf32> -> vector<8x256xf32>
    %c0_145 = arith.constant 0 : index
    %c0_146 = arith.constant 0 : index
    %153 = vector.load %arg8[%c0_145, %c0_146] : memref<8x1xf32, #tpu.memory_space<vmem>>, vector<8x1xf32>
    %154 = vector.broadcast %153 : vector<8x1xf32> to vector<8x256xf32>
    %155 = arith.addf %152, %154 : vector<8x256xf32>
    %cst_147 = arith.constant 0.000000e+00 : f32
    %156 = vector.broadcast %cst_147 : f32 to vector<8x256xf32>
    %157 = arith.cmpf oge, %155, %156 : vector<8x256xf32>
    %cst_148 = arith.constant 2.000000e-01 : f32
    %158 = vector.broadcast %cst_148 : f32 to vector<8x256xf32>
    %159 = arith.mulf %158, %155 : vector<8x256xf32>
    %160 = arith.select %157, %155, %159 : vector<8x256xi1>, vector<8x256xf32>
    %c0_149 = arith.constant 0 : index
    %c128_150 = arith.constant 128 : index
    %161 = vector.load %arg28[%c0_149, %c128_150] : memref<8x512xf32, #tpu.memory_space<vmem>>, vector<8x256xf32>
    tpu.vector_store %arg28[%c0_149, %c128_150], %160 {strides = array<i32>} : memref<8x512xf32, #tpu.memory_space<vmem>>, vector<8x256xf32>,
    %c0_151 = arith.constant 0 : index
    %c0_152 = arith.constant 0 : index
    %162 = vector.load %arg9[%c0_151, %c0_152] : memref<8x9xf32, #tpu.memory_space<vmem>>, vector<8x9xf32>
    %cst_153 = arith.constant 0.000000e+00 : f32
    %163 = vector.broadcast %cst_153 : f32 to vector<8x256xf32>
    %c0_154 = arith.constant 0 : index
    %c111_155 = arith.constant 111 : index
    %164 = vector.load %arg28[%c0_154, %c111_155] : memref<8x512xf32, #tpu.memory_space<vmem>>, vector<8x256xf32>
    %c0_156 = arith.constant 0 : index
    %c0_157 = arith.constant 0 : index
    %165 = vector.load %arg2[%c0_156, %c0_157] : memref<27x256xf32, #tpu.memory_space<vmem>>, vector<1x256xf32>
    %166 = vector.broadcast %165 : vector<1x256xf32> to vector<8x256xf32>
    %167 = arith.mulf %164, %166 : vector<8x256xf32>
    %168 = vector.extract_strided_slice %162 {offsets = [0, 0], sizes = [8, 1], strides = [1, 1]} : vector<8x9xf32> to vector<8x1xf32>
    %169 = vector.broadcast %168 : vector<8x1xf32> to vector<8x256xf32>
    %170 = arith.mulf %167, %169 : vector<8x256xf32>
    %171 = arith.addf %163, %170 : vector<8x256xf32>
    %c0_158 = arith.constant 0 : index
    %c112_159 = arith.constant 112 : index
    %172 = vector.load %arg28[%c0_158, %c112_159] : memref<8x512xf32, #tpu.memory_space<vmem>>, vector<8x256xf32>
    %c1_160 = arith.constant 1 : index
    %c0_161 = arith.constant 0 : index
    %173 = vector.load %arg2[%c1_160, %c0_161] : memref<27x256xf32, #tpu.memory_space<vmem>>, vector<1x256xf32>
    %174 = vector.broadcast %173 : vector<1x256xf32> to vector<8x256xf32>
    %175 = arith.mulf %172, %174 : vector<8x256xf32>
    %176 = vector.extract_strided_slice %162 {offsets = [0, 1], sizes = [8, 1], strides = [1, 1]} : vector<8x9xf32> to vector<8x1xf32>
    %177 = vector.broadcast %176 : vector<8x1xf32> to vector<8x256xf32>
    %178 = arith.mulf %175, %177 : vector<8x256xf32>
    %179 = arith.addf %171, %178 : vector<8x256xf32>
    %c0_162 = arith.constant 0 : index
    %c113_163 = arith.constant 113 : index
    %180 = vector.load %arg28[%c0_162, %c113_163] : memref<8x512xf32, #tpu.memory_space<vmem>>, vector<8x256xf32>
    %c2_164 = arith.constant 2 : index
    %c0_165 = arith.constant 0 : index
    %181 = vector.load %arg2[%c2_164, %c0_165] : memref<27x256xf32, #tpu.memory_space<vmem>>, vector<1x256xf32>
    %182 = vector.broadcast %181 : vector<1x256xf32> to vector<8x256xf32>
    %183 = arith.mulf %180, %182 : vector<8x256xf32>
    %184 = vector.extract_strided_slice %162 {offsets = [0, 2], sizes = [8, 1], strides = [1, 1]} : vector<8x9xf32> to vector<8x1xf32>
    %185 = vector.broadcast %184 : vector<8x1xf32> to vector<8x256xf32>
    %186 = arith.mulf %183, %185 : vector<8x256xf32>
    %187 = arith.addf %179, %186 : vector<8x256xf32>
    %c0_166 = arith.constant 0 : index
    %c127_167 = arith.constant 127 : index
    %188 = vector.load %arg28[%c0_166, %c127_167] : memref<8x512xf32, #tpu.memory_space<vmem>>, vector<8x256xf32>
    %c3_168 = arith.constant 3 : index
    %c0_169 = arith.constant 0 : index
    %189 = vector.load %arg2[%c3_168, %c0_169] : memref<27x256xf32, #tpu.memory_space<vmem>>, vector<1x256xf32>
    %190 = vector.broadcast %189 : vector<1x256xf32> to vector<8x256xf32>
    %191 = arith.mulf %188, %190 : vector<8x256xf32>
    %192 = vector.extract_strided_slice %162 {offsets = [0, 3], sizes = [8, 1], strides = [1, 1]} : vector<8x9xf32> to vector<8x1xf32>
    %193 = vector.broadcast %192 : vector<8x1xf32> to vector<8x256xf32>
    %194 = arith.mulf %191, %193 : vector<8x256xf32>
    %195 = arith.addf %187, %194 : vector<8x256xf32>
    %c0_170 = arith.constant 0 : index
    %c128_171 = arith.constant 128 : index
    %196 = vector.load %arg28[%c0_170, %c128_171] : memref<8x512xf32, #tpu.memory_space<vmem>>, vector<8x256xf32>
    %197 = vector.extract_strided_slice %162 {offsets = [0, 4], sizes = [8, 1], strides = [1, 1]} : vector<8x9xf32> to vector<8x1xf32>
    %198 = vector.broadcast %197 : vector<8x1xf32> to vector<8x256xf32>
    %199 = arith.mulf %196, %198 : vector<8x256xf32>
    %200 = arith.addf %195, %199 : vector<8x256xf32>
    %c0_172 = arith.constant 0 : index
    %c129_173 = arith.constant 129 : index
    %201 = vector.load %arg28[%c0_172, %c129_173] : memref<8x512xf32, #tpu.memory_space<vmem>>, vector<8x256xf32>
    %c5_174 = arith.constant 5 : index
    %c0_175 = arith.constant 0 : index
    %202 = vector.load %arg2[%c5_174, %c0_175] : memref<27x256xf32, #tpu.memory_space<vmem>>, vector<1x256xf32>
    %203 = vector.broadcast %202 : vector<1x256xf32> to vector<8x256xf32>
    %204 = arith.mulf %201, %203 : vector<8x256xf32>
    %205 = vector.extract_strided_slice %162 {offsets = [0, 5], sizes = [8, 1], strides = [1, 1]} : vector<8x9xf32> to vector<8x1xf32>
    %206 = vector.broadcast %205 : vector<8x1xf32> to vector<8x256xf32>
    %207 = arith.mulf %204, %206 : vector<8x256xf32>
    %208 = arith.addf %200, %207 : vector<8x256xf32>
    %c0_176 = arith.constant 0 : index
    %c143_177 = arith.constant 143 : index
    %209 = vector.load %arg28[%c0_176, %c143_177] : memref<8x512xf32, #tpu.memory_space<vmem>>, vector<8x256xf32>
    %c6_178 = arith.constant 6 : index
    %c0_179 = arith.constant 0 : index
    %210 = vector.load %arg2[%c6_178, %c0_179] : memref<27x256xf32, #tpu.memory_space<vmem>>, vector<1x256xf32>
    %211 = vector.broadcast %210 : vector<1x256xf32> to vector<8x256xf32>
    %212 = arith.mulf %209, %211 : vector<8x256xf32>
    %213 = vector.extract_strided_slice %162 {offsets = [0, 6], sizes = [8, 1], strides = [1, 1]} : vector<8x9xf32> to vector<8x1xf32>
    %214 = vector.broadcast %213 : vector<8x1xf32> to vector<8x256xf32>
    %215 = arith.mulf %212, %214 : vector<8x256xf32>
    %216 = arith.addf %208, %215 : vector<8x256xf32>
    %c0_180 = arith.constant 0 : index
    %c144_181 = arith.constant 144 : index
    %217 = vector.load %arg28[%c0_180, %c144_181] : memref<8x512xf32, #tpu.memory_space<vmem>>, vector<8x256xf32>
    %c7_182 = arith.constant 7 : index
    %c0_183 = arith.constant 0 : index
    %218 = vector.load %arg2[%c7_182, %c0_183] : memref<27x256xf32, #tpu.memory_space<vmem>>, vector<1x256xf32>
    %219 = vector.broadcast %218 : vector<1x256xf32> to vector<8x256xf32>
    %220 = arith.mulf %217, %219 : vector<8x256xf32>
    %221 = vector.extract_strided_slice %162 {offsets = [0, 7], sizes = [8, 1], strides = [1, 1]} : vector<8x9xf32> to vector<8x1xf32>
    %222 = vector.broadcast %221 : vector<8x1xf32> to vector<8x256xf32>
    %223 = arith.mulf %220, %222 : vector<8x256xf32>
    %224 = arith.addf %216, %223 : vector<8x256xf32>
    %c0_184 = arith.constant 0 : index
    %c145_185 = arith.constant 145 : index
    %225 = vector.load %arg28[%c0_184, %c145_185] : memref<8x512xf32, #tpu.memory_space<vmem>>, vector<8x256xf32>
    %c8_186 = arith.constant 8 : index
    %c0_187 = arith.constant 0 : index
    %226 = vector.load %arg2[%c8_186, %c0_187] : memref<27x256xf32, #tpu.memory_space<vmem>>, vector<1x256xf32>
    %227 = vector.broadcast %226 : vector<1x256xf32> to vector<8x256xf32>
    %228 = arith.mulf %225, %227 : vector<8x256xf32>
    %229 = vector.extract_strided_slice %162 {offsets = [0, 8], sizes = [8, 1], strides = [1, 1]} : vector<8x9xf32> to vector<8x1xf32>
    %230 = vector.broadcast %229 : vector<8x1xf32> to vector<8x256xf32>
    %231 = arith.mulf %228, %230 : vector<8x256xf32>
    %232 = arith.addf %224, %231 : vector<8x256xf32>
    %c0_188 = arith.constant 0 : index
    %c0_189 = arith.constant 0 : index
    %233 = vector.load %arg10[%c0_188, %c0_189] : memref<8x1xf32, #tpu.memory_space<vmem>>, vector<8x1xf32>
    %234 = vector.broadcast %233 : vector<8x1xf32> to vector<8x256xf32>
    %235 = arith.addf %232, %234 : vector<8x256xf32>
    %cst_190 = arith.constant dense<0.000000e+00> : vector<8xf32>
    %236 = vector.multi_reduction <add>, %160, %cst_190 [1] : vector<8x256xf32> to vector<8xf32>
    %237 = vector.shape_cast %236 : vector<8xf32> to vector<8x1xf32>
    %cst_191 = arith.constant 2.560000e+02 : f32
    %238 = vector.broadcast %cst_191 : f32 to vector<8x1xf32>
    %239 = arith.divf %237, %238 : vector<8x1xf32>
    %c0_192 = arith.constant 0 : index
    %c0_193 = arith.constant 0 : index
    %240 = vector.load %arg11[%c0_192, %c0_193] : memref<8x8xf32, #tpu.memory_space<vmem>>, vector<8x8xf32>
    %cst_194 = arith.constant dense<0.000000e+00> : vector<8x1xf32>
    %241 = tpu.matmul %240, %239, %cst_194 {dimension_numbers = #tpu.dot_dimension_numbers<[1], [0], [0], [1], [0, 0, 1, 1], [], []>} : vector<8x8xf32>, vector<8x1xf32>, vector<8x1xf32> -> vector<8x1xf32>
    %c0_195 = arith.constant 0 : index
    %c0_196 = arith.constant 0 : index
    %242 = vector.load %arg12[%c0_195, %c0_196] : memref<1x1xf32, #tpu.memory_space<vmem>>, vector<1x1xf32>
    %243 = vector.broadcast %242 : vector<1x1xf32> to vector<8x1xf32>
    %244 = arith.addf %241, %243 : vector<8x1xf32>
    %245 = vector.broadcast %244 : vector<8x1xf32> to vector<8x256xf32>
    %246 = arith.addf %235, %245 : vector<8x256xf32>
    %c0_197 = arith.constant 0 : index
    %c0_198 = arith.constant 0 : index
    %247 = vector.load %arg13[%c0_197, %c0_198] : memref<36x8xf32, #tpu.memory_space<vmem>>, vector<36x8xf32>
    %cst_199 = arith.constant dense<0.000000e+00> : vector<36x256xf32>
    %248 = tpu.matmul %247, %246, %cst_199 {dimension_numbers = #tpu.dot_dimension_numbers<[1], [0], [0], [1], [0, 0, 1, 1], [], []>} : vector<36x8xf32>, vector<8x256xf32>, vector<36x256xf32> -> vector<36x256xf32>
    %c0_200 = arith.constant 0 : index
    %c0_201 = arith.constant 0 : index
    %249 = vector.load %arg14[%c0_200, %c0_201] : memref<36x1xf32, #tpu.memory_space<vmem>>, vector<36x1xf32>
    %250 = vector.broadcast %249 : vector<36x1xf32> to vector<36x256xf32>
    %251 = arith.addf %248, %250 : vector<36x256xf32>
    %c0_202 = arith.constant 0 : index
    %c0_203 = arith.constant 0 : index
    %252 = vector.load %arg15[%c0_202, %c0_203] : memref<4x8xf32, #tpu.memory_space<vmem>>, vector<4x8xf32>
    %cst_204 = arith.constant dense<0.000000e+00> : vector<4x256xf32>
    %253 = tpu.matmul %252, %5, %cst_204 {dimension_numbers = #tpu.dot_dimension_numbers<[1], [0], [0], [1], [0, 0, 1, 1], [], []>} : vector<4x8xf32>, vector<8x256xf32>, vector<4x256xf32> -> vector<4x256xf32>
    %c0_205 = arith.constant 0 : index
    %c0_206 = arith.constant 0 : index
    %254 = vector.load %arg16[%c0_205, %c0_206] : memref<4x1xf32, #tpu.memory_space<vmem>>, vector<4x1xf32>
    %255 = vector.broadcast %254 : vector<4x1xf32> to vector<4x256xf32>
    %256 = arith.addf %253, %255 : vector<4x256xf32>
    %c0_207 = arith.constant 0 : index
    %c128_208 = arith.constant 128 : index
    %257 = vector.load %arg28[%c0_207, %c128_208] : memref<8x512xf32, #tpu.memory_space<vmem>>, vector<4x256xf32>
    tpu.vector_store %arg28[%c0_207, %c128_208], %256 {strides = array<i32>} : memref<8x512xf32, #tpu.memory_space<vmem>>, vector<4x256xf32>,
    %cst_209 = arith.constant 0.000000e+00 : f32
    %258 = vector.broadcast %cst_209 : f32 to vector<4x256xf32>
    %c0_210 = arith.constant 0 : index
    %c111_211 = arith.constant 111 : index
    %259 = vector.load %arg28[%c0_210, %c111_211] : memref<8x512xf32, #tpu.memory_space<vmem>>, vector<4x256xf32>
    %c0_212 = arith.constant 0 : index
    %c0_213 = arith.constant 0 : index
    %260 = vector.load %arg2[%c0_212, %c0_213] : memref<27x256xf32, #tpu.memory_space<vmem>>, vector<1x256xf32>
    %261 = vector.broadcast %260 : vector<1x256xf32> to vector<4x256xf32>
    %262 = arith.mulf %259, %261 : vector<4x256xf32>
    %263 = vector.extract_strided_slice %251 {offsets = [0, 0], sizes = [4, 256], strides = [1, 1]} : vector<36x256xf32> to vector<4x256xf32>
    %264 = arith.mulf %262, %263 : vector<4x256xf32>
    %265 = arith.addf %258, %264 : vector<4x256xf32>
    %c0_214 = arith.constant 0 : index
    %c112_215 = arith.constant 112 : index
    %266 = vector.load %arg28[%c0_214, %c112_215] : memref<8x512xf32, #tpu.memory_space<vmem>>, vector<4x256xf32>
    %c1_216 = arith.constant 1 : index
    %c0_217 = arith.constant 0 : index
    %267 = vector.load %arg2[%c1_216, %c0_217] : memref<27x256xf32, #tpu.memory_space<vmem>>, vector<1x256xf32>
    %268 = vector.broadcast %267 : vector<1x256xf32> to vector<4x256xf32>
    %269 = arith.mulf %266, %268 : vector<4x256xf32>
    %270 = vector.extract_strided_slice %251 {offsets = [4, 0], sizes = [4, 256], strides = [1, 1]} : vector<36x256xf32> to vector<4x256xf32>
    %271 = arith.mulf %269, %270 : vector<4x256xf32>
    %272 = arith.addf %265, %271 : vector<4x256xf32>
    %c0_218 = arith.constant 0 : index
    %c113_219 = arith.constant 113 : index
    %273 = vector.load %arg28[%c0_218, %c113_219] : memref<8x512xf32, #tpu.memory_space<vmem>>, vector<4x256xf32>
    %c2_220 = arith.constant 2 : index
    %c0_221 = arith.constant 0 : index
    %274 = vector.load %arg2[%c2_220, %c0_221] : memref<27x256xf32, #tpu.memory_space<vmem>>, vector<1x256xf32>
    %275 = vector.broadcast %274 : vector<1x256xf32> to vector<4x256xf32>
    %276 = arith.mulf %273, %275 : vector<4x256xf32>
    %277 = vector.extract_strided_slice %251 {offsets = [8, 0], sizes = [4, 256], strides = [1, 1]} : vector<36x256xf32> to vector<4x256xf32>
    %278 = arith.mulf %276, %277 : vector<4x256xf32>
    %279 = arith.addf %272, %278 : vector<4x256xf32>
    %c0_222 = arith.constant 0 : index
    %c127_223 = arith.constant 127 : index
    %280 = vector.load %arg28[%c0_222, %c127_223] : memref<8x512xf32, #tpu.memory_space<vmem>>, vector<4x256xf32>
    %c3_224 = arith.constant 3 : index
    %c0_225 = arith.constant 0 : index
    %281 = vector.load %arg2[%c3_224, %c0_225] : memref<27x256xf32, #tpu.memory_space<vmem>>, vector<1x256xf32>
    %282 = vector.broadcast %281 : vector<1x256xf32> to vector<4x256xf32>
    %283 = arith.mulf %280, %282 : vector<4x256xf32>
    %284 = vector.extract_strided_slice %251 {offsets = [12, 0], sizes = [4, 256], strides = [1, 1]} : vector<36x256xf32> to vector<4x256xf32>
    %285 = arith.mulf %283, %284 : vector<4x256xf32>
    %286 = arith.addf %279, %285 : vector<4x256xf32>
    %c0_226 = arith.constant 0 : index
    %c128_227 = arith.constant 128 : index
    %287 = vector.load %arg28[%c0_226, %c128_227] : memref<8x512xf32, #tpu.memory_space<vmem>>, vector<4x256xf32>
    %288 = vector.extract_strided_slice %251 {offsets = [16, 0], sizes = [4, 256], strides = [1, 1]} : vector<36x256xf32> to vector<4x256xf32>
    %289 = arith.mulf %287, %288 : vector<4x256xf32>
    %290 = arith.addf %286, %289 : vector<4x256xf32>
    %c0_228 = arith.constant 0 : index
    %c129_229 = arith.constant 129 : index
    %291 = vector.load %arg28[%c0_228, %c129_229] : memref<8x512xf32, #tpu.memory_space<vmem>>, vector<4x256xf32>
    %c5_230 = arith.constant 5 : index
    %c0_231 = arith.constant 0 : index
    %292 = vector.load %arg2[%c5_230, %c0_231] : memref<27x256xf32, #tpu.memory_space<vmem>>, vector<1x256xf32>
    %293 = vector.broadcast %292 : vector<1x256xf32> to vector<4x256xf32>
    %294 = arith.mulf %291, %293 : vector<4x256xf32>
    %295 = vector.extract_strided_slice %251 {offsets = [20, 0], sizes = [4, 256], strides = [1, 1]} : vector<36x256xf32> to vector<4x256xf32>
    %296 = arith.mulf %294, %295 : vector<4x256xf32>
    %297 = arith.addf %290, %296 : vector<4x256xf32>
    %c0_232 = arith.constant 0 : index
    %c143_233 = arith.constant 143 : index
    %298 = vector.load %arg28[%c0_232, %c143_233] : memref<8x512xf32, #tpu.memory_space<vmem>>, vector<4x256xf32>
    %c6_234 = arith.constant 6 : index
    %c0_235 = arith.constant 0 : index
    %299 = vector.load %arg2[%c6_234, %c0_235] : memref<27x256xf32, #tpu.memory_space<vmem>>, vector<1x256xf32>
    %300 = vector.broadcast %299 : vector<1x256xf32> to vector<4x256xf32>
    %301 = arith.mulf %298, %300 : vector<4x256xf32>
    %302 = vector.extract_strided_slice %251 {offsets = [24, 0], sizes = [4, 256], strides = [1, 1]} : vector<36x256xf32> to vector<4x256xf32>
    %303 = arith.mulf %301, %302 : vector<4x256xf32>
    %304 = arith.addf %297, %303 : vector<4x256xf32>
    %c0_236 = arith.constant 0 : index
    %c144_237 = arith.constant 144 : index
    %305 = vector.load %arg28[%c0_236, %c144_237] : memref<8x512xf32, #tpu.memory_space<vmem>>, vector<4x256xf32>
    %c7_238 = arith.constant 7 : index
    %c0_239 = arith.constant 0 : index
    %306 = vector.load %arg2[%c7_238, %c0_239] : memref<27x256xf32, #tpu.memory_space<vmem>>, vector<1x256xf32>
    %307 = vector.broadcast %306 : vector<1x256xf32> to vector<4x256xf32>
    %308 = arith.mulf %305, %307 : vector<4x256xf32>
    %309 = vector.extract_strided_slice %251 {offsets = [28, 0], sizes = [4, 256], strides = [1, 1]} : vector<36x256xf32> to vector<4x256xf32>
    %310 = arith.mulf %308, %309 : vector<4x256xf32>
    %311 = arith.addf %304, %310 : vector<4x256xf32>
    %c0_240 = arith.constant 0 : index
    %c145_241 = arith.constant 145 : index
    %312 = vector.load %arg28[%c0_240, %c145_241] : memref<8x512xf32, #tpu.memory_space<vmem>>, vector<4x256xf32>
    %c8_242 = arith.constant 8 : index
    %c0_243 = arith.constant 0 : index
    %313 = vector.load %arg2[%c8_242, %c0_243] : memref<27x256xf32, #tpu.memory_space<vmem>>, vector<1x256xf32>
    %314 = vector.broadcast %313 : vector<1x256xf32> to vector<4x256xf32>
    %315 = arith.mulf %312, %314 : vector<4x256xf32>
    %316 = vector.extract_strided_slice %251 {offsets = [32, 0], sizes = [4, 256], strides = [1, 1]} : vector<36x256xf32> to vector<4x256xf32>
    %317 = arith.mulf %315, %316 : vector<4x256xf32>
    %318 = arith.addf %311, %317 : vector<4x256xf32>
    %cst_244 = arith.constant 0.000000e+00 : f32
    %319 = vector.broadcast %cst_244 : f32 to vector<4x256xf32>
    %c0_245 = arith.constant 0 : index
    %c77 = arith.constant 77 : index
    %320 = vector.load %arg28[%c0_245, %c77] : memref<8x512xf32, #tpu.memory_space<vmem>>, vector<4x256xf32>
    %c9 = arith.constant 9 : index
    %c0_246 = arith.constant 0 : index
    %321 = vector.load %arg2[%c9, %c0_246] : memref<27x256xf32, #tpu.memory_space<vmem>>, vector<1x256xf32>
    %322 = vector.broadcast %321 : vector<1x256xf32> to vector<4x256xf32>
    %323 = arith.mulf %320, %322 : vector<4x256xf32>
    %324 = vector.extract_strided_slice %251 {offsets = [0, 0], sizes = [4, 256], strides = [1, 1]} : vector<36x256xf32> to vector<4x256xf32>
    %325 = arith.mulf %323, %324 : vector<4x256xf32>
    %326 = arith.addf %319, %325 : vector<4x256xf32>
    %c0_247 = arith.constant 0 : index
    %c80 = arith.constant 80 : index
    %327 = vector.load %arg28[%c0_247, %c80] : memref<8x512xf32, #tpu.memory_space<vmem>>, vector<4x256xf32>
    %c10 = arith.constant 10 : index
    %c0_248 = arith.constant 0 : index
    %328 = vector.load %arg2[%c10, %c0_248] : memref<27x256xf32, #tpu.memory_space<vmem>>, vector<1x256xf32>
    %329 = vector.broadcast %328 : vector<1x256xf32> to vector<4x256xf32>
    %330 = arith.mulf %327, %329 : vector<4x256xf32>
    %331 = vector.extract_strided_slice %251 {offsets = [4, 0], sizes = [4, 256], strides = [1, 1]} : vector<36x256xf32> to vector<4x256xf32>
    %332 = arith.mulf %330, %331 : vector<4x256xf32>
    %333 = arith.addf %326, %332 : vector<4x256xf32>
    %c0_249 = arith.constant 0 : index
    %c83 = arith.constant 83 : index
    %334 = vector.load %arg28[%c0_249, %c83] : memref<8x512xf32, #tpu.memory_space<vmem>>, vector<4x256xf32>
    %c11 = arith.constant 11 : index
    %c0_250 = arith.constant 0 : index
    %335 = vector.load %arg2[%c11, %c0_250] : memref<27x256xf32, #tpu.memory_space<vmem>>, vector<1x256xf32>
    %336 = vector.broadcast %335 : vector<1x256xf32> to vector<4x256xf32>
    %337 = arith.mulf %334, %336 : vector<4x256xf32>
    %338 = vector.extract_strided_slice %251 {offsets = [8, 0], sizes = [4, 256], strides = [1, 1]} : vector<36x256xf32> to vector<4x256xf32>
    %339 = arith.mulf %337, %338 : vector<4x256xf32>
    %340 = arith.addf %333, %339 : vector<4x256xf32>
    %c0_251 = arith.constant 0 : index
    %c125 = arith.constant 125 : index
    %341 = vector.load %arg28[%c0_251, %c125] : memref<8x512xf32, #tpu.memory_space<vmem>>, vector<4x256xf32>
    %c12_252 = arith.constant 12 : index
    %c0_253 = arith.constant 0 : index
    %342 = vector.load %arg2[%c12_252, %c0_253] : memref<27x256xf32, #tpu.memory_space<vmem>>, vector<1x256xf32>
    %343 = vector.broadcast %342 : vector<1x256xf32> to vector<4x256xf32>
    %344 = arith.mulf %341, %343 : vector<4x256xf32>
    %345 = vector.extract_strided_slice %251 {offsets = [12, 0], sizes = [4, 256], strides = [1, 1]} : vector<36x256xf32> to vector<4x256xf32>
    %346 = arith.mulf %344, %345 : vector<4x256xf32>
    %347 = arith.addf %340, %346 : vector<4x256xf32>
    %c0_254 = arith.constant 0 : index
    %c128_255 = arith.constant 128 : index
    %348 = vector.load %arg28[%c0_254, %c128_255] : memref<8x512xf32, #tpu.memory_space<vmem>>, vector<4x256xf32>
    %349 = vector.extract_strided_slice %251 {offsets = [16, 0], sizes = [4, 256], strides = [1, 1]} : vector<36x256xf32> to vector<4x256xf32>
    %350 = arith.mulf %348, %349 : vector<4x256xf32>
    %351 = arith.addf %347, %350 : vector<4x256xf32>
    %c0_256 = arith.constant 0 : index
    %c131 = arith.constant 131 : index
    %352 = vector.load %arg28[%c0_256, %c131] : memref<8x512xf32, #tpu.memory_space<vmem>>, vector<4x256xf32>
    %c14 = arith.constant 14 : index
    %c0_257 = arith.constant 0 : index
    %353 = vector.load %arg2[%c14, %c0_257] : memref<27x256xf32, #tpu.memory_space<vmem>>, vector<1x256xf32>
    %354 = vector.broadcast %353 : vector<1x256xf32> to vector<4x256xf32>
    %355 = arith.mulf %352, %354 : vector<4x256xf32>
    %356 = vector.extract_strided_slice %251 {offsets = [20, 0], sizes = [4, 256], strides = [1, 1]} : vector<36x256xf32> to vector<4x256xf32>
    %357 = arith.mulf %355, %356 : vector<4x256xf32>
    %358 = arith.addf %351, %357 : vector<4x256xf32>
    %c0_258 = arith.constant 0 : index
    %c173 = arith.constant 173 : index
    %359 = vector.load %arg28[%c0_258, %c173] : memref<8x512xf32, #tpu.memory_space<vmem>>, vector<4x256xf32>
    %c15 = arith.constant 15 : index
    %c0_259 = arith.constant 0 : index
    %360 = vector.load %arg2[%c15, %c0_259] : memref<27x256xf32, #tpu.memory_space<vmem>>, vector<1x256xf32>
    %361 = vector.broadcast %360 : vector<1x256xf32> to vector<4x256xf32>
    %362 = arith.mulf %359, %361 : vector<4x256xf32>
    %363 = vector.extract_strided_slice %251 {offsets = [24, 0], sizes = [4, 256], strides = [1, 1]} : vector<36x256xf32> to vector<4x256xf32>
    %364 = arith.mulf %362, %363 : vector<4x256xf32>
    %365 = arith.addf %358, %364 : vector<4x256xf32>
    %c0_260 = arith.constant 0 : index
    %c176 = arith.constant 176 : index
    %366 = vector.load %arg28[%c0_260, %c176] : memref<8x512xf32, #tpu.memory_space<vmem>>, vector<4x256xf32>
    %c16_261 = arith.constant 16 : index
    %c0_262 = arith.constant 0 : index
    %367 = vector.load %arg2[%c16_261, %c0_262] : memref<27x256xf32, #tpu.memory_space<vmem>>, vector<1x256xf32>
    %368 = vector.broadcast %367 : vector<1x256xf32> to vector<4x256xf32>
    %369 = arith.mulf %366, %368 : vector<4x256xf32>
    %370 = vector.extract_strided_slice %251 {offsets = [28, 0], sizes = [4, 256], strides = [1, 1]} : vector<36x256xf32> to vector<4x256xf32>
    %371 = arith.mulf %369, %370 : vector<4x256xf32>
    %372 = arith.addf %365, %371 : vector<4x256xf32>
    %c0_263 = arith.constant 0 : index
    %c179 = arith.constant 179 : index
    %373 = vector.load %arg28[%c0_263, %c179] : memref<8x512xf32, #tpu.memory_space<vmem>>, vector<4x256xf32>
    %c17 = arith.constant 17 : index
    %c0_264 = arith.constant 0 : index
    %374 = vector.load %arg2[%c17, %c0_264] : memref<27x256xf32, #tpu.memory_space<vmem>>, vector<1x256xf32>
    %375 = vector.broadcast %374 : vector<1x256xf32> to vector<4x256xf32>
    %376 = arith.mulf %373, %375 : vector<4x256xf32>
    %377 = vector.extract_strided_slice %251 {offsets = [32, 0], sizes = [4, 256], strides = [1, 1]} : vector<36x256xf32> to vector<4x256xf32>
    %378 = arith.mulf %376, %377 : vector<4x256xf32>
    %379 = arith.addf %372, %378 : vector<4x256xf32>
    %cst_265 = arith.constant 0.000000e+00 : f32
    %380 = vector.broadcast %cst_265 : f32 to vector<4x256xf32>
    %c0_266 = arith.constant 0 : index
    %c43 = arith.constant 43 : index
    %381 = vector.load %arg28[%c0_266, %c43] : memref<8x512xf32, #tpu.memory_space<vmem>>, vector<4x256xf32>
    %c18 = arith.constant 18 : index
    %c0_267 = arith.constant 0 : index
    %382 = vector.load %arg2[%c18, %c0_267] : memref<27x256xf32, #tpu.memory_space<vmem>>, vector<1x256xf32>
    %383 = vector.broadcast %382 : vector<1x256xf32> to vector<4x256xf32>
    %384 = arith.mulf %381, %383 : vector<4x256xf32>
    %385 = vector.extract_strided_slice %251 {offsets = [0, 0], sizes = [4, 256], strides = [1, 1]} : vector<36x256xf32> to vector<4x256xf32>
    %386 = arith.mulf %384, %385 : vector<4x256xf32>
    %387 = arith.addf %380, %386 : vector<4x256xf32>
    %c0_268 = arith.constant 0 : index
    %c48_269 = arith.constant 48 : index
    %388 = vector.load %arg28[%c0_268, %c48_269] : memref<8x512xf32, #tpu.memory_space<vmem>>, vector<4x256xf32>
    %c19 = arith.constant 19 : index
    %c0_270 = arith.constant 0 : index
    %389 = vector.load %arg2[%c19, %c0_270] : memref<27x256xf32, #tpu.memory_space<vmem>>, vector<1x256xf32>
    %390 = vector.broadcast %389 : vector<1x256xf32> to vector<4x256xf32>
    %391 = arith.mulf %388, %390 : vector<4x256xf32>
    %392 = vector.extract_strided_slice %251 {offsets = [4, 0], sizes = [4, 256], strides = [1, 1]} : vector<36x256xf32> to vector<4x256xf32>
    %393 = arith.mulf %391, %392 : vector<4x256xf32>
    %394 = arith.addf %387, %393 : vector<4x256xf32>
    %c0_271 = arith.constant 0 : index
    %c53 = arith.constant 53 : index
    %395 = vector.load %arg28[%c0_271, %c53] : memref<8x512xf32, #tpu.memory_space<vmem>>, vector<4x256xf32>
    %c20_272 = arith.constant 20 : index
    %c0_273 = arith.constant 0 : index
    %396 = vector.load %arg2[%c20_272, %c0_273] : memref<27x256xf32, #tpu.memory_space<vmem>>, vector<1x256xf32>
    %397 = vector.broadcast %396 : vector<1x256xf32> to vector<4x256xf32>
    %398 = arith.mulf %395, %397 : vector<4x256xf32>
    %399 = vector.extract_strided_slice %251 {offsets = [8, 0], sizes = [4, 256], strides = [1, 1]} : vector<36x256xf32> to vector<4x256xf32>
    %400 = arith.mulf %398, %399 : vector<4x256xf32>
    %401 = arith.addf %394, %400 : vector<4x256xf32>
    %c0_274 = arith.constant 0 : index
    %c123 = arith.constant 123 : index
    %402 = vector.load %arg28[%c0_274, %c123] : memref<8x512xf32, #tpu.memory_space<vmem>>, vector<4x256xf32>
    %c21 = arith.constant 21 : index
    %c0_275 = arith.constant 0 : index
    %403 = vector.load %arg2[%c21, %c0_275] : memref<27x256xf32, #tpu.memory_space<vmem>>, vector<1x256xf32>
    %404 = vector.broadcast %403 : vector<1x256xf32> to vector<4x256xf32>
    %405 = arith.mulf %402, %404 : vector<4x256xf32>
    %406 = vector.extract_strided_slice %251 {offsets = [12, 0], sizes = [4, 256], strides = [1, 1]} : vector<36x256xf32> to vector<4x256xf32>
    %407 = arith.mulf %405, %406 : vector<4x256xf32>
    %408 = arith.addf %401, %407 : vector<4x256xf32>
    %c0_276 = arith.constant 0 : index
    %c128_277 = arith.constant 128 : index
    %409 = vector.load %arg28[%c0_276, %c128_277] : memref<8x512xf32, #tpu.memory_space<vmem>>, vector<4x256xf32>
    %410 = vector.extract_strided_slice %251 {offsets = [16, 0], sizes = [4, 256], strides = [1, 1]} : vector<36x256xf32> to vector<4x256xf32>
    %411 = arith.mulf %409, %410 : vector<4x256xf32>
    %412 = arith.addf %408, %411 : vector<4x256xf32>
    %c0_278 = arith.constant 0 : index
    %c133 = arith.constant 133 : index
    %413 = vector.load %arg28[%c0_278, %c133] : memref<8x512xf32, #tpu.memory_space<vmem>>, vector<4x256xf32>
    %c23 = arith.constant 23 : index
    %c0_279 = arith.constant 0 : index
    %414 = vector.load %arg2[%c23, %c0_279] : memref<27x256xf32, #tpu.memory_space<vmem>>, vector<1x256xf32>
    %415 = vector.broadcast %414 : vector<1x256xf32> to vector<4x256xf32>
    %416 = arith.mulf %413, %415 : vector<4x256xf32>
    %417 = vector.extract_strided_slice %251 {offsets = [20, 0], sizes = [4, 256], strides = [1, 1]} : vector<36x256xf32> to vector<4x256xf32>
    %418 = arith.mulf %416, %417 : vector<4x256xf32>
    %419 = arith.addf %412, %418 : vector<4x256xf32>
    %c0_280 = arith.constant 0 : index
    %c203 = arith.constant 203 : index
    %420 = vector.load %arg28[%c0_280, %c203] : memref<8x512xf32, #tpu.memory_space<vmem>>, vector<4x256xf32>
    %c24_281 = arith.constant 24 : index
    %c0_282 = arith.constant 0 : index
    %421 = vector.load %arg2[%c24_281, %c0_282] : memref<27x256xf32, #tpu.memory_space<vmem>>, vector<1x256xf32>
    %422 = vector.broadcast %421 : vector<1x256xf32> to vector<4x256xf32>
    %423 = arith.mulf %420, %422 : vector<4x256xf32>
    %424 = vector.extract_strided_slice %251 {offsets = [24, 0], sizes = [4, 256], strides = [1, 1]} : vector<36x256xf32> to vector<4x256xf32>
    %425 = arith.mulf %423, %424 : vector<4x256xf32>
    %426 = arith.addf %419, %425 : vector<4x256xf32>
    %c0_283 = arith.constant 0 : index
    %c208 = arith.constant 208 : index
    %427 = vector.load %arg28[%c0_283, %c208] : memref<8x512xf32, #tpu.memory_space<vmem>>, vector<4x256xf32>
    %c25 = arith.constant 25 : index
    %c0_284 = arith.constant 0 : index
    %428 = vector.load %arg2[%c25, %c0_284] : memref<27x256xf32, #tpu.memory_space<vmem>>, vector<1x256xf32>
    %429 = vector.broadcast %428 : vector<1x256xf32> to vector<4x256xf32>
    %430 = arith.mulf %427, %429 : vector<4x256xf32>
    %431 = vector.extract_strided_slice %251 {offsets = [28, 0], sizes = [4, 256], strides = [1, 1]} : vector<36x256xf32> to vector<4x256xf32>
    %432 = arith.mulf %430, %431 : vector<4x256xf32>
    %433 = arith.addf %426, %432 : vector<4x256xf32>
    %c0_285 = arith.constant 0 : index
    %c213 = arith.constant 213 : index
    %434 = vector.load %arg28[%c0_285, %c213] : memref<8x512xf32, #tpu.memory_space<vmem>>, vector<4x256xf32>
    %c26 = arith.constant 26 : index
    %c0_286 = arith.constant 0 : index
    %435 = vector.load %arg2[%c26, %c0_286] : memref<27x256xf32, #tpu.memory_space<vmem>>, vector<1x256xf32>
    %436 = vector.broadcast %435 : vector<1x256xf32> to vector<4x256xf32>
    %437 = arith.mulf %434, %436 : vector<4x256xf32>
    %438 = vector.extract_strided_slice %251 {offsets = [32, 0], sizes = [4, 256], strides = [1, 1]} : vector<36x256xf32> to vector<4x256xf32>
    %439 = arith.mulf %437, %438 : vector<4x256xf32>
    %440 = arith.addf %433, %439 : vector<4x256xf32>
    %c0_287 = arith.constant 0 : index
    %c128_288 = arith.constant 128 : index
    %441 = vector.load %arg28[%c0_287, %c128_288] : memref<8x512xf32, #tpu.memory_space<vmem>>, vector<4x256xf32>
    tpu.vector_store %arg28[%c0_287, %c128_288], %318 {strides = array<i32>} : memref<8x512xf32, #tpu.memory_space<vmem>>, vector<4x256xf32>,
    %c0_289 = arith.constant 0 : index
    %c111_290 = arith.constant 111 : index
    %442 = vector.load %arg28[%c0_289, %c111_290] : memref<8x512xf32, #tpu.memory_space<vmem>>, vector<4x256xf32>
    %c0_291 = arith.constant 0 : index
    %c0_292 = arith.constant 0 : index
    %443 = vector.load %arg2[%c0_291, %c0_292] : memref<27x256xf32, #tpu.memory_space<vmem>>, vector<1x256xf32>
    %444 = vector.broadcast %443 : vector<1x256xf32> to vector<4x256xf32>
    %445 = arith.mulf %442, %444 : vector<4x256xf32>
    %c0_293 = arith.constant 0 : index
    %c0_294 = arith.constant 0 : index
    %446 = vector.load %arg29[%c0_293, %c0_294] : memref<72x256xf32, #tpu.memory_space<vmem>>, vector<4x256xf32>
    tpu.vector_store %arg29[%c0_293, %c0_294], %445 {strides = array<i32>} : memref<72x256xf32, #tpu.memory_space<vmem>>, vector<4x256xf32>,
    %c0_295 = arith.constant 0 : index
    %c112_296 = arith.constant 112 : index
    %447 = vector.load %arg28[%c0_295, %c112_296] : memref<8x512xf32, #tpu.memory_space<vmem>>, vector<4x256xf32>
    %c1_297 = arith.constant 1 : index
    %c0_298 = arith.constant 0 : index
    %448 = vector.load %arg2[%c1_297, %c0_298] : memref<27x256xf32, #tpu.memory_space<vmem>>, vector<1x256xf32>
    %449 = vector.broadcast %448 : vector<1x256xf32> to vector<4x256xf32>
    %450 = arith.mulf %447, %449 : vector<4x256xf32>
    %c4_299 = arith.constant 4 : index
    %c0_300 = arith.constant 0 : index
    %451 = vector.load %arg29[%c4_299, %c0_300] : memref<72x256xf32, #tpu.memory_space<vmem>>, vector<4x256xf32>
    tpu.vector_store %arg29[%c4_299, %c0_300], %450 {strides = array<i32>} : memref<72x256xf32, #tpu.memory_space<vmem>>, vector<4x256xf32>,
    %c0_301 = arith.constant 0 : index
    %c113_302 = arith.constant 113 : index
    %452 = vector.load %arg28[%c0_301, %c113_302] : memref<8x512xf32, #tpu.memory_space<vmem>>, vector<4x256xf32>
    %c2_303 = arith.constant 2 : index
    %c0_304 = arith.constant 0 : index
    %453 = vector.load %arg2[%c2_303, %c0_304] : memref<27x256xf32, #tpu.memory_space<vmem>>, vector<1x256xf32>
    %454 = vector.broadcast %453 : vector<1x256xf32> to vector<4x256xf32>
    %455 = arith.mulf %452, %454 : vector<4x256xf32>
    %c8_305 = arith.constant 8 : index
    %c0_306 = arith.constant 0 : index
    %456 = vector.load %arg29[%c8_305, %c0_306] : memref<72x256xf32, #tpu.memory_space<vmem>>, vector<4x256xf32>
    tpu.vector_store %arg29[%c8_305, %c0_306], %455 {strides = array<i32>} : memref<72x256xf32, #tpu.memory_space<vmem>>, vector<4x256xf32>,
    %c0_307 = arith.constant 0 : index
    %c127_308 = arith.constant 127 : index
    %457 = vector.load %arg28[%c0_307, %c127_308] : memref<8x512xf32, #tpu.memory_space<vmem>>, vector<4x256xf32>
    %c3_309 = arith.constant 3 : index
    %c0_310 = arith.constant 0 : index
    %458 = vector.load %arg2[%c3_309, %c0_310] : memref<27x256xf32, #tpu.memory_space<vmem>>, vector<1x256xf32>
    %459 = vector.broadcast %458 : vector<1x256xf32> to vector<4x256xf32>
    %460 = arith.mulf %457, %459 : vector<4x256xf32>
    %c12_311 = arith.constant 12 : index
    %c0_312 = arith.constant 0 : index
    %461 = vector.load %arg29[%c12_311, %c0_312] : memref<72x256xf32, #tpu.memory_space<vmem>>, vector<4x256xf32>
    tpu.vector_store %arg29[%c12_311, %c0_312], %460 {strides = array<i32>} : memref<72x256xf32, #tpu.memory_space<vmem>>, vector<4x256xf32>,
    %c0_313 = arith.constant 0 : index
    %c128_314 = arith.constant 128 : index
    %462 = vector.load %arg28[%c0_313, %c128_314] : memref<8x512xf32, #tpu.memory_space<vmem>>, vector<4x256xf32>
    %c16_315 = arith.constant 16 : index
    %c0_316 = arith.constant 0 : index
    %463 = vector.load %arg29[%c16_315, %c0_316] : memref<72x256xf32, #tpu.memory_space<vmem>>, vector<4x256xf32>
    tpu.vector_store %arg29[%c16_315, %c0_316], %462 {strides = array<i32>} : memref<72x256xf32, #tpu.memory_space<vmem>>, vector<4x256xf32>,
    %c0_317 = arith.constant 0 : index
    %c129_318 = arith.constant 129 : index
    %464 = vector.load %arg28[%c0_317, %c129_318] : memref<8x512xf32, #tpu.memory_space<vmem>>, vector<4x256xf32>
    %c5_319 = arith.constant 5 : index
    %c0_320 = arith.constant 0 : index
    %465 = vector.load %arg2[%c5_319, %c0_320] : memref<27x256xf32, #tpu.memory_space<vmem>>, vector<1x256xf32>
    %466 = vector.broadcast %465 : vector<1x256xf32> to vector<4x256xf32>
    %467 = arith.mulf %464, %466 : vector<4x256xf32>
    %c20_321 = arith.constant 20 : index
    %c0_322 = arith.constant 0 : index
    %468 = vector.load %arg29[%c20_321, %c0_322] : memref<72x256xf32, #tpu.memory_space<vmem>>, vector<4x256xf32>
    tpu.vector_store %arg29[%c20_321, %c0_322], %467 {strides = array<i32>} : memref<72x256xf32, #tpu.memory_space<vmem>>, vector<4x256xf32>,
    %c0_323 = arith.constant 0 : index
    %c143_324 = arith.constant 143 : index
    %469 = vector.load %arg28[%c0_323, %c143_324] : memref<8x512xf32, #tpu.memory_space<vmem>>, vector<4x256xf32>
    %c6_325 = arith.constant 6 : index
    %c0_326 = arith.constant 0 : index
    %470 = vector.load %arg2[%c6_325, %c0_326] : memref<27x256xf32, #tpu.memory_space<vmem>>, vector<1x256xf32>
    %471 = vector.broadcast %470 : vector<1x256xf32> to vector<4x256xf32>
    %472 = arith.mulf %469, %471 : vector<4x256xf32>
    %c24_327 = arith.constant 24 : index
    %c0_328 = arith.constant 0 : index
    %473 = vector.load %arg29[%c24_327, %c0_328] : memref<72x256xf32, #tpu.memory_space<vmem>>, vector<4x256xf32>
    tpu.vector_store %arg29[%c24_327, %c0_328], %472 {strides = array<i32>} : memref<72x256xf32, #tpu.memory_space<vmem>>, vector<4x256xf32>,
    %c0_329 = arith.constant 0 : index
    %c144_330 = arith.constant 144 : index
    %474 = vector.load %arg28[%c0_329, %c144_330] : memref<8x512xf32, #tpu.memory_space<vmem>>, vector<4x256xf32>
    %c7_331 = arith.constant 7 : index
    %c0_332 = arith.constant 0 : index
    %475 = vector.load %arg2[%c7_331, %c0_332] : memref<27x256xf32, #tpu.memory_space<vmem>>, vector<1x256xf32>
    %476 = vector.broadcast %475 : vector<1x256xf32> to vector<4x256xf32>
    %477 = arith.mulf %474, %476 : vector<4x256xf32>
    %c28_333 = arith.constant 28 : index
    %c0_334 = arith.constant 0 : index
    %478 = vector.load %arg29[%c28_333, %c0_334] : memref<72x256xf32, #tpu.memory_space<vmem>>, vector<4x256xf32>
    tpu.vector_store %arg29[%c28_333, %c0_334], %477 {strides = array<i32>} : memref<72x256xf32, #tpu.memory_space<vmem>>, vector<4x256xf32>,
    %c0_335 = arith.constant 0 : index
    %c145_336 = arith.constant 145 : index
    %479 = vector.load %arg28[%c0_335, %c145_336] : memref<8x512xf32, #tpu.memory_space<vmem>>, vector<4x256xf32>
    %c8_337 = arith.constant 8 : index
    %c0_338 = arith.constant 0 : index
    %480 = vector.load %arg2[%c8_337, %c0_338] : memref<27x256xf32, #tpu.memory_space<vmem>>, vector<1x256xf32>
    %481 = vector.broadcast %480 : vector<1x256xf32> to vector<4x256xf32>
    %482 = arith.mulf %479, %481 : vector<4x256xf32>
    %c32_339 = arith.constant 32 : index
    %c0_340 = arith.constant 0 : index
    %483 = vector.load %arg29[%c32_339, %c0_340] : memref<72x256xf32, #tpu.memory_space<vmem>>, vector<4x256xf32>
    tpu.vector_store %arg29[%c32_339, %c0_340], %482 {strides = array<i32>} : memref<72x256xf32, #tpu.memory_space<vmem>>, vector<4x256xf32>,
    %c0_341 = arith.constant 0 : index
    %c0_342 = arith.constant 0 : index
    %484 = vector.load %arg17[%c0_341, %c0_342] : memref<4x36xf32, #tpu.memory_space<vmem>>, vector<4x36xf32>
    %c0_343 = arith.constant 0 : index
    %c0_344 = arith.constant 0 : index
    %485 = vector.load %arg29[%c0_343, %c0_344] : memref<72x256xf32, #tpu.memory_space<vmem>>, vector<36x256xf32>
    %cst_345 = arith.constant dense<0.000000e+00> : vector<4x256xf32>
    %486 = tpu.matmul %484, %485, %cst_345 {dimension_numbers = #tpu.dot_dimension_numbers<[1], [0], [0], [1], [0, 0, 1, 1], [], []>} : vector<4x36xf32>, vector<36x256xf32>, vector<4x256xf32> -> vector<4x256xf32>
    %c0_346 = arith.constant 0 : index
    %c0_347 = arith.constant 0 : index
    %487 = vector.load %arg18[%c0_346, %c0_347] : memref<4x1xf32, #tpu.memory_space<vmem>>, vector<4x1xf32>
    %488 = vector.broadcast %487 : vector<4x1xf32> to vector<4x256xf32>
    %489 = arith.addf %486, %488 : vector<4x256xf32>
    %cst_348 = arith.constant 0.000000e+00 : f32
    %490 = vector.broadcast %cst_348 : f32 to vector<4x256xf32>
    %491 = arith.cmpf oge, %489, %490 : vector<4x256xf32>
    %cst_349 = arith.constant 2.000000e-01 : f32
    %492 = vector.broadcast %cst_349 : f32 to vector<4x256xf32>
    %493 = arith.mulf %492, %489 : vector<4x256xf32>
    %494 = arith.select %491, %489, %493 : vector<4x256xi1>, vector<4x256xf32>
    %c0_350 = arith.constant 0 : index
    %c128_351 = arith.constant 128 : index
    %495 = vector.load %arg28[%c0_350, %c128_351] : memref<8x512xf32, #tpu.memory_space<vmem>>, vector<4x256xf32>
    tpu.vector_store %arg28[%c0_350, %c128_351], %379 {strides = array<i32>} : memref<8x512xf32, #tpu.memory_space<vmem>>, vector<4x256xf32>,
    %c0_352 = arith.constant 0 : index
    %c111_353 = arith.constant 111 : index
    %496 = vector.load %arg28[%c0_352, %c111_353] : memref<8x512xf32, #tpu.memory_space<vmem>>, vector<4x256xf32>
    %c0_354 = arith.constant 0 : index
    %c0_355 = arith.constant 0 : index
    %497 = vector.load %arg2[%c0_354, %c0_355] : memref<27x256xf32, #tpu.memory_space<vmem>>, vector<1x256xf32>
    %498 = vector.broadcast %497 : vector<1x256xf32> to vector<4x256xf32>
    %499 = arith.mulf %496, %498 : vector<4x256xf32>
    %c0_356 = arith.constant 0 : index
    %c0_357 = arith.constant 0 : index
    %500 = vector.load %arg29[%c0_356, %c0_357] : memref<72x256xf32, #tpu.memory_space<vmem>>, vector<4x256xf32>
    tpu.vector_store %arg29[%c0_356, %c0_357], %499 {strides = array<i32>} : memref<72x256xf32, #tpu.memory_space<vmem>>, vector<4x256xf32>,
    %c0_358 = arith.constant 0 : index
    %c112_359 = arith.constant 112 : index
    %501 = vector.load %arg28[%c0_358, %c112_359] : memref<8x512xf32, #tpu.memory_space<vmem>>, vector<4x256xf32>
    %c1_360 = arith.constant 1 : index
    %c0_361 = arith.constant 0 : index
    %502 = vector.load %arg2[%c1_360, %c0_361] : memref<27x256xf32, #tpu.memory_space<vmem>>, vector<1x256xf32>
    %503 = vector.broadcast %502 : vector<1x256xf32> to vector<4x256xf32>
    %504 = arith.mulf %501, %503 : vector<4x256xf32>
    %c4_362 = arith.constant 4 : index
    %c0_363 = arith.constant 0 : index
    %505 = vector.load %arg29[%c4_362, %c0_363] : memref<72x256xf32, #tpu.memory_space<vmem>>, vector<4x256xf32>
    tpu.vector_store %arg29[%c4_362, %c0_363], %504 {strides = array<i32>} : memref<72x256xf32, #tpu.memory_space<vmem>>, vector<4x256xf32>,
    %c0_364 = arith.constant 0 : index
    %c113_365 = arith.constant 113 : index
    %506 = vector.load %arg28[%c0_364, %c113_365] : memref<8x512xf32, #tpu.memory_space<vmem>>, vector<4x256xf32>
    %c2_366 = arith.constant 2 : index
    %c0_367 = arith.constant 0 : index
    %507 = vector.load %arg2[%c2_366, %c0_367] : memref<27x256xf32, #tpu.memory_space<vmem>>, vector<1x256xf32>
    %508 = vector.broadcast %507 : vector<1x256xf32> to vector<4x256xf32>
    %509 = arith.mulf %506, %508 : vector<4x256xf32>
    %c8_368 = arith.constant 8 : index
    %c0_369 = arith.constant 0 : index
    %510 = vector.load %arg29[%c8_368, %c0_369] : memref<72x256xf32, #tpu.memory_space<vmem>>, vector<4x256xf32>
    tpu.vector_store %arg29[%c8_368, %c0_369], %509 {strides = array<i32>} : memref<72x256xf32, #tpu.memory_space<vmem>>, vector<4x256xf32>,
    %c0_370 = arith.constant 0 : index
    %c127_371 = arith.constant 127 : index
    %511 = vector.load %arg28[%c0_370, %c127_371] : memref<8x512xf32, #tpu.memory_space<vmem>>, vector<4x256xf32>
    %c3_372 = arith.constant 3 : index
    %c0_373 = arith.constant 0 : index
    %512 = vector.load %arg2[%c3_372, %c0_373] : memref<27x256xf32, #tpu.memory_space<vmem>>, vector<1x256xf32>
    %513 = vector.broadcast %512 : vector<1x256xf32> to vector<4x256xf32>
    %514 = arith.mulf %511, %513 : vector<4x256xf32>
    %c12_374 = arith.constant 12 : index
    %c0_375 = arith.constant 0 : index
    %515 = vector.load %arg29[%c12_374, %c0_375] : memref<72x256xf32, #tpu.memory_space<vmem>>, vector<4x256xf32>
    tpu.vector_store %arg29[%c12_374, %c0_375], %514 {strides = array<i32>} : memref<72x256xf32, #tpu.memory_space<vmem>>, vector<4x256xf32>,
    %c0_376 = arith.constant 0 : index
    %c128_377 = arith.constant 128 : index
    %516 = vector.load %arg28[%c0_376, %c128_377] : memref<8x512xf32, #tpu.memory_space<vmem>>, vector<4x256xf32>
    %c16_378 = arith.constant 16 : index
    %c0_379 = arith.constant 0 : index
    %517 = vector.load %arg29[%c16_378, %c0_379] : memref<72x256xf32, #tpu.memory_space<vmem>>, vector<4x256xf32>
    tpu.vector_store %arg29[%c16_378, %c0_379], %516 {strides = array<i32>} : memref<72x256xf32, #tpu.memory_space<vmem>>, vector<4x256xf32>,
    %c0_380 = arith.constant 0 : index
    %c129_381 = arith.constant 129 : index
    %518 = vector.load %arg28[%c0_380, %c129_381] : memref<8x512xf32, #tpu.memory_space<vmem>>, vector<4x256xf32>
    %c5_382 = arith.constant 5 : index
    %c0_383 = arith.constant 0 : index
    %519 = vector.load %arg2[%c5_382, %c0_383] : memref<27x256xf32, #tpu.memory_space<vmem>>, vector<1x256xf32>
    %520 = vector.broadcast %519 : vector<1x256xf32> to vector<4x256xf32>
    %521 = arith.mulf %518, %520 : vector<4x256xf32>
    %c20_384 = arith.constant 20 : index
    %c0_385 = arith.constant 0 : index
    %522 = vector.load %arg29[%c20_384, %c0_385] : memref<72x256xf32, #tpu.memory_space<vmem>>, vector<4x256xf32>
    tpu.vector_store %arg29[%c20_384, %c0_385], %521 {strides = array<i32>} : memref<72x256xf32, #tpu.memory_space<vmem>>, vector<4x256xf32>,
    %c0_386 = arith.constant 0 : index
    %c143_387 = arith.constant 143 : index
    %523 = vector.load %arg28[%c0_386, %c143_387] : memref<8x512xf32, #tpu.memory_space<vmem>>, vector<4x256xf32>
    %c6_388 = arith.constant 6 : index
    %c0_389 = arith.constant 0 : index
    %524 = vector.load %arg2[%c6_388, %c0_389] : memref<27x256xf32, #tpu.memory_space<vmem>>, vector<1x256xf32>
    %525 = vector.broadcast %524 : vector<1x256xf32> to vector<4x256xf32>
    %526 = arith.mulf %523, %525 : vector<4x256xf32>
    %c24_390 = arith.constant 24 : index
    %c0_391 = arith.constant 0 : index
    %527 = vector.load %arg29[%c24_390, %c0_391] : memref<72x256xf32, #tpu.memory_space<vmem>>, vector<4x256xf32>
    tpu.vector_store %arg29[%c24_390, %c0_391], %526 {strides = array<i32>} : memref<72x256xf32, #tpu.memory_space<vmem>>, vector<4x256xf32>,
    %c0_392 = arith.constant 0 : index
    %c144_393 = arith.constant 144 : index
    %528 = vector.load %arg28[%c0_392, %c144_393] : memref<8x512xf32, #tpu.memory_space<vmem>>, vector<4x256xf32>
    %c7_394 = arith.constant 7 : index
    %c0_395 = arith.constant 0 : index
    %529 = vector.load %arg2[%c7_394, %c0_395] : memref<27x256xf32, #tpu.memory_space<vmem>>, vector<1x256xf32>
    %530 = vector.broadcast %529 : vector<1x256xf32> to vector<4x256xf32>
    %531 = arith.mulf %528, %530 : vector<4x256xf32>
    %c28_396 = arith.constant 28 : index
    %c0_397 = arith.constant 0 : index
    %532 = vector.load %arg29[%c28_396, %c0_397] : memref<72x256xf32, #tpu.memory_space<vmem>>, vector<4x256xf32>
    tpu.vector_store %arg29[%c28_396, %c0_397], %531 {strides = array<i32>} : memref<72x256xf32, #tpu.memory_space<vmem>>, vector<4x256xf32>,
    %c0_398 = arith.constant 0 : index
    %c145_399 = arith.constant 145 : index
    %533 = vector.load %arg28[%c0_398, %c145_399] : memref<8x512xf32, #tpu.memory_space<vmem>>, vector<4x256xf32>
    %c8_400 = arith.constant 8 : index
    %c0_401 = arith.constant 0 : index
    %534 = vector.load %arg2[%c8_400, %c0_401] : memref<27x256xf32, #tpu.memory_space<vmem>>, vector<1x256xf32>
    %535 = vector.broadcast %534 : vector<1x256xf32> to vector<4x256xf32>
    %536 = arith.mulf %533, %535 : vector<4x256xf32>
    %c32_402 = arith.constant 32 : index
    %c0_403 = arith.constant 0 : index
    %537 = vector.load %arg29[%c32_402, %c0_403] : memref<72x256xf32, #tpu.memory_space<vmem>>, vector<4x256xf32>
    tpu.vector_store %arg29[%c32_402, %c0_403], %536 {strides = array<i32>} : memref<72x256xf32, #tpu.memory_space<vmem>>, vector<4x256xf32>,
    %c0_404 = arith.constant 0 : index
    %c0_405 = arith.constant 0 : index
    %538 = vector.load %arg19[%c0_404, %c0_405] : memref<4x36xf32, #tpu.memory_space<vmem>>, vector<4x36xf32>
    %c0_406 = arith.constant 0 : index
    %c0_407 = arith.constant 0 : index
    %539 = vector.load %arg29[%c0_406, %c0_407] : memref<72x256xf32, #tpu.memory_space<vmem>>, vector<36x256xf32>
    %cst_408 = arith.constant dense<0.000000e+00> : vector<4x256xf32>
    %540 = tpu.matmul %538, %539, %cst_408 {dimension_numbers = #tpu.dot_dimension_numbers<[1], [0], [0], [1], [0, 0, 1, 1], [], []>} : vector<4x36xf32>, vector<36x256xf32>, vector<4x256xf32> -> vector<4x256xf32>
    %c0_409 = arith.constant 0 : index
    %c0_410 = arith.constant 0 : index
    %541 = vector.load %arg20[%c0_409, %c0_410] : memref<4x1xf32, #tpu.memory_space<vmem>>, vector<4x1xf32>
    %542 = vector.broadcast %541 : vector<4x1xf32> to vector<4x256xf32>
    %543 = arith.addf %540, %542 : vector<4x256xf32>
    %cst_411 = arith.constant 0.000000e+00 : f32
    %544 = vector.broadcast %cst_411 : f32 to vector<4x256xf32>
    %545 = arith.cmpf oge, %543, %544 : vector<4x256xf32>
    %cst_412 = arith.constant 2.000000e-01 : f32
    %546 = vector.broadcast %cst_412 : f32 to vector<4x256xf32>
    %547 = arith.mulf %546, %543 : vector<4x256xf32>
    %548 = arith.select %545, %543, %547 : vector<4x256xi1>, vector<4x256xf32>
    %c0_413 = arith.constant 0 : index
    %c128_414 = arith.constant 128 : index
    %549 = vector.load %arg28[%c0_413, %c128_414] : memref<8x512xf32, #tpu.memory_space<vmem>>, vector<4x256xf32>
    tpu.vector_store %arg28[%c0_413, %c128_414], %440 {strides = array<i32>} : memref<8x512xf32, #tpu.memory_space<vmem>>, vector<4x256xf32>,
    %c0_415 = arith.constant 0 : index
    %c111_416 = arith.constant 111 : index
    %550 = vector.load %arg28[%c0_415, %c111_416] : memref<8x512xf32, #tpu.memory_space<vmem>>, vector<4x256xf32>
    %c0_417 = arith.constant 0 : index
    %c0_418 = arith.constant 0 : index
    %551 = vector.load %arg2[%c0_417, %c0_418] : memref<27x256xf32, #tpu.memory_space<vmem>>, vector<1x256xf32>
    %552 = vector.broadcast %551 : vector<1x256xf32> to vector<4x256xf32>
    %553 = arith.mulf %550, %552 : vector<4x256xf32>
    %c0_419 = arith.constant 0 : index
    %c0_420 = arith.constant 0 : index
    %554 = vector.load %arg29[%c0_419, %c0_420] : memref<72x256xf32, #tpu.memory_space<vmem>>, vector<4x256xf32>
    tpu.vector_store %arg29[%c0_419, %c0_420], %553 {strides = array<i32>} : memref<72x256xf32, #tpu.memory_space<vmem>>, vector<4x256xf32>,
    %c0_421 = arith.constant 0 : index
    %c112_422 = arith.constant 112 : index
    %555 = vector.load %arg28[%c0_421, %c112_422] : memref<8x512xf32, #tpu.memory_space<vmem>>, vector<4x256xf32>
    %c1_423 = arith.constant 1 : index
    %c0_424 = arith.constant 0 : index
    %556 = vector.load %arg2[%c1_423, %c0_424] : memref<27x256xf32, #tpu.memory_space<vmem>>, vector<1x256xf32>
    %557 = vector.broadcast %556 : vector<1x256xf32> to vector<4x256xf32>
    %558 = arith.mulf %555, %557 : vector<4x256xf32>
    %c4_425 = arith.constant 4 : index
    %c0_426 = arith.constant 0 : index
    %559 = vector.load %arg29[%c4_425, %c0_426] : memref<72x256xf32, #tpu.memory_space<vmem>>, vector<4x256xf32>
    tpu.vector_store %arg29[%c4_425, %c0_426], %558 {strides = array<i32>} : memref<72x256xf32, #tpu.memory_space<vmem>>, vector<4x256xf32>,
    %c0_427 = arith.constant 0 : index
    %c113_428 = arith.constant 113 : index
    %560 = vector.load %arg28[%c0_427, %c113_428] : memref<8x512xf32, #tpu.memory_space<vmem>>, vector<4x256xf32>
    %c2_429 = arith.constant 2 : index
    %c0_430 = arith.constant 0 : index
    %561 = vector.load %arg2[%c2_429, %c0_430] : memref<27x256xf32, #tpu.memory_space<vmem>>, vector<1x256xf32>
    %562 = vector.broadcast %561 : vector<1x256xf32> to vector<4x256xf32>
    %563 = arith.mulf %560, %562 : vector<4x256xf32>
    %c8_431 = arith.constant 8 : index
    %c0_432 = arith.constant 0 : index
    %564 = vector.load %arg29[%c8_431, %c0_432] : memref<72x256xf32, #tpu.memory_space<vmem>>, vector<4x256xf32>
    tpu.vector_store %arg29[%c8_431, %c0_432], %563 {strides = array<i32>} : memref<72x256xf32, #tpu.memory_space<vmem>>, vector<4x256xf32>,
    %c0_433 = arith.constant 0 : index
    %c127_434 = arith.constant 127 : index
    %565 = vector.load %arg28[%c0_433, %c127_434] : memref<8x512xf32, #tpu.memory_space<vmem>>, vector<4x256xf32>
    %c3_435 = arith.constant 3 : index
    %c0_436 = arith.constant 0 : index
    %566 = vector.load %arg2[%c3_435, %c0_436] : memref<27x256xf32, #tpu.memory_space<vmem>>, vector<1x256xf32>
    %567 = vector.broadcast %566 : vector<1x256xf32> to vector<4x256xf32>
    %568 = arith.mulf %565, %567 : vector<4x256xf32>
    %c12_437 = arith.constant 12 : index
    %c0_438 = arith.constant 0 : index
    %569 = vector.load %arg29[%c12_437, %c0_438] : memref<72x256xf32, #tpu.memory_space<vmem>>, vector<4x256xf32>
    tpu.vector_store %arg29[%c12_437, %c0_438], %568 {strides = array<i32>} : memref<72x256xf32, #tpu.memory_space<vmem>>, vector<4x256xf32>,
    %c0_439 = arith.constant 0 : index
    %c128_440 = arith.constant 128 : index
    %570 = vector.load %arg28[%c0_439, %c128_440] : memref<8x512xf32, #tpu.memory_space<vmem>>, vector<4x256xf32>
    %c16_441 = arith.constant 16 : index
    %c0_442 = arith.constant 0 : index
    %571 = vector.load %arg29[%c16_441, %c0_442] : memref<72x256xf32, #tpu.memory_space<vmem>>, vector<4x256xf32>
    tpu.vector_store %arg29[%c16_441, %c0_442], %570 {strides = array<i32>} : memref<72x256xf32, #tpu.memory_space<vmem>>, vector<4x256xf32>,
    %c0_443 = arith.constant 0 : index
    %c129_444 = arith.constant 129 : index
    %572 = vector.load %arg28[%c0_443, %c129_444] : memref<8x512xf32, #tpu.memory_space<vmem>>, vector<4x256xf32>
    %c5_445 = arith.constant 5 : index
    %c0_446 = arith.constant 0 : index
    %573 = vector.load %arg2[%c5_445, %c0_446] : memref<27x256xf32, #tpu.memory_space<vmem>>, vector<1x256xf32>
    %574 = vector.broadcast %573 : vector<1x256xf32> to vector<4x256xf32>
    %575 = arith.mulf %572, %574 : vector<4x256xf32>
    %c20_447 = arith.constant 20 : index
    %c0_448 = arith.constant 0 : index
    %576 = vector.load %arg29[%c20_447, %c0_448] : memref<72x256xf32, #tpu.memory_space<vmem>>, vector<4x256xf32>
    tpu.vector_store %arg29[%c20_447, %c0_448], %575 {strides = array<i32>} : memref<72x256xf32, #tpu.memory_space<vmem>>, vector<4x256xf32>,
    %c0_449 = arith.constant 0 : index
    %c143_450 = arith.constant 143 : index
    %577 = vector.load %arg28[%c0_449, %c143_450] : memref<8x512xf32, #tpu.memory_space<vmem>>, vector<4x256xf32>
    %c6_451 = arith.constant 6 : index
    %c0_452 = arith.constant 0 : index
    %578 = vector.load %arg2[%c6_451, %c0_452] : memref<27x256xf32, #tpu.memory_space<vmem>>, vector<1x256xf32>
    %579 = vector.broadcast %578 : vector<1x256xf32> to vector<4x256xf32>
    %580 = arith.mulf %577, %579 : vector<4x256xf32>
    %c24_453 = arith.constant 24 : index
    %c0_454 = arith.constant 0 : index
    %581 = vector.load %arg29[%c24_453, %c0_454] : memref<72x256xf32, #tpu.memory_space<vmem>>, vector<4x256xf32>
    tpu.vector_store %arg29[%c24_453, %c0_454], %580 {strides = array<i32>} : memref<72x256xf32, #tpu.memory_space<vmem>>, vector<4x256xf32>,
    %c0_455 = arith.constant 0 : index
    %c144_456 = arith.constant 144 : index
    %582 = vector.load %arg28[%c0_455, %c144_456] : memref<8x512xf32, #tpu.memory_space<vmem>>, vector<4x256xf32>
    %c7_457 = arith.constant 7 : index
    %c0_458 = arith.constant 0 : index
    %583 = vector.load %arg2[%c7_457, %c0_458] : memref<27x256xf32, #tpu.memory_space<vmem>>, vector<1x256xf32>
    %584 = vector.broadcast %583 : vector<1x256xf32> to vector<4x256xf32>
    %585 = arith.mulf %582, %584 : vector<4x256xf32>
    %c28_459 = arith.constant 28 : index
    %c0_460 = arith.constant 0 : index
    %586 = vector.load %arg29[%c28_459, %c0_460] : memref<72x256xf32, #tpu.memory_space<vmem>>, vector<4x256xf32>
    tpu.vector_store %arg29[%c28_459, %c0_460], %585 {strides = array<i32>} : memref<72x256xf32, #tpu.memory_space<vmem>>, vector<4x256xf32>,
    %c0_461 = arith.constant 0 : index
    %c145_462 = arith.constant 145 : index
    %587 = vector.load %arg28[%c0_461, %c145_462] : memref<8x512xf32, #tpu.memory_space<vmem>>, vector<4x256xf32>
    %c8_463 = arith.constant 8 : index
    %c0_464 = arith.constant 0 : index
    %588 = vector.load %arg2[%c8_463, %c0_464] : memref<27x256xf32, #tpu.memory_space<vmem>>, vector<1x256xf32>
    %589 = vector.broadcast %588 : vector<1x256xf32> to vector<4x256xf32>
    %590 = arith.mulf %587, %589 : vector<4x256xf32>
    %c32_465 = arith.constant 32 : index
    %c0_466 = arith.constant 0 : index
    %591 = vector.load %arg29[%c32_465, %c0_466] : memref<72x256xf32, #tpu.memory_space<vmem>>, vector<4x256xf32>
    tpu.vector_store %arg29[%c32_465, %c0_466], %590 {strides = array<i32>} : memref<72x256xf32, #tpu.memory_space<vmem>>, vector<4x256xf32>,
    %c0_467 = arith.constant 0 : index
    %c0_468 = arith.constant 0 : index
    %592 = vector.load %arg21[%c0_467, %c0_468] : memref<4x36xf32, #tpu.memory_space<vmem>>, vector<4x36xf32>
    %c0_469 = arith.constant 0 : index
    %c0_470 = arith.constant 0 : index
    %593 = vector.load %arg29[%c0_469, %c0_470] : memref<72x256xf32, #tpu.memory_space<vmem>>, vector<36x256xf32>
    %cst_471 = arith.constant dense<0.000000e+00> : vector<4x256xf32>
    %594 = tpu.matmul %592, %593, %cst_471 {dimension_numbers = #tpu.dot_dimension_numbers<[1], [0], [0], [1], [0, 0, 1, 1], [], []>} : vector<4x36xf32>, vector<36x256xf32>, vector<4x256xf32> -> vector<4x256xf32>
    %c0_472 = arith.constant 0 : index
    %c0_473 = arith.constant 0 : index
    %595 = vector.load %arg22[%c0_472, %c0_473] : memref<4x1xf32, #tpu.memory_space<vmem>>, vector<4x1xf32>
    %596 = vector.broadcast %595 : vector<4x1xf32> to vector<4x256xf32>
    %597 = arith.addf %594, %596 : vector<4x256xf32>
    %cst_474 = arith.constant 0.000000e+00 : f32
    %598 = vector.broadcast %cst_474 : f32 to vector<4x256xf32>
    %599 = arith.cmpf oge, %597, %598 : vector<4x256xf32>
    %cst_475 = arith.constant 2.000000e-01 : f32
    %600 = vector.broadcast %cst_475 : f32 to vector<4x256xf32>
    %601 = arith.mulf %600, %597 : vector<4x256xf32>
    %602 = arith.select %599, %597, %601 : vector<4x256xi1>, vector<4x256xf32>
    %cst_476 = arith.constant dense<0.000000e+00> : vector<4xf32>
    %603 = vector.multi_reduction <add>, %256, %cst_476 [1] : vector<4x256xf32> to vector<4xf32>
    %604 = vector.shape_cast %603 : vector<4xf32> to vector<4x1xf32>
    %cst_477 = arith.constant 2.560000e+02 : f32
    %605 = vector.broadcast %cst_477 : f32 to vector<4x1xf32>
    %606 = arith.divf %604, %605 : vector<4x1xf32>
    %607 = arith.negf %606 : vector<4x1xf32>
    %608 = math.exp %607 : vector<4x1xf32>
    %cst_478 = arith.constant 1.000000e+00 : f32
    %609 = vector.broadcast %cst_478 : f32 to vector<4x1xf32>
    %610 = arith.addf %609, %608 : vector<4x1xf32>
    %611 = arith.divf %609, %610 : vector<4x1xf32>
    %cst_479 = arith.constant 2.000000e+00 : f32
    %612 = vector.broadcast %cst_479 : f32 to vector<4x1xf32>
    %613 = arith.mulf %612, %611 : vector<4x1xf32>
    %614 = vector.broadcast %613 : vector<4x1xf32> to vector<4x256xf32>
    %615 = arith.mulf %614, %256 : vector<4x256xf32>
    %cst_480 = arith.constant dense<0.000000e+00> : vector<4xf32>
    %616 = vector.multi_reduction <add>, %494, %cst_480 [1] : vector<4x256xf32> to vector<4xf32>
    %617 = vector.shape_cast %616 : vector<4xf32> to vector<4x1xf32>
    %cst_481 = arith.constant 2.560000e+02 : f32
    %618 = vector.broadcast %cst_481 : f32 to vector<4x1xf32>
    %619 = arith.divf %617, %618 : vector<4x1xf32>
    %620 = arith.negf %619 : vector<4x1xf32>
    %621 = math.exp %620 : vector<4x1xf32>
    %cst_482 = arith.constant 1.000000e+00 : f32
    %622 = vector.broadcast %cst_482 : f32 to vector<4x1xf32>
    %623 = arith.addf %622, %621 : vector<4x1xf32>
    %624 = arith.divf %622, %623 : vector<4x1xf32>
    %cst_483 = arith.constant 2.000000e+00 : f32
    %625 = vector.broadcast %cst_483 : f32 to vector<4x1xf32>
    %626 = arith.mulf %625, %624 : vector<4x1xf32>
    %627 = vector.broadcast %626 : vector<4x1xf32> to vector<4x256xf32>
    %628 = arith.mulf %627, %494 : vector<4x256xf32>
    %cst_484 = arith.constant dense<0.000000e+00> : vector<4xf32>
    %629 = vector.multi_reduction <add>, %548, %cst_484 [1] : vector<4x256xf32> to vector<4xf32>
    %630 = vector.shape_cast %629 : vector<4xf32> to vector<4x1xf32>
    %cst_485 = arith.constant 2.560000e+02 : f32
    %631 = vector.broadcast %cst_485 : f32 to vector<4x1xf32>
    %632 = arith.divf %630, %631 : vector<4x1xf32>
    %633 = arith.negf %632 : vector<4x1xf32>
    %634 = math.exp %633 : vector<4x1xf32>
    %cst_486 = arith.constant 1.000000e+00 : f32
    %635 = vector.broadcast %cst_486 : f32 to vector<4x1xf32>
    %636 = arith.addf %635, %634 : vector<4x1xf32>
    %637 = arith.divf %635, %636 : vector<4x1xf32>
    %cst_487 = arith.constant 2.000000e+00 : f32
    %638 = vector.broadcast %cst_487 : f32 to vector<4x1xf32>
    %639 = arith.mulf %638, %637 : vector<4x1xf32>
    %640 = vector.broadcast %639 : vector<4x1xf32> to vector<4x256xf32>
    %641 = arith.mulf %640, %548 : vector<4x256xf32>
    %cst_488 = arith.constant dense<0.000000e+00> : vector<4xf32>
    %642 = vector.multi_reduction <add>, %602, %cst_488 [1] : vector<4x256xf32> to vector<4xf32>
    %643 = vector.shape_cast %642 : vector<4xf32> to vector<4x1xf32>
    %cst_489 = arith.constant 2.560000e+02 : f32
    %644 = vector.broadcast %cst_489 : f32 to vector<4x1xf32>
    %645 = arith.divf %643, %644 : vector<4x1xf32>
    %646 = arith.negf %645 : vector<4x1xf32>
    %647 = math.exp %646 : vector<4x1xf32>
    %cst_490 = arith.constant 1.000000e+00 : f32
    %648 = vector.broadcast %cst_490 : f32 to vector<4x1xf32>
    %649 = arith.addf %648, %647 : vector<4x1xf32>
    %650 = arith.divf %648, %649 : vector<4x1xf32>
    %cst_491 = arith.constant 2.000000e+00 : f32
    %651 = vector.broadcast %cst_491 : f32 to vector<4x1xf32>
    %652 = arith.mulf %651, %650 : vector<4x1xf32>
    %653 = vector.broadcast %652 : vector<4x1xf32> to vector<4x256xf32>
    %654 = arith.mulf %653, %602 : vector<4x256xf32>
    %cst_492 = arith.constant dense<0.000000e+00> : vector<256xf32>
    %655 = vector.multi_reduction <add>, %615, %cst_492 [0] : vector<4x256xf32> to vector<256xf32>
    %656 = vector.shape_cast %655 : vector<256xf32> to vector<1x256xf32>
    %cst_493 = arith.constant dense<0.000000e+00> : vector<256xf32>
    %657 = vector.multi_reduction <add>, %628, %cst_493 [0] : vector<4x256xf32> to vector<256xf32>
    %658 = vector.shape_cast %657 : vector<256xf32> to vector<1x256xf32>
    %659 = arith.addf %656, %658 : vector<1x256xf32>
    %cst_494 = arith.constant dense<0.000000e+00> : vector<256xf32>
    %660 = vector.multi_reduction <add>, %641, %cst_494 [0] : vector<4x256xf32> to vector<256xf32>
    %661 = vector.shape_cast %660 : vector<256xf32> to vector<1x256xf32>
    %662 = arith.addf %659, %661 : vector<1x256xf32>
    %cst_495 = arith.constant dense<0.000000e+00> : vector<256xf32>
    %663 = vector.multi_reduction <add>, %654, %cst_495 [0] : vector<4x256xf32> to vector<256xf32>
    %664 = vector.shape_cast %663 : vector<256xf32> to vector<1x256xf32>
    %665 = arith.addf %662, %664 : vector<1x256xf32>
    %c0_496 = arith.constant 0 : index
    %c0_497 = arith.constant 0 : index
    %666 = vector.load %arg25[%c0_496, %c0_497] : memref<256x32xf32, #tpu.memory_space<vmem>>, vector<256x32xf32>
    %cst_498 = arith.constant dense<0.000000e+00> : vector<1x32xf32>
    %667 = tpu.matmul %665, %666, %cst_498 {dimension_numbers = #tpu.dot_dimension_numbers<[1], [0], [0], [1], [0, 0, 1, 1], [], []>} : vector<1x256xf32>, vector<256x32xf32>, vector<1x32xf32> -> vector<1x32xf32>
    %668 = arith.negf %667 : vector<1x32xf32>
    %669 = math.exp %668 : vector<1x32xf32>
    %cst_499 = arith.constant 1.000000e+00 : f32
    %670 = vector.broadcast %cst_499 : f32 to vector<1x32xf32>
    %671 = arith.addf %670, %669 : vector<1x32xf32>
    %672 = arith.divf %670, %671 : vector<1x32xf32>
    %cst_500 = arith.constant 2.000000e+00 : f32
    %673 = vector.broadcast %cst_500 : f32 to vector<1x32xf32>
    %674 = arith.mulf %673, %672 : vector<1x32xf32>
    %c0_501 = arith.constant 0 : index
    %c0_502 = arith.constant 0 : index
    %675 = vector.load %arg26[%c0_501, %c0_502] : memref<32x256xf32, #tpu.memory_space<vmem>>, vector<32x256xf32>
    %cst_503 = arith.constant dense<0.000000e+00> : vector<1x256xf32>
    %676 = tpu.matmul %674, %675, %cst_503 {dimension_numbers = #tpu.dot_dimension_numbers<[1], [0], [0], [1], [0, 0, 1, 1], [], []>} : vector<1x32xf32>, vector<32x256xf32>, vector<1x256xf32> -> vector<1x256xf32>
    %cst_504 = arith.constant 1.000000e+00 : f32
    %677 = vector.broadcast %cst_504 : f32 to vector<1x256xf32>
    %678 = arith.addf %677, %676 : vector<1x256xf32>
    %c0_505 = arith.constant 0 : index
    %c0_506 = arith.constant 0 : index
    %679 = vector.load %arg24[%c0_505, %c0_506] : memref<8x1xf32, #tpu.memory_space<vmem>>, vector<8x1xf32>
    %680 = vector.broadcast %679 : vector<8x1xf32> to vector<8x256xf32>
    %681 = arith.addf %680, %5 : vector<8x256xf32>
    %c0_507 = arith.constant 0 : index
    %c0_508 = arith.constant 0 : index
    %682 = vector.load %arg23[%c0_507, %c0_508] : memref<8x16xf32, #tpu.memory_space<vmem>>, vector<8x4xf32>
    %683 = vector.broadcast %678 : vector<1x256xf32> to vector<4x256xf32>
    %684 = arith.mulf %615, %683 : vector<4x256xf32>
    %cst_509 = arith.constant dense<0.000000e+00> : vector<8x256xf32>
    %685 = tpu.matmul %682, %684, %cst_509 {dimension_numbers = #tpu.dot_dimension_numbers<[1], [0], [0], [1], [0, 0, 1, 1], [], []>} : vector<8x4xf32>, vector<4x256xf32>, vector<8x256xf32> -> vector<8x256xf32>
    %686 = arith.addf %681, %685 : vector<8x256xf32>
    %c0_510 = arith.constant 0 : index
    %c4_511 = arith.constant 4 : index
    %687 = vector.load %arg23[%c0_510, %c4_511] : memref<8x16xf32, #tpu.memory_space<vmem>>, vector<8x4xf32>
    %688 = vector.broadcast %678 : vector<1x256xf32> to vector<4x256xf32>
    %689 = arith.mulf %628, %688 : vector<4x256xf32>
    %cst_512 = arith.constant dense<0.000000e+00> : vector<8x256xf32>
    %690 = tpu.matmul %687, %689, %cst_512 {dimension_numbers = #tpu.dot_dimension_numbers<[1], [0], [0], [1], [0, 0, 1, 1], [], []>} : vector<8x4xf32>, vector<4x256xf32>, vector<8x256xf32> -> vector<8x256xf32>
    %691 = arith.addf %686, %690 : vector<8x256xf32>
    %c0_513 = arith.constant 0 : index
    %c8_514 = arith.constant 8 : index
    %692 = vector.load %arg23[%c0_513, %c8_514] : memref<8x16xf32, #tpu.memory_space<vmem>>, vector<8x4xf32>
    %693 = vector.broadcast %678 : vector<1x256xf32> to vector<4x256xf32>
    %694 = arith.mulf %641, %693 : vector<4x256xf32>
    %cst_515 = arith.constant dense<0.000000e+00> : vector<8x256xf32>
    %695 = tpu.matmul %692, %694, %cst_515 {dimension_numbers = #tpu.dot_dimension_numbers<[1], [0], [0], [1], [0, 0, 1, 1], [], []>} : vector<8x4xf32>, vector<4x256xf32>, vector<8x256xf32> -> vector<8x256xf32>
    %696 = arith.addf %691, %695 : vector<8x256xf32>
    %c0_516 = arith.constant 0 : index
    %c12_517 = arith.constant 12 : index
    %697 = vector.load %arg23[%c0_516, %c12_517] : memref<8x16xf32, #tpu.memory_space<vmem>>, vector<8x4xf32>
    %698 = vector.broadcast %678 : vector<1x256xf32> to vector<4x256xf32>
    %699 = arith.mulf %654, %698 : vector<4x256xf32>
    %cst_518 = arith.constant dense<0.000000e+00> : vector<8x256xf32>
    %700 = tpu.matmul %697, %699, %cst_518 {dimension_numbers = #tpu.dot_dimension_numbers<[1], [0], [0], [1], [0, 0, 1, 1], [], []>} : vector<8x4xf32>, vector<4x256xf32>, vector<8x256xf32> -> vector<8x256xf32>
    %701 = arith.addf %696, %700 : vector<8x256xf32>
    %c0_519 = arith.constant 0 : index
    %c0_520 = arith.constant 0 : index
    %c0_521 = arith.constant 0 : index
    %702 = vector.load %arg27[%c0_519, %c0_520, %c0_521] : memref<1x8x256xf32, #tpu.memory_space<vmem>>, vector<1x8x256xf32>
    %703 = vector.shape_cast %702 : vector<1x8x256xf32> to vector<8x256xf32>
    %704 = vector.shape_cast %701 : vector<8x256xf32> to vector<1x8x256xf32>
    tpu.vector_store %arg27[%c0_519, %c0_520, %c0_521], %704 {strides = array<i32>} : memref<1x8x256xf32, #tpu.memory_space<vmem>>, vector<1x8x256xf32>,
    return
  }
  func.func @transform_0(%arg0: i32) -> (i32, i32, i32) {
    %c0_i32 = arith.constant 0 : i32
    %c0_i32_0 = arith.constant 0 : i32
    %c0_i32_1 = arith.constant 0 : i32
    return %arg0, %c0_i32, %c0_i32_0 : i32, i32, i32
  }
  func.func @transform_1(%arg0: i32) -> (i32, i32) {
    %c0_i32 = arith.constant 0 : i32
    %c0_i32_0 = arith.constant 0 : i32
    %c0_i32_1 = arith.constant 0 : i32
    return %c0_i32, %c0_i32_0 : i32, i32
  }
  func.func @transform_2(%arg0: i32) -> (i32, i32) {
    %c0_i32 = arith.constant 0 : i32
    %c0_i32_0 = arith.constant 0 : i32
    %c0_i32_1 = arith.constant 0 : i32
    return %c0_i32, %c0_i32_0 : i32, i32
  }
  func.func @transform_3(%arg0: i32) -> (i32, i32) {
    %c0_i32 = arith.constant 0 : i32
    %c0_i32_0 = arith.constant 0 : i32
    %c0_i32_1 = arith.constant 0 : i32
    return %c0_i32, %c0_i32_0 : i32, i32
  }
  func.func @transform_4(%arg0: i32) -> (i32, i32) {
    %c0_i32 = arith.constant 0 : i32
    %c0_i32_0 = arith.constant 0 : i32
    %c0_i32_1 = arith.constant 0 : i32
    return %c0_i32, %c0_i32_0 : i32, i32
  }
  func.func @transform_5(%arg0: i32) -> (i32, i32) {
    %c0_i32 = arith.constant 0 : i32
    %c0_i32_0 = arith.constant 0 : i32
    %c0_i32_1 = arith.constant 0 : i32
    return %c0_i32, %c0_i32_0 : i32, i32
  }
  func.func @transform_6(%arg0: i32) -> (i32, i32) {
    %c0_i32 = arith.constant 0 : i32
    %c0_i32_0 = arith.constant 0 : i32
    %c0_i32_1 = arith.constant 0 : i32
    return %c0_i32, %c0_i32_0 : i32, i32
  }
  func.func @transform_7(%arg0: i32) -> (i32, i32) {
    %c0_i32 = arith.constant 0 : i32
    %c0_i32_0 = arith.constant 0 : i32
    %c0_i32_1 = arith.constant 0 : i32
    return %c0_i32, %c0_i32_0 : i32, i32
  }
  func.func @transform_8(%arg0: i32) -> (i32, i32) {
    %c0_i32 = arith.constant 0 : i32
    %c0_i32_0 = arith.constant 0 : i32
    %c0_i32_1 = arith.constant 0 : i32
    return %c0_i32, %c0_i32_0 : i32, i32
  }
  func.func @transform_9(%arg0: i32) -> (i32, i32) {
    %c0_i32 = arith.constant 0 : i32
    %c0_i32_0 = arith.constant 0 : i32
    %c0_i32_1 = arith.constant 0 : i32
    return %c0_i32, %c0_i32_0 : i32, i32
  }
  func.func @transform_10(%arg0: i32) -> (i32, i32) {
    %c0_i32 = arith.constant 0 : i32
    %c0_i32_0 = arith.constant 0 : i32
    %c0_i32_1 = arith.constant 0 : i32
    return %c0_i32, %c0_i32_0 : i32, i32
  }
  func.func @transform_11(%arg0: i32) -> (i32, i32) {
    %c0_i32 = arith.constant 0 : i32
    %c0_i32_0 = arith.constant 0 : i32
    %c0_i32_1 = arith.constant 0 : i32
    return %c0_i32, %c0_i32_0 : i32, i32
  }
  func.func @transform_12(%arg0: i32) -> (i32, i32) {
    %c0_i32 = arith.constant 0 : i32
    %c0_i32_0 = arith.constant 0 : i32
    %c0_i32_1 = arith.constant 0 : i32
    return %c0_i32, %c0_i32_0 : i32, i32
  }
  func.func @transform_13(%arg0: i32) -> (i32, i32) {
    %c0_i32 = arith.constant 0 : i32
    %c0_i32_0 = arith.constant 0 : i32
    %c0_i32_1 = arith.constant 0 : i32
    return %c0_i32, %c0_i32_0 : i32, i32
  }
  func.func @transform_14(%arg0: i32) -> (i32, i32) {
    %c0_i32 = arith.constant 0 : i32
    %c0_i32_0 = arith.constant 0 : i32
    %c0_i32_1 = arith.constant 0 : i32
    return %c0_i32, %c0_i32_0 : i32, i32
  }
  func.func @transform_15(%arg0: i32) -> (i32, i32) {
    %c0_i32 = arith.constant 0 : i32
    %c0_i32_0 = arith.constant 0 : i32
    %c0_i32_1 = arith.constant 0 : i32
    return %c0_i32, %c0_i32_0 : i32, i32
  }
  func.func @transform_16(%arg0: i32) -> (i32, i32) {
    %c0_i32 = arith.constant 0 : i32
    %c0_i32_0 = arith.constant 0 : i32
    %c0_i32_1 = arith.constant 0 : i32
    return %c0_i32, %c0_i32_0 : i32, i32
  }
  func.func @transform_17(%arg0: i32) -> (i32, i32) {
    %c0_i32 = arith.constant 0 : i32
    %c0_i32_0 = arith.constant 0 : i32
    %c0_i32_1 = arith.constant 0 : i32
    return %c0_i32, %c0_i32_0 : i32, i32
  }
  func.func @transform_18(%arg0: i32) -> (i32, i32) {
    %c0_i32 = arith.constant 0 : i32
    %c0_i32_0 = arith.constant 0 : i32
    %c0_i32_1 = arith.constant 0 : i32
    return %c0_i32, %c0_i32_0 : i32, i32
  }
  func.func @transform_19(%arg0: i32) -> (i32, i32) {
    %c0_i32 = arith.constant 0 : i32
    %c0_i32_0 = arith.constant 0 : i32
    %c0_i32_1 = arith.constant 0 : i32
    return %c0_i32, %c0_i32_0 : i32, i32
  }
  func.func @transform_20(%arg0: i32) -> (i32, i32) {
    %c0_i32 = arith.constant 0 : i32
    %c0_i32_0 = arith.constant 0 : i32
    %c0_i32_1 = arith.constant 0 : i32
    return %c0_i32, %c0_i32_0 : i32, i32
  }
  func.func @transform_21(%arg0: i32) -> (i32, i32) {
    %c0_i32 = arith.constant 0 : i32
    %c0_i32_0 = arith.constant 0 : i32
    %c0_i32_1 = arith.constant 0 : i32
    return %c0_i32, %c0_i32_0 : i32, i32
  }
  func.func @transform_22(%arg0: i32) -> (i32, i32) {
    %c0_i32 = arith.constant 0 : i32
    %c0_i32_0 = arith.constant 0 : i32
    %c0_i32_1 = arith.constant 0 : i32
    return %c0_i32, %c0_i32_0 : i32, i32
  }
  func.func @transform_23(%arg0: i32) -> (i32, i32) {
    %c0_i32 = arith.constant 0 : i32
    %c0_i32_0 = arith.constant 0 : i32
    %c0_i32_1 = arith.constant 0 : i32
    return %c0_i32, %c0_i32_0 : i32, i32
  }
  func.func @transform_24(%arg0: i32) -> (i32, i32) {
    %c0_i32 = arith.constant 0 : i32
    %c0_i32_0 = arith.constant 0 : i32
    %c0_i32_1 = arith.constant 0 : i32
    return %c0_i32, %c0_i32_0 : i32, i32
  }
  func.func @transform_25(%arg0: i32) -> (i32, i32) {
    %c0_i32 = arith.constant 0 : i32
    %c0_i32_0 = arith.constant 0 : i32
    %c0_i32_1 = arith.constant 0 : i32
    return %c0_i32, %c0_i32_0 : i32, i32
  }
  func.func @transform_26(%arg0: i32) -> (i32, i32, i32) {
    %c0_i32 = arith.constant 0 : i32
    %c0_i32_0 = arith.constant 0 : i32
    %c0_i32_1 = arith.constant 0 : i32
    return %arg0, %c0_i32, %c0_i32_0 : i32, i32, i32
  }
}

</mosaic_0001>

<bundles_post_ra>
// kernel: db_pallas.1
= control target key start
LH: loop header
LB: loop body
LE: loop exit
PB: predicated region body
PF: predicated region fallthrough
CT: control target
= control target key end

     0   :  { %s9419_s0 = inlined_call_operand.vmem [shape: f32[2,8,256], index: 0, kind: input, shape index: {}]   ;;  %s9420_s1 = inlined_call_operand.vmem [shape: f32[27,256], index: 1, kind: input, shape index: {}]   ;;  %s9421_s2 = inlined_call_operand.vmem [shape: f32[4,72], index: 2, kind: input, shape index: {}]   ;;  %s9422_s3 = inlined_call_operand.vmem [shape: f32[4,1], index: 3, kind: input, shape index: {}]   ;;  %s9423_s4 = inlined_call_operand.vmem [shape: f32[72,36], index: 4, kind: input, shape index: {}]   ;;  %s9424_s5 = inlined_call_operand.vmem [shape: f32[72,1], index: 5, kind: input, shape index: {}]   ;;  %s9425_s6 = inlined_call_operand.vmem [shape: f32[8,72], index: 6, kind: input, shape index: {}]   ;;  %s9426_s7 = inlined_call_operand.vmem [shape: f32[8,1], index: 7, kind: input, shape index: {}]   ;;  %s9427_s8 = inlined_call_operand.vmem [shape: f32[8,9], index: 8, kind: input, shape index: {}]   ;;  %s9428_s9 = inlined_call_operand.vmem [shape: f32[8,1], index: 9, kind: input, shape index: {}]   ;;  %s9429_s10 = inlined_call_operand.vmem [shape: f32[8,8], index: 10, kind: input, shape index: {}]   ;;  %s9430_s11 = inlined_call_operand.<no memory space> [shape: f32[1,1], index: 11, kind: input, shape index: {}]   ;;  %s9431_s12 = inlined_call_operand.vmem [shape: f32[36,8], index: 12, kind: input, shape index: {}]   ;;  %s9432_s13 = inlined_call_operand.vmem [shape: f32[36,1], index: 13, kind: input, shape index: {}]   ;;  %s9433_s14 = inlined_call_operand.vmem [shape: f32[4,8], index: 14, kind: input, shape index: {}]   ;;  %s9434_s15 = inlined_call_operand.vmem [shape: f32[4,1], index: 15, kind: input, shape index: {}]   ;;  %s9435_s16 = inlined_call_operand.vmem [shape: f32[4,36], index: 16, kind: input, shape index: {}]   ;;  %s9436_s17 = inlined_call_operand.vmem [shape: f32[4,1], index: 17, kind: input, shape index: {}]   ;;  %s9437_s18 = inlined_call_operand.vmem [shape: f32[4,36], index: 18, kind: input, shape index: {}]   ;;  %s9438_s19 = inlined_call_operand.vmem [shape: f32[4,1], index: 19, kind: input, shape index: {}]   ;;  %s9439_s20 = inlined_call_operand.vmem [shape: f32[4,36], index: 20, kind: input, shape index: {}]   ;;  %s9440_s21 = inlined_call_operand.vmem [shape: f32[4,1], index: 21, kind: input, shape index: {}]   ;;  %s9441_s22 = inlined_call_operand.vmem [shape: f32[8,16], index: 22, kind: input, shape index: {}]   ;;  %s9442_s23 = inlined_call_operand.vmem [shape: f32[8,1], index: 23, kind: input, shape index: {}]   ;;  %s9443_s24 = inlined_call_operand.vmem [shape: f32[256,32], index: 24, kind: input, shape index: {}]   ;;  %s9444_s25 = inlined_call_operand.vmem [shape: f32[32,256], index: 25, kind: input, shape index: {}]   ;;  %s9445_s26 = inlined_call_operand.vmem [shape: f32[2,8,256], index: 26, kind: output, shape index: {}]  }
   0x1   :  { %9607 = sst [smem:[#allocation98_spill]] %s9419_s0  ;;  %v31_v0 = vstv %s9430_s11 }
   0x2   :  { %9608 = sst [smem:[#allocation99_spill]] %s9420_s1  ;;  %32 = vst [vmem:[#allocation5] sm:$0x1] %v31_v0 }
   0x3   :  { %9609 = sst [smem:[#allocation100_spill]] %s9421_s2 }
   0x4   :  { %9610 = sst [smem:[#allocation101_spill]] %s9422_s3 }
   0x5   :  { %9611 = sst [smem:[#allocation102_spill]] %s9423_s4 }
   0x6   :  { %9612 = sst [smem:[#allocation103_spill]] %s9424_s5 }
   0x7   :  { %9613 = sst [smem:[#allocation104_spill]] %s9425_s6 }
   0x8   :  { %9614 = sst [smem:[#allocation105_spill]] %s9426_s7  ;;  %s6633_s7 = smov 0  }
   0x9   :  { %9615 = sst [smem:[#allocation106_spill]] %s9427_s8 }
   0xa   :  { %9616 = sst [smem:[#allocation107_spill]] %s9428_s9 }
   0xb   :  { %9617 = sst [smem:[#allocation108_spill]] %s9429_s10 }
   0xc   :  { %9618 = sst [smem:[#allocation109_spill]] %s9432_s13 }
   0xd   :  { %9619 = sst [smem:[#allocation110_spill]] %s9433_s14 }
   0xe   :  { %9620 = sst [smem:[#allocation111_spill]] %s9434_s15 }
   0xf   :  { %9621 = sst [smem:[#allocation112_spill]] %s9435_s16 }
  0x10   :  { %9622 = sst [smem:[#allocation113_spill]] %s9436_s17 }
  0x11   :  { %9623 = sst [smem:[#allocation114_spill]] %s9437_s18 }
  0x12   :  { %9624 = sst [smem:[#allocation115_spill]] %s9438_s19 }
  0x13   :  { %9625 = sst [smem:[#allocation116_spill]] %s9439_s20 }
  0x14   :  { %9626 = sst [smem:[#allocation117_spill]] %s9440_s21 }
  0x15   :  { %9627 = sst [smem:[#allocation118_spill]] %s9441_s22 }
  0x16   :  { %9628 = sst [smem:[#allocation119_spill]] %s9442_s23 }
  0x17   :  { %9629 = sst [smem:[#allocation120_spill]] %s9443_s24 }
  0x18   :  { %9630 = sst [smem:[#allocation121_spill]] %s9444_s25 }
  0x19   :  { %9631 = sst [smem:[#allocation122_spill]] %s9445_s26 }
  0x1a LB: > { %9632 = sst [smem:[#allocation6_spill]] %s6443_s7  ;;  %s6085_s28 = sadd.s32 4294967295, %s6443_s7   ;;  %s6443_s7 = sphi %s6633_s7, %s38_s7  }
  0x1b   : > { %p6089_p0 = scmp.ge.s32.totalorder %s6443_s7, 1  ;;  %p714_p1 = scmp.lt.s32.totalorder %s6443_s7, 3 }
  0x1d   : > { %p715_p2 = pnand %p6089_p0, %p714_p1 }
  0x1f   : > { %718 = sbr.rel (%p715_p2) target bundleno = 3738 (0xe9a), region = 124 }
  0x24   : > { %v805_v1 = vlaneseq  ;;  %v6445_v3 = vmov 0.0   ;;  %s9633_s4 = sld [smem:[#allocation99_spill]]  ;;  %p784_p3 = scmp.lt.s32.totalorder %s6085_s28, 1  ;;  %vm834_vm0 = vcmask 138240   ;;  %vm9588_vm1 = vcmask 130048  }
  0x25   : > { %795 = vst [vmem:[#allocation2] sm:$0xff] %v6445_v3  ;;  %794 = vst [vmem:[#allocation2 + $0x8] sm:$0xff] %v6445_v3  ;;  %1224 = vmatprep.mubr.f32.mxu0 %v6445_v3  ;;  %1739 = vmatprep.mubr.f32.mxu1 %v6445_v3  ;;  %s9460_s9 = smov 17   ;;  %s9465_s30 = smov 16   ;;  %vm9606_vm2 = vcmask 121856   ;;  %vm9587_vm3 = vcmask 7168  }
  0x26   : > { %v806_v2 = vshrl.u32 %v805_v1, 7  ;;  %s9969_s28 = smov (!%p784_p3, %s6085_s28), 1  ;;  %s9636_s27 = sld [smem:[#allocation98_spill]]  ;;  %vm943_vm4 = vcmask 1039360   ;;  %vm9584_vm5 = vcmask 924672   ;;  %vm859_vm6 = vcmask 916480  }
  0x27   : > { %9635 = sst [smem:[#allocation8_spill]] %s9969_s28  ;;  %s9449_s10 = sshll.u32 %s9969_s28, 4  ;;  %vm817_vm7 = vcmask 908288   ;;  %vm1156_vm8 = vcmask 588800   ;;  %vm9583_vm11 = vcmask 1043456   ;;  %vm9578_vm12 = vcmask 293888  }
  0x28   : > { %v6651_v6 = vsub.s32 0, %v806_v2  ;;  %v6653_v7 = vsub.s32 1, %v806_v2  ;;  %s9458_s29 = smov 15   ;;  %s9462_s5 = smov 1   ;;  %vm6463_vm15 = vmmov 0  }
  0x29   : > { %s9452_s8 = smov 113   ;;  %s9454_s6 = smov 112  }
  0x2a   : > { %v6100_v4 = vld [vmem:[%s9633_s4 + $0x10] ss:$8 sm:$0x3]  ;;  %v6099_v5 = vld [vmem:[%s9633_s4 + $0x7] ss:$8 sm:$0x3] }
  0x2b   : > { %9634 = vst [vmem:[#allocation7_spill] sm:$0xff] %v6651_v6  ;;  %v1100_v8 = vrot.slane %v6100_v4, %v6651_v6  ;;  %v1060_v9 = vrot.slane %v6099_v5, %v6651_v6  ;;  %v1104_v10 = vrot.slane %v6100_v4, %v6653_v7  ;;  %v1064_v11 = vrot.slane %v6099_v5, %v6653_v7  ;;  %v6098_v12 = vld [vmem:[%s9633_s4 + $0x6] ss:$8 sm:$0x3]  ;;  %s9450_s1 = smov 111   ;;  %s9639_s0 = sld [smem:[#allocation101_spill]] }
  0x2c   : > { %s788_s3 = scalar_lea.vmem %s9636_s27, %s9449_s10  ;;  %v1024_v13 = vrot.slane %v6098_v12, %v6653_v7  ;;  %v1020_v14 = vrot.slane %v6098_v12, %v6651_v6  ;;  %v6097_v17 = vld [vmem:[%s9633_s4 + $0x5] ss:$8 sm:$0x3]  ;;  %v6096_v20 = vld [vmem:[%s9633_s4 + $0x3] ss:$8 sm:$0x3] }
  0x2d   : > { %1105 = vrot.lane.b32.xlu0 %v1100_v8, %s9460_s9  ;;  %1065 = vrot.lane.b32.xlu1 %v1060_v9, %s9465_s30  ;;  %v6676_v15 = vld [vmem:[%s788_s3] sm:$0xff]  ;;  %v6678_v16 = vld [vmem:[%s788_s3 + $0x8] sm:$0xff]  ;;  %v984_v18 = vrot.slane %v6097_v17, %v6653_v7  ;;  %v980_v19 = vrot.slane %v6097_v17, %v6651_v6  ;;  %v938_v21 = vrot.slane %v6096_v20, %v6653_v7  ;;  %s9456_s27 = smov 127   ;;  %s9640_s11 = smov 127  }
  0x2e   : > { %9637 = vst [vmem:[#allocation9_spill] sm:$0xff] %v6676_v15  ;;  %9638 = vst [vmem:[#allocation10_spill] sm:$0xff] %v6678_v16  ;;  %v934_v22 = vrot.slane %v6096_v20, %v6651_v6  ;;  %v6095_v23 = vld [vmem:[%s9633_s4 + $0x2] ss:$8 sm:$0x3]  ;;  %s9641_s10 = smov 112  }
  0x2f   : > { %798 = vst [vmem:[#allocation2 + $0x10] sm:$0xff] %v6676_v15  ;;  %799 = vst [vmem:[#allocation2 + $0x18] sm:$0xff] %v6678_v16  ;;  %v896_v24 = vrot.slane %v6095_v23, %v6653_v7  ;;  %v892_v25 = vrot.slane %v6095_v23, %v6651_v6  ;;  %v6094_v26 = vld [vmem:[%s9633_s4 + $0x1] ss:$8 sm:$0x3]  ;;  %s9644_s2 = sld [smem:[#allocation100_spill]] }
  0x30   : > { %v850_v27 = vrot.slane %v6094_v26, %v6651_v6  ;;  %v854_v28 = vrot.slane %v6094_v26, %v6653_v7  ;;  %v803_v29 = vld [vmem:[%s9633_s4] ss:$8 sm:$0x3]  ;;  %s9645_s3 = sld [smem:[#allocation103_spill]]  ;;  %s9469_s7 = smov 110  }
  0x31   : > { %1107 = vrot.lane.b32.xlu0 %v1104_v10, %s9460_s9  ;;  %1067 = vrot.lane.b32.xlu1 %v1064_v11, %s9465_s30  ;;  %v812_v30 = vrot.slane %v803_v29, %v6653_v7  ;;  %v808_v31 = vrot.slane %v803_v29, %v6651_v6  ;;  %s9653_s26 = sld [smem:[#allocation104_spill]]  ;;  %s9659_s28 = smov 126  }
  0x32   : > { %s9654_s14 = sld [smem:[#allocation110_spill]]  ;;  %s9661_s25 = smov 96  }
  0x33   : > { %s9657_s13 = sld [smem:[#allocation109_spill]]  ;;  %s9673_s24 = smov 75  }
  0x34   : > { %s9658_s15 = sld [smem:[#allocation111_spill]]  ;;  %s9674_s20 = smov 85  }
  0x35   : > { %1027 = vrot.lane.b32.xlu1 %v1024_v13, %s9458_s29  ;;  %1025 = vrot.lane.b32.xlu0 %v1020_v14, %s9458_s29  ;;  %s9675_s18 = smov 77   ;;  %s9676_s23 = smov 43  }
  0x36   : > { %s9709_s22 = smov 83   ;;  %s9921_s17 = sld [smem:[#allocation118_spill]] }
  0x37   : > { %s6492_s21 = smov 124  }
  0x39   : > { %987 = vrot.lane.b32.xlu1 %v984_v18, %s9462_s5  ;;  %985 = vrot.lane.b32.xlu0 %v980_v19, %s9462_s5  ;;  %v6454_v18 = vmov 0  }
  0x3a   : > { %6329 = vset.pattern.permute.xlu0 %v6454_v18  ;;  %6330 = vset.pattern.permute.xlu1 %v6454_v18 }
  0x3d   : > { %941 = vrot.lane.b32.xlu1 %v938_v21, %s9456_s27  ;;  %939 = vrot.lane.b32.xlu0 %v934_v22, %s9456_s27  ;;  %v1150_v21 = vld [vmem:[%s9639_s0] sm:$0xf]  ;;  %v6107_v22 = vld [vmem:[%s9633_s4 + $0x7] ss:$8 sm:$0x3]  ;;  %s9646_s0 = sld [smem:[#allocation105_spill]] }
  0x41   : > { %899 = vrot.lane.b32.xlu1 %v896_v24, %s9452_s8  ;;  %897 = vrot.lane.b32.xlu0 %v892_v25, %s9452_s8  ;;  %v6108_v24 = vld [vmem:[%s9633_s4 + $0x10] ss:$8 sm:$0x3]  ;;  %v1494_v25 = vrot.slane %v6107_v22, %v6651_v6 }
  0x42   : > { %v1536_v26 = vrot.slane %v6108_v24, %v6651_v6 }
  0x45   : > { %855 = vrot.lane.b32.xlu0 %v850_v27, %s9454_s6  ;;  %857 = vrot.lane.b32.xlu1 %v854_v28, %s9454_s6  ;;  %v6105_v27 = vld [vmem:[%s9633_s4 + $0x5] ss:$8 sm:$0x3]  ;;  %v1498_v28 = vrot.slane %v6107_v22, %v6653_v7 }
  0x46   : > { %v1413_v29 = vrot.slane %v6105_v27, %v6651_v6 }
  0x49   : > { %815 = vrot.lane.b32.xlu1 %v812_v30, %s9450_s1  ;;  %813 = vrot.lane.b32.xlu0 %v808_v31, %s9450_s1  ;;  %v6106_v30 = vld [vmem:[%s9633_s4 + $0x6] ss:$8 sm:$0x3]  ;;  %v1540_v31 = vrot.slane %v6108_v24, %v6653_v7 }
  0x9f   : > { %v1106_v32 = vpop.permute.xlu0 %1105  ;;  %v1066_v33 = vpop.permute.xlu1 %1065 }
  0xa0   : > { %v1113_v34 = vmul.f32 %v1106_v32, %v6676_v15  ;;  %v1073_v41 = vmul.f32 %v1066_v33, %v6676_v15 }
  0xa2   : > { %1119 = vrot.lane.b32.xlu0 %v1113_v34, %s9450_s1  ;;  %v1417_v34 = vrot.slane %v6105_v27, %v6653_v7 }
  0xa3   : > { %v1108_v35 = vpop.permute.xlu0 %1107  ;;  %v1068_v36 = vpop.permute.xlu1 %1067 }
  0xa4   : > { %v1115_v37 = vmul.f32 0.0, %v1108_v35  ;;  %v1075_v38 = vmul.f32 0.0, %v1068_v36  ;;  %v1109_v59 = vsel %vm834_vm0, %v1106_v32, %v1108_v35  ;;  %v1069_v62 = vsel %vm9588_vm1, %v1066_v33, %v1068_v36  ;;  %v6104_v33 = vld [vmem:[%s9633_s4 + $0x3] ss:$8 sm:$0x3] }
  0xa5   : > { %v1114_v61 = vmul.f32 %v1109_v59, %v6678_v16  ;;  %v1074_v1 = vmul.f32 %v1069_v62, %v6678_v16  ;;  %v1455_v32 = vrot.slane %v6106_v30, %v6651_v6  ;;  %v1367_v35 = vrot.slane %v6104_v33, %v6651_v6  ;;  %v6102_v36 = vld [vmem:[%s9633_s4 + $0x1] ss:$8 sm:$0x3] }
  0xa6   : > { %1123 = vrot.lane.b32.xlu1 %v1115_v37, %s9450_s1  ;;  %1083 = vrot.lane.b32.xlu0 %v1075_v38, %s9454_s6  ;;  %v1459_v37 = vrot.slane %v6106_v30, %v6653_v7  ;;  %v1286_v38 = vrot.slane %v6102_v36, %v6651_v6 }
  0xa7   : > { %v1028_v39 = vpop.permute.xlu1 %1027  ;;  %v1026_v40 = vpop.permute.xlu0 %1025 }
  0xa8   : > { %v1033_v42 = vmul.f32 %v1026_v40, %v6676_v15  ;;  %v1035_v43 = vmul.f32 0.0, %v1028_v39  ;;  %v1029_v63 = vsel %vm9606_vm2, %v1026_v40, %v1028_v39  ;;  %v6103_v39 = vld [vmem:[%s9633_s4 + $0x2] ss:$8 sm:$0x3]  ;;  %v1371_v40 = vrot.slane %v6104_v33, %v6653_v7 }
  0xa9   : > { %v1034_v0 = vmul.f32 %v1029_v63, %v6678_v16 }
  0xaa   : > { %1079 = vrot.lane.b32.xlu1 %v1073_v41, %s9454_s6  ;;  %1039 = vrot.lane.b32.xlu0 %v1033_v42, %s9452_s8  ;;  %v1328_v41 = vrot.slane %v6103_v39, %v6651_v6  ;;  %v1242_v42 = vld [vmem:[%s9633_s4] ss:$8 sm:$0x3] }
  0xab   : > { %v988_v44 = vpop.permute.xlu1 %987  ;;  %v986_v45 = vpop.permute.xlu0 %985 }
  0xac   : > { %v995_v46 = vmul.f32 0.0, %v988_v44  ;;  %v993_v47 = vmul.f32 %v986_v45, %v6676_v15  ;;  %v989_v2 = vsel %vm9587_vm3, %v986_v45, %v988_v44  ;;  %v1247_v44 = vrot.slane %v1242_v42, %v6651_v6 }
  0xad   : > { %v994_v5 = vmul.f32 %v989_v2, %v6678_v16  ;;  %v1332_v45 = vrot.slane %v6103_v39, %v6653_v7 }
  0xae   : > { %1043 = vrot.lane.b32.xlu1 %v1035_v43, %s9452_s8  ;;  %1003 = vrot.lane.b32.xlu0 %v995_v46, %s9456_s27  ;;  %v1290_v43 = vrot.slane %v6102_v36, %v6653_v7  ;;  %v1251_v46 = vrot.slane %v1242_v42, %v6653_v7 }
  0xaf   : > { %v942_v48 = vpop.permute.xlu1 %941  ;;  %v940_v49 = vpop.permute.xlu0 %939 }
  0xb0   : > { %v948_v50 = vmul.f32 0.0, %v940_v49  ;;  %v950_v51 = vmul.f32 %v942_v48, %v6678_v16  ;;  %v944_v4 = vsel %vm943_vm4, %v940_v49, %v942_v48 }
  0xb1   : > { %v949_v8 = vmul.f32 %v944_v4, %v6676_v15 }
  0xb2   : > { %954 = vrot.lane.b32.xlu0 %v948_v50, %s9462_s5  ;;  %999 = vrot.lane.b32.xlu1 %v993_v47, %s9456_s27 }
  0xb3   : > { %v900_v52 = vpop.permute.xlu1 %899  ;;  %v898_v53 = vpop.permute.xlu0 %897 }
  0xb4   : > { %v908_v54 = vmul.f32 %v900_v52, %v6678_v16  ;;  %v906_v55 = vmul.f32 0.0, %v898_v53  ;;  %v902_v11 = vsel %vm9584_vm5, %v898_v53, %v900_v52 }
  0xb5   : > { %v907_v14 = vmul.f32 %v902_v11, %v6676_v15 }
  0xb6   : > { %916 = vrot.lane.b32.xlu0 %v908_v54, %s9458_s29  ;;  %958 = vrot.lane.b32.xlu1 %v950_v51, %s9462_s5 }
  0xb7   : > { %v856_v56 = vpop.permute.xlu0 %855  ;;  %v858_v57 = vpop.permute.xlu1 %857 }
  0xb8   : > { %v864_v58 = vmul.f32 0.0, %v856_v56  ;;  %v866_v60 = vmul.f32 %v858_v57, %v6678_v16  ;;  %v860_v12 = vsel %vm859_vm6, %v856_v56, %v858_v57 }
  0xb9   : > { %v865_v17 = vmul.f32 %v860_v12, %v6676_v15 }
  0xba   : > { %870 = vrot.lane.b32.xlu0 %v864_v58, %s9465_s30  ;;  %912 = vrot.lane.b32.xlu1 %v906_v55, %s9458_s29 }
  0xbb   : > { %v816_v9 = vpop.permute.xlu1 %815  ;;  %v814_v10 = vpop.permute.xlu0 %813 }
  0xbc   : > { %v818_v13 = vsel %vm817_vm7, %v814_v10, %v816_v9  ;;  %v824_v19 = vmul.f32 %v816_v9, %v6678_v16  ;;  %v822_v23 = vmul.f32 0.0, %v814_v10 }
  0xbd   : > { %v823_v20 = vmul.f32 %v818_v13, %v6676_v15 }
  0xbe   : > { %1121 = vrot.lane.b32.xlu0 %v1114_v61, %s9450_s1  ;;  %874 = vrot.lane.b32.xlu1 %v866_v60, %s9465_s30  ;;  %s9643_s1 = smov 111  }
  0xc2   : > { %1041 = vrot.lane.b32.xlu0 %v1034_v0, %s9452_s8  ;;  %1081 = vrot.lane.b32.xlu1 %v1074_v1, %s9454_s6  ;;  %s9642_s6 = smov 113   ;;  %s9471_s8 = smov 126  }
  0xc6   : > { %1001 = vrot.lane.b32.xlu1 %v994_v5, %s9456_s27  ;;  %956 = vrot.lane.b32.xlu0 %v949_v8, %s9462_s5  ;;  %s9650_s27 = smov 15  }
  0xca   : > { %914 = vrot.lane.b32.xlu1 %v907_v14, %s9458_s29  ;;  %872 = vrot.lane.b32.xlu0 %v865_v17, %s9465_s30 }
  0xce   : > { %832 = vrot.lane.b32.xlu0 %v824_v19, %s9460_s9  ;;  %830 = vrot.lane.b32.xlu1 %v823_v20, %s9460_s9 }
  0xd2   : > { %828 = vrot.lane.b32.xlu1 %v822_v23, %s9460_s9  ;;  %1153 = vperm.xlu0 %6329, %v1150_v21  }
  0xd6   : > { %1499 = vrot.lane.b32.xlu1 %v1494_v25, %s9465_s30  ;;  %1541 = vrot.lane.b32.xlu0 %v1536_v26, %s9460_s9 }
  0xda   : > { %1501 = vrot.lane.b32.xlu1 %v1498_v28, %s9465_s30  ;;  %1418 = vrot.lane.b32.xlu0 %v1413_v29, %s9462_s5  ;;  %v1131_v28 = vld [vmem:[%s9644_s2] sm:$0xf]  ;;  %s9647_s2 = sld [smem:[#allocation102_spill]] }
  0xde   : > { %1543 = vrot.lane.b32.xlu1 %v1540_v31, %s9460_s9  ;;  %1460 = vrot.lane.b32.xlu0 %v1455_v32, %s9458_s29  ;;  %v1530_v32 = vld [vmem:[#allocation2] sm:$0xf] }
  0xe2   : > { %1420 = vrot.lane.b32.xlu1 %v1417_v34, %s9462_s5  ;;  %1372 = vrot.lane.b32.xlu0 %v1367_v35, %s9640_s11  ;;  %v1488_v35 = vld [vmem:[#allocation2] sm:$0xf] }
  0xe6   : > { %1462 = vrot.lane.b32.xlu1 %v1459_v37, %s9458_s29  ;;  %1291 = vrot.lane.b32.xlu0 %v1286_v38, %s9641_s10  ;;  %v1449_v37 = vld [vmem:[#allocation2] sm:$0xf] }
  0xea   : > { %1374 = vrot.lane.b32.xlu1 %v1371_v40, %s9640_s11  ;;  %1333 = vrot.lane.b32.xlu0 %v1328_v41, %s9642_s6 }
  0xee   : > { %1293 = vrot.lane.b32.xlu1 %v1290_v43, %s9641_s10  ;;  %1252 = vrot.lane.b32.xlu0 %v1247_v44, %s9643_s1 }
  0xf2   : > { %1335 = vrot.lane.b32.xlu1 %v1332_v45, %s9642_s6 }
  0xf6   : > { %1254 = vrot.lane.b32.xlu1 %v1251_v46, %s9643_s1  ;;  %v1407_v46 = vld [vmem:[#allocation2] sm:$0xf] }
 0x114   : > { %v1120_v47 = vpop.permute.xlu0 %1119 }
 0x118   : > { %v1124_v48 = vpop.permute.xlu1 %1123  ;;  %v1084_v49 = vpop.permute.xlu0 %1083 }
 0x11c   : > { %v1080_v50 = vpop.permute.xlu1 %1079  ;;  %v1040_v51 = vpop.permute.xlu0 %1039 }
 0x120   : > { %v1044_v52 = vpop.permute.xlu1 %1043  ;;  %v1004_v53 = vpop.permute.xlu0 %1003 }
 0x124   : > { %v955_v54 = vpop.permute.xlu0 %954  ;;  %v1000_v55 = vpop.permute.xlu1 %999 }
 0x128   : > { %v917_v56 = vpop.permute.xlu0 %916  ;;  %v959_v57 = vpop.permute.xlu1 %958 }
 0x12c   : > { %v871_v58 = vpop.permute.xlu0 %870  ;;  %v913_v59 = vpop.permute.xlu1 %912 }
 0x130   : > { %v1122_v60 = vpop.permute.xlu0 %1121  ;;  %v875_v61 = vpop.permute.xlu1 %874 }
 0x131   : > { %v1125_v62 = vsel %vm817_vm7, %v1120_v47, %v1122_v60  ;;  %v1126_v63 = vsel %vm817_vm7, %v1122_v60, %v1124_v48 }
 0x132   : > { %1129 = vst [vmem:[#allocation3 + $0x68] sm:$0xff] %v1125_v62  ;;  %1130 = vst [vmem:[#allocation3 + $0x60] sm:$0xff] %v1126_v63  ;;  %1174 = vmatprep.subr.mxu0 %v1126_v63 }
 0x133   : > { %1175 = vmatpush1.msra.mxu0 %v1125_v62 }
 0x134   : > { %v1042_v0 = vpop.permute.xlu0 %1041  ;;  %v1082_v1 = vpop.permute.xlu1 %1081 }
 0x135   : > { %v6831_v2 = vsel %vm859_vm6, %v1080_v50, %v1082_v1  ;;  %v1086_v4 = vsel %vm859_vm6, %v1082_v1, %v1084_v49  ;;  %v6835_v5 = vsel %vm9584_vm5, %v1042_v0, %v1044_v52  ;;  %v6839_v8 = vsel %vm9584_vm5, %v1040_v51, %v1042_v0  ;;  %v1359_v49 = vld [vmem:[#allocation2 + $0x8] sm:$0xf] }
 0x136   : > { %1090 = vst [vmem:[#allocation3 + $0x18] sm:$0xff] %v1086_v4  ;;  %1176 = vmatprep.subr.mxu0 %v1086_v4 }
 0x137   : > { %1177 = vmatpush1.msra.mxu0 %v6831_v2 }
 0x138   : > { %v1002_v9 = vpop.permute.xlu1 %1001  ;;  %v957_v10 = vpop.permute.xlu0 %956  ;;  %1178 = vmatprep.subr.mxu0 %v6835_v5 }
 0x139   : > { %v6843_v11 = vsel %vm943_vm4, %v1000_v55, %v1002_v9  ;;  %v6846_v12 = vsel %vm943_vm4, %v1002_v9, %v1004_v53  ;;  %1179 = vmatpush1.msra.mxu0 %v6839_v8  ;;  %v6853_v17 = vsel %vm9587_vm3, %v957_v10, %v959_v57  ;;  %v6857_v19 = vsel %vm9587_vm3, %v955_v54, %v957_v10  ;;  %v1320_v54 = vld [vmem:[#allocation2 + $0x8] sm:$0xf] }
 0x13a   : > { %1180 = vmatprep.subr.mxu0 %v6846_v12 }
 0x13b   : > { %1181 = vmatpush1.msra.mxu0 %v6843_v11 }
 0x13c   : > { %v915_v13 = vpop.permute.xlu1 %914  ;;  %v873_v14 = vpop.permute.xlu0 %872  ;;  %1182 = vmatprep.subr.mxu0 %v6678_v16 }
 0x13d   : > { %1183 = vmatpush1.msra.mxu0 %v6676_v15  ;;  %v6861_v20 = vsel %vm9606_vm2, %v915_v13, %v917_v56  ;;  %v6865_v21 = vsel %vm9606_vm2, %v913_v59, %v915_v13  ;;  %v6869_v24 = vsel %vm9588_vm1, %v873_v14, %v875_v61  ;;  %v6873_v25 = vsel %vm9588_vm1, %v871_v58, %v873_v14 }
 0x13e   : > { %1184 = vmatprep.subr.mxu0 %v6853_v17 }
 0x13f   : > { %1185 = vmatpush1.msra.mxu0 %v6857_v19 }
 0x140   : > { %v833_v22 = vpop.permute.xlu0 %832  ;;  %v831_v23 = vpop.permute.xlu1 %830  ;;  %1186 = vmatprep.subr.mxu0 %v6861_v20 }
 0x141   : > { %1187 = vmatpush1.msra.mxu0 %v6865_v21  ;;  %v6877_v26 = vsel %vm834_vm0, %v831_v23, %v833_v22 }
 0x142   : > { %1188 = vmatprep.subr.mxu0 %v6869_v24 }
 0x143   : > { %1189 = vmatpush1.msra.mxu0 %v6873_v25 }
 0x144   : > { %v829_v27 = vpop.permute.xlu1 %828  ;;  %1190 = vmatprep.subr.mxu0 %v6877_v26 }
 0x145   : > { %v6885_v29 = vsel %vm834_vm0, %v829_v27, %v831_v23 }
 0x146   : > { %1191 = vmatpush1.msra.mxu0 %v6885_v29 }
 0x147   : > { %6101 = vmatmul.mubr.msk.f32.vlgmr.msra.gmra.mxu0 %vm1156_vm8, %v1131_v28  ;;  %6266 = vmatprep.subr.mxu0 %v6445_v3 }
 0x148   : > { %v6890_v30 = vpop.permute.xlu1 %1499 }
 0x14c   : > { %v6892_v31 = vpop.permute.xlu1 %1501 }
 0x14d   : > { %v1509_v38 = vmul.f32 %v6892_v31, %v1488_v35  ;;  %v1154_v42 = vpop.permute.xlu0 %1153 }
 0x14f   : > { %v1515_v41 = vrot.slane %v1509_v38, 4 }
 0x150   : > { %v6894_v33 = vpop.permute.xlu1 %1543 }
 0x151   : > { %v1551_v34 = vmul.f32 %v6894_v33, %v1530_v32  ;;  %v6903_v43 = vpop.permute.xlu0 %1541 }
 0x153   : > { %1559 = vrot.lane.b32.xlu1 %v1551_v34, %s9643_s1 }
 0x154   : > { %v6898_v36 = vpop.permute.xlu1 %1420 }
 0x155   : > { %v6905_v44 = vpop.permute.xlu0 %1418  ;;  %v1428_v48 = vmul.f32 %v6898_v36, %v1407_v46 }
 0x157   : > { %v1434_v51 = vrot.slane %v1428_v48, 4 }
 0x158   : > { %v1463_v39 = vpop.permute.xlu1 %1462 }
 0x159   : > { %v1470_v40 = vmul.f32 %v1463_v39, %v1449_v37  ;;  %v1461_v45 = vpop.permute.xlu0 %1460 }
 0x15a   : > { %v1464_v37 = vsel %vm9606_vm2, %v1461_v45, %v1463_v39 }
 0x15b   : > { %1478 = vrot.lane.b32.xlu0 %v1470_v40, %s9642_s6 }
 0x15c   : > { %v6916_v57 = vpop.permute.xlu1 %1374 }
 0x15d   : > { %v6907_v47 = vpop.permute.xlu0 %1372 }
 0x15e   : > { %v1380_v52 = vmul.f32 %v6907_v47, %v1359_v49 }
 0x15f   : > { %1520 = vrot.lane.b32.xlu0 %v1515_v41, %s9641_s10 }
 0x160   : > { %v1386_v56 = vrot.slane %v1380_v52, 4  ;;  %v6918_v63 = vpop.permute.xlu1 %1293 }
 0x161   : > { %v6910_v50 = vpop.permute.xlu0 %1291 }
 0x162   : > { %1389 = vrot.lane.b32.xlu1 %v1386_v56, %s9462_s5 }
 0x163   : > { %1439 = vrot.lane.b32.xlu0 %v1434_v51, %s9640_s11 }
 0x164   : > { %v1336_v9 = vpop.permute.xlu1 %1335 }
 0x165   : > { %v1334_v53 = vpop.permute.xlu0 %1333 }
 0x166   : > { %v1341_v55 = vmul.f32 %v1334_v53, %v1320_v54  ;;  %v1337_v23 = vsel %vm9584_vm5, %v1334_v53, %v1336_v9 }
 0x168   : > { %1347 = vrot.lane.b32.xlu0 %v1341_v55, %s9458_s29  ;;  %v1255_v34 = vpop.permute.xlu1 %1254 }
 0x169   : > { %v1253_v32 = vpop.permute.xlu0 %1252 }
 0x207   : > { %v1226_v58 = vpop.f32.mrf.mxu0 }
 0x208   : > { %v1227_v59 = vadd.f32 %v1226_v58, %v1154_v42 }
 0x209   : > { %v1228_v60 = vpop.f32.mrf.mxu0 }
 0x20a   : > { %vm1231_vm9 = vcmp.ge.f32.partialorder %v1227_v59, 0.0  ;;  %v1233_v61 = vmul.f32 0.2, %v1227_v59  ;;  %v1229_v62 = vadd.f32 %v1228_v60, %v1154_v42  ;;  %v1256_v42 = vsel %vm817_vm7, %v1253_v32, %v1255_v34 }
 0x20c   : > { %v1235_v0 = vsel %vm1231_vm9, %v1227_v59, %v1233_v61  ;;  %vm1232_vm10 = vcmp.ge.f32.partialorder %v1229_v62, 0.0  ;;  %v1234_v1 = vmul.f32 0.2, %v1229_v62  ;;  %vm2181_vm9 = vcmask 1031168  }
 0x20d   : > { %1237 = vst [vmem:[#allocation2 + $0x10] sm:$0xf] %v1235_v0  ;;  %v1376_v0 = vsel %vm943_vm4, %v6907_v47, %v6916_v57 }
 0x20e   : > { %v1236_v4 = vsel %vm1232_vm10, %v1229_v62, %v1234_v1  ;;  %v1503_v62 = vsel %vm9588_vm1, %v6890_v30, %v6892_v31  ;;  %vm2294_vm10 = vcmask 900096  }
 0x20f   : > { %1238 = vst [vmem:[#allocation2 + $0x18] sm:$0xf] %v1236_v4 }
 0x214   : > { %v1447_v10 = vld [vmem:[#allocation2 + $0x10] sm:$0xf] }
 0x215   : > { %v1528_v13 = vld [vmem:[#allocation2 + $0x10] sm:$0xf]  ;;  %v1468_v14 = vmul.f32 %v1461_v45, %v1447_v10  ;;  %v1545_v45 = vsel %vm834_vm0, %v6903_v43, %v6894_v33 }
 0x216   : > { %v1549_v22 = vmul.f32 %v6903_v43, %v1528_v13  ;;  %v1321_v27 = vld [vmem:[#allocation2 + $0x10] sm:$0xf]  ;;  %v1448_v35 = vld [vmem:[#allocation2 + $0x18] sm:$0xf] }
 0x217   : > { %v1405_v28 = vld [vmem:[#allocation2 + $0x10] sm:$0xf]  ;;  %1474 = vrot.lane.b32.xlu1 %v1468_v14, %s9642_s6  ;;  %v1469_v38 = vmul.f32 %v1464_v37, %v1448_v35  ;;  %v1342_v40 = vmul.f32 %v1337_v23, %v1321_v27  ;;  %v1402_v48 = vld [vmem:[#allocation2 + $0x18] sm:$0xf]  ;;  %v1239_v37 = vld [vmem:[#allocation2 + $0x8] sm:$0xf] }
 0x218   : > { %1555 = vrot.lane.b32.xlu0 %v1549_v22, %s9643_s1  ;;  %v1426_v41 = vmul.f32 %v6905_v44, %v1405_v28  ;;  %v1240_v46 = vld [vmem:[#allocation2 + $0x10] sm:$0xf]  ;;  %1404 = vst [vmem:[#allocation4 + $0x28] sm:$0xf] %v1402_v48  ;;  %v1322_v53 = vld [vmem:[#allocation2 + $0x18] sm:$0xf] }
 0x219   : > { %v1401_v49 = vld [vmem:[#allocation2 + $0x10] sm:$0xf]  ;;  %v1261_v52 = vmul.f32 %v1256_v42, %v1240_v46  ;;  %v1529_v54 = vld [vmem:[#allocation2 + $0x18] sm:$0xf]  ;;  %v1343_v55 = vmul.f32 %v1336_v9, %v1322_v53  ;;  %v1295_v9 = vsel %vm859_vm6, %v6910_v50, %v6918_v63  ;;  %v1590_v46 = vld [vmem:[%s9645_s3 + $0x20] sm:$0xff] }
 0x21a   : > { %1403 = vst [vmem:[#allocation4] sm:$0xf] %v1401_v49  ;;  %v1432_v51 = vrot.slane %v1426_v41, 4  ;;  %v1486_v39 = vld [vmem:[#allocation2 + $0x10] sm:$0xf]  ;;  %v1550_v56 = vmul.f32 %v1545_v45, %v1529_v54  ;;  %v1594_v41 = vld [vmem:[%s9645_s3 + $0x40] sm:$0xff] }
 0x21b   : > { %1476 = vrot.lane.b32.xlu1 %v1469_v38, %s9642_s6  ;;  %v1507_v58 = vmul.f32 %v6890_v30, %v1486_v39  ;;  %v1241_v59 = vld [vmem:[#allocation2 + $0x18] sm:$0xf]  ;;  %v1360_v61 = vld [vmem:[#allocation2 + $0x10] sm:$0xf]  ;;  %v1422_v30 = vsel %vm9587_vm3, %v6905_v44, %v6898_v36  ;;  %v1260_v44 = vmul.f32 %v1253_v32, %v1239_v37  ;;  %v1586_v48 = vld [vmem:[%s9645_s3] sm:$0xff]  ;;  %v1479_v39 = vpop.permute.xlu0 %1478 }
 0x21c   : > { %1349 = vrot.lane.b32.xlu0 %v1342_v40, %s9458_s29  ;;  %v1487_v60 = vld [vmem:[#allocation2 + $0x18] sm:$0xf]  ;;  %v1262_v33 = vmul.f32 %v1255_v34, %v1241_v59  ;;  %v1381_v4 = vmul.f32 %v1376_v0, %v1360_v61  ;;  %v1279_v13 = vld [vmem:[#allocation2 + $0x10] sm:$0xf]  ;;  %v1278_v40 = vld [vmem:[#allocation2 + $0x8] sm:$0xf] }
 0x21d   : > { %v1513_v43 = vrot.slane %v1507_v58, 4  ;;  %v1508_v1 = vmul.f32 %v1503_v62, %v1487_v60  ;;  %v1406_v10 = vld [vmem:[#allocation2 + $0x18] sm:$0xf]  ;;  %v1300_v22 = vmul.f32 %v1295_v9, %v1279_v13  ;;  %v1587_v53 = vld [vmem:[%s9645_s3 + $0x8] sm:$0xff]  ;;  %v1975_v54 = vld [vmem:[%s9646_s0] sm:$0xff]  ;;  %s9474_s0 = smov 96  }
 0x21e   : > { %v1387_v47 = vrot.slane %v1381_v4, 4  ;;  %v1427_v14 = vmul.f32 %v1422_v30, %v1406_v10  ;;  %v1361_v23 = vld [vmem:[#allocation2 + $0x18] sm:$0xf] }
 0x21f   : > { %1435 = vrot.lane.b32.xlu1 %v1432_v51, %s9640_s11  ;;  %v1514_v31 = vrot.slane %v1508_v1, 4  ;;  %v1306_v28 = vrot.slane %v1300_v22, 4  ;;  %v1382_v34 = vmul.f32 %v6916_v57, %v1361_v23  ;;  %v1280_v35 = vld [vmem:[#allocation2 + $0x18] sm:$0xf]  ;;  %v1299_v57 = vmul.f32 %v6910_v50, %v1278_v40  ;;  %v1588_v50 = vld [vmem:[%s9645_s3 + $0x10] sm:$0xff]  ;;  %v1591_v51 = vld [vmem:[%s9645_s3 + $0x28] sm:$0xff]  ;;  %v1521_v45 = vpop.permute.xlu0 %1520 }
 0x220   : > { %1268 = vrot.lane.b32.xlu0 %v1261_v52, %s9460_s9  ;;  %v1433_v27 = vrot.slane %v1427_v14, 4  ;;  %v1301_v36 = vmul.f32 %v6918_v63, %v1280_v35  ;;  %v1592_v63 = vld [vmem:[%s9645_s3 + $0x30] sm:$0xff]  ;;  %v1593_v49 = vld [vmem:[%s9645_s3 + $0x38] sm:$0xff] }
 0x221   : > { %v1388_v38 = vrot.slane %v1382_v34, 4  ;;  %v1305_v32 = vrot.slane %v1299_v57, 4  ;;  %v1589_v52 = vld [vmem:[%s9645_s3 + $0x18] sm:$0xff]  ;;  %s9669_s3 = smov 53  }
 0x222   : > { %v1307_v42 = vrot.slane %v1301_v36, 4 }
 0x223   : > { %1351 = vrot.lane.b32.xlu1 %v1343_v55, %s9458_s29  ;;  %v1560_v55 = vpop.permute.xlu1 %1559  ;;  %s9652_s29 = smov 17  }
 0x224   : > { %1557 = vrot.lane.b32.xlu0 %v1550_v56, %s9643_s1  ;;  %v1440_v56 = vpop.permute.xlu0 %1439 }
 0x227   : > { %1270 = vrot.lane.b32.xlu1 %v1262_v33, %s9460_s9  ;;  %v1390_v59 = vpop.permute.xlu1 %1389 }
 0x228   : > { %1516 = vrot.lane.b32.xlu0 %v1513_v43, %s9641_s10  ;;  %v1348_v58 = vpop.permute.xlu0 %1347 }
 0x22b   : > { %1518 = vrot.lane.b32.xlu1 %v1514_v31, %s9641_s10 }
 0x22c   : > { %1391 = vrot.lane.b32.xlu0 %v1387_v47, %s9462_s5 }
 0x22f   : > { %1437 = vrot.lane.b32.xlu1 %v1433_v27, %s9640_s11 }
 0x230   : > { %1310 = vrot.lane.b32.xlu0 %v1306_v28, %s9465_s30 }
 0x233   : > { %1393 = vrot.lane.b32.xlu1 %v1388_v38, %s9462_s5  ;;  %s9467_s5 = smov 95  }
 0x234   : > { %1266 = vrot.lane.b32.xlu0 %v1260_v44, %s9460_s9  ;;  %s9648_s9 = sld [smem:[#allocation106_spill]] }
 0x237   : > { %1312 = vrot.lane.b32.xlu1 %v1307_v42, %s9465_s30 }
 0x238   : > { %1637 = vperm.xlu0 %6329, %v1594_v41  }
 0x23b   : > { %1308 = vrot.lane.b32.xlu1 %v1305_v32, %s9465_s30  ;;  %s9651_s30 = smov 16  }
 0x23c   : > { %1627 = vperm.xlu0 %6329, %v1592_v63  }
 0x23f   : > { %1632 = vperm.xlu1 %6330, %v1593_v49  }
 0x240   : > { %1617 = vperm.xlu0 %6329, %v1590_v46  }
 0x243   : > { %1622 = vperm.xlu1 %6330, %v1591_v51  }
 0x244   : > { %1607 = vperm.xlu0 %6329, %v1588_v50  }
 0x247   : > { %1612 = vperm.xlu1 %6330, %v1589_v52  }
 0x248   : > { %1597 = vperm.xlu0 %6329, %v1586_v48  }
 0x24b   : > { %1602 = vperm.xlu1 %6330, %v1587_v53  }
 0x24f   : > { %1978 = vperm.xlu1 %6330, %v1975_v54  }
 0x289   : > { %v1475_v61 = vpop.permute.xlu1 %1474 }
 0x28a   : > { %v1556_v60 = vpop.permute.xlu0 %1555 }
 0x28d   : > { %v1477_v0 = vpop.permute.xlu1 %1476 }
 0x28e   : > { %v1350_v62 = vpop.permute.xlu0 %1349  ;;  %v1480_v43 = vsel %vm9584_vm5, %v1475_v61, %v1477_v0  ;;  %v1481_v1 = vsel %vm9584_vm5, %v1477_v0, %v1479_v39  ;;  %v1569_v61 = vld [vmem:[%s9647_s2 + $0x10] sm:$0xff]  ;;  %v1571_v0 = vld [vmem:[%s9647_s2 + $0x20] sm:$0xff] }
 0x28f   : > { %v1353_v33 = vsel %vm9606_vm2, %v1348_v58, %v1350_v62  ;;  %1484 = vst [vmem:[#allocation4 + $0x40] sm:$0xf] %v1480_v43  ;;  %1485 = vst [vmem:[#allocation4 + $0x38] sm:$0xf] %v1481_v1  ;;  %v1567_v58 = vld [vmem:[%s9647_s2] sm:$0xff]  ;;  %v1573_v43 = vld [vmem:[%s9647_s2 + $0x30] sm:$0xff] }
 0x290   : > { %1357 = vst [vmem:[#allocation4 + $0x10] sm:$0xf] %v1353_v33  ;;  %v1572_v33 = vld [vmem:[%s9647_s2 + $0x28] sm:$0xff]  ;;  %v1574_v1 = vld [vmem:[%s9647_s2 + $0x38] sm:$0xff] }
 0x291   : > { %v1436_v9 = vpop.permute.xlu1 %1435 }
 0x292   : > { %v1269_v4 = vpop.permute.xlu0 %1268 }
 0x295   : > { %v1352_v13 = vpop.permute.xlu1 %1351 }
 0x296   : > { %v1558_v10 = vpop.permute.xlu0 %1557  ;;  %v1354_v47 = vsel %vm9606_vm2, %v1350_v62, %v1352_v13  ;;  %v1570_v62 = vld [vmem:[%s9647_s2 + $0x18] sm:$0xff]  ;;  %v6455_v13 = vmov 1  }
 0x297   : > { %v1561_v30 = vsel %vm817_vm7, %v1556_v60, %v1558_v10  ;;  %v1562_v31 = vsel %vm817_vm7, %v1558_v10, %v1560_v55  ;;  %1358 = vst [vmem:[#allocation4 + $0x20] sm:$0xf] %v1354_v47  ;;  %v1568_v60 = vld [vmem:[%s9647_s2 + $0x8] sm:$0xff]  ;;  %6331 = vset.pattern.permute.xlu1 %v6455_v13 }
 0x298   : > { %1565 = vst [vmem:[#allocation4 + $0x30] sm:$0xf] %v1561_v30  ;;  %1566 = vst [vmem:[#allocation4 + $0x18] sm:$0xf] %v1562_v31 }
 0x299   : > { %v1271_v22 = vpop.permute.xlu1 %1270  ;;  %v6139_v10 = vld [vmem:[%s9633_s4 + $0x1] ss:$8 sm:$0x3]  ;;  %v6140_v47 = vld [vmem:[%s9633_s4 + $0x2] ss:$8 sm:$0x3] }
 0x29a   : > { %v1517_v14 = vpop.permute.xlu0 %1516  ;;  %v1273_v23 = vsel %vm834_vm0, %v1269_v4, %v1271_v22  ;;  %v2104_v30 = vrot.slane %v6139_v10, %v6651_v6  ;;  %v2108_v31 = vrot.slane %v6139_v10, %v6653_v7 }
 0x29b   : > { %1277 = vst [vmem:[#allocation4 + $0x48] sm:$0xf] %v1273_v23  ;;  %v2153_v23 = vrot.slane %v6140_v47, %v6653_v7 }
 0x29d   : > { %v1519_v28 = vpop.permute.xlu1 %1518 }
 0x29e   : > { %v1392_v27 = vpop.permute.xlu0 %1391  ;;  %v1522_v35 = vsel %vm859_vm6, %v1517_v14, %v1519_v28  ;;  %v1523_v37 = vsel %vm859_vm6, %v1519_v28, %v1521_v45  ;;  %v2149_v14 = vrot.slane %v6140_v47, %v6651_v6 }
 0x29f   : > { %v1395_v34 = vsel %vm9587_vm3, %v1390_v59, %v1392_v27  ;;  %v1585_v36 = vld [vmem:[#allocation4 + $0x18] sm:$0xf]  ;;  %v1584_v44 = vld [vmem:[#allocation4 + $0x30] sm:$0xf]  ;;  %1526 = vst [vmem:[#allocation4 + $0x40] sm:$0xf0] %v1522_v35 }
 0x2a0   : > { %1399 = vst [vmem:[#allocation4 + $0x10] sm:$0xf0] %v1395_v34  ;;  %1527 = vst [vmem:[#allocation4 + $0x38] sm:$0xf0] %v1523_v37  ;;  %6109 = vmatprep.subr.msk.mxu1 %vm9583_vm11, %v1585_v36 }
 0x2a1   : > { %6110 = vmatpush1.msk.msra.mxu1 %vm9583_vm11, %v1584_v44  ;;  %v1438_v40 = vpop.permute.xlu1 %1437  ;;  %v7085_v35 = vld [vmem:[%s9633_s4 + $0x3] ss:$8 sm:$0x3]  ;;  %vm3716_vm11 = vcmask 433152  }
 0x2a2   : > { %v1311_v38 = vpop.permute.xlu0 %1310  ;;  %v1441_v41 = vsel %vm943_vm4, %v1436_v9, %v1438_v40  ;;  %v1442_v57 = vsel %vm943_vm4, %v1438_v40, %v1440_v56  ;;  %v7058_v9 = vld [vmem:[%s9648_s9] sm:$0xff]  ;;  %v2195_v37 = vrot.slane %v7085_v35, %v6651_v6  ;;  %s9649_s9 = smov 1  }
 0x2a3   : > { %1445 = vst [vmem:[#allocation4] sm:$0xf0] %v1441_v41  ;;  %1446 = vst [vmem:[#allocation4 + $0x28] sm:$0xf0] %v1442_v57  ;;  %2121 = vperm.xlu1 %6331, %v7058_v9  }
 0x2a4   : > { %v6142_v57 = vld [vmem:[%s9633_s4 + $0x5] ss:$8 sm:$0x3] }
 0x2a5   : > { %v1394_v63 = vpop.permute.xlu1 %1393 }
 0x2a6   : > { %v1267_v42 = vpop.permute.xlu0 %1266  ;;  %v1396_v46 = vsel %vm9587_vm3, %v1392_v27, %v1394_v63  ;;  %v1582_v48 = vld [vmem:[#allocation4 + $0x40] sm:$0xff]  ;;  %v6457_v27 = vmov 3  }
 0x2a7   : > { %v1272_v32 = vsel %vm834_vm0, %v1267_v42, %v1269_v4  ;;  %v1583_v50 = vld [vmem:[#allocation4 + $0x38] sm:$0xff]  ;;  %1400 = vst [vmem:[#allocation4 + $0x20] sm:$0xf0] %v1396_v46  ;;  %v1578_v55 = vld [vmem:[#allocation4 + $0x10] sm:$0xff]  ;;  %2109 = vrot.lane.b32.xlu1 %v2104_v30, %s9641_s10  ;;  %v6459_v42 = vmov 5   ;;  %v2262_v46 = vrot.slane %v6142_v57, %v6651_v6 }
 0x2a8   : > { %1276 = vst [vmem:[#allocation4 + $0x8] sm:$0xf] %v1272_v32  ;;  %1699 = vmatprep.subr.mxu1 %v1583_v50  ;;  %v1575_v4 = vld [vmem:[%s9647_s2 + $0x40] sm:$0xff]  ;;  %s9660_s2 = smov 110  }
 0x2a9   : > { %1700 = vmatpush1.msra.mxu1 %v1582_v48  ;;  %v1313_v49 = vpop.permute.xlu1 %1312 }
 0x2aa   : > { %v1315_v51 = vsel %vm9588_vm1, %v1311_v38, %v1313_v49  ;;  %v1581_v52 = vld [vmem:[#allocation4 + $0x28] sm:$0xff]  ;;  %v1580_v53 = vld [vmem:[#allocation4] sm:$0xff] }
 0x2ab   : > { %1319 = vst [vmem:[#allocation4 + $0x48] sm:$0xf0] %v1315_v51  ;;  %1701 = vmatprep.subr.mxu1 %v1581_v52  ;;  %2111 = vrot.lane.b32.xlu1 %v2108_v31, %s9641_s10 }
 0x2ac   : > { %1702 = vmatpush1.msra.mxu1 %v1580_v53 }
 0x2ad   : > { %v1309_v54 = vpop.permute.xlu1 %1308 }
 0x2ae   : > { %v1314_v39 = vsel %vm9588_vm1, %v1309_v54, %v1311_v38  ;;  %v1579_v45 = vld [vmem:[#allocation4 + $0x20] sm:$0xff]  ;;  %v6458_v38 = vmov 4   ;;  %v2266_v54 = vrot.slane %v6142_v57, %v6653_v7 }
 0x2af   : > { %1318 = vst [vmem:[#allocation4 + $0x8] sm:$0xf0] %v1314_v39  ;;  %1703 = vmatprep.subr.mxu1 %v1579_v45 }
 0x2b0   : > { %1704 = vmatpush1.msra.mxu1 %v1578_v55  ;;  %v6460_v55 = vmov 6  }
 0x2b2   : > { %v1577_v56 = vld [vmem:[#allocation4 + $0x48] sm:$0xff] }
 0x2b3   : > { %1705 = vmatprep.subr.mxu1 %v1577_v56  ;;  %v7073_v22 = vpop.permute.xlu0 %1637 }
 0x2b6   : > { %v1576_v59 = vld [vmem:[#allocation4 + $0x8] sm:$0xff] }
 0x2b7   : > { %1706 = vmatpush1.msra.mxu1 %v1576_v59  ;;  %v7077_v28 = vpop.permute.xlu0 %1627 }
 0x2b8   : > { %6111 = vmatmul.mubr.msk.f32.vlgmr.msra.gmra.mxu1 %vm9578_vm12, %v1567_v58 }
 0x2b9   : > { %1745 = vmatprep.mubr.f32.mxu1 %v6445_v3 }
 0x2ba   : > { %v7080_v34 = vpop.permute.xlu1 %1632 }
 0x2bb   : > { %v7090_v36 = vpop.permute.xlu0 %1617 }
 0x2bc   : > { %6112 = vmatmul.mubr.msk.f32.gmra.mxu1 %vm9578_vm12, %v1568_v60 }
 0x2bd   : > { %1751 = vmatprep.mubr.f32.mxu1 %v6445_v3 }
 0x2be   : > { %v7092_v44 = vpop.permute.xlu1 %1622 }
 0x2bf   : > { %v1608_v40 = vpop.permute.xlu0 %1607 }
 0x2c0   : > { %6113 = vmatmul.mubr.msk.f32.gmra.mxu1 %vm9578_vm12, %v1569_v61 }
 0x2c1   : > { %1757 = vmatprep.mubr.f32.mxu1 %v6445_v3 }
 0x2c2   : > { %v1613_v41 = vpop.permute.xlu1 %1612 }
 0x2c3   : > { %v1598_v63 = vpop.permute.xlu0 %1597 }
 0x2c4   : > { %6114 = vmatmul.mubr.msk.f32.gmra.mxu1 %vm9578_vm12, %v1570_v62 }
 0x2c5   : > { %1763 = vmatprep.mubr.f32.mxu1 %v6445_v3 }
 0x2c6   : > { %v1603_v49 = vpop.permute.xlu1 %1602 }
 0x2c8   : > { %6115 = vmatmul.mubr.msk.f32.gmra.mxu1 %vm9578_vm12, %v1571_v0  ;;  %v7107_v0 = vld [vmem:[%s9633_s4 + $0x6] ss:$8 sm:$0x3] }
 0x2c9   : > { %1769 = vmatprep.mubr.f32.mxu1 %v6445_v3  ;;  %v2308_v10 = vrot.slane %v7107_v0, %v6651_v6 }
 0x2cc   : > { %6116 = vmatmul.mubr.msk.f32.gmra.mxu1 %vm9578_vm12, %v1572_v33 }
 0x2cd   : > { %1775 = vmatprep.mubr.f32.mxu1 %v6445_v3 }
 0x2d0   : > { %6117 = vmatmul.mubr.msk.f32.gmra.mxu1 %vm9578_vm12, %v1573_v43 }
 0x2d1   : > { %1781 = vmatprep.mubr.f32.mxu1 %v6445_v3 }
 0x2d4   : > { %6118 = vmatmul.mubr.msk.f32.gmra.mxu1 %vm9578_vm12, %v1574_v1 }
 0x2d5   : > { %1787 = vmatprep.mubr.f32.mxu1 %v6445_v3 }
 0x2d8   : > { %6119 = vmatmul.mubr.msk.f32.gmra.mxu1 %vm9578_vm12, %v1575_v4  ;;  %vm3255_vm12 = vcmask 654336  }
 0x2d9   : > { %2048 = vmatprep.mubr.f32.mxu1 %v6445_v3  ;;  %v6456_v3 = vmov 2  }
 0x2da   : > { %6332 = vset.pattern.permute.xlu1 %v6456_v3 }
 0x2db   : > { %2166 = vperm.xlu1 %6332, %v7058_v9  }
 0x2df   : > { %2154 = vrot.lane.b32.xlu1 %v2149_v14, %s9642_s6 }
 0x2e0   : > { %6333 = vset.pattern.permute.xlu1 %v6457_v27 }
 0x2e3   : > { %2156 = vrot.lane.b32.xlu1 %v2153_v23, %s9642_s6 }
 0x2e7   : > { %2212 = vperm.xlu1 %6333, %v7058_v9  }
 0x2eb   : > { %2200 = vrot.lane.b32.xlu1 %v2195_v37, %s9640_s11  ;;  %v6461_v37 = vmov 7  }
 0x2ec   : > { %6334 = vset.pattern.permute.xlu1 %v6458_v38  ;;  %v7117_v38 = vld [vmem:[%s9633_s4 + $0x7] ss:$8 sm:$0x3] }
 0x2ef   : > { %2236 = vperm.xlu1 %6334, %v7058_v9  }
 0x2f3   : > { %6335 = vset.pattern.permute.xlu1 %v6459_v42 }
 0x2f4   : > { %2279 = vperm.xlu1 %6335, %v7058_v9  }
 0x2f8   : > { %2267 = vrot.lane.b32.xlu1 %v2262_v46, %s9649_s9 }
 0x2f9   : > { %6336 = vset.pattern.permute.xlu1 %v6460_v55 }
 0x2fc   : > { %2269 = vrot.lane.b32.xlu1 %v2266_v54, %s9649_s9 }
 0x300   : > { %2325 = vperm.xlu1 %6336, %v7058_v9  }
 0x304   : > { %2313 = vrot.lane.b32.xlu1 %v2308_v10, %s9650_s27 }
 0x305   : > { %6337 = vset.pattern.permute.xlu1 %v6461_v37 }
 0x308   : > { %2371 = vperm.xlu1 %6337, %v7058_v9  }
 0x30c   : > { %6340 = vset.pattern.permute.xlu1 %v6454_v18 }
 0x378   : > { %v1741_v32 = vpop.f32.mrf.mxu1 }
 0x379   : > { %v1742_v50 = vadd.f32 %v1741_v32, %v1598_v63 }
 0x37a   : > { %v1743_v48 = vpop.f32.mrf.mxu1 }
 0x37b   : > { %v6120_v51 = vmul.f32 -1.442695, %v1742_v50  ;;  %v1744_v52 = vadd.f32 %v1743_v48, %v1598_v63  ;;  %v2358_v50 = vrot.slane %v7117_v38, %v6653_v7 }
 0x37c   : > { %v1747_v53 = vpop.f32.mrf.mxu1 }
 0x37d   : > { %6341 = vpow2.f32 %v6120_v51  ;;  %v6121_v39 = vmul.f32 -1.442695, %v1744_v52  ;;  %v1748_v45 = vadd.f32 %v1747_v53, %v1603_v49  ;;  %v6145_v52 = vld [vmem:[%s9633_s4 + $0x10] ss:$8 sm:$0x3]  ;;  %2361 = vrot.lane.b32.xlu1 %v2358_v50, %s9651_s30 }
 0x37e   : > { %v1749_v56 = vpop.f32.mrf.mxu1 }
 0x37f   : > { %6343 = vpow2.f32 %v6121_v39  ;;  %v6122_v58 = vmul.f32 -1.442695, %v1748_v45  ;;  %v1750_v59 = vadd.f32 %v1749_v56, %v1603_v49 }
 0x380   : > { %v1753_v60 = vpop.f32.mrf.mxu1 }
 0x381   : > { %6345 = vpow2.f32 %v6122_v58  ;;  %v6123_v61 = vmul.f32 -1.442695, %v1750_v59  ;;  %v1754_v62 = vadd.f32 %v1753_v60, %v1608_v40  ;;  %v2400_v58 = vrot.slane %v6145_v52, %v6651_v6 }
 0x382   : > { %v1755_v33 = vpop.f32.mrf.mxu1 }
 0x383   : > { %6347 = vpow2.f32 %v6123_v61  ;;  %v6124_v43 = vmul.f32 -1.442695, %v1754_v62  ;;  %v1756_v1 = vadd.f32 %v1755_v33, %v1608_v40  ;;  %2405 = vrot.lane.b32.xlu1 %v2400_v58, %s9652_s29 }
 0x384   : > { %v1759_v4 = vpop.f32.mrf.mxu1 }
 0x385   : > { %6349 = vpow2.f32 %v6124_v43  ;;  %v6125_v13 = vmul.f32 -1.442695, %v1756_v1  ;;  %v1760_v30 = vadd.f32 %v1759_v4, %v1613_v41 }
 0x386   : > { %v1761_v31 = vpop.f32.mrf.mxu1 }
 0x387   : > { %6351 = vpow2.f32 %v6125_v13  ;;  %v6126_v3 = vmul.f32 -1.442695, %v1760_v30  ;;  %v1762_v47 = vadd.f32 %v1761_v31, %v1613_v41  ;;  %v2404_v13 = vrot.slane %v6145_v52, %v6653_v7 }
 0x388   : > { %v1765_v14 = vpop.f32.mrf.mxu1 }
 0x389   : > { %6353 = vpow2.f32 %v6126_v3  ;;  %v6127_v23 = vmul.f32 -1.442695, %v1762_v47  ;;  %v1766_v27 = vadd.f32 %v1765_v14, %v7090_v36  ;;  %v2067_v47 = vld [vmem:[%s9633_s4] ss:$8 sm:$0x3]  ;;  %2407 = vrot.lane.b32.xlu1 %v2404_v13, %s9652_s29 }
 0x38a   : > { %v6342_v40 = vpop.eup %6341  ;;  %v1767_v57 = vpop.f32.mrf.mxu1 }
 0x38b   : > { %v1848_v42 = vadd.f32 1.0, %v6342_v40  ;;  %6355 = vpow2.f32 %v6127_v23  ;;  %v6128_v63 = vmul.f32 -1.442695, %v1766_v27  ;;  %v1768_v41 = vadd.f32 %v1767_v57, %v7090_v36 }
 0x38c   : > { %v6344_v32 = vpop.eup %6343  ;;  %v1771_v46 = vpop.f32.mrf.mxu1 }
 0x38d   : > { %6357 = vrcp.f32 %v1848_v42  ;;  %v1849_v48 = vadd.f32 1.0, %v6344_v32  ;;  %v6129_v49 = vmul.f32 -1.442695, %v1768_v41  ;;  %v1772_v51 = vadd.f32 %v1771_v46, %v7092_v44 }
 0x38e   : > { %v6346_v53 = vpop.eup %6345  ;;  %6359 = vpow2.f32 %v6128_v63  ;;  %v1773_v54 = vpop.f32.mrf.mxu1  ;;  %v2072_v42 = vrot.slane %v2067_v47, %v6651_v6 }
 0x38f   : > { %6361 = vrcp.f32 %v1849_v48  ;;  %v1850_v36 = vadd.f32 1.0, %v6346_v53  ;;  %v6130_v39 = vmul.f32 -1.442695, %v1772_v51  ;;  %v1774_v45 = vadd.f32 %v1773_v54, %v7092_v44 }
 0x390   : > { %v6348_v55 = vpop.eup %6347  ;;  %6363 = vpow2.f32 %v6129_v49  ;;  %v1777_v56 = vpop.f32.mrf.mxu1  ;;  %2077 = vrot.lane.b32.xlu1 %v2072_v42, %s9643_s1  ;;  %v2076_v54 = vrot.slane %v2067_v47, %v6653_v7 }
 0x391   : > { %6365 = vrcp.f32 %v1850_v36  ;;  %v1851_v59 = vadd.f32 1.0, %v6348_v55  ;;  %v6131_v60 = vmul.f32 -1.442695, %v1774_v45  ;;  %v1778_v61 = vadd.f32 %v1777_v56, %v7077_v28 }
 0x392   : > { %v6350_v62 = vpop.eup %6349  ;;  %6367 = vpow2.f32 %v6130_v39  ;;  %v1779_v33 = vpop.f32.mrf.mxu1 }
 0x393   : > { %6369 = vrcp.f32 %v1851_v59  ;;  %v1852_v43 = vadd.f32 1.0, %v6350_v62  ;;  %v6132_v44 = vmul.f32 -1.442695, %v1778_v61  ;;  %v1780_v1 = vadd.f32 %v1779_v33, %v7077_v28 }
 0x394   : > { %v6352_v4 = vpop.eup %6351  ;;  %6371 = vpow2.f32 %v6131_v60  ;;  %v1783_v10 = vpop.f32.mrf.mxu1  ;;  %2079 = vrot.lane.b32.xlu1 %v2076_v54, %s9643_s1 }
 0x395   : > { %6373 = vrcp.f32 %v1852_v43  ;;  %v1853_v30 = vadd.f32 1.0, %v6352_v4  ;;  %v6133_v31 = vmul.f32 -1.442695, %v1780_v1  ;;  %v1784_v3 = vadd.f32 %v1783_v10, %v7080_v34 }
 0x396   : > { %v6354_v14 = vpop.eup %6353  ;;  %6375 = vpow2.f32 %v6132_v44  ;;  %v1785_v23 = vpop.f32.mrf.mxu1 }
 0x397   : > { %6377 = vrcp.f32 %v1853_v30  ;;  %v1854_v28 = vadd.f32 1.0, %v6354_v14  ;;  %v6134_v27 = vmul.f32 -1.442695, %v1784_v3  ;;  %v1786_v37 = vadd.f32 %v1785_v23, %v7080_v34 }
 0x398   : > { %v6356_v40 = vpop.eup %6355  ;;  %6379 = vpow2.f32 %v6133_v31  ;;  %v1789_v57 = vpop.f32.mrf.mxu1 }
 0x399   : > { %6381 = vrcp.f32 %v1854_v28  ;;  %v1855_v63 = vadd.f32 1.0, %v6356_v40  ;;  %v6135_v41 = vmul.f32 -1.442695, %v1786_v37  ;;  %v1790_v32 = vadd.f32 %v1789_v57, %v7073_v22 }
 0x39a   : > { %v6358_v46 = vpop.eup %6357  ;;  %6383 = vpow2.f32 %v6134_v27  ;;  %v1791_v50 = vpop.f32.mrf.mxu1 }
 0x39b   : > { %v6360_v48 = vpop.eup %6359  ;;  %v7144_v49 = vmul.f32 %v6358_v46, %v6885_v29  ;;  %6385 = vrcp.f32 %v1855_v63  ;;  %v6136_v34 = vmul.f32 -1.442695, %v1790_v32  ;;  %v1792_v51 = vadd.f32 %v1791_v50, %v7073_v22 }
 0x39c   : > { %v6362_v52 = vpop.eup %6361  ;;  %v1856_v53 = vadd.f32 1.0, %v6360_v48  ;;  %6387 = vpow2.f32 %v6135_v41 }
 0x39d   : > { %v6364_v36 = vpop.eup %6363  ;;  %1906 = vst [vmem:[#allocation3] sm:$0xff] %v7144_v49  ;;  %v7151_v39 = vmul.f32 %v6362_v52, %v6877_v26  ;;  %6389 = vpow2.f32 %v6136_v34  ;;  %v6137_v29 = vmul.f32 -1.442695, %v1792_v51 }
 0x39e   : > { %v6366_v45 = vpop.eup %6365  ;;  %6391 = vrcp.f32 %v1856_v53  ;;  %v1857_v55 = vadd.f32 1.0, %v6364_v36  ;;  %v1945_v53 = vld [vmem:[#allocation3 + $0x18] sm:$0xff] }
 0x39f   : > { %v6368_v56 = vpop.eup %6367  ;;  %1907 = vst [vmem:[#allocation3 + $0x38] sm:$0xff] %v7151_v39  ;;  %v7155_v22 = vmul.f32 %v6366_v45, %v6873_v25  ;;  %6393 = vpow2.f32 %v6137_v29  ;;  %v1950_v29 = vld [vmem:[#allocation3 + $0x68] sm:$0xff] }
 0x3a0   : > { %v6370_v58 = vpop.eup %6369  ;;  %6395 = vrcp.f32 %v1857_v55  ;;  %v1858_v59 = vadd.f32 1.0, %v6368_v56  ;;  %v1979_v56 = vpop.permute.xlu1 %1978 }
 0x3a1   : > { %v6372_v60 = vpop.eup %6371  ;;  %1912 = vst [vmem:[#allocation3 + $0x78] sm:$0xff] %v7155_v22  ;;  %v7160_v26 = vmul.f32 %v6370_v58, %v6869_v24 }
 0x3a2   : > { %v6374_v61 = vpop.eup %6373  ;;  %6397 = vrcp.f32 %v1858_v59  ;;  %v1859_v62 = vadd.f32 1.0, %v6372_v60 }
 0x3a3   : > { %v6376_v33 = vpop.eup %6375  ;;  %1913 = vst [vmem:[#allocation3 + $0x58] sm:$0xff] %v7160_v26  ;;  %v7164_v25 = vmul.f32 %v6374_v61, %v6865_v21 }
 0x3a4   : > { %v6378_v43 = vpop.eup %6377  ;;  %6399 = vrcp.f32 %v1859_v62  ;;  %v1860_v44 = vadd.f32 1.0, %v6376_v33 }
 0x3a5   : > { %v6380_v1 = vpop.eup %6379  ;;  %1918 = vst [vmem:[#allocation3 + $0x20] sm:$0xff] %v7164_v25  ;;  %v1917_v4 = vmul.f32 %v6378_v43, %v6861_v20 }
 0x3a6   : > { %v6382_v10 = vpop.eup %6381  ;;  %6401 = vrcp.f32 %v1860_v44  ;;  %v1861_v24 = vadd.f32 1.0, %v6380_v1 }
 0x3a7   : > { %v6384_v13 = vpop.eup %6383  ;;  %1919 = vst [vmem:[#allocation3 + $0x8] sm:$0xff] %v1917_v4  ;;  %v1922_v30 = vmul.f32 %v6382_v10, %v6857_v19 }
 0x3a8   : > { %v6386_v31 = vpop.eup %6385  ;;  %6403 = vrcp.f32 %v1861_v24  ;;  %v1862_v3 = vadd.f32 1.0, %v6384_v13 }
 0x3a9   : > { %v6388_v21 = vpop.eup %6387  ;;  %1924 = vst [vmem:[#allocation3 + $0x70] sm:$0xff] %v1922_v30  ;;  %v1923_v47 = vmul.f32 %v6386_v31, %v6853_v17 }
 0x3aa   : > { %v6390_v14 = vpop.eup %6389  ;;  %6405 = vrcp.f32 %v1862_v3  ;;  %v1863_v23 = vadd.f32 1.0, %v6388_v21 }
 0x3ab   : > { %v6392_v28 = vpop.eup %6391  ;;  %1925 = vst [vmem:[#allocation3 + $0x80] sm:$0xff] %v1923_v47  ;;  %v1864_v20 = vadd.f32 1.0, %v6390_v14 }
 0x3ac   : > { %v6394_v27 = vpop.eup %6393  ;;  %v1928_v37 = vmul.f32 %v6392_v28, %v6676_v15  ;;  %6407 = vrcp.f32 %v1863_v23 }
 0x3ad   : > { %v6396_v40 = vpop.eup %6395  ;;  %6409 = vrcp.f32 %v1864_v20  ;;  %v1865_v19 = vadd.f32 1.0, %v6394_v27  ;;  %v2199_v27 = vrot.slane %v7085_v35, %v6653_v7  ;;  %v2354_v35 = vrot.slane %v7117_v38, %v6651_v6 }
 0x3ae   : > { %1930 = vst [vmem:[#allocation3 + $0x88] sm:$0xff] %v1928_v37  ;;  %v1929_v57 = vmul.f32 %v6396_v40, %v6678_v16 }
 0x3af   : > { %v6398_v42 = vpop.eup %6397  ;;  %6411 = vrcp.f32 %v1865_v19 }
 0x3b0   : > { %1931 = vst [vmem:[#allocation3 + $0x40] sm:$0xff] %v1929_v57  ;;  %v1934_v17 = vmul.f32 %v6398_v42, %v6843_v11  ;;  %v1951_v11 = vld [vmem:[#allocation3 + $0x60] sm:$0xff] }
 0x3b1   : > { %v6400_v63 = vpop.eup %6399 }
 0x3b2   : > { %v1935_v41 = vmul.f32 %v6400_v63, %v6846_v12 }
 0x3b3   : > { %v6402_v32 = vpop.eup %6401 }
 0x3b4   : > { %v1940_v46 = vmul.f32 %v6402_v32, %v6839_v8  ;;  %v6462_v8 = vmov 8  }
 0x3b5   : > { %v6404_v50 = vpop.eup %6403  ;;  %6338 = vset.pattern.permute.xlu0 %v6462_v8  ;;  %v6154_v8 = vld [vmem:[%s9633_s4 + $0x1] ss:$8 sm:$0x3] }
 0x3b6   : > { %v1941_v48 = vmul.f32 %v6404_v50, %v6835_v5  ;;  %v7188_v5 = vld [vmem:[#allocation2] sm:$0xff] }
 0x3b7   : > { %v6406_v34 = vpop.eup %6405  ;;  %6268 = vmatprep.mubr.msk.f32.mxu0 %vm6463_vm15, %v7188_v5  ;;  %vm9585_vm15 = vcmask 769024  }
 0x3b8   : > { %v1946_v51 = vmul.f32 %v6406_v34, %v6831_v2  ;;  %v1956_v2 = vld [vmem:[%s9653_s26] sm:$0xff]  ;;  %s9662_s26 = smov 95  }
 0x3b9   : > { %v6408_v52 = vpop.eup %6407 }
 0x3ba   : > { %v6410_v54 = vpop.eup %6409  ;;  %v1947_v36 = vmul.f32 %v6408_v52, %v1945_v53 }
 0x3bb   : > { %v1952_v45 = vmul.f32 %v6410_v54, %v1950_v29  ;;  %v2550_v29 = vld [vmem:[%s9657_s13] sm:$0xff] }
 0x3bc   : > { %v6412_v55 = vpop.eup %6411  ;;  %1949 = vst [vmem:[#allocation3 + $0x18] sm:$0xff] %v1947_v36 }
 0x3bd   : > { %1954 = vst [vmem:[#allocation3 + $0x68] sm:$0xff] %v1952_v45  ;;  %v1953_v12 = vmul.f32 %v6412_v55, %v1951_v11  ;;  %v2552_v11 = vld [vmem:[%s9657_s13 + $0x10] sm:$0xff] }
 0x3bf   : > { %1955 = vst [vmem:[#allocation3 + $0x60] sm:$0xff] %v1953_v12  ;;  %1998 = vmatprep.subr.mxu1 %v1953_v12  ;;  %v2551_v12 = vld [vmem:[%s9657_s13 + $0x8] sm:$0xff] }
 0x3c0   : > { %1999 = vmatpush1.msra.mxu1 %v1952_v45 }
 0x3c1   : > { %2000 = vmatprep.subr.mxu1 %v1947_v36 }
 0x3c2   : > { %2001 = vmatpush1.msra.mxu1 %v1946_v51 }
 0x3c3   : > { %2002 = vmatprep.subr.mxu1 %v1941_v48 }
 0x3c4   : > { %2003 = vmatpush1.msra.mxu1 %v1940_v46 }
 0x3c5   : > { %2004 = vmatprep.subr.mxu1 %v1935_v41  ;;  %v2703_v41 = vld [vmem:[%s9654_s14] sm:$0xf]  ;;  %s9481_s14 = smov 80  }
 0x3c6   : > { %2005 = vmatpush1.msra.mxu1 %v1934_v17 }
 0x3c7   : > { %2006 = vmatprep.subr.mxu1 %v1929_v57  ;;  %v2312_v57 = vrot.slane %v7107_v0, %v6653_v7 }
 0x3c8   : > { %2007 = vmatpush1.msra.mxu1 %v1928_v37 }
 0x3c9   : > { %2008 = vmatprep.subr.mxu1 %v1923_v47 }
 0x3ca   : > { %2009 = vmatpush1.msra.mxu1 %v1922_v30 }
 0x3cb   : > { %2010 = vmatprep.subr.mxu1 %v1917_v4 }
 0x3cc   : > { %2011 = vmatpush1.msra.mxu1 %v7164_v25 }
 0x3cd   : > { %2012 = vmatprep.subr.mxu1 %v7160_v26 }
 0x3ce   : > { %2013 = vmatpush1.msra.mxu1 %v7155_v22  ;;  %v7191_v22 = vpop.permute.xlu1 %2121 }
 0x3cf   : > { %2014 = vmatprep.subr.mxu1 %v7151_v39 }
 0x3d0   : > { %2015 = vmatpush1.msra.mxu1 %v7144_v49 }
 0x3d1   : > { %6138 = vmatmul.mubr.msk.f32.vlgmr.msra.gmra.mxu1 %vm1156_vm8, %v1956_v2  ;;  %2743 = vmatprep.subr.mxu1 %v6678_v16  ;;  %vm2463_vm8 = vcmask 64512   ;;  %v2554_v2 = vld [vmem:[%s9657_s13 + $0x20] sm:$0xf] }
 0x3d2   : > { %2744 = vmatpush1.msra.mxu1 %v6676_v15  ;;  %2777 = vmatprep.mubr.f32.mxu1 %v7188_v5  ;;  %v7193_v58 = vpop.permute.xlu1 %2109 }
 0x3d3   : > { %v2117_v0 = vmul.f32 %v7188_v5, %v7193_v58 }
 0x3d5   : > { %v2124_v17 = vmul.f32 %v7191_v22, %v2117_v0  ;;  %6153 = vmatmul.mubr.msk.f32.vlgmr.msra.gmra.mxu1 %vm2463_vm8, %v2703_v41  ;;  %v6163_v0 = vld [vmem:[%s9633_s4 + $0x13] ss:$8 sm:$0x3] }
 0x3d6   : > { %v7195_v39 = vpop.permute.xlu1 %2111  ;;  %4453 = vmatprep.mubr.f32.mxu1 %v7188_v5 }
 0x3da   : > { %v7197_v49 = vpop.permute.xlu1 %2166 }
 0x3de   : > { %v7199_v59 = vpop.permute.xlu1 %2154 }
 0x3df   : > { %v2162_v14 = vmul.f32 %v7188_v5, %v7199_v59 }
 0x3e1   : > { %v2169_v28 = vmul.f32 %v7197_v49, %v2162_v14  ;;  %v6157_v14 = vld [vmem:[%s9633_s4 + $0x5] ss:$8 sm:$0x3] }
 0x3e2   : > { %v7201_v60 = vpop.permute.xlu1 %2156 }
 0x3e3   : > { %2175 = vrot.lane.b32.xlu1 %v2169_v28, %s9471_s8  ;;  %s9655_s8 = sld [smem:[#allocation108_spill]] }
 0x3e6   : > { %v7203_v26 = vpop.permute.xlu1 %2212 }
 0x3ea   : > { %v7205_v61 = vpop.permute.xlu1 %2200 }
 0x3eb   : > { %v2208_v38 = vmul.f32 %v7188_v5, %v7205_v61 }
 0x3ed   : > { %v2215_v63 = vmul.f32 %v7203_v26, %v2208_v38  ;;  %v3298_v38 = vrot.slane %v6163_v0, %v6651_v6 }
 0x3ee   : > { %v7207_v62 = vpop.permute.xlu1 %2236 }
 0x3f2   : > { %v7209_v33 = vpop.permute.xlu1 %2279 }
 0x3f6   : > { %v7211_v43 = vpop.permute.xlu1 %2267 }
 0x3fa   : > { %v7216_v30 = vpop.permute.xlu1 %2269 }
 0x3fb   : > { %v2277_v20 = vmul.f32 %v7188_v5, %v7216_v30 }
 0x3fd   : > { %v2284_v40 = vmul.f32 %v7209_v33, %v2277_v20  ;;  %v3002_v20 = vrot.slane %v6157_v14, %v6651_v6 }
 0x3fe   : > { %v7223_v21 = vpop.permute.xlu1 %2325 }
 0x3ff   : > { %2292 = vrot.lane.b32.xlu1 %v2284_v40, %s9469_s7  ;;  %s9483_s7 = smov 94  }
 0x402   : > { %v7225_v47 = vpop.permute.xlu1 %2313 }
 0x406   : > { %v7230_v23 = vpop.permute.xlu1 %2371 }
 0x40a   : > { %v7237_v37 = vpop.permute.xlu1 %2361 }
 0x40b   : > { %v2369_v19 = vmul.f32 %v7188_v5, %v7237_v37 }
 0x40d   : > { %v2376_v42 = vmul.f32 %v7230_v23, %v2369_v19 }
 0x40e   : > { %v7280_v34 = vpop.permute.xlu1 %2405 }
 0x40f   : > { %2384 = vrot.lane.b32.xlu1 %v2376_v42, %s9467_s5  ;;  %s9656_s5 = sld [smem:[#allocation107_spill]]  ;;  %v3006_v42 = vrot.slane %v6157_v14, %v6653_v7 }
 0x412   : > { %v7287_v53 = vpop.permute.xlu1 %2407 }
 0x413   : > { %v2415_v36 = vmul.f32 %v7188_v5, %v7287_v53 }
 0x415   : > { %v2441_v52 = vld [vmem:[%s9656_s5] sm:$0xff]  ;;  %s9485_s5 = smov 125  }
 0x491   : > { %v2050_v25 = vpop.f32.mrf.mxu1 }
 0x492   : > { %v2051_v44 = vadd.f32 %v2050_v25, %v1979_v56  ;;  %v2831_v25 = vrot.slane %v6154_v8, %v6651_v6 }
 0x493   : > { %v2052_v1 = vpop.f32.mrf.mxu1 }
 0x494   : > { %v2057_v4 = vmul.f32 0.2, %v2051_v44  ;;  %v2053_v10 = vadd.f32 %v2052_v1, %v1979_v56  ;;  %vm2055_vm13 = vcmp.ge.f32.partialorder %v2051_v44, 0.0  ;;  %v2553_v56 = vld [vmem:[%s9657_s13 + $0x18] sm:$0xff]  ;;  %v2704_v1 = vld [vmem:[%s9658_s15] sm:$0xf] }
 0x495   : > { %s9497_s13 = smov 51   ;;  %s9672_s15 = smov 5  }
 0x496   : > { %v2058_v24 = vmul.f32 0.2, %v2053_v10  ;;  %vm2056_vm14 = vcmp.ge.f32.partialorder %v2053_v10, 0.0  ;;  %v7213_v13 = vsel %vm2055_vm13, %v2051_v44, %v2057_v4  ;;  %v6155_v44 = vld [vmem:[%s9633_s4 + $0x2] ss:$8 sm:$0x3] }
 0x497   : > { %2061 = vst [vmem:[#allocation2 + $0x10] sm:$0xff] %v7213_v13  ;;  %v2882_v4 = vrot.slane %v6155_v44, %v6651_v6  ;;  %v2886_v28 = vrot.slane %v6155_v44, %v6653_v7  ;;  %v2413_v14 = vmul.f32 %v7280_v34, %v7213_v13  ;;  %vm2340_vm13 = vcmask 785408  }
 0x498   : > { %v7218_v31 = vsel %vm2056_vm14, %v2053_v10, %v2058_v24  ;;  %v6156_v10 = vld [vmem:[%s9633_s4 + $0x3] ss:$8 sm:$0x3]  ;;  %v2835_v24 = vrot.slane %v6154_v8, %v6653_v7  ;;  %v2275_v8 = vmul.f32 %v7211_v43, %v7213_v13  ;;  %vm9586_vm14 = vcmask 777216  }
 0x499   : > { %v2450_v3 = vadd.f32 %v7218_v31, %v7213_v13  ;;  %2062 = vst [vmem:[#allocation2 + $0x18] sm:$0xff] %v7218_v31  ;;  %v2937_v40 = vrot.slane %v6156_v10, %v6653_v7 }
 0x49b   : > { %2451 = vadd.xlane.f32.xlu0 %v2450_v3  ;;  %v2933_v3 = vrot.slane %v6156_v10, %v6651_v6  ;;  %v2164_v10 = vmul.f32 %v7201_v60, %v7218_v31 }
 0x4b1   : > { %2202 = vrot.lane.b32.xlu0 %v2199_v27, %s9640_s11  ;;  %v6162_v27 = vld [vmem:[%s9633_s4 + $0x12] ss:$8 sm:$0x3] }
 0x4b2   : > { %v3246_v19 = vrot.slane %v6162_v27, %v6651_v6 }
 0x4b5   : > { %2315 = vrot.lane.b32.xlu0 %v2312_v57, %s9650_s27  ;;  %v6158_v57 = vld [vmem:[%s9633_s4 + $0x6] ss:$8 sm:$0x3] }
 0x4b6   : > { %v3059_v41 = vrot.slane %v6158_v57, %v6653_v7 }
 0x4b9   : > { %2359 = vrot.lane.b32.xlu0 %v2354_v35, %s9651_s30  ;;  %v3055_v35 = vrot.slane %v6158_v57, %v6651_v6  ;;  %v7480_v57 = vld [vmem:[%s9633_s4 + $0x17] ss:$8 sm:$0x3] }
 0x4bd   : > { %2417 = vperm.xlu0 %6338, %v7058_v9  }
 0x4c1   : > { %6339 = vset.pattern.permute.xlu0 %v6454_v18 }
 0x4c2   : > { %2090 = vperm.xlu0 %6339, %v7058_v9   ;;  %v2455_v9 = vld [vmem:[%s9655_s8] sm:$0xff]  ;;  %s9668_s8 = smov 45  }
 0x4c6   : > { %2130 = vrot.lane.b32.xlu0 %v2124_v17, %s9640_s11  ;;  %v3250_v17 = vrot.slane %v6162_v27, %v6653_v7 }
 0x4ca   : > { %2221 = vrot.lane.b32.xlu0 %v2215_v63, %s9641_s10  ;;  %v6159_v63 = vld [vmem:[%s9633_s4 + $0x7] ss:$8 sm:$0x3] }
 0x524   : > { %v2452_v18 = vpop.xlane.xlu0 %2451 }
 0x525   : > { %v2454_v32 = vmul.f32 0.00390625, %v2452_v18  ;;  %v3106_v18 = vrot.slane %v6159_v63, %v6651_v6 }
 0x527   : > { %6267 = vmatpush3.msra.mxu0 %v2454_v32  ;;  %v6164_v32 = vld [vmem:[%s9633_s4 + $0x14] ss:$8 sm:$0x3] }
 0x528   : > { %6269 = vmatmul.mubr.msk.f32.vlgmr.msra.gmra.mxu0 %vm2463_vm8, %v2455_v9  ;;  %v7273_v46 = vpop.permute.xlu0 %2202  ;;  %v3302_v9 = vrot.slane %v6163_v0, %v6653_v7  ;;  %v7490_v0 = vld [vmem:[%s9633_s4 + $0x24] ss:$8 sm:$0x3] }
 0x529   : > { %2672 = vmatprep.mubr.f32.mxu0 %v7188_v5  ;;  %v2210_v27 = vmul.f32 %v7273_v46, %v7218_v31 }
 0x52c   : > { %v7276_v50 = vpop.permute.xlu0 %2315 }
 0x52d   : > { %v2323_v48 = vmul.f32 %v7188_v5, %v7276_v50 }
 0x52f   : > { %v2330_v51 = vmul.f32 %v7223_v21, %v2323_v48  ;;  %v2113_v48 = vsel %vm859_vm6, %v7193_v58, %v7195_v39  ;;  %v2158_v58 = vsel %vm9584_vm5, %v7199_v59, %v7201_v60 }
 0x530   : > { %v7289_v54 = vpop.permute.xlu0 %2359 }
 0x531   : > { %2338 = vrot.lane.b32.xlu0 %v2330_v51, %s9474_s0  ;;  %s9479_s0 = smov 83   ;;  %v3350_v51 = vrot.slane %v6164_v32, %v6651_v6  ;;  %v2367_v44 = vmul.f32 %v7289_v54, %v7213_v13  ;;  %v2363_v60 = vsel %vm9588_vm1, %v7289_v54, %v7237_v37  ;;  %v2409_v54 = vsel %vm834_vm0, %v7280_v34, %v7287_v53 }
 0x532   : > { %v3354_v34 = vrot.slane %v6164_v32, %v6653_v7 }
 0x535   : > { %2444 = vperm.xlu0 %6339, %v2441_v52   ;;  %v3110_v52 = vrot.slane %v6159_v63, %v6653_v7 }
 0x538   : > { %v7296_v45 = vpop.permute.xlu0 %2417 }
 0x539   : > { %v2422_v55 = vmul.f32 %v7296_v45, %v2415_v36  ;;  %2557 = vperm.xlu0 %6339, %v2550_v29   ;;  %v2118_v36 = vmul.f32 %v2113_v48, %v7213_v13  ;;  %v2204_v29 = vsel %vm943_vm4, %v7205_v61, %v7273_v46  ;;  %v2163_v61 = vmul.f32 %v2158_v58, %v7213_v13  ;;  %v7518_v48 = vld [vmem:[%s9633_s4 + $0x21] ss:$8 sm:$0x3]  ;;  %v7536_v58 = vld [vmem:[%s9633_s4 + $0x30] ss:$8 sm:$0x3] }
 0x53a   : > { %v2317_v46 = vsel %vm9606_vm2, %v7225_v47, %v7276_v50  ;;  %v7464_v50 = vld [vmem:[%s9633_s4 + $0x16] ss:$8 sm:$0x3] }
 0x53b   : > { %2430 = vrot.lane.b32.xlu1 %v2422_v55, %s9483_s7  ;;  %v2209_v55 = vmul.f32 %v2204_v29, %v7213_v13  ;;  %v2170_v59 = vmul.f32 %v7197_v49, %v2163_v61 }
 0x53d   : > { %2567 = vperm.xlu0 %6339, %v2552_v11   ;;  %v2125_v11 = vmul.f32 %v7191_v22, %v2118_v36  ;;  %v7528_v36 = vld [vmem:[%s9633_s4 + $0x27] ss:$8 sm:$0x3] }
 0x53e   : > { %v3824_v29 = vrot.slane %v7528_v36, %v6653_v7 }
 0x53f   : > { %2562 = vperm.xlu1 %6340, %v2551_v12   ;;  %v2239_v12 = vmul.f32 %v7207_v62, %v7213_v13 }
 0x541   : > { %2577 = vperm.xlu0 %6339, %v2554_v2   ;;  %v2216_v2 = vmul.f32 %v7203_v26, %v2209_v55 }
 0x543   : > { %2572 = vperm.xlu1 %6340, %v2553_v56   ;;  %v2240_v56 = vmul.f32 %v7207_v62, %v7218_v31  ;;  %v2271_v62 = vsel %vm9587_vm3, %v7211_v43, %v7216_v30  ;;  %v2420_v43 = vmul.f32 %v7296_v45, %v2413_v14  ;;  %v2119_v30 = vmul.f32 %v7195_v39, %v7218_v31 }
 0x544   : > { %v2217_v39 = vmul.f32 %v7203_v26, %v2210_v27  ;;  %v7455_v26 = vld [vmem:[%s9633_s4 + $0x10] ss:$8 sm:$0x3] }
 0x545   : > { %2836 = vrot.lane.b32.xlu0 %v2831_v25, %s9641_s10  ;;  %v2321_v25 = vmul.f32 %v7225_v47, %v7213_v13  ;;  %v2126_v37 = vmul.f32 %v7191_v22, %v2119_v30  ;;  %v3161_v47 = vrot.slane %v7455_v26, %v6653_v7  ;;  %v7596_v30 = vpop.permute.xlu0 %2090 }
 0x547   : > { %2707 = vperm.xlu1 %6340, %v2704_v1   ;;  %v2282_v1 = vmul.f32 %v7209_v33, %v2275_v8 }
 0x549   : > { %2887 = vrot.lane.b32.xlu0 %v2882_v4, %s9642_s6  ;;  %v2328_v4 = vmul.f32 %v7223_v21, %v2321_v25 }
 0x54b   : > { %2838 = vrot.lane.b32.xlu1 %v2835_v24, %s9641_s10  ;;  %v2374_v24 = vmul.f32 %v7230_v23, %v2367_v44 }
 0x54d   : > { %2938 = vrot.lane.b32.xlu0 %v2933_v3, %s9640_s11  ;;  %v2171_v3 = vmul.f32 %v7197_v49, %v2164_v10 }
 0x54f   : > { %2889 = vrot.lane.b32.xlu1 %v2886_v28, %s9642_s6  ;;  %v2276_v28 = vmul.f32 %v2271_v62, %v7218_v31 }
 0x551   : > { %3007 = vrot.lane.b32.xlu0 %v3002_v20, %s9649_s9  ;;  %v2368_v20 = vmul.f32 %v2363_v60, %v7218_v31  ;;  %v2283_v49 = vmul.f32 %v7209_v33, %v2276_v28  ;;  %v2414_v33 = vmul.f32 %v2409_v54, %v7218_v31  ;;  %v6146_v54 = vld [vmem:[#allocation5] ss:$0 sm:$0xff] }
 0x553   : > { %2940 = vrot.lane.b32.xlu1 %v2937_v40, %s9640_s11  ;;  %v2375_v40 = vmul.f32 %v7230_v23, %v2368_v20  ;;  %v2421_v22 = vmul.f32 %v7296_v45, %v2414_v33  ;;  %v2322_v23 = vmul.f32 %v2317_v46, %v7218_v31  ;;  %v3415_v45 = vrot.slane %v7464_v50, %v6653_v7  ;;  %v7598_v20 = vpop.permute.xlu0 %2130 }
 0x555   : > { %3251 = vrot.lane.b32.xlu0 %v3246_v19, %s9481_s14  ;;  %v2329_v53 = vmul.f32 %v7223_v21, %v2322_v23  ;;  %v7472_v19 = vld [vmem:[%s9633_s4 + $0x23] ss:$8 sm:$0x3]  ;;  %v3411_v23 = vrot.slane %v7464_v50, %v6651_v6  ;;  %v3707_v50 = vrot.slane %v7490_v0, %v6651_v6 }
 0x556   : > { %v3660_v21 = vrot.slane %v7472_v19, %v6653_v7 }
 0x557   : > { %3009 = vrot.lane.b32.xlu1 %v3006_v42, %s9649_s9  ;;  %v3467_v42 = vrot.slane %v7480_v57, %v6653_v7 }
 0x559   : > { %3060 = vrot.lane.b32.xlu0 %v3055_v35, %s9650_s27  ;;  %v7485_v35 = vpop.permute.xlu1 %2077 }
 0x55b   : > { %3253 = vrot.lane.b32.xlu1 %v3250_v17, %s9481_s14  ;;  %v3711_v17 = vrot.slane %v7490_v0, %v6653_v7  ;;  %s9667_s14 = smov 3   ;;  %v3567_v0 = vrot.slane %v7518_v48, %v6651_v6 }
 0x55d   : > { %3303 = vrot.lane.b32.xlu0 %v3298_v38, %s9479_s0  ;;  %v7498_v38 = vld [vmem:[%s9633_s4 + $0x20] ss:$8 sm:$0x3]  ;;  %v7500_v63 = vpop.permute.xlu1 %2079 }
 0x55f   : > { %3062 = vrot.lane.b32.xlu1 %v3059_v41, %s9650_s27  ;;  %v3519_v41 = vrot.slane %v7498_v38, %v6653_v7 }
 0x561   : > { %3111 = vrot.lane.b32.xlu0 %v3106_v18, %s9651_s30  ;;  %v7508_v18 = vld [vmem:[%s9633_s4 + $0x25] ss:$8 sm:$0x3]  ;;  %v7510_v32 = vpop.permute.xlu1 %2175 }
 0x563   : > { %3305 = vrot.lane.b32.xlu1 %v3302_v9, %s9479_s0  ;;  %s9489_s0 = smov 48   ;;  %v3763_v9 = vrot.slane %v7508_v18, %v6653_v7 }
 0x565   : > { %3355 = vrot.lane.b32.xlu0 %v3350_v51, %s9485_s5  ;;  %v3571_v51 = vrot.slane %v7518_v48, %v6653_v7 }
 0x567   : > { %3113 = vrot.lane.b32.xlu1 %v3110_v52, %s9651_s30  ;;  %v7523_v52 = vpop.permute.xlu1 %2292 }
 0x569   : > { %2132 = vrot.lane.b32.xlu0 %v2125_v11, %s9640_s11  ;;  %v3876_v11 = vrot.slane %v7536_v58, %v6653_v7 }
 0x56b   : > { %2243 = vrot.lane.b32.xlu1 %v2239_v12, %s9643_s1  ;;  %v7538_v55 = vpop.permute.xlu1 %2384  ;;  %v7546_v12 = vld [vmem:[%s9633_s4 + $0x31] ss:$8 sm:$0x3] }
 0x56c   : > { %v3927_v61 = vrot.slane %v7546_v12, %v6653_v7  ;;  %v3923_v48 = vrot.slane %v7546_v12, %v6651_v6 }
 0x56d   : > { %2223 = vrot.lane.b32.xlu0 %v2216_v2, %s9641_s10 }
 0x56f   : > { %2177 = vrot.lane.b32.xlu1 %v2170_v59, %s9659_s28  ;;  %v7556_v59 = vld [vmem:[%s9633_s4 + $0x32] ss:$8 sm:$0x3] }
 0x570   : > { %v3978_v8 = vrot.slane %v7556_v59, %v6653_v7 }
 0x571   : > { %2245 = vrot.lane.b32.xlu0 %v2240_v56, %s9643_s1  ;;  %v7564_v56 = vld [vmem:[%s9633_s4] ss:$8 sm:$0x3] }
 0x572   : > { %v2798_v44 = vrot.slane %v7564_v56, %v6653_v7 }
 0x573   : > { %2288 = vrot.lane.b32.xlu1 %v2282_v1, %s9660_s2  ;;  %v7574_v1 = vld [vmem:[%s9633_s4 + $0x11] ss:$8 sm:$0x3] }
 0x574   : > { %v3213_v62 = vrot.slane %v7574_v1, %v6653_v7  ;;  %v3209_v12 = vrot.slane %v7574_v1, %v6651_v6  ;;  %v2081_v1 = vsel %vm817_vm7, %v7485_v35, %v7500_v63 }
 0x575   : > { %2334 = vrot.lane.b32.xlu0 %v2328_v4, %s9661_s25  ;;  %v2779_v4 = vpop.f32.mrf.mxu1 }
 0x577   : > { %2380 = vrot.lane.b32.xlu1 %v2374_v24, %s9662_s26  ;;  %v7584_v24 = vld [vmem:[%s9633_s4 + $0x22] ss:$8 sm:$0x3] }
 0x578   : > { %v3623_v28 = vrot.slane %v7584_v24, %v6653_v7 }
 0x579   : > { %2179 = vrot.lane.b32.xlu0 %v2171_v3, %s9659_s28  ;;  %v2781_v3 = vpop.f32.mrf.mxu1 }
 0x57b   : > { %2426 = vrot.lane.b32.xlu1 %v2420_v43, %s9483_s7 }
 0x57d   : > { %2290 = vrot.lane.b32.xlu0 %v2283_v49, %s9660_s2  ;;  %v7600_v49 = vpop.permute.xlu0 %2221 }
 0x57f   : > { %2134 = vrot.lane.b32.xlu1 %v2126_v37, %s9640_s11 }
 0x581   : > { %2382 = vrot.lane.b32.xlu0 %v2375_v40, %s9662_s26  ;;  %s9714_s26 = smov 125  }
 0x583   : > { %2225 = vrot.lane.b32.xlu1 %v2217_v39, %s9641_s10 }
 0x585   : > { %2428 = vrot.lane.b32.xlu0 %v2421_v22, %s9483_s7  ;;  %s9487_s7 = smov 3   ;;  %v3157_v22 = vrot.slane %v7455_v26, %v6651_v6  ;;  %v3463_v26 = vrot.slane %v7480_v57, %v6651_v6  ;;  %v3759_v57 = vrot.slane %v7508_v18, %v6651_v6  ;;  %v3872_v18 = vrot.slane %v7536_v58, %v6651_v6 }
 0x586   : > { %v2794_v58 = vrot.slane %v7564_v56, %v6651_v6 }
 0x587   : > { %3357 = vrot.lane.b32.xlu1 %v3354_v34, %s9485_s5  ;;  %s9505_s5 = smov 43  }
 0x58b   : > { %2336 = vrot.lane.b32.xlu1 %v2329_v53, %s9661_s25 }
 0x58f   : > { %3164 = vrot.lane.b32.xlu1 %v3161_v47, %s9652_s29 }
 0x593   : > { %3418 = vrot.lane.b32.xlu1 %v3415_v45, %s9487_s7  ;;  %s9491_s7 = smov 45   ;;  %v3656_v45 = vrot.slane %v7472_v19, %v6651_v6  ;;  %v3515_v19 = vrot.slane %v7498_v38, %v6651_v6  ;;  %v3820_v38 = vrot.slane %v7528_v36, %v6651_v6  ;;  %v3974_v36 = vrot.slane %v7556_v59, %v6651_v6 }
 0x594   : > { %v3619_v59 = vrot.slane %v7584_v24, %v6651_v6  ;;  %v2085_v24 = vmul.f32 %v7188_v5, %v7485_v35 }
 0x597   : > { %3663 = vrot.lane.b32.xlu1 %v3660_v21, %s9489_s0  ;;  %s9493_s0 = smov 53  }
 0x59b   : > { %3470 = vrot.lane.b32.xlu1 %v3467_v42, %s9491_s7  ;;  %s9663_s7 = smov 48  }
 0x59f   : > { %3714 = vrot.lane.b32.xlu1 %v3711_v17, %s9493_s0  ;;  %s9495_s0 = smov 123  }
 0x5a3   : > { %3522 = vrot.lane.b32.xlu1 %v3519_v41, %s9663_s7  ;;  %v7602_v27 = vpop.permute.xlu0 %2338 }
 0x5a7   : > { %3766 = vrot.lane.b32.xlu1 %v3763_v9, %s9495_s0  ;;  %s9499_s0 = smov 5  }
 0x5ab   : > { %3574 = vrot.lane.b32.xlu1 %v3571_v51, %s9497_s13  ;;  %s9501_s13 = smov 75  }
 0x5ad   : > { %v7551_v2 = vpop.permute.xlu1 %2430 }
 0x5af   : > { %3827 = vrot.lane.b32.xlu1 %v3824_v29, %s9499_s0  ;;  %s9664_s0 = smov 80  }
 0x5b0   : > { %v7604_v37 = vpop.permute.xlu0 %2444 }
 0x5b3   : > { %3879 = vrot.lane.b32.xlu1 %v3876_v11, %s9501_s13  ;;  %s9503_s13 = smov 85  }
 0x5b4   : > { %v7606_v40 = vpop.permute.xlu0 %2557 }
 0x5b7   : > { %3930 = vrot.lane.b32.xlu1 %v3927_v61, %s9664_s0 }
 0x5b8   : > { %v7610_v34 = vpop.permute.xlu0 %2567 }
 0x5ba   : > { %v7566_v25 = vpop.permute.xlu1 %2562 }
 0x5bb   : > { %3981 = vrot.lane.b32.xlu1 %v3978_v8, %s9503_s13  ;;  %s9507_s13 = smov 77  }
 0x5bc   : > { %v7615_v53 = vpop.permute.xlu0 %2577 }
 0x5be   : > { %v7576_v10 = vpop.permute.xlu1 %2572 }
 0x5bf   : > { %2801 = vrot.lane.b32.xlu1 %v2798_v44, %s9643_s1 }
 0x5c0   : > { %v7625_v21 = vpop.permute.xlu0 %2836 }
 0x5c2   : > { %v2708_v14 = vpop.permute.xlu1 %2707 }
 0x5c3   : > { %3216 = vrot.lane.b32.xlu1 %v3213_v62, %s9507_s13  ;;  %v7589_v60 = vadd.f32 %v2779_v4, %v2708_v14  ;;  %v7591_v43 = vadd.f32 %v2781_v3, %v2708_v14  ;;  %s9671_s13 = smov 51  }
 0x5c4   : > { %v7632_v17 = vpop.permute.xlu0 %2887 }
 0x5c5   : > { %9665 = vst [vmem:[#allocation11_spill] sm:$0xff] %v7589_v60  ;;  %9666 = vst [vmem:[#allocation12_spill] sm:$0xff] %v7591_v43 }
 0x5c6   : > { %2784 = vst [vmem:[#allocation2 + $0x10] sm:$0xf] %v7589_v60  ;;  %2785 = vst [vmem:[#allocation2 + $0x18] sm:$0xf] %v7591_v43  ;;  %v7617_v47 = vpop.permute.xlu1 %2838  ;;  %v2549_v43 = vld [vmem:[%s9431_s12 + $0x20] sm:$0xf] }
 0x5c7   : > { %3626 = vrot.lane.b32.xlu1 %v3623_v28, %s9505_s5  ;;  %s9670_s5 = smov 123   ;;  %v4284_v60 = vld [vmem:[#allocation2] sm:$0xf] }
 0x5c8   : > { %v7642_v9 = vpop.permute.xlu0 %2938 }
 0x5ca   : > { %v7627_v42 = vpop.permute.xlu1 %2889 }
 0x5cc   : > { %v7649_v29 = vpop.permute.xlu0 %3007 }
 0x5ce   : > { %v7634_v41 = vpop.permute.xlu1 %2940 }
 0x5d0   : > { %v7659_v61 = vpop.permute.xlu0 %3251 }
 0x5d2   : > { %v7644_v51 = vpop.permute.xlu1 %3009 }
 0x5d4   : > { %v7666_v44 = vpop.permute.xlu0 %3060 }
 0x5d6   : > { %v7651_v11 = vpop.permute.xlu1 %3253 }
 0x5d8   : > { %v7676_v62 = vpop.permute.xlu0 %3303 }
 0x5da   : > { %v7661_v8 = vpop.permute.xlu1 %3062 }
 0x5dc   : > { %v7683_v14 = vpop.permute.xlu0 %3111 }
 0x5de   : > { %v7668_v4 = vpop.permute.xlu1 %3305 }
 0x5e0   : > { %v7689_v56 = vpop.permute.xlu0 %3355 }
 0x5e2   : > { %v7678_v3 = vpop.permute.xlu1 %3113 }
 0x5e6   : > { %v2244_v28 = vpop.permute.xlu1 %2243 }
 0x5e8   : > { %v2533_v39 = vpop.f32.mrf.mxu0 }
 0x5e9   : > { %v2534_v33 = vadd.f32 %v6146_v54, %v2533_v39  ;;  %v2133_v39 = vpop.permute.xlu0 %2132 }
 0x5ea   : > { %v6270_v46 = vpop.f32.mrf.mxu0  ;;  %v2178_v54 = vpop.permute.xlu1 %2177  ;;  %v2136_v5 = vsel %vm943_vm4, %v7598_v20, %v2133_v39 }
 0x5eb   : > { %2539 = vperm.xlu0 %6339, %v2534_v33  }
 0x5ed   : > { %v2224_v46 = vpop.permute.xlu0 %2223 }
 0x5ee   : > { %v2289_v33 = vpop.permute.xlu1 %2288 }
 0x5ef   : > { %3162 = vrot.lane.b32.xlu0 %v3157_v22, %s9652_s29 }
 0x5f2   : > { %v2381_v22 = vpop.permute.xlu1 %2380 }
 0x5f3   : > { %3416 = vrot.lane.b32.xlu0 %v3411_v23, %s9667_s14  ;;  %v2246_v23 = vpop.permute.xlu0 %2245 }
 0x5f7   : > { %3661 = vrot.lane.b32.xlu0 %v3656_v45, %s9663_s7  ;;  %v2427_v45 = vpop.permute.xlu1 %2426 }
 0x5fb   : > { %3468 = vrot.lane.b32.xlu0 %v3463_v26, %s9668_s8  ;;  %v2335_v26 = vpop.permute.xlu0 %2334 }
 0x5ff   : > { %3712 = vrot.lane.b32.xlu0 %v3707_v50, %s9669_s3  ;;  %v2135_v50 = vpop.permute.xlu1 %2134 }
 0x603   : > { %3520 = vrot.lane.b32.xlu0 %v3515_v19, %s9663_s7  ;;  %v2086_v19 = vmul.f32 %v2081_v1, %v7213_v13  ;;  %v2182_v13 = vsel %vm2181_vm9, %v7510_v32, %v2178_v54 }
 0x607   : > { %3764 = vrot.lane.b32.xlu0 %v3759_v57, %s9670_s5  ;;  %v2087_v57 = vmul.f32 %v7500_v63, %v7218_v31 }
 0x60b   : > { %3572 = vrot.lane.b32.xlu0 %v3567_v0, %s9671_s13  ;;  %v2137_v0 = vsel %vm943_vm4, %v2133_v39, %v2135_v50  ;;  %v2247_v39 = vsel %vm817_vm7, %v2244_v28, %v2246_v23 }
 0x60f   : > { %3825 = vrot.lane.b32.xlu0 %v3820_v38, %s9672_s15  ;;  %v2094_v38 = vmul.f32 %v7596_v30, %v2086_v19 }
 0x613   : > { %3877 = vrot.lane.b32.xlu0 %v3872_v18, %s9673_s24  ;;  %v2095_v18 = vmul.f32 %v7596_v30, %v2087_v57 }
 0x617   : > { %3928 = vrot.lane.b32.xlu0 %v3923_v48, %s9664_s0  ;;  %v2093_v48 = vmul.f32 %v7596_v30, %v2085_v24 }
 0x619   : > { %v2141_v35 = vadd.f32 %v2136_v5, %v2093_v48 }
 0x61b   : > { %3979 = vrot.lane.b32.xlu0 %v3974_v36, %s9674_s20  ;;  %v2180_v36 = vpop.permute.xlu0 %2179  ;;  %v2187_v57 = vadd.f32 %v2182_v13, %v2141_v35 }
 0x61c   : > { %v2183_v31 = vsel %vm2181_vm9, %v2178_v54, %v2180_v36 }
 0x61f   : > { %2799 = vrot.lane.b32.xlu0 %v2794_v58, %s9643_s1  ;;  %v2142_v58 = vadd.f32 %v2137_v0, %v2094_v38  ;;  %v2291_v20 = vpop.permute.xlu0 %2290 }
 0x621   : > { %v2188_v63 = vadd.f32 %v2183_v31, %v2142_v58  ;;  %v2296_v58 = vsel %vm2294_vm10, %v2291_v20, %v7523_v52 }
 0x623   : > { %3214 = vrot.lane.b32.xlu0 %v3209_v12, %s9675_s18  ;;  %v2143_v12 = vadd.f32 %v2135_v50, %v2095_v18  ;;  %v2227_v50 = vsel %vm859_vm6, %v7600_v49, %v2224_v46 }
 0x624   : > { %v2232_v38 = vadd.f32 %v2227_v50, %v2187_v57 }
 0x625   : > { %v2189_v1 = vadd.f32 %v2180_v36, %v2143_v12  ;;  %v2295_v36 = vsel %vm2294_vm10, %v2289_v33, %v2291_v20 }
 0x626   : > { %v2251_v48 = vadd.f32 %v2244_v28, %v2232_v38 }
 0x627   : > { %3624 = vrot.lane.b32.xlu0 %v3619_v59, %s9676_s23  ;;  %v2226_v59 = vpop.permute.xlu1 %2225 }
 0x628   : > { %v2228_v19 = vsel %vm859_vm6, %v2224_v46, %v2226_v59  ;;  %v2234_v0 = vadd.f32 %v2226_v59, %v2189_v1  ;;  %v2383_v46 = vpop.permute.xlu0 %2382  ;;  %v2300_v13 = vadd.f32 %v2289_v33, %v2251_v48  ;;  %v6180_v48 = vld [vmem:[%s9633_s4 + $0x5] ss:$8 sm:$0x3] }
 0x629   : > { %v2233_v24 = vadd.f32 %v2228_v19, %v2188_v63  ;;  %v2387_v35 = vsel %vm9586_vm14, %v2381_v22, %v2383_v46  ;;  %v2388_v28 = vsel %vm9586_vm14, %v2383_v46, %v7538_v55  ;;  %vm3829_vm14 = vcmask 39936  }
 0x62a   : > { %v2253_v54 = vadd.f32 %v2246_v23, %v2234_v0  ;;  %v2346_v63 = vadd.f32 %v2335_v26, %v2300_v13 }
 0x62b   : > { %v7709_v30 = vpop.permute.xlu1 %3357  ;;  %v2252_v32 = vadd.f32 %v2247_v39, %v2233_v24 }
 0x62c   : > { %v2302_v5 = vadd.f32 %v2296_v58, %v2253_v54  ;;  %v2429_v52 = vpop.permute.xlu0 %2428  ;;  %v2392_v24 = vadd.f32 %v2381_v22, %v2346_v63  ;;  %v6183_v22 = vld [vmem:[%s9633_s4 + $0x10] ss:$8 sm:$0x3]  ;;  %v4213_v58 = vrot.slane %v6180_v48, %v6653_v7 }
 0x62d   : > { %v2301_v59 = vadd.f32 %v2295_v36, %v2252_v32  ;;  %v2433_v57 = vsel %vm9585_vm15, %v2427_v45, %v2429_v52  ;;  %v4336_v36 = vrot.slane %v6183_v22, %v6653_v7 }
 0x62e   : > { %v2438_v50 = vadd.f32 %v2427_v45, %v2392_v24  ;;  %v4038_v24 = vld [vmem:[%s9633_s4] ss:$8 sm:$0x3] }
 0x62f   : > { %v2337_v18 = vpop.permute.xlu1 %2336 }
 0x630   : > { %v2341_v12 = vsel %vm2340_vm13, %v2335_v26, %v2337_v18  ;;  %v2342_v49 = vsel %vm2340_vm13, %v2337_v18, %v7602_v27  ;;  %v2434_v27 = vsel %vm9585_vm15, %v2429_v52, %v7551_v2  ;;  %v2447_v32 = vadd.f32 %v7604_v37, %v2438_v50  ;;  %v6182_v2 = vld [vmem:[%s9633_s4 + $0x7] ss:$8 sm:$0x3]  ;;  %v6178_v52 = vld [vmem:[%s9633_s4 + $0x2] ss:$8 sm:$0x3] }
 0x631   : > { %v2347_v31 = vadd.f32 %v2341_v12, %v2301_v59  ;;  %v2348_v23 = vadd.f32 %v2342_v49, %v2302_v5  ;;  %v4290_v45 = vrot.slane %v6182_v2, %v6651_v6  ;;  %v4294_v18 = vrot.slane %v6182_v2, %v6653_v7  ;;  %v6181_v12 = vld [vmem:[%s9633_s4 + $0x6] ss:$8 sm:$0x3]  ;;  %v6179_v5 = vld [vmem:[%s9633_s4 + $0x3] ss:$8 sm:$0x3] }
 0x632   : > { %v4209_v49 = vrot.slane %v6180_v48, %v6651_v6  ;;  %v4255_v46 = vrot.slane %v6181_v12, %v6653_v7  ;;  %v4251_v59 = vrot.slane %v6181_v12, %v6651_v6  ;;  %v4167_v13 = vrot.slane %v6179_v5, %v6653_v7  ;;  %v6192_v50 = vld [vmem:[%s9633_s4 + $0x7] ss:$8 sm:$0x3]  ;;  %v6191_v48 = vld [vmem:[%s9633_s4 + $0x6] ss:$8 sm:$0x3] }
 0x633   : > { %v2393_v1 = vadd.f32 %v2387_v35, %v2347_v31  ;;  %v2394_v19 = vadd.f32 %v2388_v28, %v2348_v23  ;;  %v6177_v31 = vld [vmem:[%s9633_s4 + $0x1] ss:$8 sm:$0x3]  ;;  %v4163_v23 = vrot.slane %v6179_v5, %v6651_v6  ;;  %v7768_v35 = vpop.permute.xlu1 %3164  ;;  %vm3420_vm15 = vcmask 23552  }
 0x634   : > { %v4086_v63 = vrot.slane %v6177_v31, %v6653_v7 }
 0x635   : > { %v2439_v33 = vadd.f32 %v2433_v57, %v2393_v1  ;;  %v2440_v0 = vadd.f32 %v2434_v27, %v2394_v19  ;;  %v4082_v1 = vrot.slane %v6177_v31, %v6651_v6  ;;  %v4128_v27 = vrot.slane %v6178_v52, %v6653_v7 }
 0x637   : > { %v2448_v38 = vadd.f32 %v7604_v37, %v2439_v33  ;;  %v2449_v20 = vadd.f32 %v7604_v37, %v2440_v0  ;;  %v4332_v37 = vrot.slane %v6183_v22, %v6651_v6  ;;  %v7779_v19 = vpop.permute.xlu1 %3418  ;;  %v4124_v33 = vrot.slane %v6178_v52, %v6651_v6 }
 0x638   : > { %v4047_v0 = vrot.slane %v4038_v24, %v6653_v7 }
 0x666   : > { %v2540_v39 = vpop.permute.xlu0 %2539 }
 0x667   : > { %v2543_v55 = vadd.f32 %v2540_v39, %v2448_v38  ;;  %v2544_v26 = vadd.f32 %v2540_v39, %v2449_v20  ;;  %v2542_v54 = vadd.f32 %v2540_v39, %v2447_v32  ;;  %v4043_v38 = vrot.slane %v4038_v24, %v6651_v6  ;;  %v7797_v20 = vpop.permute.xlu1 %3663 }
 0x668   : > { %v4736_v32 = vrot.slane %v6192_v50, %v6651_v6 }
 0x669   : > { %2587 = vrot.lane.b32.xlu0 %v2544_v26, %s9652_s29  ;;  %2585 = vrot.lane.b32.xlu1 %v2543_v55, %s9652_s29  ;;  %v4740_v55 = vrot.slane %v6192_v50, %v6653_v7  ;;  %v6193_v26 = vld [vmem:[%s9633_s4 + $0x10] ss:$8 sm:$0x3]  ;;  %v4484_v50 = vld [vmem:[%s9633_s4] ss:$8 sm:$0x3] }
 0x66a   : > { %v7770_v28 = vpop.permute.xlu0 %3162  ;;  %v4782_v22 = vrot.slane %v6193_v26, %v6653_v7 }
 0x66d   : > { %2583 = vrot.lane.b32.xlu1 %v2542_v54, %s9652_s29  ;;  %4295 = vrot.lane.b32.xlu0 %v4290_v45, %s9651_s30  ;;  %v7808_v54 = vpop.permute.xlu1 %3470  ;;  %v6190_v45 = vld [vmem:[%s9633_s4 + $0x5] ss:$8 sm:$0x3] }
 0x66e   : > { %v7781_v57 = vpop.permute.xlu0 %3416 }
 0x671   : > { %4297 = vrot.lane.b32.xlu1 %v4294_v18, %s9651_s30  ;;  %4337 = vrot.lane.b32.xlu0 %v4332_v37, %s9652_s29  ;;  %v4778_v18 = vrot.slane %v6193_v26, %v6651_v6  ;;  %v4655_v37 = vrot.slane %v6190_v45, %v6651_v6 }
 0x672   : > { %v7799_v39 = vpop.permute.xlu0 %3661 }
 0x675   : > { %4339 = vrot.lane.b32.xlu1 %v4336_v36, %s9652_s29  ;;  %4216 = vrot.lane.b32.xlu0 %v4213_v58, %s9649_s9  ;;  %v4659_v36 = vrot.slane %v6190_v45, %v6653_v7  ;;  %v7826_v58 = vpop.permute.xlu1 %3714  ;;  %v4493_v45 = vrot.slane %v4484_v50, %v6653_v7 }
 0x676   : > { %v7810_v2 = vpop.permute.xlu0 %3468 }
 0x679   : > { %4214 = vrot.lane.b32.xlu1 %v4209_v49, %s9649_s9  ;;  %4258 = vrot.lane.b32.xlu0 %v4255_v46, %s9650_s27  ;;  %v4697_v49 = vrot.slane %v6191_v48, %v6651_v6  ;;  %v6189_v46 = vld [vmem:[%s9633_s4 + $0x3] ss:$8 sm:$0x3]  ;;  %v7837_v5 = vpop.permute.xlu1 %3522 }
 0x67a   : > { %v7828_v12 = vpop.permute.xlu0 %3712  ;;  %v4609_v31 = vrot.slane %v6189_v46, %v6651_v6 }
 0x67d   : > { %4256 = vrot.lane.b32.xlu1 %v4251_v59, %s9650_s27  ;;  %4170 = vrot.lane.b32.xlu0 %v4167_v13, %s9640_s11  ;;  %v4701_v59 = vrot.slane %v6191_v48, %v6653_v7  ;;  %v7855_v24 = vpop.permute.xlu1 %3766 }
 0x67e   : > { %v7839_v13 = vpop.permute.xlu0 %3520 }
 0x681   : > { %4168 = vrot.lane.b32.xlu1 %v4163_v23, %s9640_s11  ;;  %4089 = vrot.lane.b32.xlu0 %v4086_v63, %s9641_s10  ;;  %v6187_v23 = vld [vmem:[%s9633_s4 + $0x1] ss:$8 sm:$0x3]  ;;  %v4613_v63 = vrot.slane %v6189_v46, %v6653_v7 }
 0x682   : > { %v4528_v52 = vrot.slane %v6187_v23, %v6651_v6 }
 0x685   : > { %4087 = vrot.lane.b32.xlu1 %v4082_v1, %s9641_s10  ;;  %4131 = vrot.lane.b32.xlu0 %v4128_v27, %s9642_s6  ;;  %v6188_v1 = vld [vmem:[%s9633_s4 + $0x2] ss:$8 sm:$0x3]  ;;  %v4532_v27 = vrot.slane %v6187_v23, %v6653_v7 }
 0x689   : > { %4129 = vrot.lane.b32.xlu1 %v4124_v33, %s9642_s6  ;;  %4050 = vrot.lane.b32.xlu0 %v4047_v0, %s9643_s1  ;;  %v7857_v33 = vpop.permute.xlu0 %3764  ;;  %v4570_v0 = vrot.slane %v6188_v1, %v6651_v6 }
 0x68d   : > { %4048 = vrot.lane.b32.xlu1 %v4043_v38, %s9643_s1  ;;  %4743 = vrot.lane.b32.xlu0 %v4740_v55, %s9651_s30  ;;  %v4574_v38 = vrot.slane %v6188_v1, %v6653_v7  ;;  %v7866_v55 = vpop.permute.xlu1 %3574  ;;  %v7868_v26 = vpop.permute.xlu0 %3572  ;;  %v6201_v1 = vld [vmem:[%s9633_s4 + $0x6] ss:$8 sm:$0x3] }
 0x68e   : > { %9677 = vst [vmem:[#allocation13_spill] sm:$0xff] %v7866_v55 }
 0x691   : > { %4741 = vrot.lane.b32.xlu1 %v4736_v32, %s9651_s30  ;;  %4785 = vrot.lane.b32.xlu0 %v4782_v22, %s9652_s29  ;;  %v4489_v32 = vrot.slane %v4484_v50, %v6651_v6  ;;  %v6202_v22 = vld [vmem:[%s9633_s4 + $0x7] ss:$8 sm:$0x3]  ;;  %v6199_v50 = vld [vmem:[%s9633_s4 + $0x3] ss:$8 sm:$0x3] }
 0x692   : > { %v5186_v48 = vrot.slane %v6202_v22, %v6653_v7 }
 0x695   : > { %4783 = vrot.lane.b32.xlu1 %v4778_v18, %s9652_s29  ;;  %4660 = vrot.lane.b32.xlu0 %v4655_v37, %s9649_s9  ;;  %v5182_v18 = vrot.slane %v6202_v22, %v6651_v6  ;;  %v6203_v37 = vld [vmem:[%s9633_s4 + $0x10] ss:$8 sm:$0x3] }
 0x696   : > { %v5224_v46 = vrot.slane %v6203_v37, %v6651_v6 }
 0x699   : > { %4662 = vrot.lane.b32.xlu1 %v4659_v36, %s9649_s9  ;;  %4702 = vrot.lane.b32.xlu0 %v4697_v49, %s9650_s27  ;;  %v7884_v36 = vpop.permute.xlu1 %3827  ;;  %v7886_v49 = vpop.permute.xlu0 %3825 }
 0x69d   : > { %4704 = vrot.lane.b32.xlu1 %v4701_v59, %s9650_s27  ;;  %4614 = vrot.lane.b32.xlu0 %v4609_v31, %s9640_s11  ;;  %v6200_v59 = vld [vmem:[%s9633_s4 + $0x5] ss:$8 sm:$0x3]  ;;  %v5228_v31 = vrot.slane %v6203_v37, %v6653_v7  ;;  %v7895_v23 = vpop.permute.xlu1 %3879  ;;  %v5059_v37 = vrot.slane %v6199_v50, %v6653_v7 }
 0x6a1   : > { %4616 = vrot.lane.b32.xlu1 %v4613_v63, %s9640_s11  ;;  %4533 = vrot.lane.b32.xlu0 %v4528_v52, %s9641_s10  ;;  %v7897_v63 = vpop.permute.xlu0 %3877  ;;  %v5101_v52 = vrot.slane %v6200_v59, %v6651_v6 }
 0x6a5   : > { %4535 = vrot.lane.b32.xlu1 %v4532_v27, %s9641_s10  ;;  %4575 = vrot.lane.b32.xlu0 %v4570_v0, %s9642_s6  ;;  %v5105_v27 = vrot.slane %v6200_v59, %v6653_v7  ;;  %v5143_v0 = vrot.slane %v6201_v1, %v6651_v6  ;;  %v7915_v22 = vpop.permute.xlu0 %3928 }
 0x6a9   : > { %4577 = vrot.lane.b32.xlu1 %v4574_v38, %s9642_s6  ;;  %4494 = vrot.lane.b32.xlu0 %v4489_v32, %s9643_s1  ;;  %v5147_v38 = vrot.slane %v6201_v1, %v6653_v7  ;;  %v7913_v32 = vpop.permute.xlu1 %3930 }
 0x6ad   : > { %4496 = vrot.lane.b32.xlu1 %v4493_v45, %s9643_s1  ;;  %5187 = vrot.lane.b32.xlu0 %v5182_v18, %s9651_s30  ;;  %v5055_v45 = vrot.slane %v6199_v50, %v6651_v6  ;;  %v6197_v18 = vld [vmem:[%s9633_s4 + $0x1] ss:$8 sm:$0x3] }
 0x6ae   : > { %v4974_v59 = vrot.slane %v6197_v18, %v6651_v6 }
 0x6b1   : > { %5189 = vrot.lane.b32.xlu1 %v5186_v48, %s9651_s30  ;;  %5229 = vrot.lane.b32.xlu0 %v5224_v46, %s9652_s29  ;;  %v7924_v48 = vpop.permute.xlu1 %3981  ;;  %v7926_v46 = vpop.permute.xlu0 %3979 }
 0x6b2   : > { %9678 = vst [vmem:[#allocation14_spill] sm:$0xff] %v7924_v48  ;;  %9679 = vst [vmem:[#allocation15_spill] sm:$0xff] %v7926_v46 }
 0x6b5   : > { %5231 = vrot.lane.b32.xlu1 %v5228_v31, %s9652_s29  ;;  %5106 = vrot.lane.b32.xlu0 %v5101_v52, %s9649_s9  ;;  %v6198_v31 = vld [vmem:[%s9633_s4 + $0x2] ss:$8 sm:$0x3]  ;;  %v4978_v52 = vrot.slane %v6197_v18, %v6653_v7  ;;  %v7942_v50 = vpop.permute.xlu1 %2801 }
 0x6b6   : > { %v5016_v1 = vrot.slane %v6198_v31, %v6651_v6  ;;  %9680 = vst [vmem:[#allocation16_spill] sm:$0xff] %v7942_v50 }
 0x6b9   : > { %5108 = vrot.lane.b32.xlu1 %v5105_v27, %s9649_s9  ;;  %5148 = vrot.lane.b32.xlu0 %v5143_v0, %s9650_s27  ;;  %v4930_v27 = vld [vmem:[%s9633_s4] ss:$8 sm:$0x3]  ;;  %v5020_v0 = vrot.slane %v6198_v31, %v6653_v7 }
 0x6ba   : > { %v4939_v18 = vrot.slane %v4930_v27, %v6653_v7  ;;  %v2545_v7 = vld [vmem:[%s9431_s12] sm:$0xff] }
 0x6bd   : > { %5150 = vrot.lane.b32.xlu1 %v5147_v38, %s9650_s27  ;;  %5060 = vrot.lane.b32.xlu0 %v5055_v45, %s9640_s11  ;;  %v7944_v38 = vpop.permute.xlu0 %2799  ;;  %v4935_v45 = vrot.slane %v4930_v27, %v6651_v6 }
 0x6be   : > { %9681 = vst [vmem:[#allocation17_spill] sm:$0xff] %v7944_v38 }
 0x6c1   : > { %5062 = vrot.lane.b32.xlu1 %v5059_v37, %s9640_s11  ;;  %4979 = vrot.lane.b32.xlu0 %v4974_v59, %s9641_s10  ;;  %v7950_v37 = vpop.permute.xlu1 %3216  ;;  %v7952_v59 = vpop.permute.xlu0 %3214 }
 0x6c2   : > { %9682 = vst [vmem:[#allocation18_spill] sm:$0xff] %v7950_v37  ;;  %9683 = vst [vmem:[#allocation19_spill] sm:$0xff] %v7952_v59 }
 0x6c5   : > { %4981 = vrot.lane.b32.xlu1 %v4978_v52, %s9641_s10  ;;  %5021 = vrot.lane.b32.xlu0 %v5016_v1, %s9642_s6  ;;  %v7956_v31 = vpop.permute.xlu1 %3626  ;;  %v7958_v52 = vpop.permute.xlu0 %3624 }
 0x6c6   : > { %9684 = vst [vmem:[#allocation20_spill] sm:$0xff] %v7956_v31  ;;  %9685 = vst [vmem:[#allocation21_spill] sm:$0xff] %v7958_v52 }
 0x6c9   : > { %5023 = vrot.lane.b32.xlu1 %v5020_v0, %s9642_s6  ;;  %4940 = vrot.lane.b32.xlu0 %v4935_v45, %s9643_s1  ;;  %v6434_v45 = vld [vmem:[#allocation2] sm:$0xff] }
 0x6cd   : > { %4942 = vrot.lane.b32.xlu1 %v4939_v18, %s9643_s1  ;;  %v2546_v18 = vld [vmem:[%s9431_s12 + $0x8] sm:$0xff] }
 0x6db   : > { %v2588_v16 = vpop.permute.xlu0 %2587  ;;  %v2586_v1 = vpop.permute.xlu1 %2585 }
 0x6dc   : > { %v2590_v15 = vsel %vm834_vm0, %v2586_v1, %v2588_v16 }
 0x6dd   : > { %2638 = vmatprep.subr.mxu0 %v2590_v15  ;;  %v2547_v15 = vld [vmem:[%s9431_s12 + $0x10] sm:$0xff] }
 0x6df   : > { %v2584_v0 = vpop.permute.xlu1 %2583  ;;  %v7973_v16 = vpop.permute.xlu0 %4295 }
 0x6e0   : > { %v2589_v27 = vsel %vm834_vm0, %v2584_v0, %v2586_v1  ;;  %9686 = vst [vmem:[#allocation22_spill] sm:$0xff] %v7973_v16  ;;  %v4326_v1 = vld [vmem:[#allocation2] sm:$0xf]  ;;  %v2548_v0 = vld [vmem:[%s9431_s12 + $0x18] sm:$0xff] }
 0x6e1   : > { %2639 = vmatpush1.msra.mxu0 %v2589_v27  ;;  %v4245_v16 = vld [vmem:[#allocation2] sm:$0xf] }
 0x6e2   : > { %6148 = vmatmul.mubr.msk.f32.vlgmr.msra.gmra.mxu0 %vm2463_vm8, %v2545_v7 }
 0x6e3   : > { %2678 = vmatprep.mubr.f32.mxu0 %v6434_v45  ;;  %v7975_v6 = vpop.permute.xlu1 %4297  ;;  %v7981_v7 = vpop.permute.xlu0 %4337 }
 0x6e4   : > { %9687 = vst [vmem:[#allocation23_spill] sm:$0xff] %v7975_v6  ;;  %9688 = vst [vmem:[#allocation24_spill] sm:$0xff] %v7981_v7  ;;  %v4305_v7 = vmul.f32 %v7975_v6, %v4284_v60 }
 0x6e6   : > { %6149 = vmatmul.mubr.msk.f32.gmra.mxu0 %vm2463_vm8, %v2546_v18 }
 0x6e7   : > { %2684 = vmatprep.mubr.f32.mxu0 %v6434_v45  ;;  %v7983_v27 = vpop.permute.xlu1 %4339 }
 0x6e8   : > { %9689 = vst [vmem:[#allocation25_spill] sm:$0xff] %v7983_v27  ;;  %v4347_v18 = vmul.f32 %v7983_v27, %v4326_v1 }
 0x6ea   : > { %6150 = vmatmul.mubr.msk.f32.gmra.mxu0 %vm2463_vm8, %v2547_v15  ;;  %v7990_v15 = vpop.permute.xlu0 %4216  ;;  %4355 = vrot.lane.b32.xlu1 %v4347_v18, %s9643_s1 }
 0x6eb   : > { %2690 = vmatprep.mubr.f32.mxu0 %v6434_v45  ;;  %9690 = vst [vmem:[#allocation26_spill] sm:$0xff] %v7990_v15  ;;  %v8000_v27 = vpop.permute.xlu1 %4214 }
 0x6ec   : > { %9692 = vst [vmem:[#allocation28_spill] sm:$0xff] %v8000_v27 }
 0x6ee   : > { %6151 = vmatmul.mubr.msk.f32.gmra.mxu0 %vm2463_vm8, %v2548_v0  ;;  %v7995_v52 = vpop.permute.xlu0 %4258  ;;  %v4311_v0 = vrot.slane %v4305_v7, 4 }
 0x6ef   : > { %2696 = vmatprep.mubr.f32.mxu0 %v6434_v45  ;;  %9691 = vst [vmem:[#allocation27_spill] sm:$0xff] %v7995_v52  ;;  %v4266_v1 = vmul.f32 %v7995_v52, %v4245_v16  ;;  %v8004_v18 = vpop.permute.xlu1 %4256 }
 0x6f0   : > { %9694 = vst [vmem:[#allocation30_spill] sm:$0xff] %v8004_v18 }
 0x6f1   : > { %4274 = vrot.lane.b32.xlu0 %v4266_v1, %s9642_s6 }
 0x6f2   : > { %6152 = vmatmul.mubr.msk.f32.gmra.mxu0 %vm2463_vm8, %v2549_v43  ;;  %v8002_v31 = vpop.permute.xlu0 %4170  ;;  %vm3524_vm8 = vcmask 392192  }
 0x6f3   : > { %4899 = vmatprep.mubr.f32.mxu0 %v6434_v45  ;;  %9693 = vst [vmem:[#allocation29_spill] sm:$0xff] %v8002_v31  ;;  %v8008_v43 = vpop.permute.xlu1 %4168 }
 0x6f4   : > { %9696 = vst [vmem:[#allocation32_spill] sm:$0xff] %v8008_v43 }
 0x6f5   : > { %4316 = vrot.lane.b32.xlu0 %v4311_v0, %s9641_s10 }
 0x6f6   : > { %v8006_v59 = vpop.permute.xlu0 %4089 }
 0x6f7   : > { %9695 = vst [vmem:[#allocation31_spill] sm:$0xff] %v8006_v59  ;;  %v8012_v45 = vpop.permute.xlu1 %4087 }
 0x6f8   : > { %9698 = vst [vmem:[#allocation34_spill] sm:$0xff] %v8012_v45 }
 0x6fa   : > { %v8010_v60 = vpop.permute.xlu0 %4131 }
 0x6fb   : > { %9697 = vst [vmem:[#allocation33_spill] sm:$0xff] %v8010_v60  ;;  %v8020_v31 = vpop.permute.xlu1 %4129 }
 0x6fc   : > { %9700 = vst [vmem:[#allocation36_spill] sm:$0xff] %v8020_v31 }
 0x6fe   : > { %v8017_v0 = vpop.permute.xlu0 %4050 }
 0x6ff   : > { %9699 = vst [vmem:[#allocation35_spill] sm:$0xff] %v8017_v0 }
 0x702   : > { %v8024_v6 = vpop.permute.xlu0 %4743 }
 0x703   : > { %9701 = vst [vmem:[#allocation37_spill] sm:$0xff] %v8024_v6 }
 0x7a2   : > { %v2674_v16 = vpop.f32.mrf.mxu0 }
 0x7a3   : > { %v2675_v7 = vadd.f32 %v2674_v16, %v7606_v40  ;;  %v8028_v16 = vpop.permute.xlu1 %4048 }
 0x7a4   : > { %v2676_v1 = vpop.f32.mrf.mxu0  ;;  %9702 = vst [vmem:[#allocation38_spill] sm:$0xff] %v8028_v16 }
 0x7a5   : > { %2812 = vrot.lane.b32.xlu0 %v2675_v7, %s9643_s1  ;;  %3226 = vrot.lane.b32.xlu1 %v2675_v7, %s9675_s18  ;;  %v2677_v27 = vadd.f32 %v2676_v1, %v7606_v40  ;;  %v2847_v59 = vrot.slane %v2675_v7, 4  ;;  %v8032_v40 = vpop.permute.xlu0 %4785 }
 0x7a6   : > { %9703 = vst [vmem:[#allocation39_spill] sm:$0xff] %v8032_v40  ;;  %v2680_v0 = vpop.f32.mrf.mxu0 }
 0x7a7   : > { %v2848_v60 = vrot.slane %v2677_v27, 4  ;;  %v8034_v1 = vpop.permute.xlu1 %4741  ;;  %v2681_v37 = vadd.f32 %v2680_v0, %v7566_v25 }
 0x7a8   : > { %9704 = vst [vmem:[#allocation40_spill] sm:$0xff] %v8034_v1  ;;  %v2682_v18 = vpop.f32.mrf.mxu0 }
 0x7a9   : > { %3636 = vrot.lane.b32.xlu0 %v2675_v7, %s9676_s23  ;;  %2814 = vrot.lane.b32.xlu1 %v2677_v27, %s9643_s1  ;;  %v8038_v7 = vpop.permute.xlu0 %4660  ;;  %v2683_v38 = vadd.f32 %v2682_v18, %v7566_v25  ;;  %v2949_v25 = vrot.slane %v2681_v37, 4 }
 0x7aa   : > { %9705 = vst [vmem:[#allocation41_spill] sm:$0xff] %v8038_v7 }
 0x7ab   : > { %v8042_v52 = vpop.permute.xlu1 %4783  ;;  %v2950_v18 = vrot.slane %v2683_v38, 4 }
 0x7ac   : > { %9706 = vst [vmem:[#allocation42_spill] sm:$0xff] %v8042_v52 }
 0x7ad   : > { %2849 = vrot.lane.b32.xlu0 %v2847_v59, %s9641_s10  ;;  %3638 = vrot.lane.b32.xlu1 %v2677_v27, %s9676_s23 }
 0x7af   : > { %v8050_v1 = vpop.permute.xlu1 %4662 }
 0x7b0   : > { %9708 = vst [vmem:[#allocation44_spill] sm:$0xff] %v8050_v1 }
 0x7b1   : > { %3263 = vrot.lane.b32.xlu0 %v2847_v59, %s9664_s0  ;;  %2851 = vrot.lane.b32.xlu1 %v2848_v60, %s9641_s10 }
 0x7b5   : > { %3672 = vrot.lane.b32.xlu0 %v2847_v59, %s9663_s7  ;;  %3265 = vrot.lane.b32.xlu1 %v2848_v60, %s9664_s0  ;;  %v8048_v59 = vpop.permute.xlu0 %4702 }
 0x7b6   : > { %9707 = vst [vmem:[#allocation43_spill] sm:$0xff] %v8048_v59  ;;  %v2686_v59 = vpop.f32.mrf.mxu0 }
 0x7b7   : > { %v2687_v52 = vadd.f32 %v2686_v59, %v7610_v34 }
 0x7b9   : > { %3228 = vrot.lane.b32.xlu0 %v2677_v27, %s9675_s18  ;;  %3674 = vrot.lane.b32.xlu1 %v2848_v60, %s9663_s7  ;;  %v8054_v27 = vpop.permute.xlu0 %4614  ;;  %v8058_v60 = vpop.permute.xlu1 %4704 }
 0x7ba   : > { %9710 = vst [vmem:[#allocation45_spill] sm:$0xff] %v8054_v27  ;;  %9711 = vst [vmem:[#allocation46_spill] sm:$0xff] %v8058_v60  ;;  %v2688_v60 = vpop.f32.mrf.mxu0 }
 0x7bb   : > { %v2689_v59 = vadd.f32 %v2688_v60, %v7610_v34 }
 0x7bd   : > { %2900 = vrot.lane.b32.xlu0 %v2681_v37, %s9642_s6  ;;  %2902 = vrot.lane.b32.xlu1 %v2683_v38, %s9642_s6  ;;  %v8062_v0 = vpop.permute.xlu0 %4533  ;;  %v8064_v7 = vpop.permute.xlu1 %4616 }
 0x7be   : > { %9712 = vst [vmem:[#allocation47_spill] sm:$0xff] %v8062_v0  ;;  %9713 = vst [vmem:[#allocation48_spill] sm:$0xff] %v8064_v7  ;;  %v3020_v7 = vrot.slane %v2687_v52, 4 }
 0x7c1   : > { %3315 = vrot.lane.b32.xlu0 %v2681_v37, %s9709_s22  ;;  %3317 = vrot.lane.b32.xlu1 %v2683_v38, %s9709_s22  ;;  %v8069_v50 = vpop.permute.xlu0 %4575  ;;  %s6493_s22 = smov 116  }
 0x7c2   : > { %9715 = vst [vmem:[#allocation49_spill] sm:$0xff] %v8069_v50 }
 0x7c5   : > { %3724 = vrot.lane.b32.xlu0 %v2681_v37, %s9669_s3  ;;  %3726 = vrot.lane.b32.xlu1 %v2683_v38, %s9669_s3  ;;  %v8073_v38 = vpop.permute.xlu1 %4535  ;;  %v8075_v37 = vld [vmem:[#allocation2 + $0x10] sm:$0xf]  ;;  %v8080_v6 = vpop.permute.xlu0 %4494  ;;  %s9896_s3 = sld [smem:[#allocation115_spill]] }
 0x7c6   : > { %9716 = vst [vmem:[#allocation50_spill] sm:$0xff] %v8073_v38  ;;  %v2979_v1 = vmul.f32 %v8075_v37, %v2687_v52  ;;  %9717 = vst [vmem:[#allocation51_spill] sm:$0xff] %v8080_v6  ;;  %v2692_v38 = vpop.f32.mrf.mxu0 }
 0x7c7   : > { %v2693_v60 = vadd.f32 %v2692_v38, %v7576_v10 }
 0x7c8   : > { %v2694_v6 = vpop.f32.mrf.mxu0 }
 0x7c9   : > { %2951 = vrot.lane.b32.xlu0 %v2949_v25, %s9640_s11  ;;  %2953 = vrot.lane.b32.xlu1 %v2950_v18, %s9640_s11  ;;  %v8083_v50 = vpop.permute.xlu1 %4577  ;;  %v2695_v38 = vadd.f32 %v2694_v6, %v7576_v10  ;;  %v3122_v6 = vrot.slane %v2693_v60, 4 }
 0x7ca   : > { %9718 = vst [vmem:[#allocation52_spill] sm:$0xff] %v8083_v50 }
 0x7cb   : > { %v3123_v10 = vrot.slane %v2695_v38, 4 }
 0x7cd   : > { %3366 = vrot.lane.b32.xlu0 %v2949_v25, %s9714_s26  ;;  %3368 = vrot.lane.b32.xlu1 %v2950_v18, %s9714_s26  ;;  %v8091_v52 = vpop.permute.xlu1 %4496 }
 0x7ce   : > { %9720 = vst [vmem:[#allocation54_spill] sm:$0xff] %v8091_v52 }
 0x7d1   : > { %3775 = vrot.lane.b32.xlu0 %v2949_v25, %s9670_s5  ;;  %3777 = vrot.lane.b32.xlu1 %v2950_v18, %s9670_s5  ;;  %v3021_v25 = vrot.slane %v2689_v59, 4  ;;  %v8087_v18 = vpop.permute.xlu0 %5187  ;;  %v8098_v50 = vpop.permute.xlu1 %5189 }
 0x7d2   : > { %9719 = vst [vmem:[#allocation53_spill] sm:$0xff] %v8087_v18  ;;  %9722 = vst [vmem:[#allocation56_spill] sm:$0xff] %v8098_v50  ;;  %v2698_v50 = vpop.f32.mrf.mxu0 }
 0x7d5   : > { %3022 = vrot.lane.b32.xlu0 %v3020_v7, %s9649_s9  ;;  %2983 = vrot.lane.b32.xlu1 %v2979_v1, %s9643_s1  ;;  %v8095_v34 = vpop.permute.xlu0 %5229 }
 0x7d6   : > { %9721 = vst [vmem:[#allocation55_spill] sm:$0xff] %v8095_v34 }
 0x7d9   : > { %3428 = vrot.lane.b32.xlu0 %v3020_v7, %s9667_s14  ;;  %3803 = vrot.lane.b32.xlu1 %v2979_v1, %s9676_s23  ;;  %v8105_v52 = vpop.permute.xlu0 %5106 }
 0x7da   : > { %9723 = vst [vmem:[#allocation57_spill] sm:$0xff] %v8105_v52 }
 0x7dd   : > { %3837 = vrot.lane.b32.xlu0 %v3020_v7, %s9672_s15  ;;  %3024 = vrot.lane.b32.xlu1 %v3021_v25, %s9649_s9  ;;  %v8102_v7 = vld [vmem:[#allocation2 + $0x18] sm:$0xf] }
 0x7de   : > { %v2980_v18 = vmul.f32 %v8102_v7, %v2689_v59  ;;  %v3262_v40 = vmul.f32 %v7651_v11, %v8102_v7 }
 0x7e1   : > { %3394 = vrot.lane.b32.xlu0 %v2979_v1, %s9675_s18  ;;  %3430 = vrot.lane.b32.xlu1 %v3021_v25, %s9667_s14  ;;  %v8109_v1 = vpop.permute.xlu1 %5231  ;;  %s6491_s14 = smov 86  }
 0x7e2   : > { %9724 = vst [vmem:[#allocation58_spill] sm:$0xff] %v8109_v1 }
 0x7e5   : > { %3073 = vrot.lane.b32.xlu0 %v2693_v60, %s9650_s27  ;;  %3839 = vrot.lane.b32.xlu1 %v3021_v25, %s9672_s15  ;;  %v8114_v25 = vpop.permute.xlu0 %5148  ;;  %v8116_v34 = vpop.permute.xlu1 %5108  ;;  %s6483_s15 = smov 122  }
 0x7e6   : > { %9725 = vst [vmem:[#allocation59_spill] sm:$0xff] %v8114_v25  ;;  %9726 = vst [vmem:[#allocation60_spill] sm:$0xff] %v8116_v34 }
 0x7e9   : > { %3480 = vrot.lane.b32.xlu0 %v2693_v60, %s9668_s8  ;;  %3396 = vrot.lane.b32.xlu1 %v2980_v18, %s9675_s18  ;;  %v8120_v59 = vpop.permute.xlu0 %5060  ;;  %v8124_v52 = vpop.permute.xlu1 %5150  ;;  %s6484_s18 = smov 118  }
 0x7ea   : > { %9727 = vst [vmem:[#allocation61_spill] sm:$0xff] %v8120_v59  ;;  %9728 = vst [vmem:[#allocation62_spill] sm:$0xff] %v8124_v52  ;;  %v2700_v59 = vpop.f32.mrf.mxu0 }
 0x7ed   : > { %3889 = vrot.lane.b32.xlu0 %v2693_v60, %s9673_s24  ;;  %3075 = vrot.lane.b32.xlu1 %v2695_v38, %s9650_s27  ;;  %v8128_v25 = vpop.permute.xlu0 %4979  ;;  %v8130_v34 = vpop.permute.xlu1 %5062 }
 0x7ee   : > { %9729 = vst [vmem:[#allocation63_spill] sm:$0xff] %v8128_v25  ;;  %9730 = vst [vmem:[#allocation64_spill] sm:$0xff] %v8130_v34  ;;  %v2701_v25 = vadd.f32 %v2700_v59, %v7615_v53 }
 0x7f1   : > { %2985 = vrot.lane.b32.xlu0 %v2980_v18, %s9643_s1  ;;  %3482 = vrot.lane.b32.xlu1 %v2695_v38, %s9668_s8  ;;  %v8138_v60 = vpop.permute.xlu1 %4981  ;;  %s9895_s8 = sld [smem:[#allocation117_spill]] }
 0x7f2   : > { %9732 = vst [vmem:[#allocation66_spill] sm:$0xff] %v8138_v60 }
 0x7f5   : > { %3805 = vrot.lane.b32.xlu0 %v2980_v18, %s9676_s23  ;;  %3891 = vrot.lane.b32.xlu1 %v2695_v38, %s9673_s24  ;;  %v8134_v18 = vpop.permute.xlu0 %5021  ;;  %v2699_v38 = vadd.f32 %v2698_v50, %v7615_v53  ;;  %v8146_v52 = vpop.permute.xlu1 %5023  ;;  %s6485_s23 = smov 38   ;;  %s6486_s24 = smov 74  }
 0x7f6   : > { %9731 = vst [vmem:[#allocation65_spill] sm:$0xff] %v8134_v18  ;;  %9734 = vst [vmem:[#allocation68_spill] sm:$0xff] %v8146_v52 }
 0x7f9   : > { %3124 = vrot.lane.b32.xlu0 %v3122_v6, %s9651_s30  ;;  %3126 = vrot.lane.b32.xlu1 %v3123_v10, %s9651_s30  ;;  %v8144_v34 = vpop.permute.xlu0 %4940  ;;  %v8154_v50 = vpop.permute.xlu1 %4942 }
 0x7fa   : > { %9733 = vst [vmem:[#allocation67_spill] sm:$0xff] %v8144_v34  ;;  %9736 = vst [vmem:[#allocation70_spill] sm:$0xff] %v8154_v50  ;;  %v8164_v34 = vld [vmem:[#allocation2 + $0x8] sm:$0xf] }
 0x7fd   : > { %3532 = vrot.lane.b32.xlu0 %v3122_v6, %s9663_s7  ;;  %3534 = vrot.lane.b32.xlu1 %v3123_v10, %s9663_s7  ;;  %v8158_v59 = vpop.permute.xlu1 %4355 }
 0x7fe   : > { %9738 = vst [vmem:[#allocation72_spill] sm:$0xff] %v8158_v59 }
 0x801   : > { %3939 = vrot.lane.b32.xlu0 %v3122_v6, %s9664_s0  ;;  %3941 = vrot.lane.b32.xlu1 %v3123_v10, %s9664_s0  ;;  %v8150_v6 = vpop.permute.xlu0 %4274 }
 0x802   : > { %9735 = vst [vmem:[#allocation69_spill] sm:$0xff] %v8150_v6 }
 0x805   : > { %3175 = vrot.lane.b32.xlu0 %v2699_v38, %s9652_s29  ;;  %3177 = vrot.lane.b32.xlu1 %v2701_v25, %s9652_s29  ;;  %v8156_v53 = vpop.permute.xlu0 %4316 }
 0x806   : > { %9737 = vst [vmem:[#allocation71_spill] sm:$0xff] %v8156_v53  ;;  %v3260_v53 = vmul.f32 %v7659_v61, %v8164_v34 }
 0x809   : > { %3584 = vrot.lane.b32.xlu0 %v2699_v38, %s9671_s13  ;;  %3586 = vrot.lane.b32.xlu1 %v2701_v25, %s9671_s13 }
 0x80d   : > { %3991 = vrot.lane.b32.xlu0 %v2699_v38, %s9674_s20  ;;  %3993 = vrot.lane.b32.xlu1 %v2701_v25, %s9674_s20  ;;  %v2844_v38 = vmul.f32 %v7625_v21, %v8164_v34 }
 0x817   : > { %v8160_v10 = vpop.permute.xlu0 %2812  ;;  %v8162_v60 = vpop.permute.xlu1 %3226 }
 0x818   : > { %9739 = vst [vmem:[#allocation73_spill] sm:$0xff] %v8160_v10  ;;  %9740 = vst [vmem:[#allocation74_spill] sm:$0xff] %v8162_v60 }
 0x81b   : > { %v8166_v52 = vpop.permute.xlu0 %3636  ;;  %v8168_v18 = vpop.permute.xlu1 %2814 }
 0x81c   : > { %9741 = vst [vmem:[#allocation75_spill] sm:$0xff] %v8166_v52  ;;  %9742 = vst [vmem:[#allocation76_spill] sm:$0xff] %v8168_v18  ;;  %v3669_v52 = vmul.f32 %v7799_v39, %v8164_v34 }
 0x81f   : > { %v2850_v25 = vpop.permute.xlu0 %2849  ;;  %v8172_v6 = vpop.permute.xlu1 %3638 }
 0x820   : > { %9743 = vst [vmem:[#allocation77_spill] sm:$0xff] %v8172_v6  ;;  %v2857_v50 = vmul.f32 %v2850_v25, %v2844_v38  ;;  %v2846_v6 = vmul.f32 %v7617_v47, %v8102_v7 }
 0x822   : > { %2863 = vrot.lane.b32.xlu0 %v2857_v50, %s9640_s11 }
 0x823   : > { %v3264_v59 = vpop.permute.xlu0 %3263  ;;  %v2852_v60 = vpop.permute.xlu1 %2851 }
 0x824   : > { %v3271_v10 = vmul.f32 %v3264_v59, %v3260_v53  ;;  %v2859_v50 = vmul.f32 %v2852_v60, %v2846_v6  ;;  %v2895_v53 = vmul.f32 %v7632_v17, %v8164_v34  ;;  %v2853_v48 = vsel %vm859_vm6, %v2850_v25, %v2852_v60 }
 0x825   : > { %v3314_v25 = vmul.f32 %v7668_v4, %v8102_v7 }
 0x826   : > { %3277 = vrot.lane.b32.xlu0 %v3271_v10, %s9714_s26 }
 0x827   : > { %v3673_v18 = vpop.permute.xlu0 %3672  ;;  %v3266_v1 = vpop.permute.xlu1 %3265 }
 0x828   : > { %v3680_v0 = vmul.f32 %v3673_v18, %v3669_v52  ;;  %v3312_v52 = vmul.f32 %v7676_v62, %v8164_v34  ;;  %v3273_v6 = vmul.f32 %v3266_v1, %v3262_v40  ;;  %v3665_v40 = vsel %vm3524_vm8, %v7799_v39, %v7797_v20 }
 0x82a   : > { %3686 = vrot.lane.b32.xlu1 %v3680_v0, %s9670_s5 }
 0x82b   : > { %v8183_v38 = vpop.permute.xlu0 %3228  ;;  %v3675_v16 = vpop.permute.xlu1 %3674 }
 0x82c   : > { %9744 = vst [vmem:[#allocation78_spill] sm:$0xff] %v8183_v38  ;;  %v3676_v46 = vsel %vm3524_vm8, %v3673_v18, %v3675_v16 }
 0x82e   : > { %2867 = vrot.lane.b32.xlu1 %v2859_v50, %s9640_s11  ;;  %v3721_v50 = vmul.f32 %v7828_v12, %v8164_v34 }
 0x82f   : > { %v2901_v27 = vpop.permute.xlu0 %2900  ;;  %v2903_v31 = vpop.permute.xlu1 %2902 }
 0x830   : > { %v2908_v10 = vmul.f32 %v2901_v27, %v2895_v53  ;;  %v3671_v53 = vmul.f32 %v7797_v20, %v8102_v7 }
 0x832   : > { %2914 = vrot.lane.b32.xlu1 %v2908_v10, %s9659_s28  ;;  %v2840_v10 = vsel %vm859_vm6, %v7625_v21, %v7617_v47  ;;  %v3682_v55 = vmul.f32 %v3675_v16, %v3671_v53  ;;  %v3256_v47 = vsel %vm3255_vm12, %v7659_v61, %v7651_v11  ;;  %v3267_v16 = vsel %vm3255_vm12, %v3264_v59, %v3266_v1 }
 0x833   : > { %v8193_v0 = vpop.permute.xlu0 %3315  ;;  %v8195_v38 = vpop.permute.xlu1 %3317  ;;  %v3261_v18 = vmul.f32 %v3256_v47, %v8075_v37  ;;  %v2891_v1 = vsel %vm9584_vm5, %v7632_v17, %v7627_v42  ;;  %v3717_v47 = vsel %vm3716_vm11, %v7828_v12, %v7826_v58 }
 0x834   : > { %v3323_v45 = vmul.f32 %v8193_v0, %v3312_v52 }
 0x835   : > { %v3272_v61 = vmul.f32 %v3267_v16, %v3261_v18  ;;  %v3722_v16 = vmul.f32 %v3717_v47, %v8075_v37 }
 0x836   : > { %3329 = vrot.lane.b32.xlu0 %v3323_v45, %s6483_s15  ;;  %3281 = vrot.lane.b32.xlu1 %v3273_v6, %s9714_s26  ;;  %v3670_v45 = vmul.f32 %v3665_v40, %v8075_v37  ;;  %v2845_v6 = vmul.f32 %v2840_v10, %v8075_v37  ;;  %v2904_v40 = vsel %vm9584_vm5, %v2901_v27, %v2903_v31  ;;  %vm3307_vm5 = vcmask 678912  }
 0x837   : > { %v3725_v52 = vpop.permute.xlu0 %3724  ;;  %v3727_v15 = vpop.permute.xlu1 %3726  ;;  %v3363_v27 = vmul.f32 %v7689_v56, %v8164_v34 }
 0x838   : > { %v3732_v43 = vmul.f32 %v3725_v52, %v3721_v50  ;;  %v2858_v39 = vmul.f32 %v2853_v48, %v2845_v6  ;;  %v3681_v60 = vmul.f32 %v3676_v46, %v3670_v45  ;;  %v3772_v48 = vmul.f32 %v7857_v33, %v8164_v34 }
 0x839   : > { %v2897_v46 = vmul.f32 %v7627_v42, %v8102_v7  ;;  %v2946_v45 = vmul.f32 %v7642_v9, %v8164_v34  ;;  %v2896_v6 = vmul.f32 %v2891_v1, %v8075_v37 }
 0x83a   : > { %3738 = vrot.lane.b32.xlu1 %v3732_v43, %s6484_s18  ;;  %3690 = vrot.lane.b32.xlu0 %v3682_v55, %s9670_s5  ;;  %v3325_v43 = vmul.f32 %v8195_v38, %v3314_v25 }
 0x83b   : > { %v8219_v21 = vpop.permute.xlu0 %2951  ;;  %v8221_v20 = vpop.permute.xlu1 %2953  ;;  %v2910_v53 = vmul.f32 %v2903_v31, %v2897_v46  ;;  %v3728_v31 = vsel %vm3716_vm11, %v3725_v52, %v3727_v15  ;;  %v3723_v52 = vmul.f32 %v7826_v58, %v8102_v7  ;;  %vm3692_vm11 = vcmask 1006592  }
 0x83c   : > { %v3733_v25 = vmul.f32 %v3728_v31, %v3722_v16  ;;  %v3319_v58 = vsel %vm3307_vm5, %v8193_v0, %v8195_v38  ;;  %v3774_v0 = vmul.f32 %v7855_v24, %v8102_v7 }
 0x83d   : > { %v3734_v1 = vmul.f32 %v3727_v15, %v3723_v52 }
 0x83e   : > { %2865 = vrot.lane.b32.xlu0 %v2858_v39, %s9640_s11  ;;  %3688 = vrot.lane.b32.xlu1 %v3681_v60, %s9670_s5  ;;  %v2909_v39 = vmul.f32 %v2904_v40, %v2896_v6  ;;  %v2959_v60 = vmul.f32 %v8219_v21, %v2946_v45  ;;  %v3365_v45 = vmul.f32 %v7709_v30, %v8102_v7  ;;  %s9748_s5 = smov 94  }
 0x83f   : > { %v8229_v55 = vpop.permute.xlu0 %3366  ;;  %v8231_v11 = vpop.permute.xlu1 %3368 }
 0x840   : > { %v3376_v6 = vmul.f32 %v8231_v11, %v3365_v45 }
 0x842   : > { %3279 = vrot.lane.b32.xlu0 %v3272_v61, %s9714_s26  ;;  %3333 = vrot.lane.b32.xlu1 %v3325_v43, %s6483_s15  ;;  %v3374_v61 = vmul.f32 %v8229_v55, %v3363_v27  ;;  %v2948_v43 = vmul.f32 %v7634_v41, %v8102_v7 }
 0x843   : > { %v3776_v59 = vpop.permute.xlu0 %3775  ;;  %v3778_v50 = vpop.permute.xlu1 %3777 }
 0x844   : > { %v3783_v10 = vmul.f32 %v3776_v59, %v3772_v48  ;;  %v3308_v48 = vsel %vm3307_vm5, %v7676_v62, %v7668_v4  ;;  %v3768_v4 = vsel %vm3692_vm11, %v7857_v33, %v7855_v24  ;;  %v3779_v38 = vsel %vm3692_vm11, %v3776_v59, %v3778_v50 }
 0x845   : > { %v3313_v40 = vmul.f32 %v3308_v48, %v8075_v37  ;;  %v3773_v47 = vmul.f32 %v3768_v4, %v8075_v37  ;;  %v2942_v33 = vsel %vm943_vm4, %v7642_v9, %v7634_v41  ;;  %vm3283_vm5 = vcmask 1022976  }
 0x846   : > { %2918 = vrot.lane.b32.xlu0 %v2910_v53, %s9659_s28  ;;  %3789 = vrot.lane.b32.xlu1 %v3783_v10, %s9663_s7  ;;  %v2961_v53 = vmul.f32 %v8221_v20, %v2948_v43  ;;  %v3785_v27 = vmul.f32 %v3778_v50, %v3774_v0  ;;  %v2955_v24 = vsel %vm943_vm4, %v8219_v21, %v8221_v20 }
 0x847   : > { %v8251_v42 = vpop.permute.xlu0 %3022  ;;  %v8253_v17 = vpop.permute.xlu1 %2983  ;;  %v3324_v15 = vmul.f32 %v3319_v58, %v3313_v40  ;;  %v3784_v59 = vmul.f32 %v3779_v38, %v3773_v47  ;;  %v2947_v16 = vmul.f32 %v2942_v33, %v8075_v37  ;;  %v3359_v41 = vsel %vm3283_vm5, %v7689_v56, %v7709_v30  ;;  %v8327_v56 = vld [vmem:[#allocation2] sm:$0xf] }
 0x848   : > { %v3370_v21 = vsel %vm3283_vm5, %v8229_v55, %v8231_v11  ;;  %v3364_v43 = vmul.f32 %v3359_v41, %v8075_v37  ;;  %v3427_v45 = vmul.f32 %v7779_v19, %v8327_v56  ;;  %v3836_v0 = vmul.f32 %v7884_v36, %v8327_v56 }
 0x849   : > { %v2960_v50 = vmul.f32 %v2955_v24, %v2947_v16  ;;  %v3421_v33 = vsel %vm3420_vm15, %v7781_v57, %v7779_v19  ;;  %v8362_v16 = vld [vmem:[#allocation2 + $0x18] sm:$0xf]  ;;  %v3011_v19 = vsel %vm9587_vm3, %v7649_v29, %v7644_v51 }
 0x84a   : > { %2965 = vrot.lane.b32.xlu0 %v2959_v60, %s9641_s10  ;;  %2916 = vrot.lane.b32.xlu1 %v2909_v39, %s9659_s28  ;;  %v8301_v60 = vld [vmem:[#allocation2 + $0x10] sm:$0xf]  ;;  %v3375_v48 = vmul.f32 %v3370_v21, %v3364_v43  ;;  %v3426_v41 = vmul.f32 %v3421_v33, %v8362_v16  ;;  %v3016_v43 = vmul.f32 %v3011_v19, %v8362_v16  ;;  %s9747_s28 = smov 95  }
 0x84b   : > { %v8261_v18 = vpop.permute.xlu0 %3428  ;;  %v8263_v12 = vpop.permute.xlu1 %3803  ;;  %v3834_v20 = vmul.f32 %v7886_v49, %v8301_v60  ;;  %v3425_v55 = vmul.f32 %v7781_v57, %v8301_v60  ;;  %v3068_v4 = vmul.f32 %v7666_v44, %v8301_v60  ;;  %v3477_v47 = vmul.f32 %v7810_v2, %v8301_v60 }
 0x84c   : > { %9745 = vst [vmem:[#allocation79_spill] sm:$0xff] %v8263_v12 }
 0x84d   : > { %v3436_v37 = vmul.f32 %v8261_v18, %v3425_v55 }
 0x84e   : > { %3380 = vrot.lane.b32.xlu0 %v3374_v61, %s9664_s0  ;;  %3740 = vrot.lane.b32.xlu1 %v3733_v25, %s6484_s18  ;;  %v3015_v25 = vmul.f32 %v7649_v29, %v8301_v60 }
 0x84f   : > { %v8274_v46 = vpop.permute.xlu0 %3837  ;;  %v8277_v10 = vpop.permute.xlu1 %3024 }
 0x850   : > { %v3030_v61 = vmul.f32 %v8251_v42, %v3015_v25 }
 0x852   : > { %3742 = vrot.lane.b32.xlu0 %v3734_v1, %s6484_s18  ;;  %2969 = vrot.lane.b32.xlu1 %v2961_v53, %s9641_s10  ;;  %v3845_v1 = vmul.f32 %v8274_v46, %v3834_v20  ;;  %v3017_v53 = vmul.f32 %v7644_v51, %v8327_v56  ;;  %v3070_v20 = vmul.f32 %v7661_v8, %v8327_v56  ;;  %s9923_s18 = sld [smem:[#allocation119_spill]] }
 0x853   : > { %v8289_v62 = vpop.permute.xlu0 %3394  ;;  %v3431_v39 = vpop.permute.xlu1 %3430  ;;  %v3830_v51 = vsel %vm3829_vm14, %v7886_v49, %v7884_v36  ;;  %v3479_v36 = vmul.f32 %v7808_v54, %v8327_v56  ;;  %v3888_v49 = vmul.f32 %v7895_v23, %v8327_v56 }
 0x854   : > { %v3032_v58 = vmul.f32 %v8277_v10, %v3017_v53  ;;  %v3432_v25 = vsel %vm3420_vm15, %v8261_v18, %v3431_v39  ;;  %v3026_v18 = vsel %vm9587_vm3, %v8251_v42, %v8277_v10  ;;  %v3835_v42 = vmul.f32 %v3830_v51, %v8362_v16 }
 0x855   : > { %v3437_v57 = vmul.f32 %v3432_v25, %v3426_v41  ;;  %v3031_v29 = vmul.f32 %v3026_v18, %v3016_v43  ;;  %v3119_v10 = vmul.f32 %v7683_v14, %v8301_v60  ;;  %vm3881_vm15 = vcmask 613376  }
 0x856   : > { %3331 = vrot.lane.b32.xlu0 %v3324_v15, %s6483_s15  ;;  %3384 = vrot.lane.b32.xlu1 %v3376_v6, %s9664_s0  ;;  %v3438_v15 = vmul.f32 %v3431_v39, %v3427_v45  ;;  %vm3218_vm3 = vcmask 629760  }
 0x857   : > { %v8303_v31 = vpop.permute.xlu0 %3073  ;;  %v3840_v52 = vpop.permute.xlu1 %3839 }
 0x858   : > { %v3081_v6 = vmul.f32 %v8303_v31, %v3068_v4  ;;  %v3841_v53 = vsel %vm3829_vm14, %v8274_v46, %v3840_v52  ;;  %vm3472_vm14 = vcmask 367616  }
 0x85a   : > { %3793 = vrot.lane.b32.xlu0 %v3785_v27, %s9663_s7  ;;  %3791 = vrot.lane.b32.xlu1 %v3784_v59, %s9663_s7  ;;  %v3847_v27 = vmul.f32 %v3840_v52, %v3836_v0  ;;  %s6487_s7 = smov 32   ;;  %v3064_v0 = vsel %vm9606_vm2, %v7666_v44, %v7661_v8  ;;  %v3882_v8 = vsel %vm3881_vm15, %v7897_v63, %v7895_v23 }
 0x85b   : > { %v8316_v9 = vpop.permute.xlu0 %3480  ;;  %v8336_v11 = vpop.permute.xlu1 %3396  ;;  %v3069_v19 = vmul.f32 %v3064_v0, %v8362_v16  ;;  %v3531_v23 = vmul.f32 %v7837_v5, %v8327_v56  ;;  %v4155_v0 = vld [vmem:[#allocation2 + $0x8] sm:$0xf] }
 0x85c   : > { %v3488_v24 = vmul.f32 %v8316_v9, %v3477_v47  ;;  %v3473_v47 = vsel %vm3472_vm14, %v7810_v2, %v7808_v54 }
 0x85e   : > { %2967 = vrot.lane.b32.xlu0 %v2960_v50, %s9641_s10  ;;  %3036 = vrot.lane.b32.xlu1 %v3030_v61, %s9660_s2  ;;  %v3886_v50 = vmul.f32 %v7897_v63, %v8301_v60  ;;  %v3170_v63 = vmul.f32 %v7770_v28, %v8301_v60 }
 0x85f   : > { %v8329_v30 = vpop.permute.xlu0 %3889  ;;  %v3076_v38 = vpop.permute.xlu1 %3075 }
 0x860   : > { %v3897_v21 = vmul.f32 %v8329_v30, %v3886_v50  ;;  %v3077_v25 = vsel %vm9606_vm2, %v8303_v31, %v3076_v38  ;;  %v3478_v50 = vmul.f32 %v3473_v47, %v8362_v16  ;;  %v3121_v31 = vmul.f32 %v7678_v3, %v8327_v56 }
 0x861   : > { %v3082_v44 = vmul.f32 %v3077_v25, %v3069_v19  ;;  %vm3335_vm2 = vcmask 998400  }
 0x862   : > { %3382 = vrot.lane.b32.xlu0 %v3375_v48, %s9664_s0  ;;  %3851 = vrot.lane.b32.xlu1 %v3845_v1, %s6485_s23  ;;  %v3083_v48 = vmul.f32 %v3076_v38, %v3070_v20  ;;  %s6489_s0 = smov 91  }
 0x863   : > { %v8342_v40 = vpop.permute.xlu0 %2985  ;;  %v3483_v61 = vpop.permute.xlu1 %3482 }
 0x864   : > { %v3490_v52 = vmul.f32 %v3483_v61, %v3479_v36  ;;  %v3484_v41 = vsel %vm3472_vm14, %v8316_v9, %v3483_v61  ;;  %v3887_v9 = vmul.f32 %v3882_v8, %v8362_v16  ;;  %vm3576_vm14 = vcmask 416768  }
 0x865   : > { %v3489_v54 = vmul.f32 %v3484_v41, %v3478_v50  ;;  %v9752_v50 = vld [vmem:[#allocation13_spill] sm:$0xff] }
 0x866   : > { %3442 = vrot.lane.b32.xlu0 %v3436_v37, %s6486_s24  ;;  %3040 = vrot.lane.b32.xlu1 %v3032_v58, %s9660_s2  ;;  %v3846_v37 = vmul.f32 %v3841_v53, %v3835_v42  ;;  %v3583_v19 = vmul.f32 %v9752_v50, %v8327_v56 }
 0x867   : > { %v8359_v59 = vpop.permute.xlu0 %3805  ;;  %v3892_v1 = vpop.permute.xlu1 %3891 }
 0x868   : > { %9746 = vst [vmem:[#allocation80_spill] sm:$0xff] %v8359_v59  ;;  %v3899_v45 = vmul.f32 %v3892_v1, %v3888_v49  ;;  %v3893_v2 = vsel %vm3881_vm15, %v8329_v30, %v3892_v1  ;;  %v3525_v30 = vsel %vm3524_vm8, %v7839_v13, %v7837_v5  ;;  %v3581_v1 = vmul.f32 %v7868_v26, %v8301_v60 }
 0x869   : > { %v3932_v5 = vsel %vm3255_vm12, %v7915_v22, %v7913_v32  ;;  %vm9605_vm15 = vcmask 695296  }
 0x86a   : > { %3087 = vrot.lane.b32.xlu1 %v3081_v6, %s9661_s25  ;;  %3446 = vrot.lane.b32.xlu0 %v3438_v15, %s6486_s24  ;;  %v3529_v15 = vmul.f32 %v7839_v13, %v8301_v60  ;;  %v3936_v6 = vmul.f32 %v7915_v22, %v8301_v60  ;;  %v3172_v22 = vmul.f32 %v7768_v35, %v8327_v56 }
 0x86b   : > { %v8377_v39 = vpop.permute.xlu0 %3124  ;;  %v8397_v46 = vpop.permute.xlu1 %3126 }
 0x86c   : > { %v3132_v58 = vmul.f32 %v8377_v39, %v3119_v10  ;;  %v3938_v10 = vmul.f32 %v7913_v32, %v8327_v56  ;;  %v3115_v32 = vsel %vm9588_vm1, %v7683_v14, %v7678_v3  ;;  %v3128_v47 = vsel %vm9588_vm1, %v8377_v39, %v8397_v46  ;;  %v9751_v3 = vld [vmem:[#allocation32_spill] sm:$0xff] }
 0x86d   : > { %v4176_v14 = vmul.f32 %v9751_v3, %v4155_v0  ;;  %vm3628_vm1 = vcmask 351232  }
 0x86e   : > { %3494 = vrot.lane.b32.xlu0 %v3488_v24, %s6487_s7  ;;  %3855 = vrot.lane.b32.xlu1 %v3847_v27, %s6485_s23 }
 0x86f   : > { %v3533_v55 = vpop.permute.xlu0 %3532  ;;  %v3535_v27 = vpop.permute.xlu1 %3534  ;;  %v4182_v8 = vrot.slane %v4176_v14, 4  ;;  %v4520_v14 = vld [vmem:[#allocation2 + $0x8] sm:$0xf] }
 0x870   : > { %v3540_v33 = vmul.f32 %v3533_v55, %v3529_v15  ;;  %v3542_v18 = vmul.f32 %v3535_v27, %v3531_v23  ;;  %v3536_v51 = vsel %vm3524_vm8, %v3533_v55, %v3535_v27  ;;  %v3937_v55 = vmul.f32 %v3932_v5, %v8362_v16  ;;  %v9754_v23 = vld [vmem:[#allocation34_spill] sm:$0xff]  ;;  %v4116_v5 = vld [vmem:[#allocation2 + $0x8] sm:$0xf] }
 0x871   : > { %v3120_v27 = vmul.f32 %v3115_v32, %v8362_v16 }
 0x872   : > { %3903 = vrot.lane.b32.xlu0 %v3897_v21, %s9661_s25  ;;  %3444 = vrot.lane.b32.xlu1 %v3437_v57, %s6486_s24  ;;  %v3898_v57 = vmul.f32 %v3893_v2, %v3887_v9  ;;  %v3134_v21 = vmul.f32 %v8397_v46, %v3121_v31  ;;  %v3166_v46 = vsel %vm834_vm0, %v7770_v28, %v7768_v35  ;;  %v4203_v2 = vld [vmem:[#allocation2] sm:$0xf]  ;;  %v4074_v31 = vld [vmem:[#allocation2 + $0x8] sm:$0xf] }
 0x873   : > { %v3940_v4 = vpop.permute.xlu0 %3939  ;;  %v3942_v38 = vpop.permute.xlu1 %3941  ;;  %v4772_v9 = vld [vmem:[#allocation2] sm:$0xf]  ;;  %v4095_v35 = vmul.f32 %v9754_v23, %v4074_v31  ;;  %v9763_v31 = vld [vmem:[#allocation46_spill] sm:$0xff] }
 0x874   : > { %v3947_v24 = vmul.f32 %v3940_v4, %v3936_v6  ;;  %v3943_v42 = vsel %vm3255_vm12, %v3940_v4, %v3942_v38  ;;  %v3949_v36 = vmul.f32 %v3942_v38, %v3938_v10  ;;  %v9755_v28 = vld [vmem:[#allocation39_spill] sm:$0xff]  ;;  %v9756_v10 = vld [vmem:[#allocation36_spill] sm:$0xff] }
 0x875   : > { %v9791_v23 = vld [vmem:[#allocation16_spill] sm:$0xff] }
 0x876   : > { %3038 = vrot.lane.b32.xlu0 %v3031_v29, %s9660_s2  ;;  %3091 = vrot.lane.b32.xlu1 %v3083_v48, %s9661_s25  ;;  %s6488_s2 = smov 29   ;;  %v3530_v48 = vmul.f32 %v3525_v30, %v8362_v16 }
 0x877   : > { %v3176_v61 = vpop.permute.xlu0 %3175  ;;  %v3178_v43 = vpop.permute.xlu1 %3177 }
 0x878   : > { %v3183_v20 = vmul.f32 %v3176_v61, %v3170_v63  ;;  %v3541_v13 = vmul.f32 %v3536_v51, %v3530_v48  ;;  %v3185_v4 = vmul.f32 %v3178_v43, %v3172_v22  ;;  %v3179_v38 = vsel %vm834_vm0, %v3176_v61, %v3178_v43  ;;  %v4035_v22 = vld [vmem:[#allocation2 + $0x8] sm:$0xf] }
 0x879   : > { %v4793_v63 = vmul.f32 %v9755_v28, %v4772_v9  ;;  %v3577_v61 = vsel %vm3576_vm14, %v7868_v26, %v9752_v50  ;;  %v4101_v51 = vrot.slane %v4095_v35, 4  ;;  %v4137_v26 = vmul.f32 %v9756_v10, %v4116_v5  ;;  %v4730_v50 = vld [vmem:[#allocation2] sm:$0xf] }
 0x87a   : > { %3853 = vrot.lane.b32.xlu0 %v3846_v37, %s6485_s23  ;;  %3138 = vrot.lane.b32.xlu1 %v3132_v58, %s9747_s28  ;;  %v3948_v58 = vmul.f32 %v3943_v42, %v3937_v55  ;;  %v4601_v42 = vld [vmem:[#allocation2 + $0x8] sm:$0xf]  ;;  %v9794_v10 = vld [vmem:[#allocation19_spill] sm:$0xff] }
 0x87b   : > { %v8438_v29 = vpop.permute.xlu0 %3584  ;;  %v3587_v37 = vpop.permute.xlu1 %3586 }
 0x87c   : > { %v3592_v53 = vmul.f32 %v8438_v29, %v3581_v1 }
 0x87e   : > { %3498 = vrot.lane.b32.xlu0 %v3490_v52, %s6487_s7  ;;  %3907 = vrot.lane.b32.xlu1 %v3899_v45, %s9661_s25  ;;  %v9749_v52 = vld [vmem:[#allocation15_spill] sm:$0xff] }
 0x87f   : > { %v8455_v49 = vpop.permute.xlu0 %3991  ;;  %v3988_v45 = vmul.f32 %v9749_v52, %v8301_v60  ;;  %v3994_v6 = vpop.permute.xlu1 %3993 }
 0x881   : > { %v3999_v15 = vmul.f32 %v8455_v49, %v3988_v45  ;;  %v9758_v45 = vld [vmem:[#allocation45_spill] sm:$0xff] }
 0x882   : > { %3546 = vrot.lane.b32.xlu0 %v3540_v33, %s6488_s2  ;;  %3953 = vrot.lane.b32.xlu1 %v3947_v24, %s6489_s0  ;;  %v9750_v33 = vld [vmem:[#allocation14_spill] sm:$0xff]  ;;  %v3133_v24 = vmul.f32 %v3128_v47, %v3120_v27  ;;  %v4622_v32 = vmul.f32 %v9758_v45, %v4601_v42 }
 0x883   : > { %v3990_v60 = vmul.f32 %v9750_v33, %v8327_v56  ;;  %v3171_v56 = vmul.f32 %v3166_v46, %v8362_v16  ;;  %v9760_v46 = vld [vmem:[#allocation47_spill] sm:$0xff] }
 0x884   : > { %v4628_v47 = vrot.slane %v4622_v32, 4  ;;  %v9767_v32 = vld [vmem:[#allocation49_spill] sm:$0xff] }
 0x885   : > { %v4001_v25 = vmul.f32 %v3994_v6, %v3990_v60  ;;  %v3184_v30 = vmul.f32 %v3179_v38, %v3171_v56  ;;  %v3995_v60 = vsel %vm9605_vm15, %v8455_v49, %v3994_v6  ;;  %v5047_v49 = vld [vmem:[#allocation2 + $0x8] sm:$0xf] }
 0x886   : > { %3089 = vrot.lane.b32.xlu0 %v3082_v44, %s9661_s25  ;;  %3496 = vrot.lane.b32.xlu1 %v3489_v54, %s6487_s7  ;;  %v3594_v44 = vmul.f32 %v3587_v37, %v3583_v19  ;;  %v4691_v19 = vld [vmem:[#allocation2] sm:$0xf]  ;;  %s9932_s7 = sld [smem:[#allocation114_spill]] }
 0x887   : > { %v4712_v9 = vmul.f32 %v9763_v31, %v4691_v19  ;;  %v5137_v19 = vld [vmem:[#allocation2] sm:$0xf] }
 0x88a   : > { %3905 = vrot.lane.b32.xlu0 %v3898_v57, %s9661_s25  ;;  %3142 = vrot.lane.b32.xlu1 %v3134_v21, %s9747_s28  ;;  %s6490_s25 = smov 26   ;;  %v9753_v57 = vld [vmem:[#allocation26_spill] sm:$0xff] }
 0x88b   : > { %v4224_v21 = vmul.f32 %v9753_v57, %v4203_v2  ;;  %v9792_v57 = vld [vmem:[#allocation17_spill] sm:$0xff] }
 0x88c   : > { %v2803_v3 = vsel %vm817_vm7, %v9792_v57, %v9791_v23  ;;  %v2807_v12 = vmul.f32 %v9792_v57, %v8164_v34 }
 0x88d   : > { %v4230_v43 = vrot.slane %v4224_v21, 4  ;;  %v4649_v21 = vld [vmem:[#allocation2] sm:$0xf] }
 0x88e   : > { %3189 = vrot.lane.b32.xlu1 %v3183_v20, %s9748_s5  ;;  %3550 = vrot.lane.b32.xlu0 %v3542_v18, %s6488_s2 }
 0x892   : > { %3598 = vrot.lane.b32.xlu0 %v3592_v53, %s6490_s25  ;;  %3548 = vrot.lane.b32.xlu1 %v3541_v13, %s6488_s2  ;;  %v3588_v13 = vsel %vm3576_vm14, %v8438_v29, %v3587_v37  ;;  %v3582_v53 = vmul.f32 %v3577_v61, %v8362_v16  ;;  %v3984_v29 = vsel %vm9605_vm15, %v9749_v52, %v9750_v33  ;;  %v9759_v37 = vld [vmem:[#allocation38_spill] sm:$0xff]  ;;  %vm3744_vm15 = vcmask 965632   ;;  %s9962_s2 = sld [smem:[#allocation8_spill]] }
 0x893   : > { %v3989_v27 = vmul.f32 %v3984_v29, %v8362_v16  ;;  %v9762_v16 = vld [vmem:[#allocation37_spill] sm:$0xff] }
 0x894   : > { %v8480_v39 = vpop.permute.xlu0 %2863  ;;  %v3593_v55 = vmul.f32 %v3588_v13, %v3582_v53  ;;  %v4751_v6 = vmul.f32 %v9762_v16, %v4730_v50  ;;  %v5176_v50 = vld [vmem:[#allocation2] sm:$0xf] }
 0x896   : > { %3957 = vrot.lane.b32.xlu0 %v3949_v36, %s6489_s0  ;;  %3955 = vrot.lane.b32.xlu1 %v3948_v58, %s6489_s0  ;;  %v4757_v61 = vrot.slane %v4751_v6, 4  ;;  %s9936_s0 = sld [smem:[#allocation116_spill]] }
 0x898   : > { %v8496_v18 = vpop.permute.xlu0 %3277 }
 0x89a   : > { %4005 = vrot.lane.b32.xlu0 %v3999_v15, %s6491_s14  ;;  %3193 = vrot.lane.b32.xlu1 %v3185_v4, %s9748_s5  ;;  %v4056_v4 = vmul.f32 %v9759_v37, %v4035_v22  ;;  %v4562_v22 = vld [vmem:[#allocation2 + $0x8] sm:$0xf]  ;;  %v9793_v37 = vld [vmem:[#allocation18_spill] sm:$0xff] }
 0x89b   : > { %v4583_v29 = vmul.f32 %v9767_v32, %v4562_v22 }
 0x89c   : > { %v8476_v41 = vpop.permute.xlu1 %3686 }
 0x89e   : > { %3140 = vrot.lane.b32.xlu0 %v3133_v24, %s9747_s28  ;;  %4009 = vrot.lane.b32.xlu1 %v4001_v25, %s6491_s14  ;;  %v5218_v24 = vld [vmem:[#allocation2] sm:$0xf]  ;;  %v4000_v25 = vmul.f32 %v3995_v60, %v3989_v27  ;;  %v4481_v60 = vld [vmem:[#allocation2 + $0x8] sm:$0xf] }
 0x89f   : > { %v9768_v27 = vld [vmem:[#allocation51_spill] sm:$0xff] }
 0x8a0   : > { %v8487_v54 = vpop.permute.xlu1 %2867 }
 0x8a2   : > { %3602 = vrot.lane.b32.xlu0 %v3594_v44, %s6490_s25  ;;  %4185 = vrot.lane.b32.xlu1 %v4182_v8, %s9649_s9  ;;  %v4541_v8 = vmul.f32 %v9760_v46, %v4520_v14  ;;  %v9761_v44 = vld [vmem:[#allocation58_spill] sm:$0xff]  ;;  %v4502_v14 = vmul.f32 %v9768_v27, %v4481_v60 }
 0x8a3   : > { %v5239_v2 = vmul.f32 %v9761_v44, %v5218_v24 }
 0x8a4   : > { %v8498_v20 = vpop.permute.xlu1 %2914  ;;  %v4547_v35 = vrot.slane %v4541_v8, 4  ;;  %v9769_v8 = vld [vmem:[#allocation56_spill] sm:$0xff] }
 0x8a6   : > { %3191 = vrot.lane.b32.xlu0 %v3184_v30, %s9748_s5  ;;  %4801 = vrot.lane.b32.xlu1 %v4793_v63, %s9643_s1  ;;  %v9765_v63 = vld [vmem:[#allocation61_spill] sm:$0xff] }
 0x8a7   : > { %v5068_v30 = vmul.f32 %v9765_v63, %v5047_v49  ;;  %v9770_v49 = vld [vmem:[#allocation62_spill] sm:$0xff] }
 0x8a8   : > { %v8505_v48 = vpop.permute.xlu0 %3329  ;;  %v8507_v1 = vpop.permute.xlu1 %3281  ;;  %v5158_v6 = vmul.f32 %v9770_v49, %v5137_v19 }
 0x8a9   : > { %v5074_v53 = vrot.slane %v5068_v30, 4 }
 0x8aa   : > { %4235 = vrot.lane.b32.xlu0 %v4230_v43, %s9640_s11  ;;  %4104 = vrot.lane.b32.xlu1 %v4101_v51, %s9651_s30  ;;  %v9766_v43 = vld [vmem:[#allocation44_spill] sm:$0xff] }
 0x8ab   : > { %v4670_v51 = vmul.f32 %v9766_v43, %v4649_v21 }
 0x8ac   : > { %v8515_v58 = vpop.permute.xlu0 %3690  ;;  %v8517_v36 = vpop.permute.xlu1 %3738 }
 0x8ad   : > { %9757 = vst [vmem:[#allocation15_spill] sm:$0xff] %v8517_v36  ;;  %v4676_v42 = vrot.slane %v4670_v51, 4 }
 0x8ae   : > { %4143 = vrot.lane.b32.xlu0 %v4137_v26, %s9650_s27  ;;  %3600 = vrot.lane.b32.xlu1 %v3593_v55, %s6490_s25 }
 0x8b0   : > { %v8526_v15 = vpop.permute.xlu0 %2865  ;;  %v8528_v0 = vpop.permute.xlu1 %3688 }
 0x8b2   : > { %4062 = vrot.lane.b32.xlu0 %v4056_v4, %s9652_s29  ;;  %4631 = vrot.lane.b32.xlu1 %v4628_v47, %s9649_s9 }
 0x8b4   : > { %v8535_v52 = vpop.permute.xlu0 %3279  ;;  %v8537_v33 = vpop.permute.xlu1 %3333 }
 0x8b6   : > { %4007 = vrot.lane.b32.xlu0 %v4000_v25, %s6491_s14  ;;  %5247 = vrot.lane.b32.xlu1 %v5239_v2, %s9643_s1  ;;  %v5197_v2 = vmul.f32 %v9769_v8, %v5176_v50  ;;  %v9775_v50 = vld [vmem:[#allocation65_spill] sm:$0xff]  ;;  %s9944_s14 = sld [smem:[#allocation120_spill]] }
 0x8b8   : > { %v8545_v38 = vpop.permute.xlu0 %2918  ;;  %v8547_v56 = vpop.permute.xlu1 %3789  ;;  %v5203_v30 = vrot.slane %v5197_v2, 4 }
 0x8b9   : > { %9764 = vst [vmem:[#allocation14_spill] sm:$0xff] %v8547_v56  ;;  %v9802_v56 = vld [vmem:[#allocation75_spill] sm:$0xff] }
 0x8ba   : > { %4720 = vrot.lane.b32.xlu0 %v4712_v9, %s9642_s6  ;;  %4550 = vrot.lane.b32.xlu1 %v4547_v35, %s9651_s30  ;;  %v5095_v35 = vld [vmem:[#allocation2] sm:$0xf] }
 0x8bc   : > { %v8553_v5 = vpop.permute.xlu0 %2965  ;;  %v8555_v13 = vpop.permute.xlu1 %2916 }
 0x8be   : > { %4762 = vrot.lane.b32.xlu0 %v4757_v61, %s9641_s10  ;;  %5077 = vrot.lane.b32.xlu1 %v5074_v53, %s9649_s9  ;;  %v9773_v61 = vld [vmem:[#allocation60_spill] sm:$0xff] }
 0x8bf   : > { %v5116_v51 = vmul.f32 %v9773_v61, %v5095_v35 }
 0x8c0   : > { %v8559_v26 = vpop.permute.xlu0 %3380  ;;  %v8561_v55 = vpop.permute.xlu1 %3740 }
 0x8c1   : > { %v5122_v22 = vrot.slane %v5116_v51, 4 }
 0x8c2   : > { %4681 = vrot.lane.b32.xlu0 %v4676_v42, %s9640_s11 }
 0x8c4   : > { %v8565_v4 = vpop.permute.xlu0 %3742  ;;  %v8567_v47 = vpop.permute.xlu1 %2969 }
 0x8c6   : > { %4589 = vrot.lane.b32.xlu0 %v4583_v29, %s9650_s27 }
 0x8c8   : > { %v8571_v24 = vpop.permute.xlu0 %3331  ;;  %v8573_v25 = vpop.permute.xlu1 %3384 }
 0x8ca   : > { %4508 = vrot.lane.b32.xlu0 %v4502_v14, %s9652_s29  ;;  %v5008_v14 = vld [vmem:[#allocation2 + $0x8] sm:$0xf] }
 0x8cb   : > { %v5029_v19 = vmul.f32 %v9775_v50, %v5008_v14 }
 0x8cc   : > { %v8578_v9 = vpop.permute.xlu0 %3793  ;;  %v8580_v21 = vpop.permute.xlu1 %3791 }
 0x8cd   : > { %9771 = vst [vmem:[#allocation13_spill] sm:$0xff] %v8578_v9  ;;  %9772 = vst [vmem:[#allocation81_spill] sm:$0xff] %v8580_v21 }
 0x8ce   : > { %5166 = vrot.lane.b32.xlu0 %v5158_v6, %s9642_s6 }
 0x8d0   : > { %v8584_v53 = vpop.permute.xlu0 %2967  ;;  %v8586_v42 = vpop.permute.xlu1 %3036 }
 0x8d2   : > { %5208 = vrot.lane.b32.xlu0 %v5203_v30, %s9641_s10 }
 0x8d4   : > { %v8589_v29 = vpop.permute.xlu0 %3382  ;;  %v8591_v60 = vpop.permute.xlu1 %3851 }
 0x8d5   : > { %9774 = vst [vmem:[#allocation82_spill] sm:$0xff] %v8591_v60  ;;  %v2809_v60 = vmul.f32 %v9791_v23, %v8102_v7  ;;  %v9799_v23 = vld [vmem:[#allocation76_spill] sm:$0xff] }
 0x8d6   : > { %5127 = vrot.lane.b32.xlu0 %v5122_v22, %s9640_s11 }
 0x8d7   : > { %v2822_v9 = vmul.f32 %v9799_v23, %v2809_v60 }
 0x8d8   : > { %v8595_v6 = vpop.permute.xlu0 %3442  ;;  %v8597_v2 = vpop.permute.xlu1 %3040 }
 0x8d9   : > { %9776 = vst [vmem:[#allocation83_spill] sm:$0xff] %v8595_v6 }
 0x8da   : > { %5035 = vrot.lane.b32.xlu0 %v5029_v19, %s9650_s27 }
 0x8dc   : > { %v8600_v35 = vpop.permute.xlu0 %3446  ;;  %v8602_v61 = vpop.permute.xlu1 %3087 }
 0x8dd   : > { %9777 = vst [vmem:[#allocation84_spill] sm:$0xff] %v8600_v35  ;;  %v9803_v35 = vld [vmem:[#allocation78_spill] sm:$0xff] }
 0x8e0   : > { %v8604_v30 = vpop.permute.xlu0 %3494  ;;  %v8606_v51 = vpop.permute.xlu1 %3855 }
 0x8e1   : > { %9778 = vst [vmem:[#allocation85_spill] sm:$0xff] %v8604_v30  ;;  %9779 = vst [vmem:[#allocation86_spill] sm:$0xff] %v8606_v51  ;;  %v9800_v30 = vld [vmem:[#allocation73_spill] sm:$0xff] }
 0x8e4   : > { %v8608_v8 = vpop.permute.xlu0 %3903  ;;  %v8610_v49 = vpop.permute.xlu1 %3444 }
 0x8e5   : > { %9780 = vst [vmem:[#allocation87_spill] sm:$0xff] %v8608_v8  ;;  %9781 = vst [vmem:[#allocation88_spill] sm:$0xff] %v8610_v49  ;;  %v9795_v8 = vld [vmem:[#allocation20_spill] sm:$0xff]  ;;  %v2870_v49 = vsel %vm943_vm4, %v8526_v15, %v8487_v54 }
 0x8e6   : > { %v3635_v51 = vmul.f32 %v9795_v8, %v8102_v7 }
 0x8e8   : > { %v8612_v22 = vpop.permute.xlu0 %3038  ;;  %v8614_v14 = vpop.permute.xlu1 %3091 }
 0x8ec   : > { %v8616_v63 = vpop.permute.xlu0 %3853  ;;  %v8618_v50 = vpop.permute.xlu1 %3138 }
 0x8ed   : > { %9782 = vst [vmem:[#allocation89_spill] sm:$0xff] %v8616_v63  ;;  %v3225_v63 = vmul.f32 %v9793_v37, %v8102_v7 }
 0x8f0   : > { %v8620_v19 = vpop.permute.xlu0 %3498  ;;  %v8622_v44 = vpop.permute.xlu1 %3907 }
 0x8f1   : > { %9783 = vst [vmem:[#allocation90_spill] sm:$0xff] %v8620_v19  ;;  %9784 = vst [vmem:[#allocation91_spill] sm:$0xff] %v8622_v44  ;;  %v9796_v44 = vld [vmem:[#allocation21_spill] sm:$0xff] }
 0x8f2   : > { %v3633_v19 = vmul.f32 %v9796_v44, %v8164_v34 }
 0x8f4   : > { %v8624_v43 = vpop.permute.xlu0 %3546  ;;  %v8626_v16 = vpop.permute.xlu1 %3953 }
 0x8f5   : > { %9785 = vst [vmem:[#allocation92_spill] sm:$0xff] %v8624_v43  ;;  %9786 = vst [vmem:[#allocation93_spill] sm:$0xff] %v8626_v16  ;;  %v3219_v16 = vsel %vm3218_vm3, %v9794_v10, %v9793_v37  ;;  %v3223_v43 = vmul.f32 %v9794_v10, %v8164_v34  ;;  %v2816_v37 = vsel %vm817_vm7, %v9800_v30, %v9799_v23 }
 0x8f6   : > { %v2820_v10 = vmul.f32 %v9800_v30, %v2807_v12  ;;  %v3236_v12 = vmul.f32 %v9803_v35, %v3225_v63  ;;  %v3694_v63 = vsel %vm3692_vm11, %v8528_v0, %v8515_v58 }
 0x8f8   : > { %v8628_v46 = vpop.permute.xlu0 %3089  ;;  %v8630_v45 = vpop.permute.xlu1 %3496 }
 0x8f9   : > { %9787 = vst [vmem:[#allocation94_spill] sm:$0xff] %v8630_v45  ;;  %v9801_v45 = vld [vmem:[#allocation77_spill] sm:$0xff] }
 0x8fa   : > { %v3640_v7 = vsel %vm3628_vm1, %v9802_v56, %v9801_v45 }
 0x8fc   : > { %v8632_v27 = vpop.permute.xlu0 %3905  ;;  %v8634_v31 = vpop.permute.xlu1 %3142 }
 0x8fd   : > { %9788 = vst [vmem:[#allocation95_spill] sm:$0xff] %v8632_v27  ;;  %v3629_v27 = vsel %vm3628_vm1, %v9796_v44, %v9795_v8  ;;  %v6435_v8 = vld [vmem:[#allocation2 + $0x10] sm:$0xf]  ;;  %v3644_v44 = vmul.f32 %v9802_v56, %v3633_v19  ;;  %v2869_v56 = vsel %vm943_vm4, %v8480_v39, %v8526_v15  ;;  %v2920_v39 = vsel %vm2181_vm9, %v8498_v20, %v8555_v13 }
 0x8fe   : > { %v2808_v57 = vmul.f32 %v6435_v8, %v2803_v3  ;;  %v2874_v15 = vadd.f32 %v2869_v56, %v2820_v10  ;;  %v3291_v20 = vadd.f32 %v8507_v1, %v3236_v12  ;;  %v3336_v10 = vsel %vm3335_vm2, %v8505_v48, %v8571_v24 }
 0x8ff   : > { %v3386_v48 = vsel %vm3255_vm12, %v8559_v26, %v8589_v29 }
 0x900   : > { %v8636_v32 = vpop.permute.xlu0 %3550  ;;  %v8638_v28 = vpop.permute.xlu1 %3189  ;;  %v2821_v21 = vmul.f32 %v2816_v37, %v2808_v57  ;;  %v3043_v57 = vsel %vm2294_vm10, %v8612_v22, %v8597_v2 }
 0x901   : > { %9789 = vst [vmem:[#allocation96_spill] sm:$0xff] %v8636_v32  ;;  %9790 = vst [vmem:[#allocation97_spill] sm:$0xff] %v8638_v28  ;;  %v3224_v28 = vmul.f32 %v6435_v8, %v3219_v16  ;;  %v3646_v16 = vmul.f32 %v9801_v45, %v3635_v51  ;;  %v8697_v45 = vsel %vm3218_vm3, %v8289_v62, %v8336_v11 }
 0x903   : > { %v3700_v51 = vadd.f32 %v8515_v58, %v3646_v16  ;;  %v3746_v58 = vsel %vm3744_vm15, %v8561_v55, %v8565_v4  ;;  %v3093_v16 = vsel %vm2340_vm13, %v8602_v61, %v8628_v46 }
 0x904   : > { %v8657_v59 = vpop.permute.xlu0 %3598  ;;  %v8659_v32 = vpop.permute.xlu1 %3548 }
 0x905   : > { %9797 = vst [vmem:[#allocation16_spill] sm:$0xff] %v8657_v59  ;;  %9798 = vst [vmem:[#allocation17_spill] sm:$0xff] %v8659_v32  ;;  %v3634_v59 = vmul.f32 %v6435_v8, %v3629_v27  ;;  %v9804_v32 = vld [vmem:[#allocation74_spill] sm:$0xff] }
 0x906   : > { %v3230_v6 = vsel %vm3218_vm3, %v9804_v32, %v9803_v35  ;;  %v3234_v34 = vmul.f32 %v9804_v32, %v3223_v43  ;;  %v2921_v43 = vsel %vm2181_vm9, %v8555_v13, %v8545_v38  ;;  %v2876_v32 = vadd.f32 %v8487_v54, %v2822_v9 }
 0x907   : > { %v3645_v3 = vmul.f32 %v3640_v7, %v3634_v59  ;;  %v3235_v36 = vmul.f32 %v3230_v6, %v3224_v28  ;;  %v2875_v59 = vadd.f32 %v2870_v49, %v2821_v21  ;;  %v3693_v28 = vsel %vm3692_vm11, %v8476_v41, %v8528_v0 }
 0x908   : > { %v8682_v27 = vpop.permute.xlu0 %3957  ;;  %v8684_v8 = vpop.permute.xlu1 %3955  ;;  %v2972_v54 = vsel %vm859_vm6, %v8584_v53, %v8567_v47  ;;  %v2927_v49 = vadd.f32 %v8545_v38, %v2876_v32  ;;  %v2987_v41 = vsel %vm817_vm7, %v8253_v17, %v8342_v40  ;;  %v3284_v13 = vsel %vm3283_vm5, %v8496_v18, %v8535_v52 }
 0x909   : > { %v2926_v9 = vadd.f32 %v2921_v43, %v2875_v59  ;;  %v2971_v0 = vsel %vm859_vm6, %v8553_v5, %v8584_v53  ;;  %v3285_v38 = vsel %vm3283_vm5, %v8535_v52, %v8507_v1  ;;  %v2925_v6 = vadd.f32 %v2920_v39, %v2874_v15 }
 0x90a   : > { %v2978_v35 = vadd.f32 %v8567_v47, %v2927_v49  ;;  %v8729_v19 = vadd.f32 %v3693_v28, %v3644_v44  ;;  %v3699_v23 = vadd.f32 %v3694_v63, %v3645_v3  ;;  %vm3448_vm3 = vcmask 605184   ;;  %v9809_v63 = vld [vmem:[#allocation81_spill] sm:$0xff] }
 0x90b   : > { %v2977_v30 = vadd.f32 %v2972_v54, %v2926_v9  ;;  %v3289_v37 = vadd.f32 %v3284_v13, %v3234_v34  ;;  %v3343_v18 = vadd.f32 %v8537_v33, %v3291_v20  ;;  %v3337_v5 = vsel %vm3335_vm2, %v8571_v24, %v8537_v33  ;;  %v9808_v54 = vld [vmem:[#allocation13_spill] sm:$0xff] }
 0x90c   : > { %v8712_v21 = vpop.permute.xlu0 %4005  ;;  %v3194_v60 = vpop.permute.xlu1 %3193  ;;  %v2976_v53 = vadd.f32 %v2971_v0, %v2925_v6  ;;  %vm3500_vm9 = vcmask 261120   ;;  %v3290_v47 = vadd.f32 %v3285_v38, %v3235_v36  ;;  %v3042_v7 = vsel %vm2294_vm10, %v8586_v42, %v8612_v22  ;;  %v9811_v0 = vld [vmem:[#allocation83_spill] sm:$0xff]  ;;  %v9812_v6 = vld [vmem:[#allocation84_spill] sm:$0xff] }
 0x90d   : > { %v2993_v33 = vadd.f32 %v8342_v40, %v2978_v35  ;;  %v3393_v36 = vadd.f32 %v8573_v25, %v3343_v18  ;;  %v2992_v34 = vadd.f32 %v2987_v41, %v2977_v30  ;;  %vm3552_vm11 = vcmask 236544   ;;  %v9813_v35 = vld [vmem:[#allocation97_spill] sm:$0xff] }
 0x90e   : > { %v3342_v44 = vadd.f32 %v3337_v5, %v3290_v47  ;;  %v3387_v3 = vsel %vm3255_vm12, %v8589_v29, %v8573_v25  ;;  %v3094_v40 = vsel %vm2340_vm13, %v8628_v46, %v8614_v14  ;;  %v2991_v2 = vadd.f32 %v8253_v17, %v2976_v53  ;;  %v9807_v17 = vld [vmem:[#allocation15_spill] sm:$0xff]  ;;  %v9816_v5 = vld [vmem:[#allocation14_spill] sm:$0xff] }
 0x90f   : > { %v3048_v24 = vadd.f32 %v3042_v7, %v2992_v34  ;;  %v3049_v22 = vadd.f32 %v3043_v57, %v2993_v33  ;;  %v3752_v25 = vadd.f32 %v8565_v4, %v3700_v51  ;;  %v3341_v43 = vadd.f32 %v3336_v10, %v3289_v37  ;;  %v9817_v47 = vld [vmem:[#allocation94_spill] sm:$0xff] }
 0x910   : > { %v3141_v1 = vpop.permute.xlu0 %3140  ;;  %v8735_v52 = vpop.permute.xlu1 %4009  ;;  %vm9805_vm2 = vcmask 777216   ;;  %v3745_v14 = vsel %vm3744_vm15, %v9807_v17, %v8561_v55  ;;  %v3392_v26 = vadd.f32 %v3387_v3, %v3342_v44  ;;  %v3751_v28 = vadd.f32 %v3746_v58, %v3699_v23  ;;  %v9810_v55 = vld [vmem:[#allocation88_spill] sm:$0xff]  ;;  %v9818_v58 = vld [vmem:[#allocation85_spill] sm:$0xff]  ;;  %v9819_v57 = vld [vmem:[#allocation90_spill] sm:$0xff] }
 0x911   : > { %v3144_v32 = vsel %vm9805_vm2, %v8618_v50, %v3141_v1  ;;  %vm9806_vm10 = vmmov %vm9805_vm2  ;;  %v3099_v29 = vadd.f32 %v3093_v16, %v3048_v24  ;;  %v3100_v59 = vadd.f32 %v3094_v40, %v3049_v22  ;;  %v3404_v39 = vadd.f32 %v8336_v11, %v3393_v36  ;;  %v9820_v44 = vld [vmem:[#allocation17_spill] sm:$0xff]  ;;  %v9821_v3 = vld [vmem:[#allocation92_spill] sm:$0xff] }
 0x912   : > { %v3145_v46 = vsel %vm9806_vm10, %v3141_v1, %v8634_v31  ;;  %v3802_v15 = vadd.f32 %v9808_v54, %v3752_v25  ;;  %v3391_v4 = vadd.f32 %v3386_v48, %v3341_v43  ;;  %v3796_v49 = vsel %vm3524_vm8, %v9809_v63, %v9808_v54  ;;  %v9822_v40 = vld [vmem:[#allocation96_spill] sm:$0xff]  ;;  %v9824_v25 = vld [vmem:[#allocation79_spill] sm:$0xff] }
 0x913   : > { %v3047_v9 = vadd.f32 %v8586_v42, %v2991_v2  ;;  %v3150_v31 = vadd.f32 %v3144_v32, %v3099_v29  ;;  %v3151_v41 = vadd.f32 %v3145_v46, %v3100_v59  ;;  %v3449_v38 = vsel %vm3448_vm3, %v9811_v0, %v9810_v55  ;;  %v9823_v22 = vld [vmem:[#allocation80_spill] sm:$0xff]  ;;  %v9826_v46 = vld [vmem:[#allocation89_spill] sm:$0xff] }
 0x914   : > { %v8764_v12 = vpop.permute.xlu0 %3602  ;;  %v8766_v56 = vpop.permute.xlu1 %4185  ;;  %v3450_v11 = vsel %vm3448_vm3, %v9810_v55, %v9812_v6  ;;  %vm9814_vm12 = vcmask 769024   ;;  %v3403_v23 = vadd.f32 %v8697_v45, %v3392_v26  ;;  %v3795_v53 = vsel %vm3524_vm8, %v9816_v5, %v9809_v63 }
 0x915   : > { %vm9815_vm5 = vmmov %vm9814_vm12  ;;  %v3098_v42 = vadd.f32 %v8602_v61, %v3047_v9  ;;  %v3402_v1 = vadd.f32 %v8289_v62, %v3391_v4  ;;  %v3501_v7 = vsel %vm3500_vm9, %v9818_v58, %v9817_v47  ;;  %v3456_v61 = vadd.f32 %v3450_v11, %v3404_v39  ;;  %v9827_v4 = vld [vmem:[#allocation82_spill] sm:$0xff] }
 0x916   : > { %v3455_v33 = vadd.f32 %v3449_v38, %v3403_v23  ;;  %vm3857_vm15 = vcmask 310272   ;;  %v3750_v36 = vadd.f32 %v3745_v14, %v8729_v19  ;;  %v3801_v34 = vadd.f32 %v3796_v49, %v3751_v28  ;;  %v9825_v19 = vld [vmem:[#allocation86_spill] sm:$0xff]  ;;  %v9828_v49 = vld [vmem:[#allocation16_spill] sm:$0xff]  ;;  %v9830_v38 = vld [vmem:[#allocation95_spill] sm:$0xff] }
 0x917   : > { %v3149_v45 = vadd.f32 %v8618_v50, %v3098_v42  ;;  %v3553_v16 = vsel %vm3552_vm11, %v9821_v3, %v9820_v44  ;;  %v3554_v2 = vsel %vm3552_vm11, %v9820_v44, %v9822_v40  ;;  %vm3604_vm8 = vcmask 211968  }
 0x918   : > { %v3192_v20 = vpop.permute.xlu0 %3191  ;;  %v8782_v13 = vpop.permute.xlu1 %4801  ;;  %v3507_v50 = vadd.f32 %v3501_v7, %v3455_v33  ;;  %v3807_v43 = vsel %vm3628_vm1, %v9824_v25, %v9823_v22  ;;  %v3800_v32 = vadd.f32 %v3795_v53, %v3750_v36  ;;  %v3859_v17 = vsel %vm3857_vm15, %v9826_v46, %v9825_v19  ;;  %v9832_v7 = vld [vmem:[#allocation93_spill] sm:$0xff] }
 0x919   : > { %v3195_v30 = vsel %vm9814_vm12, %v9813_v35, %v3192_v20  ;;  %v3196_v51 = vsel %vm9815_vm5, %v3192_v20, %v3194_v60  ;;  %v3502_v60 = vsel %vm3500_vm9, %v9817_v47, %v9819_v57  ;;  %v3200_v24 = vadd.f32 %v9813_v35, %v3149_v45 }
 0x91a   : > { %v3201_v37 = vadd.f32 %v3195_v30, %v3150_v31  ;;  %v3202_v18 = vadd.f32 %v3196_v51, %v3151_v41  ;;  %v3508_v48 = vadd.f32 %v3502_v60, %v3456_v61  ;;  %vm3959_vm3 = vcmask 744448  }
 0x91b   : > { %v3813_v14 = vadd.f32 %v9823_v22, %v3802_v15  ;;  %v3454_v26 = vadd.f32 %v9811_v0, %v3402_v1  ;;  %v3559_v29 = vadd.f32 %v3553_v16, %v3507_v50  ;;  %v3812_v54 = vadd.f32 %v3807_v43, %v3801_v34  ;;  %v9829_v0 = vld [vmem:[#allocation91_spill] sm:$0xff] }
 0x91c   : > { %v8806_v10 = vpop.permute.xlu0 %4235  ;;  %4025 = vrot.lane.b32.xlu1 %v3201_v37, %s9652_s29  ;;  %4027 = vrot.lane.b32.xlu0 %v3202_v18, %s9652_s29  ;;  %v8810_v62 = vpop.permute.xlu1 %4104  ;;  %v3560_v59 = vadd.f32 %v3554_v2, %v3508_v48  ;;  %v3858_v63 = vsel %vm3857_vm15, %v9827_v4, %v9826_v46  ;;  %v3910_v6 = vsel %vm2340_vm13, %v9830_v38, %v9829_v0  ;;  %vm4011_vm1 = vcmask 703488   ;;  %v9831_v18 = vld [vmem:[#allocation87_spill] sm:$0xff] }
 0x91d   : > { %v3506_v15 = vadd.f32 %v9818_v58, %v3454_v26  ;;  %v3865_v41 = vadd.f32 %v3859_v17, %v3813_v14  ;;  %v3864_v11 = vadd.f32 %v3858_v63, %v3812_v54  ;;  %v3811_v51 = vadd.f32 %v9824_v25, %v3800_v32 }
 0x91e   : > { %v3909_v5 = vsel %vm2340_vm13, %v9831_v18, %v9830_v38  ;;  %v3960_v57 = vsel %vm3959_vm3, %v9832_v7, %v8684_v8  ;;  %vm9837_vm13 = vcmask 121856   ;;  %vm9840_vm11 = vcmask 924672  }
 0x91f   : > { %v3558_v35 = vadd.f32 %v9821_v3, %v3506_v15  ;;  %v3916_v42 = vadd.f32 %v9829_v0, %v3865_v41  ;;  %v3915_v23 = vadd.f32 %v3910_v6, %v3864_v11  ;;  %v3863_v53 = vadd.f32 %v9827_v4, %v3811_v51  ;;  %vm9859_vm5 = vmmov %vm9840_vm11 }
 0x920   : > { %v8828_v28 = vpop.permute.xlu0 %4143  ;;  %4023 = vrot.lane.b32.xlu1 %v3200_v24, %s9652_s29  ;;  %v3601_v39 = vpop.permute.xlu1 %3600  ;;  %vm9846_vm2 = vcmask 130048   ;;  %vm9852_vm12 = vcmask 7168   ;;  %vm9862_vm15 = vmmov %vm9837_vm13 }
 0x921   : > { %v3605_v9 = vsel %vm3604_vm8, %v9828_v49, %v3601_v39  ;;  %v3606_v31 = vsel %vm3604_vm8, %v3601_v39, %v8764_v12  ;;  %v3961_v12 = vsel %vm3959_vm3, %v8684_v8, %v8682_v27  ;;  %v3610_v37 = vadd.f32 %v9828_v49, %v3558_v35  ;;  %vm9871_vm8 = vmmov %vm9846_vm2 }
 0x922   : > { %v3611_v20 = vadd.f32 %v3605_v9, %v3559_v29  ;;  %v3612_v55 = vadd.f32 %v3606_v31, %v3560_v59  ;;  %v3967_v1 = vadd.f32 %v8682_v27, %v3916_v42  ;;  %v3966_v47 = vadd.f32 %v3961_v12, %v3915_v23  ;;  %v9833_v29 = vld [vmem:[#allocation25_spill] sm:$0xff]  ;;  %v9834_v59 = vld [vmem:[#allocation24_spill] sm:$0xff]  ;;  %v9835_v9 = vld [vmem:[#allocation27_spill] sm:$0xff] }
 0x923   : > { %v3914_v33 = vadd.f32 %v3909_v5, %v3863_v53  ;;  %v4341_v39 = vsel %vm834_vm0, %v9834_v59, %v9833_v29  ;;  %v9836_v31 = vld [vmem:[#allocation30_spill] sm:$0xff]  ;;  %vm9874_vm3 = vmmov %vm9852_vm12 }
 0x924   : > { %v8841_v30 = vpop.permute.xlu0 %4062  ;;  %4473 = vrot.lane.b32.xlu1 %v3612_v55, %s9671_s13  ;;  %4471 = vrot.lane.b32.xlu0 %v3611_v20, %s9671_s13  ;;  %v4019_v61 = vadd.f32 %v8735_v52, %v3967_v1  ;;  %v8878_v40 = vpop.permute.xlu1 %4631  ;;  %v4260_v15 = vsel %vm9837_vm13, %v9836_v31, %v9835_v9  ;;  %v9843_v29 = vld [vmem:[#allocation38_spill] sm:$0xff] }
 0x925   : > { %v3965_v34 = vadd.f32 %v3960_v57, %v3914_v33  ;;  %v9838_v33 = vld [vmem:[#allocation33_spill] sm:$0xff]  ;;  %v9845_v9 = vld [vmem:[#allocation22_spill] sm:$0xff] }
 0x928   : > { %v4008_v58 = vpop.permute.xlu0 %4007  ;;  %4469 = vrot.lane.b32.xlu0 %v3610_v37, %s9671_s13  ;;  %v8882_v2 = vpop.permute.xlu1 %5247  ;;  %s9966_s13 = sld [smem:[#allocation122_spill]] }
 0x929   : > { %v4013_v60 = vsel %vm4011_vm1, %v4008_v58, %v8735_v52  ;;  %v4012_v36 = vsel %vm4011_vm1, %v8712_v21, %v4008_v58  ;;  %vm9879_vm1 = vmmov %vm9859_vm5 }
 0x92a   : > { %v4018_v45 = vadd.f32 %v4013_v60, %v3966_v47  ;;  %v4017_v27 = vadd.f32 %v4012_v36, %v3965_v34 }
 0x92c   : > { %4917 = vrot.lane.b32.xlu1 %v4018_v45, %s9674_s20  ;;  %4919 = vrot.lane.b32.xlu0 %v4019_v61, %s9674_s20  ;;  %v8868_v44 = vpop.permute.xlu0 %4720  ;;  %v8886_v48 = vpop.permute.xlu1 %4550  ;;  %v9839_v61 = vld [vmem:[#allocation36_spill] sm:$0xff] }
 0x92d   : > { %v4133_v45 = vsel %vm9840_vm11, %v9839_v61, %v9838_v33  ;;  %vm9890_vm11 = vmmov %vm9846_vm2 }
 0x930   : > { %4915 = vrot.lane.b32.xlu1 %v4017_v27, %s9674_s20  ;;  %v8870_v8 = vpop.permute.xlu0 %4762  ;;  %v8890_v22 = vpop.permute.xlu1 %5077 }
 0x934   : > { %v8872_v3 = vpop.permute.xlu0 %4681 }
 0x938   : > { %v8874_v16 = vpop.permute.xlu0 %4589 }
 0x93c   : > { %v8876_v52 = vpop.permute.xlu0 %4508 }
 0x940   : > { %v8880_v21 = vpop.permute.xlu0 %5166 }
 0x944   : > { %v8884_v50 = vpop.permute.xlu0 %5208 }
 0x948   : > { %v8888_v24 = vpop.permute.xlu0 %5127 }
 0x94c   : > { %v8892_v25 = vpop.permute.xlu0 %5035 }
 0x98e   : > { %v4028_v43 = vpop.permute.xlu0 %4027  ;;  %v4026_v32 = vpop.permute.xlu1 %4025 }
 0x98f   : > { %v4030_v19 = vsel %vm834_vm0, %v4026_v32, %v4028_v43 }
 0x990   : > { %4034 = vst [vmem:[#allocation2 + $0x18] sm:$0xf] %v4030_v19 }
 0x992   : > { %v4024_v46 = vpop.permute.xlu1 %4023 }
 0x993   : > { %v4029_v17 = vsel %vm834_vm0, %v4024_v46, %v4026_v32 }
 0x994   : > { %4033 = vst [vmem:[#allocation2 + $0x10] sm:$0xf] %v4029_v17 }
 0x996   : > { %v4472_v14 = vpop.permute.xlu0 %4471  ;;  %v4474_v26 = vpop.permute.xlu1 %4473 }
 0x997   : > { %v8899_v54 = vld [vmem:[#allocation2 + $0x18] sm:$0xf]  ;;  %v4476_v63 = vsel %vm3576_vm14, %v4472_v14, %v4474_v26 }
 0x998   : > { %v4198_v4 = vld [vmem:[#allocation2 + $0x18] sm:$0xf] }
 0x999   : > { %v4325_v49 = vld [vmem:[#allocation2 + $0x18] sm:$0xf]  ;;  %4200 = vst [vmem:[#allocation3 + $0x8] sm:$0xf] %v4198_v4 }
 0x99a   : > { %v4346_v41 = vmul.f32 %v4341_v39, %v4325_v49  ;;  %v4244_v20 = vld [vmem:[#allocation2 + $0x18] sm:$0xf]  ;;  %v4470_v12 = vpop.permute.xlu0 %4469 }
 0x99b   : > { %v4118_v55 = vld [vmem:[#allocation2 + $0x18] sm:$0xf]  ;;  %v4265_v38 = vmul.f32 %v4260_v15, %v4244_v20  ;;  %v4197_v51 = vld [vmem:[#allocation2 + $0x10] sm:$0xf]  ;;  %v4475_v37 = vsel %vm3576_vm14, %v4470_v12, %v4472_v14  ;;  %vm9841_vm14 = vcmask 695296  }
 0x99c   : > { %v4037_v0 = vld [vmem:[#allocation2 + $0x18] sm:$0xf]  ;;  %4353 = vrot.lane.b32.xlu0 %v4346_v41, %s9643_s1  ;;  %v4324_v42 = vld [vmem:[#allocation2 + $0x10] sm:$0xf]  ;;  %4199 = vst [vmem:[#allocation3 + $0x20] sm:$0xf] %v4197_v51  ;;  %v4139_v27 = vmul.f32 %v9838_v33, %v4118_v55  ;;  %vm9849_vm10 = vmmov %vm9841_vm14 }
 0x99d   : > { %v8905_v6 = vld [vmem:[#allocation2 + $0x18] sm:$0xf]  ;;  %4272 = vrot.lane.b32.xlu1 %v4265_v38, %s9642_s6  ;;  %v4243_v23 = vld [vmem:[#allocation2 + $0x10] sm:$0xf]  ;;  %v4345_v18 = vmul.f32 %v9834_v59, %v4324_v42 }
 0x99e   : > { %v8907_v11 = vld [vmem:[#allocation2 + $0x18] sm:$0xf]  ;;  %v4264_v5 = vmul.f32 %v9836_v31, %v4243_v23  ;;  %v4117_v53 = vld [vmem:[#allocation2 + $0x10] sm:$0xf]  ;;  %v4918_v57 = vpop.permute.xlu1 %4917  ;;  %v4920_v36 = vpop.permute.xlu0 %4919 }
 0x99f   : > { %v4283_v35 = vld [vmem:[#allocation2 + $0x18] sm:$0xf]  ;;  %v4036_v1 = vld [vmem:[#allocation2 + $0x10] sm:$0xf]  ;;  %v4138_v34 = vmul.f32 %v4133_v45, %v4117_v53  ;;  %v4922_v19 = vsel %vm9841_vm14, %v4918_v57, %v4920_v36  ;;  %vm9894_vm14 = vmmov %vm9874_vm3 }
 0x9a0   : > { %4480 = vst [vmem:[#allocation2 + $0x18] sm:$0xf] %v4476_v63  ;;  %v4075_v47 = vld [vmem:[#allocation2 + $0x10] sm:$0xf]  ;;  %4351 = vrot.lane.b32.xlu0 %v4345_v18, %s9643_s1  ;;  %v9842_v26 = vld [vmem:[#allocation35_spill] sm:$0xff]  ;;  %v9848_v18 = vld [vmem:[#allocation32_spill] sm:$0xff] }
 0x9a1   : > { %v4156_v58 = vld [vmem:[#allocation2 + $0x10] sm:$0xf]  ;;  %4270 = vrot.lane.b32.xlu1 %v4264_v5, %s9642_s6  ;;  %v4052_v59 = vsel %vm817_vm7, %v9843_v29, %v9842_v26  ;;  %v9844_v49 = vld [vmem:[#allocation23_spill] sm:$0xff]  ;;  %v4058_v38 = vmul.f32 %v9842_v26, %v4037_v0 }
 0x9a2   : > { %v4201_v7 = vld [vmem:[#allocation2 + $0x10] sm:$0xf]  ;;  %v4299_v31 = vsel %vm9846_vm2, %v9845_v9, %v9844_v49  ;;  %v4916_v15 = vpop.permute.xlu1 %4915  ;;  %v4057_v41 = vmul.f32 %v4052_v59, %v4036_v1  ;;  %vm9899_vm2 = vmmov %vm9879_vm1 }
 0x9a3   : > { %v4282_v60 = vld [vmem:[#allocation2 + $0x10] sm:$0xf]  ;;  %v4304_v12 = vmul.f32 %v4299_v31, %v4283_v35  ;;  %v4921_v53 = vsel %vm9849_vm10, %v4916_v15, %v4918_v57  ;;  %v9851_v35 = vld [vmem:[#allocation28_spill] sm:$0xff]  ;;  %v9853_v57 = vld [vmem:[#allocation31_spill] sm:$0xff] }
 0x9a4   : > { %4479 = vst [vmem:[#allocation2 + $0x10] sm:$0xf] %v4475_v37  ;;  %4145 = vrot.lane.b32.xlu0 %v4138_v34, %s9650_s27  ;;  %v4303_v20 = vmul.f32 %v9845_v9, %v4282_v60  ;;  %v9847_v37 = vld [vmem:[#allocation29_spill] sm:$0xff]  ;;  %v9850_v0 = vld [vmem:[#allocation26_spill] sm:$0xff]  ;;  %vm9900_vm10 = vmmov %vm9879_vm1 }
 0x9a5   : > { %4147 = vrot.lane.b32.xlu1 %v4139_v27, %s9650_s27  ;;  %v4172_v5 = vsel %vm943_vm4, %v9848_v18, %v9847_v37  ;;  %v4218_v61 = vsel %vm9852_vm12, %v9851_v35, %v9850_v0  ;;  %v9854_v59 = vld [vmem:[#allocation34_spill] sm:$0xff]  ;;  %v9858_v0 = vld [vmem:[#allocation49_spill] sm:$0xff]  ;;  %vm9901_vm12 = vmmov %vm9837_vm13 }
 0x9a6   : > { %v4309_v45 = vrot.slane %v4303_v20, 4  ;;  %v4177_v36 = vmul.f32 %v4172_v5, %v4156_v58  ;;  %v4223_v26 = vmul.f32 %v4218_v61, %v8907_v11  ;;  %v4091_v49 = vsel %vm859_vm6, %v9854_v59, %v9853_v57  ;;  %v9861_v61 = vld [vmem:[#allocation43_spill] sm:$0xff]  ;;  %v9865_v59 = vld [vmem:[#allocation40_spill] sm:$0xff] }
 0x9a7   : > { %v8920_v43 = vld [vmem:[#allocation2 + $0x18] sm:$0xf]  ;;  %v4096_v31 = vmul.f32 %v4091_v49, %v4075_v47  ;;  %v4222_v58 = vmul.f32 %v9851_v35, %v4201_v7  ;;  %v4178_v20 = vmul.f32 %v9847_v37, %v8905_v6  ;;  %v4097_v7 = vmul.f32 %v9853_v57, %v8899_v54  ;;  %v9857_v37 = vld [vmem:[#allocation52_spill] sm:$0xff] }
 0x9a8   : > { %v8922_v32 = vld [vmem:[#allocation2 + $0x18] sm:$0xf]  ;;  %4064 = vrot.lane.b32.xlu0 %v4057_v41, %s9652_s29  ;;  %v4183_v9 = vrot.slane %v4177_v36, 4  ;;  %v4229_v15 = vrot.slane %v4223_v26, 4  ;;  %v4579_v35 = vsel %vm9859_vm5, %v9858_v0, %v9857_v37  ;;  %vm9902_vm5 = vmmov %vm9901_vm12 }
 0x9a9   : > { %v8926_v46 = vld [vmem:[#allocation2 + $0x18] sm:$0xf]  ;;  %4066 = vrot.lane.b32.xlu1 %v4058_v38, %s9652_s29  ;;  %v4102_v11 = vrot.slane %v4096_v31, 4  ;;  %v4228_v41 = vrot.slane %v4222_v58, 4  ;;  %v4184_v5 = vrot.slane %v4178_v20, 4  ;;  %v4103_v6 = vrot.slane %v4097_v7, 4 }
 0x9aa   : > { %v4771_v17 = vld [vmem:[#allocation2 + $0x18] sm:$0xf]  ;;  %v9866_v31 = vld [vmem:[#allocation48_spill] sm:$0xff] }
 0x9ab   : > { %v4690_v14 = vld [vmem:[#allocation2 + $0x18] sm:$0xf]  ;;  %v8946_v51 = vld [vmem:[#allocation2 + $0x10] sm:$0xf] }
 0x9ac   : > { %v8932_v39 = vld [vmem:[#allocation2 + $0x18] sm:$0xf]  ;;  %v4770_v42 = vld [vmem:[#allocation2 + $0x10] sm:$0xf]  ;;  %4312 = vrot.lane.b32.xlu0 %v4309_v45, %s9641_s10 }
 0x9ad   : > { %v8934_v4 = vld [vmem:[#allocation2 + $0x18] sm:$0xf]  ;;  %v4563_v23 = vld [vmem:[#allocation2 + $0x10] sm:$0xf] }
 0x9ae   : > { %v8936_v63 = vld [vmem:[#allocation2 + $0x18] sm:$0xf]  ;;  %v4482_v1 = vld [vmem:[#allocation2 + $0x10] sm:$0xf]  ;;  %v4584_v54 = vmul.f32 %v4579_v35, %v4563_v23 }
 0x9af   : > { %v8942_v55 = vld [vmem:[#allocation2 + $0x18] sm:$0xf]  ;;  %v4689_v60 = vld [vmem:[#allocation2 + $0x10] sm:$0xf] }
 0x9b0   : > { %4926 = vst [vmem:[#allocation2 + $0x18] sm:$0xf] %v4922_v19  ;;  %v4728_v33 = vld [vmem:[#allocation2 + $0x10] sm:$0xf]  ;;  %v4310_v19 = vrot.slane %v4304_v12, 4  ;;  %4187 = vrot.lane.b32.xlu0 %v4183_v9, %s9649_s9  ;;  %v9855_v38 = vld [vmem:[#allocation39_spill] sm:$0xff]  ;;  %v4710_v9 = vmul.f32 %v9861_v61, %v4689_v60 }
 0x9b1   : > { %v4602_v34 = vld [vmem:[#allocation2 + $0x10] sm:$0xf]  ;;  %v9864_v26 = vld [vmem:[#allocation51_spill] sm:$0xff]  ;;  %v4749_v49 = vmul.f32 %v9865_v59, %v4728_v33 }
 0x9b2   : > { %v4521_v27 = vld [vmem:[#allocation2 + $0x10] sm:$0xf]  ;;  %4314 = vrot.lane.b32.xlu1 %v4310_v19, %s9641_s10  ;;  %v9876_v0 = vld [vmem:[#allocation55_spill] sm:$0xff] }
 0x9b3   : > { %v4647_v29 = vld [vmem:[#allocation2 + $0x10] sm:$0xf] }
 0x9b4   : > { %4925 = vst [vmem:[#allocation2 + $0x10] sm:$0xf] %v4921_v53  ;;  %4106 = vrot.lane.b32.xlu0 %v4102_v11, %s9651_s30  ;;  %v9856_v12 = vld [vmem:[#allocation42_spill] sm:$0xff]  ;;  %v4585_v11 = vmul.f32 %v9857_v37, %v8932_v39  ;;  %v9870_v60 = vld [vmem:[#allocation37_spill] sm:$0xff]  ;;  %v9872_v39 = vld [vmem:[#allocation44_spill] sm:$0xff] }
 0x9b5   : > { %v4787_v18 = vsel %vm834_vm0, %v9856_v12, %v9855_v38  ;;  %v4791_v53 = vmul.f32 %v9856_v12, %v4770_v42  ;;  %v9863_v19 = vld [vmem:[#allocation54_spill] sm:$0xff]  ;;  %v4745_v20 = vsel %vm9871_vm8, %v9865_v59, %v9870_v60  ;;  %v9883_v60 = vld [vmem:[#allocation64_spill] sm:$0xff] }
 0x9b6   : > { %4233 = vrot.lane.b32.xlu1 %v4229_v15, %s9640_s11  ;;  %v4792_v47 = vmul.f32 %v4787_v18, %v4771_v17  ;;  %v9860_v17 = vld [vmem:[#allocation46_spill] sm:$0xff]  ;;  %v4498_v42 = vsel %vm817_vm7, %v9864_v26, %v9863_v19  ;;  %v9867_v15 = vld [vmem:[#allocation45_spill] sm:$0xff]  ;;  %v4750_v18 = vmul.f32 %v4745_v20, %v8936_v63 }
 0x9b7   : > { %v4706_v45 = vsel %vm9862_vm15, %v9861_v61, %v9860_v17  ;;  %v4503_v57 = vmul.f32 %v4498_v42, %v4482_v1  ;;  %v4618_v23 = vsel %vm943_vm4, %v9867_v15, %v9866_v31  ;;  %v9868_v1 = vld [vmem:[#allocation50_spill] sm:$0xff]  ;;  %v9878_v26 = vld [vmem:[#allocation65_spill] sm:$0xff]  ;;  %vm9903_vm15 = vcmask 1043456  }
 0x9b8   : > { %4799 = vrot.lane.b32.xlu0 %v4792_v47, %s9643_s1  ;;  %v4711_v36 = vmul.f32 %v4706_v45, %v4690_v14  ;;  %v4755_v14 = vrot.slane %v4749_v49, 4  ;;  %v4623_v58 = vmul.f32 %v4618_v23, %v4602_v34  ;;  %v4504_v34 = vmul.f32 %v9863_v19, %v8934_v4  ;;  %v9873_v47 = vld [vmem:[#allocation41_spill] sm:$0xff]  ;;  %v5217_v37 = vld [vmem:[#allocation2 + $0x18] sm:$0xf]  ;;  %v9877_v19 = vld [vmem:[#allocation68_spill] sm:$0xff] }
 0x9b9   : > { %v4668_v17 = vmul.f32 %v9873_v47, %v4647_v29  ;;  %v5025_v42 = vsel %vm9879_vm1, %v9878_v26, %v9877_v19  ;;  %v4543_v59 = vmul.f32 %v9868_v1, %v8920_v43  ;;  %v9880_v15 = vld [vmem:[#allocation70_spill] sm:$0xff]  ;;  %v9884_v43 = vld [vmem:[#allocation61_spill] sm:$0xff]  ;;  %vm9904_vm8 = vmmov %vm9903_vm15 }
 0x9ba   : > { %4231 = vrot.lane.b32.xlu1 %v4228_v41, %s9640_s11  ;;  %v9869_v41 = vld [vmem:[#allocation47_spill] sm:$0xff]  ;;  %v4629_v38 = vrot.slane %v4623_v58, 4  ;;  %v9885_v20 = vld [vmem:[#allocation62_spill] sm:$0xff]  ;;  %vm9906_vm1 = vmmov %vm9890_vm11 }
 0x9bb   : > { %v4537_v33 = vsel %vm859_vm6, %v9869_v41, %v9868_v1  ;;  %v5216_v61 = vld [vmem:[#allocation2 + $0x10] sm:$0xf]  ;;  %v4674_v45 = vrot.slane %v4668_v17, 4  ;;  %v5064_v1 = vsel %vm943_vm4, %v9884_v43, %v9883_v60 }
 0x9bc   : > { %4797 = vrot.lane.b32.xlu0 %v4791_v53, %s9643_s1  ;;  %v4542_v12 = vmul.f32 %v4537_v33, %v4521_v27  ;;  %v4756_v53 = vrot.slane %v4750_v18, 4  ;;  %v9875_v27 = vld [vmem:[#allocation58_spill] sm:$0xff] }
 0x9bd   : > { %v5233_v4 = vsel %vm834_vm0, %v9876_v0, %v9875_v27  ;;  %v4928_v49 = vld [vmem:[#allocation2 + $0x10] sm:$0xf]  ;;  %v5136_v33 = vld [vmem:[#allocation2 + $0x18] sm:$0xf] }
 0x9be   : > { %4189 = vrot.lane.b32.xlu1 %v4184_v5, %s9649_s9  ;;  %v4664_v5 = vsel %vm9874_vm3, %v9873_v47, %v9872_v39  ;;  %v4548_v7 = vrot.slane %v4542_v12, 4  ;;  %v5238_v63 = vmul.f32 %v5233_v4, %v5217_v37  ;;  %v5048_v41 = vld [vmem:[#allocation2 + $0x10] sm:$0xf]  ;;  %v5010_v4 = vld [vmem:[#allocation2 + $0x18] sm:$0xf] }
 0x9bf   : > { %v5069_v18 = vmul.f32 %v5064_v1, %v5048_v41  ;;  %v4967_v47 = vld [vmem:[#allocation2 + $0x10] sm:$0xf]  ;;  %v5031_v17 = vmul.f32 %v9877_v19, %v5010_v4 }
 0x9c0   : > { %4591 = vrot.lane.b32.xlu0 %v4584_v54, %s9650_s27  ;;  %v4624_v54 = vmul.f32 %v9866_v31, %v8922_v32  ;;  %v9881_v32 = vld [vmem:[#allocation67_spill] sm:$0xff] }
 0x9c1   : > { %v4944_v31 = vsel %vm817_vm7, %v9881_v32, %v9880_v15  ;;  %v5075_v37 = vrot.slane %v5069_v18, 4 }
 0x9c2   : > { %4108 = vrot.lane.b32.xlu1 %v4103_v6, %s9651_s30  ;;  %v4669_v6 = vmul.f32 %v4664_v5, %v8942_v55  ;;  %v5237_v55 = vmul.f32 %v9876_v0, %v5216_v61  ;;  %v4949_v23 = vmul.f32 %v4944_v31, %v4928_v49  ;;  %v5135_v5 = vld [vmem:[#allocation2 + $0x10] sm:$0xf]  ;;  %v4929_v61 = vld [vmem:[#allocation2 + $0x18] sm:$0xf] }
 0x9c3   : > { %v4950_v26 = vmul.f32 %v9880_v15, %v4929_v61  ;;  %v5266_v15 = vld [vmem:[%s9895_s8] sm:$0xf] }
 0x9c4   : > { %4510 = vrot.lane.b32.xlu0 %v4503_v57, %s9652_s29  ;;  %v4675_v35 = vrot.slane %v4669_v6, 4  ;;  %v4630_v57 = vrot.slane %v4624_v54, 4 }
 0x9c6   : > { %4718 = vrot.lane.b32.xlu1 %v4711_v36, %s9642_s6  ;;  %v5009_v36 = vld [vmem:[#allocation2 + $0x10] sm:$0xf] }
 0x9c7   : > { %v5030_v29 = vmul.f32 %v5025_v42, %v5009_v36 }
 0x9c8   : > { %4758 = vrot.lane.b32.xlu0 %v4755_v14, %s9641_s10  ;;  %v9882_v14 = vld [vmem:[#allocation53_spill] sm:$0xff] }
 0x9ca   : > { %4716 = vrot.lane.b32.xlu1 %v4710_v9, %s9642_s6  ;;  %v5174_v9 = vld [vmem:[#allocation2 + $0x10] sm:$0xf] }
 0x9cb   : > { %v5195_v58 = vmul.f32 %v9882_v14, %v5174_v9 }
 0x9cc   : > { %4633 = vrot.lane.b32.xlu0 %v4629_v38, %s9649_s9  ;;  %v9886_v38 = vld [vmem:[#allocation59_spill] sm:$0xff] }
 0x9cd   : > { %v5152_v12 = vsel %vm9837_vm13, %v9886_v38, %v9885_v20  ;;  %v5156_v0 = vmul.f32 %v9886_v38, %v5135_v5  ;;  %v4966_v20 = vld [vmem:[#allocation2 + $0x8] sm:$0xf]  ;;  %vm9907_vm13 = vmmov %vm9874_vm3 }
 0x9ce   : > { %4593 = vrot.lane.b32.xlu1 %v4585_v11, %s9650_s27  ;;  %v4549_v11 = vrot.slane %v4543_v59, 4  ;;  %v5157_v39 = vmul.f32 %v5152_v12, %v5136_v33  ;;  %v9893_v59 = vld [vmem:[#allocation57_spill] sm:$0xff]  ;;  %v4968_v33 = vld [vmem:[#allocation2 + $0x18] sm:$0xf] }
 0x9d0   : > { %4552 = vrot.lane.b32.xlu0 %v4548_v7, %s9651_s30  ;;  %v9887_v7 = vld [vmem:[#allocation66_spill] sm:$0xff] }
 0x9d1   : > { %v4989_v1 = vmul.f32 %v9887_v7, %v4968_v33 }
 0x9d2   : > { %4512 = vrot.lane.b32.xlu1 %v4504_v34, %s9652_s29  ;;  %v5201_v34 = vrot.slane %v5195_v58, 4  ;;  %v5049_v58 = vld [vmem:[#allocation2 + $0x18] sm:$0xf] }
 0x9d3   : > { %v5070_v41 = vmul.f32 %v9883_v60, %v5049_v58  ;;  %v4995_v12 = vrot.slane %v4989_v1, 4  ;;  %v4820_v60 = vld [vmem:[%s9896_s3] sm:$0xf]  ;;  %s9953_s3 = sld [smem:[#allocation121_spill]] }
 0x9d4   : > { %5245 = vrot.lane.b32.xlu0 %v5238_v63, %s9643_s1  ;;  %v9910_v1 = vld [vmem:[#allocation12_spill] sm:$0xff] }
 0x9d5   : > { %v5076_v43 = vrot.slane %v5070_v41, 4 }
 0x9d6   : > { %4760 = vrot.lane.b32.xlu1 %v4756_v53, %s9641_s10  ;;  %v9888_v53 = vld [vmem:[#allocation63_spill] sm:$0xff] }
 0x9d7   : > { %v4983_v6 = vsel %vm859_vm6, %v9888_v53, %v9887_v7  ;;  %v4987_v38 = vmul.f32 %v9888_v53, %v4966_v20  ;;  %v9898_v7 = vld [vmem:[#allocation69_spill] sm:$0xff] }
 0x9d8   : > { %5243 = vrot.lane.b32.xlu0 %v5237_v55, %s9643_s1  ;;  %v4988_v27 = vmul.f32 %v4983_v6, %v4967_v47  ;;  %v5175_v55 = vld [vmem:[#allocation2 + $0x18] sm:$0xf] }
 0x9da   : > { %4679 = vrot.lane.b32.xlu1 %v4675_v35, %s9640_s11  ;;  %v4994_v63 = vrot.slane %v4988_v27, 4  ;;  %v4927_v35 = vld [vmem:[#allocation2 + $0x8] sm:$0xf] }
 0x9db   : > { %v4948_v36 = vmul.f32 %v9881_v32, %v4927_v35  ;;  %v5093_v32 = vld [vmem:[#allocation2 + $0x10] sm:$0xf] }
 0x9dc   : > { %5037 = vrot.lane.b32.xlu0 %v5030_v29, %s9650_s27  ;;  %v5094_v29 = vld [vmem:[#allocation2 + $0x18] sm:$0xf] }
 0x9de   : > { %4677 = vrot.lane.b32.xlu1 %v4674_v45, %s9640_s11  ;;  %v9889_v45 = vld [vmem:[#allocation56_spill] sm:$0xff] }
 0x9df   : > { %v5191_v54 = vsel %vm9890_vm11, %v9882_v14, %v9889_v45  ;;  %v5114_v14 = vmul.f32 %v9893_v59, %v5093_v32  ;;  %vm9909_vm11 = vmmov %vm9904_vm8 }
 0x9e0   : > { %4956 = vrot.lane.b32.xlu0 %v4949_v23, %s9652_s29  ;;  %v5196_v42 = vmul.f32 %v5191_v54, %v5175_v55 }
 0x9e2   : > { %4635 = vrot.lane.b32.xlu1 %v4630_v57, %s9649_s9  ;;  %v9892_v57 = vld [vmem:[#allocation60_spill] sm:$0xff]  ;;  %v5202_v9 = vrot.slane %v5196_v42, 4 }
 0x9e3   : > { %v5110_v49 = vsel %vm9894_vm14, %v9893_v59, %v9892_v57  ;;  %vm9911_vm14 = vmmov %vm9904_vm8 }
 0x9e4   : > { %5204 = vrot.lane.b32.xlu0 %v5201_v34, %s9641_s10  ;;  %v5115_v31 = vmul.f32 %v5110_v49, %v5094_v29  ;;  %v4993_v34 = vrot.slane %v4987_v38, 4  ;;  %v5359_v20 = vsel %vm9911_vm14, %v9910_v1, 0.0 }
 0x9e6   : > { %4554 = vrot.lane.b32.xlu1 %v4549_v11, %s9651_s30  ;;  %v5121_v23 = vrot.slane %v5115_v31, 4  ;;  %v5120_v11 = vrot.slane %v5114_v14, 4 }
 0x9e8   : > { %5079 = vrot.lane.b32.xlu0 %v5075_v37, %s9649_s9 }
 0x9ea   : > { %5164 = vrot.lane.b32.xlu1 %v5157_v39, %s9642_s6  ;;  %v9897_v39 = vld [vmem:[#allocation72_spill] sm:$0xff] }
 0x9ec   : > { %4998 = vrot.lane.b32.xlu0 %v4994_v63, %s9651_s30 }
 0x9ee   : > { %5162 = vrot.lane.b32.xlu1 %v5156_v0, %s9642_s6  ;;  %s9891_s6 = sld [smem:[#allocation113_spill]] }
 0x9f0   : > { %4954 = vrot.lane.b32.xlu0 %v4948_v36, %s9652_s29 }
 0x9f2   : > { %5039 = vrot.lane.b32.xlu1 %v5031_v17, %s9650_s27 }
 0x9f4   : > { %v4374_v19 = vld [vmem:[%s9891_s6] sm:$0xf] }
 0x9f5   : > { %4377 = vperm.xlu0 %6339, %v4374_v19   ;;  %v9905_v19 = vld [vmem:[#allocation71_spill] sm:$0xff] }
 0x9f6   : > { %4958 = vrot.lane.b32.xlu1 %v4950_v26, %s9652_s29 }
 0x9f9   : > { %5269 = vperm.xlu0 %6339, %v5266_v15  }
 0x9fa   : > { %5206 = vrot.lane.b32.xlu1 %v5202_v9, %s9641_s10 }
 0x9fe   : > { %5125 = vrot.lane.b32.xlu1 %v5121_v23, %s9640_s11 }
 0xa02   : > { %5123 = vrot.lane.b32.xlu1 %v5120_v11, %s9640_s11 }
 0xa06   : > { %5081 = vrot.lane.b32.xlu1 %v5076_v43, %s9649_s9  ;;  %v9908_v43 = vld [vmem:[#allocation11_spill] sm:$0xff] }
 0xa0a   : > { %5000 = vrot.lane.b32.xlu1 %v4995_v12, %s9651_s30 }
 0xa0e   : > { %4996 = vrot.lane.b32.xlu1 %v4993_v34, %s9651_s30  ;;  %v4354_v18 = vpop.permute.xlu0 %4353  ;;  %s9918_s30 = sld [smem:[#allocation112_spill]] }
 0xa0f   : > { %v4358_v47 = vsel %vm817_vm7, %v4354_v18, %v9897_v39  ;;  %v4273_v5 = vpop.permute.xlu1 %4272 }
 0xa10   : > { %4362 = vst [vmem:[#allocation3 + $0x40] sm:$0xf] %v4358_v47  ;;  %v4277_v53 = vsel %vm9899_vm2, %v4273_v5, %v9898_v7  ;;  %vm9912_vm2 = vmmov %vm9906_vm1 }
 0xa11   : > { %4281 = vst [vmem:[#allocation3 + $0x80] sm:$0xf] %v4277_v53 }
 0xa12   : > { %4823 = vperm.xlu1 %6340, %v4820_v60   ;;  %v4352_v6 = vpop.permute.xlu0 %4351 }
 0xa13   : > { %v4357_v37 = vsel %vm817_vm7, %v4352_v6, %v4354_v18  ;;  %v4271_v27 = vpop.permute.xlu1 %4270 }
 0xa14   : > { %4361 = vst [vmem:[#allocation3 + $0x88] sm:$0xf] %v4357_v37  ;;  %v4276_v0 = vsel %vm9900_vm10, %v4271_v27, %v4273_v5  ;;  %vm9913_vm10 = vmmov %vm9902_vm5 }
 0xa15   : > { %4280 = vst [vmem:[#allocation3 + $0x70] sm:$0xf] %v4276_v0 }
 0xa16   : > { %v4146_v4 = vpop.permute.xlu0 %4145 }
 0xa17   : > { %v4149_v63 = vsel %vm9901_vm12, %v8828_v28, %v4146_v4  ;;  %v4148_v35 = vpop.permute.xlu1 %4147  ;;  %v4373_v17 = vld [vmem:[#allocation3 + $0x40] sm:$0xf]  ;;  %vm9914_vm12 = vcmask 924672  }
 0xa18   : > { %4153 = vst [vmem:[#allocation3 + $0x78] sm:$0xf] %v4149_v63  ;;  %v4150_v61 = vsel %vm9902_vm5, %v4146_v4, %v4148_v35  ;;  %6184 = vmatprep.subr.msk.mxu1 %vm9903_vm15, %v4373_v17  ;;  %vm9915_vm5 = vmmov %vm9904_vm8 }
 0xa19   : > { %4154 = vst [vmem:[#allocation3 + $0x58] sm:$0xf] %v4150_v61  ;;  %vm9916_vm15 = vmmov %vm9914_vm12  ;;  %v9137_v61 = vld [vmem:[#allocation2] sm:$0xff] }
 0xa1a   : > { %v4065_v55 = vpop.permute.xlu0 %4064 }
 0xa1b   : > { %v4068_v45 = vsel %vm834_vm0, %v8841_v30, %v4065_v55  ;;  %v4067_v54 = vpop.permute.xlu1 %4066  ;;  %v4372_v36 = vld [vmem:[#allocation3 + $0x88] sm:$0xf] }
 0xa1c   : > { %4072 = vst [vmem:[#allocation3] sm:$0xf] %v4068_v45  ;;  %v4069_v26 = vsel %vm834_vm0, %v4065_v55, %v4067_v54  ;;  %6185 = vmatpush1.msk.msra.mxu1 %vm9904_vm8, %v4372_v36  ;;  %vm9917_vm8 = vmmov %vm9915_vm5  ;;  %v9145_v36 = vld [vmem:[%s9921_s17] sm:$0xff] }
 0xa1d   : > { %4073 = vst [vmem:[#allocation3 + $0x38] sm:$0xf] %v4069_v26 }
 0xa1e   : > { %v4313_v28 = vpop.permute.xlu0 %4312 }
 0xa22   : > { %v4188_v59 = vpop.permute.xlu0 %4187 }
 0xa23   : > { %v4191_v30 = vsel %vm9874_vm3, %v8766_v56, %v4188_v59  ;;  %vm9919_vm3 = vcmask 293888  }
 0xa24   : > { %v4315_v42 = vpop.permute.xlu1 %4314  ;;  %4195 = vst [vmem:[#allocation3 + $0x78] sm:$0xf0] %v4191_v30 }
 0xa25   : > { %v4318_v29 = vsel %vm859_vm6, %v4313_v28, %v4315_v42  ;;  %v4319_v57 = vsel %vm859_vm6, %v4315_v42, %v9905_v19 }
 0xa26   : > { %4322 = vst [vmem:[#allocation3 + $0x70] sm:$0xf0] %v4318_v29  ;;  %4323 = vst [vmem:[#allocation3 + $0x80] sm:$0xf0] %v4319_v57  ;;  %v4107_v31 = vpop.permute.xlu0 %4106 }
 0xa27   : > { %v4110_v32 = vsel %vm9906_vm1, %v8810_v62, %v4107_v31  ;;  %v5358_v62 = vsel %vm9909_vm11, %v9908_v43, 0.0  ;;  %vm9920_vm1 = vmmov %vm9913_vm10 }
 0xa28   : > { %v4234_v49 = vpop.permute.xlu1 %4233  ;;  %4114 = vst [vmem:[#allocation3] sm:$0xf0] %v4110_v32  ;;  %vm9922_vm11 = vmmov %vm9912_vm2 }
 0xa29   : > { %v4238_v9 = vsel %vm943_vm4, %v4234_v49, %v8806_v10  ;;  %vm9924_vm14 = vmmov %vm9920_vm1 }
 0xa2a   : > { %4242 = vst [vmem:[#allocation3 + $0x8] sm:$0xf0] %v4238_v9  ;;  %v4800_v56 = vpop.permute.xlu0 %4799 }
 0xa2b   : > { %v4804_v11 = vsel %vm817_vm7, %v4800_v56, %v8782_v13  ;;  %v5360_v13 = vadd.f32 %v5359_v20, %v5358_v62  ;;  %v4366_v47 = vld [vmem:[#allocation3 + $0x78] sm:$0xff] }
 0xa2c   : > { %v4232_v15 = vpop.permute.xlu1 %4231  ;;  %4808 = vst [vmem:[#allocation3 + $0x40] sm:$0xf] %v4804_v11 }
 0xa2d   : > { %v4237_v23 = vsel %vm943_vm4, %v4232_v15, %v4234_v49  ;;  %v4371_v14 = vld [vmem:[#allocation3 + $0x80] sm:$0xff]  ;;  %v4370_v58 = vld [vmem:[#allocation3 + $0x70] sm:$0xff] }
 0xa2e   : > { %4241 = vst [vmem:[#allocation3 + $0x20] sm:$0xf0] %v4237_v23  ;;  %4413 = vmatprep.subr.mxu1 %v4371_v14  ;;  %v4798_v38 = vpop.permute.xlu0 %4797 }
 0xa2f   : > { %4414 = vmatpush1.msra.mxu1 %v4370_v58  ;;  %v4803_v12 = vsel %vm817_vm7, %v4798_v38, %v4800_v56  ;;  %v4364_v27 = vld [vmem:[#allocation3] sm:$0xff] }
 0xa30   : > { %v4190_v41 = vpop.permute.xlu1 %4189  ;;  %4807 = vst [vmem:[#allocation3 + $0x88] sm:$0xf] %v4803_v12 }
 0xa31   : > { %v4192_v10 = vsel %vm9907_vm13, %v4188_v59, %v4190_v41  ;;  %v4369_v33 = vld [vmem:[#allocation3 + $0x8] sm:$0xff] }
 0xa32   : > { %4196 = vst [vmem:[#allocation3 + $0x58] sm:$0xf0] %v4192_v10  ;;  %4415 = vmatprep.subr.mxu1 %v4369_v33  ;;  %4646 = vst [vmem:[#allocation3 + $0x8] sm:$0xf] %v8926_v46  ;;  %v4592_v39 = vpop.permute.xlu0 %4591  ;;  %v5090_v10 = vld [vmem:[#allocation2 + $0x18] sm:$0xf] }
 0xa33   : > { %v4595_v5 = vsel %vm9913_vm10, %v8874_v16, %v4592_v39  ;;  %v4819_v7 = vld [vmem:[#allocation3 + $0x40] sm:$0xf]  ;;  %vm9927_vm10 = vmmov %vm9922_vm11 }
 0xa34   : > { %v4109_v34 = vpop.permute.xlu1 %4108  ;;  %4599 = vst [vmem:[#allocation3 + $0x78] sm:$0xf] %v4595_v5  ;;  %6194 = vmatprep.subr.msk.mxu0 %vm9915_vm5, %v4819_v7 }
 0xa35   : > { %v4111_v60 = vsel %vm9912_vm2, %v4107_v31, %v4109_v34  ;;  %v4368_v18 = vld [vmem:[#allocation3 + $0x20] sm:$0xff]  ;;  %vm9925_vm2 = vmmov %vm9907_vm13 }
 0xa36   : > { %4115 = vst [vmem:[#allocation3 + $0x38] sm:$0xf0] %v4111_v60  ;;  %5361 = vadd.xlane.f32.xlu1 %v5360_v13  ;;  %4416 = vmatpush1.msra.mxu1 %v4368_v18  ;;  %4645 = vst [vmem:[#allocation3 + $0x20] sm:$0xf] %v8946_v51  ;;  %v4511_v37 = vpop.permute.xlu0 %4510 }
 0xa37   : > { %v4514_v51 = vsel %vm834_vm0, %v8876_v52, %v4511_v37  ;;  %v4818_v4 = vld [vmem:[#allocation3 + $0x88] sm:$0xf] }
 0xa38   : > { %v4719_v46 = vpop.permute.xlu1 %4718  ;;  %4518 = vst [vmem:[#allocation3] sm:$0xf] %v4514_v51  ;;  %6195 = vmatpush1.msk.msra.mxu0 %vm9917_vm8, %v4818_v4 }
 0xa39   : > { %v4723_v53 = vsel %vm9914_vm12, %v4719_v46, %v8868_v44  ;;  %v4367_v6 = vld [vmem:[#allocation3 + $0x58] sm:$0xff]  ;;  %v4363_v44 = vld [vmem:[%s9918_s30] sm:$0xf]  ;;  %vm9928_vm12 = vmmov %vm9915_vm5 }
 0xa3a   : > { %4727 = vst [vmem:[#allocation3 + $0x80] sm:$0xf] %v4723_v53  ;;  %4417 = vmatprep.subr.mxu1 %v4367_v6  ;;  %v4759_v35 = vpop.permute.xlu0 %4758  ;;  %v4809_v53 = vld [vmem:[%s9932_s7] sm:$0xf] }
 0xa3b   : > { %4418 = vmatpush1.msra.mxu1 %v4366_v47 }
 0xa3c   : > { %v4717_v0 = vpop.permute.xlu1 %4716 }
 0xa3d   : > { %v4722_v16 = vsel %vm9916_vm15, %v4717_v0, %v4719_v46  ;;  %v4365_v63 = vld [vmem:[#allocation3 + $0x38] sm:$0xff] }
 0xa3e   : > { %4726 = vst [vmem:[#allocation3 + $0x70] sm:$0xf] %v4722_v16  ;;  %4419 = vmatprep.subr.mxu1 %v4365_v63  ;;  %v4634_v55 = vpop.permute.xlu0 %4633 }
 0xa3f   : > { %4420 = vmatpush1.msra.mxu1 %v4364_v27  ;;  %v4637_v45 = vsel %vm9907_vm13, %v8878_v40, %v4634_v55 }
 0xa40   : > { %6186 = vmatmul.mubr.msk.f32.vlgmr.msra.gmra.mxu1 %vm9919_vm3, %v4363_v44  ;;  %v4594_v17 = vpop.permute.xlu1 %4593  ;;  %4641 = vst [vmem:[#allocation3 + $0x78] sm:$0xf0] %v4637_v45 }
 0xa41   : > { %v4596_v52 = vsel %vm9920_vm1, %v4592_v39, %v4594_v17  ;;  %5345 = vmatprep.mubr.f32.mxu1 %v9137_v61 }
 0xa42   : > { %4600 = vst [vmem:[#allocation3 + $0x58] sm:$0xf] %v4596_v52  ;;  %v4553_v28 = vpop.permute.xlu0 %4552 }
 0xa43   : > { %v4556_v42 = vsel %vm9922_vm11, %v8886_v48, %v4553_v28  ;;  %v5671_v48 = vld [vmem:[%s9923_s18] sm:$0xff]  ;;  %s6494_s18 = smov 120  }
 0xa44   : > { %v4513_v54 = vpop.permute.xlu1 %4512  ;;  %4560 = vst [vmem:[#allocation3] sm:$0xf0] %v4556_v42 }
 0xa45   : > { %v4515_v26 = vsel %vm834_vm0, %v4511_v37, %v4513_v54 }
 0xa46   : > { %4519 = vst [vmem:[#allocation3 + $0x38] sm:$0xf] %v4515_v26  ;;  %v5246_v57 = vpop.permute.xlu0 %5245 }
 0xa47   : > { %5775 = vrot.lane.b32.xlu1 %v9145_v36, %s6492_s21  ;;  %v5250_v59 = vsel %vm817_vm7, %v5246_v57, %v8882_v2  ;;  %v4812_v56 = vld [vmem:[#allocation3 + $0x78] sm:$0xff] }
 0xa48   : > { %v4761_v29 = vpop.permute.xlu1 %4760  ;;  %5254 = vst [vmem:[#allocation3 + $0x40] sm:$0xf] %v5250_v59 }
 0xa49   : > { %v4764_v40 = vsel %vm859_vm6, %v4759_v35, %v4761_v29  ;;  %v4765_v19 = vsel %vm859_vm6, %v4761_v29, %v8870_v8 }
 0xa4a   : > { %4768 = vst [vmem:[#allocation3 + $0x70] sm:$0xf0] %v4764_v40  ;;  %4769 = vst [vmem:[#allocation3 + $0x80] sm:$0xf0] %v4765_v19  ;;  %v5244_v8 = vpop.permute.xlu0 %5243 }
 0xa4b   : > { %5945 = vrot.lane.b32.xlu1 %v9145_v36, %s6493_s22  ;;  %v5249_v9 = vsel %vm817_vm7, %v5244_v8, %v5246_v57  ;;  %vm9926_vm7 = vmmov %vm9915_vm5 }
 0xa4c   : > { %v4680_v30 = vpop.permute.xlu1 %4679  ;;  %5253 = vst [vmem:[#allocation3 + $0x88] sm:$0xf] %v5249_v9  ;;  %vm9929_vm5 = vmmov %vm9916_vm15 }
 0xa4d   : > { %v4684_v49 = vsel %vm943_vm4, %v4680_v30, %v8872_v3  ;;  %vm9930_vm15 = vmmov %vm9925_vm2 }
 0xa4e   : > { %4688 = vst [vmem:[#allocation3 + $0x8] sm:$0xf0] %v4684_v49  ;;  %v5038_v23 = vpop.permute.xlu0 %5037  ;;  %vm9931_vm8 = vmmov %vm9929_vm5 }
 0xa4f   : > { %5674 = vperm.xlu1 %6340, %v5671_v48   ;;  %v5041_v14 = vsel %vm9924_vm14, %v8892_v25, %v5038_v23  ;;  %v5265_v3 = vld [vmem:[#allocation3 + $0x40] sm:$0xf]  ;;  %v5089_v25 = vld [vmem:[#allocation2 + $0x10] sm:$0xf] }
 0xa50   : > { %v4678_v31 = vpop.permute.xlu1 %4677  ;;  %6204 = vmatprep.subr.msk.mxu1 %vm9926_vm7, %v5265_v3  ;;  %5045 = vst [vmem:[#allocation3 + $0x78] sm:$0xf] %v5041_v14  ;;  %v5255_v48 = vld [vmem:[%s9936_s0] sm:$0xf]  ;;  %s9965_s0 = sshll.u32 %s9962_s2, 4 }
 0xa51   : > { %v4683_v32 = vsel %vm943_vm4, %v4678_v31, %v4680_v30  ;;  %v4817_v15 = vld [vmem:[#allocation3 + $0x80] sm:$0xff]  ;;  %v4816_v2 = vld [vmem:[#allocation3 + $0x70] sm:$0xff]  ;;  %s793_s20 = scalar_lea.vmem %s9966_s13, %s9965_s0 }
 0xa52   : > { %4687 = vst [vmem:[#allocation3 + $0x20] sm:$0xf0] %v4683_v32  ;;  %4859 = vmatprep.subr.mxu0 %v4817_v15  ;;  %v4957_v33 = vpop.permute.xlu0 %4956 }
 0xa53   : > { %4860 = vmatpush1.msra.mxu0 %v4816_v2  ;;  %v5264_v20 = vld [vmem:[#allocation3 + $0x88] sm:$0xf] }
 0xa54   : > { %v4636_v58 = vpop.permute.xlu1 %4635  ;;  %6205 = vmatpush1.msk.msra.mxu1 %vm9928_vm12, %v5264_v20 }
 0xa55   : > { %v4638_v11 = vsel %vm9925_vm2, %v4634_v55, %v4636_v58  ;;  %v4815_v41 = vld [vmem:[#allocation3 + $0x8] sm:$0xff] }
 0xa56   : > { %4642 = vst [vmem:[#allocation3 + $0x58] sm:$0xf0] %v4638_v11  ;;  %4861 = vmatprep.subr.mxu0 %v4815_v41  ;;  %5092 = vst [vmem:[#allocation3 + $0x8] sm:$0xf] %v5090_v10  ;;  %v5205_v34 = vpop.permute.xlu0 %5204 }
 0xa58   : > { %v4555_v62 = vpop.permute.xlu1 %4554 }
 0xa59   : > { %v4557_v38 = vsel %vm9927_vm10, %v4553_v28, %v4555_v62  ;;  %v4814_v12 = vld [vmem:[#allocation3 + $0x20] sm:$0xff] }
 0xa5a   : > { %4561 = vst [vmem:[#allocation3 + $0x38] sm:$0xf0] %v4557_v38  ;;  %4862 = vmatpush1.msra.mxu0 %v4814_v12  ;;  %5091 = vst [vmem:[#allocation3 + $0x20] sm:$0xf] %v5089_v25  ;;  %v5080_v39 = vpop.permute.xlu0 %5079 }
 0xa5b   : > { %v5083_v47 = vsel %vm9930_vm15, %v8890_v22, %v5080_v39 }
 0xa5c   : > { %v5165_v13 = vpop.permute.xlu1 %5164  ;;  %5087 = vst [vmem:[#allocation3 + $0x78] sm:$0xf0] %v5083_v47 }
 0xa5d   : > { %v5169_v60 = vsel %vm9929_vm5, %v5165_v13, %v8880_v21  ;;  %v4813_v18 = vld [vmem:[#allocation3 + $0x58] sm:$0xff]  ;;  %v4810_v21 = vld [vmem:[#allocation3] sm:$0xff] }
 0xa5e   : > { %5173 = vst [vmem:[#allocation3 + $0x80] sm:$0xf] %v5169_v60  ;;  %4863 = vmatprep.subr.mxu0 %v4813_v18  ;;  %v4999_v6 = vpop.permute.xlu0 %4998 }
 0xa5f   : > { %4864 = vmatpush1.msra.mxu0 %v4812_v56 }
 0xa60   : > { %v5163_v5 = vpop.permute.xlu1 %5162 }
 0xa61   : > { %v5168_v46 = vsel %vm9931_vm8, %v5163_v5, %v5165_v13  ;;  %v4811_v7 = vld [vmem:[#allocation3 + $0x38] sm:$0xff] }
 0xa62   : > { %5172 = vst [vmem:[#allocation3 + $0x70] sm:$0xf] %v5168_v46  ;;  %4865 = vmatprep.subr.mxu0 %v4811_v7  ;;  %v4955_v22 = vpop.permute.xlu0 %4954 }
 0xa63   : > { %4866 = vmatpush1.msra.mxu0 %v4810_v21  ;;  %v4960_v51 = vsel %vm834_vm0, %v4955_v22, %v4957_v33  ;;  %v5258_v59 = vld [vmem:[#allocation3 + $0x78] sm:$0xff] }
 0xa64   : > { %6196 = vmatmul.mubr.msk.f32.vlgmr.msra.gmra.mxu0 %vm9919_vm3, %v4809_v53  ;;  %v5040_v37 = vpop.permute.xlu1 %5039  ;;  %4964 = vst [vmem:[#allocation3] sm:$0xf] %v4960_v51 }
 0xa65   : > { %v5042_v27 = vsel %vm9920_vm1, %v5038_v23, %v5040_v37 }
 0xa66   : > { %5046 = vst [vmem:[#allocation3 + $0x58] sm:$0xf] %v5042_v27 }
 0xa68   : > { %v4959_v0 = vpop.permute.xlu1 %4958 }
 0xa69   : > { %v4961_v4 = vsel %vm834_vm0, %v4957_v33, %v4959_v0  ;;  %vm9933_vm0 = vmmov %vm9925_vm2  ;;  %v5511_v0 = vld [vmem:[%s9944_s14 + $0xf8] sm:$0xff] }
 0xa6a   : > { %4965 = vst [vmem:[#allocation3 + $0x38] sm:$0xf] %v4961_v4  ;;  %vm9938_vm2 = vmmov %vm9926_vm7  ;;  %6231 = vmatprep.subr.mxu0 %v5511_v0  ;;  %v5495_v4 = vld [vmem:[%s9944_s14 + $0x78] sm:$0xff] }
 0xa6b   : > { %vm9939_vm7 = vmmov %vm9938_vm2  ;;  %6232 = vmatpush3.msra.mxu0 %v5495_v4 }
 0xa6c   : > { %v5207_v16 = vpop.permute.xlu1 %5206  ;;  %vm9940_vm5 = vmmov %vm9938_vm2 }
 0xa6d   : > { %v5210_v63 = vsel %vm859_vm6, %v5205_v34, %v5207_v16  ;;  %v5211_v44 = vsel %vm859_vm6, %v5207_v16, %v8884_v50  ;;  %vm9934_vm6 = vmmov %vm9927_vm10  ;;  %v5510_v16 = vld [vmem:[%s9944_s14 + $0xf0] sm:$0xff] }
 0xa6e   : > { %5214 = vst [vmem:[#allocation3 + $0x70] sm:$0xf0] %v5210_v63  ;;  %5215 = vst [vmem:[#allocation3 + $0x80] sm:$0xf0] %v5211_v44  ;;  %6233 = vmatprep.subr.mxu0 %v5510_v16  ;;  %v5494_v63 = vld [vmem:[%s9944_s14 + $0x70] sm:$0xff]  ;;  %v5509_v44 = vld [vmem:[%s9944_s14 + $0xe8] sm:$0xff] }
 0xa6f   : > { %vm9935_vm13 = vmmov %vm9934_vm6  ;;  %6234 = vmatpush3.msra.mxu0 %v5494_v63 }
 0xa70   : > { %v5126_v35 = vpop.permute.xlu1 %5125  ;;  %v4378_v8 = vpop.permute.xlu0 %4377  ;;  %vm9941_vm15 = vmmov %vm9938_vm2  ;;  %6235 = vmatprep.subr.mxu0 %v5509_v44 }
 0xa71   : > { %v5130_v17 = vsel %vm943_vm4, %v5126_v35, %v8888_v24  ;;  %vm9942_vm1 = vmmov %vm9938_vm2 }
 0xa72   : > { %5134 = vst [vmem:[#allocation3 + $0x8] sm:$0xf0] %v5130_v17  ;;  %v5508_v17 = vld [vmem:[%s9944_s14 + $0xe0] sm:$0xff] }
 0xa74   : > { %v5124_v52 = vpop.permute.xlu1 %5123 }
 0xa75   : > { %v5129_v55 = vsel %vm943_vm4, %v5124_v52, %v5126_v35  ;;  %v5263_v45 = vld [vmem:[#allocation3 + $0x80] sm:$0xff]  ;;  %v5262_v54 = vld [vmem:[#allocation3 + $0x70] sm:$0xff]  ;;  %vm9937_vm4 = vmmov %vm9919_vm3 }
 0xa76   : > { %5133 = vst [vmem:[#allocation3 + $0x20] sm:$0xf0] %v5129_v55  ;;  %5305 = vmatprep.subr.mxu1 %v5263_v45  ;;  %v5493_v35 = vld [vmem:[%s9944_s14 + $0x68] sm:$0xff]  ;;  %v5492_v52 = vld [vmem:[%s9944_s14 + $0x60] sm:$0xff]  ;;  %v5507_v55 = vld [vmem:[%s9944_s14 + $0xd8] sm:$0xff] }
 0xa77   : > { %5306 = vmatpush1.msra.mxu1 %v5262_v54  ;;  %6236 = vmatpush3.msra.mxu0 %v5493_v35  ;;  %v5491_v45 = vld [vmem:[%s9944_s14 + $0x58] sm:$0xff]  ;;  %v5506_v54 = vld [vmem:[%s9944_s14 + $0xd0] sm:$0xff] }
 0xa78   : > { %v5082_v26 = vpop.permute.xlu1 %5081  ;;  %6237 = vmatprep.subr.mxu0 %v5508_v17 }
 0xa79   : > { %v5084_v28 = vsel %vm9933_vm0, %v5080_v39, %v5082_v26  ;;  %v5261_v42 = vld [vmem:[#allocation3 + $0x8] sm:$0xff]  ;;  %v5270_v39 = vpop.permute.xlu0 %5269  ;;  %vm9943_vm0 = vmmov %vm9942_vm1  ;;  %6238 = vmatpush3.msra.mxu0 %v5492_v52  ;;  %v5490_v26 = vld [vmem:[%s9944_s14 + $0x50] sm:$0xff] }
 0xa7a   : > { %5088 = vst [vmem:[#allocation3 + $0x58] sm:$0xf0] %v5084_v28  ;;  %5307 = vmatprep.subr.mxu1 %v5261_v42  ;;  %6239 = vmatprep.subr.mxu0 %v5507_v55  ;;  %v5505_v28 = vld [vmem:[%s9944_s14 + $0xc8] sm:$0xff] }
 0xa7b   : > { %6240 = vmatpush3.msra.mxu0 %v5491_v45  ;;  %v5489_v42 = vld [vmem:[%s9944_s14 + $0x48] sm:$0xff] }
 0xa7c   : > { %v5001_v50 = vpop.permute.xlu1 %5000  ;;  %6241 = vmatprep.subr.mxu0 %v5506_v54 }
 0xa7d   : > { %v5003_v29 = vsel %vm9934_vm6, %v4999_v6, %v5001_v50  ;;  %v5260_v40 = vld [vmem:[#allocation3 + $0x20] sm:$0xff]  ;;  %6242 = vmatpush3.msra.mxu0 %v5490_v26  ;;  %vm9945_vm6 = vmmov %vm9943_vm0 }
 0xa7e   : > { %5007 = vst [vmem:[#allocation3 + $0x38] sm:$0xf0] %v5003_v29  ;;  %5308 = vmatpush1.msra.mxu1 %v5260_v40  ;;  %v5504_v50 = vld [vmem:[%s9944_s14 + $0xc0] sm:$0xff]  ;;  %6243 = vmatprep.subr.mxu0 %v5505_v28  ;;  %v5503_v40 = vld [vmem:[%s9944_s14 + $0xb8] sm:$0xff] }
 0xa7f   : > { %v5488_v29 = vld [vmem:[%s9944_s14 + $0x40] sm:$0xff]  ;;  %6244 = vmatpush3.msra.mxu0 %v5489_v42 }
 0xa80   : > { %v4997_v24 = vpop.permute.xlu1 %4996  ;;  %6245 = vmatprep.subr.mxu0 %v5504_v50 }
 0xa81   : > { %v5002_v19 = vsel %vm9935_vm13, %v4997_v24, %v4999_v6  ;;  %v5259_v57 = vld [vmem:[#allocation3 + $0x58] sm:$0xff]  ;;  %6246 = vmatpush3.msra.mxu0 %v5488_v29  ;;  %vm9946_vm13 = vmmov %vm9943_vm0 }
 0xa82   : > { %5006 = vst [vmem:[#allocation3] sm:$0xf0] %v5002_v19  ;;  %5309 = vmatprep.subr.mxu1 %v5259_v57  ;;  %v5487_v24 = vld [vmem:[%s9944_s14 + $0x38] sm:$0xff]  ;;  %v5502_v19 = vld [vmem:[%s9944_s14 + $0xb0] sm:$0xff]  ;;  %6247 = vmatprep.subr.mxu0 %v5503_v40 }
 0xa83   : > { %5310 = vmatpush1.msra.mxu1 %v5258_v59  ;;  %v5486_v57 = vld [vmem:[%s9944_s14 + $0x30] sm:$0xff]  ;;  %6248 = vmatpush3.msra.mxu0 %v5487_v24  ;;  %v5501_v59 = vld [vmem:[%s9944_s14 + $0xa8] sm:$0xff] }
 0xa84   : > { %6249 = vmatprep.subr.mxu0 %v5502_v19 }
 0xa85   : > { %v5257_v30 = vld [vmem:[#allocation3 + $0x38] sm:$0xff]  ;;  %6250 = vmatpush3.msra.mxu0 %v5486_v57 }
 0xa86   : > { %5311 = vmatprep.subr.mxu1 %v5257_v30  ;;  %v5485_v30 = vld [vmem:[%s9944_s14 + $0x28] sm:$0xff]  ;;  %6251 = vmatprep.subr.mxu0 %v5501_v59 }
 0xa87   : > { %6252 = vmatpush3.msra.mxu0 %v5485_v30 }
 0xa89   : > { %v5256_v49 = vld [vmem:[#allocation3] sm:$0xff] }
 0xa8a   : > { %5312 = vmatpush1.msra.mxu1 %v5256_v49  ;;  %v5484_v49 = vld [vmem:[%s9944_s14 + $0x20] sm:$0xff] }
 0xa8b   : > { %6206 = vmatmul.mubr.msk.f32.vlgmr.msra.gmra.mxu1 %vm9937_vm4, %v5255_v48  ;;  %v5500_v48 = vld [vmem:[%s9944_s14 + $0xa0] sm:$0xff]  ;;  %vm9947_vm4 = vmmov %vm9943_vm0 }
 0xa8c   : > { %5764 = vmatprep.mubr.f32.mxu1 %v9137_v61  ;;  %6253 = vmatprep.subr.mxu0 %v5500_v48 }
 0xa8d   : > { %v4824_v41 = vpop.permute.xlu1 %4823  ;;  %6254 = vmatpush3.msra.mxu0 %v5484_v49 }
 0xb00   : > { %v4455_v9 = vpop.f32.mrf.mxu1 }
 0xb01   : > { %v4456_v31 = vadd.f32 %v4455_v9, %v4378_v8  ;;  %v5483_v9 = vld [vmem:[%s9944_s14 + $0x18] sm:$0xff] }
 0xb02   : > { %v4457_v32 = vpop.f32.mrf.mxu1 }
 0xb03   : > { %vm4460_vm11 = vcmp.ge.f32.partialorder %v4456_v31, 0.0  ;;  %v4462_v15 = vmul.f32 0.2, %v4456_v31  ;;  %v4458_v2 = vadd.f32 %v4457_v32, %v4378_v8  ;;  %v5499_v8 = vld [vmem:[%s9944_s14 + $0x98] sm:$0xff]  ;;  %v5482_v32 = vld [vmem:[%s9944_s14 + $0x10] sm:$0xff] }
 0xb04   : > { %6255 = vmatprep.subr.mxu0 %v5499_v8 }
 0xb05   : > { %v9196_v23 = vsel %vm4460_vm11, %v4456_v31, %v4462_v15  ;;  %vm4461_vm14 = vcmp.ge.f32.partialorder %v4458_v2, 0.0  ;;  %v4463_v14 = vmul.f32 0.2, %v4458_v2  ;;  %v5498_v31 = vld [vmem:[%s9944_s14 + $0x90] sm:$0xff]  ;;  %6256 = vmatpush3.msra.mxu0 %v5483_v9  ;;  %v5497_v15 = vld [vmem:[%s9944_s14 + $0x88] sm:$0xff]  ;;  %vm9948_vm11 = vmmov %vm9943_vm0 }
 0xb06   : > { %v5373_v3 = vsel %vm9938_vm2, %v9196_v23, 0.0  ;;  %6257 = vmatprep.subr.mxu0 %v5498_v31  ;;  %vm9950_vm2 = vmmov %vm9943_vm0 }
 0xb07   : > { %v9198_v58 = vsel %vm4461_vm14, %v4458_v2, %v4463_v14  ;;  %v5481_v2 = vld [vmem:[%s9944_s14 + $0x8] sm:$0xff]  ;;  %6258 = vmatpush3.msra.mxu0 %v5482_v32  ;;  %v5496_v14 = vld [vmem:[%s9944_s14 + $0x80] sm:$0xff]  ;;  %vm9949_vm14 = vmmov %vm9943_vm0 }
 0xb08   : > { %v5374_v56 = vsel %vm9939_vm7, %v9198_v58, 0.0  ;;  %6259 = vmatprep.subr.mxu0 %v5497_v15  ;;  %vm9951_vm7 = vmmov %vm9943_vm0 }
 0xb09   : > { %v5375_v11 = vadd.f32 %v5374_v56, %v5373_v3  ;;  %v5480_v3 = vld [vmem:[%s9944_s14] sm:$0xff]  ;;  %6260 = vmatpush3.msra.mxu0 %v5481_v2 }
 0xb0a   : > { %6261 = vmatprep.subr.mxu0 %v5496_v14 }
 0xb0b   : > { %5376 = vadd.xlane.f32.xlu0 %v5375_v11  ;;  %6262 = vmatpush3.msra.mxu0 %v5480_v3  ;;  %v5362_v11 = vpop.xlane.xlu1 %5361 }
 0xb24   : > { %v4901_v10 = vpop.f32.mrf.mxu0 }
 0xb25   : > { %v4902_v33 = vadd.f32 %v4901_v10, %v4824_v41 }
 0xb26   : > { %v4903_v62 = vpop.f32.mrf.mxu0 }
 0xb27   : > { %vm4906_vm10 = vcmp.ge.f32.partialorder %v4902_v33, 0.0  ;;  %v4908_v20 = vmul.f32 0.2, %v4902_v33  ;;  %v4904_v38 = vadd.f32 %v4903_v62, %v4824_v41 }
 0xb29   : > { %v9204_v12 = vsel %vm4906_vm10, %v4902_v33, %v4908_v20  ;;  %vm4907_vm12 = vcmp.ge.f32.partialorder %v4904_v38, 0.0  ;;  %v4909_v25 = vmul.f32 0.2, %v4904_v38  ;;  %v6207_v33 = vmul.f32 -0.00390625, %v5362_v11  ;;  %vm9952_vm10 = vmmov %vm9943_vm0 }
 0xb2a   : > { %v5388_v13 = vsel %vm9940_vm5, %v9204_v12, 0.0  ;;  %vm9955_vm5 = vmmov %vm9943_vm0 }
 0xb2b   : > { %v9206_v34 = vsel %vm4907_vm12, %v4904_v38, %v4909_v25  ;;  %v5365_v38 = vmul.f32 1.442695, %v6207_v33  ;;  %vm5690_vm12 = vcmask 31744  }
 0xb2c   : > { %v5389_v60 = vsel %vm9941_vm15, %v9206_v34, 0.0  ;;  %vm9957_vm15 = vmmov %vm9943_vm0 }
 0xb2d   : > { %v5390_v18 = vadd.f32 %v5389_v60, %v5388_v13 }
 0xb2f   : > { %5391 = vadd.xlane.f32.xlu0 %v5390_v18 }
 0xb4b   : > { %v5347_v47 = vpop.f32.mrf.mxu1 }
 0xb4c   : > { %v5348_v5 = vadd.f32 %v5347_v47, %v5270_v39 }
 0xb4d   : > { %v5349_v46 = vpop.f32.mrf.mxu1 }
 0xb4e   : > { %vm5352_vm8 = vcmp.ge.f32.partialorder %v5348_v5, 0.0  ;;  %v5354_v7 = vmul.f32 0.2, %v5348_v5  ;;  %v5350_v53 = vadd.f32 %v5349_v46, %v5270_v39 }
 0xb50   : > { %v9212_v21 = vsel %vm5352_vm8, %v5348_v5, %v5354_v7  ;;  %vm5353_vm3 = vcmp.ge.f32.partialorder %v5350_v53, 0.0  ;;  %v5355_v6 = vmul.f32 0.2, %v5350_v53  ;;  %vm9958_vm8 = vmmov %vm9943_vm0 }
 0xb51   : > { %v5403_v27 = vsel %vm9942_vm1, %v9212_v21, 0.0  ;;  %vm9960_vm1 = vmmov %vm9943_vm0 }
 0xb52   : > { %v9214_v37 = vsel %vm5353_vm3, %v5350_v53, %v5355_v6  ;;  %vm9959_vm3 = vmmov %vm9943_vm0 }
 0xb53   : > { %v5404_v22 = vsel %vm9943_vm0, %v9214_v37, 0.0 }
 0xb54   : > { %v5405_v51 = vadd.f32 %v5404_v22, %v5403_v27 }
 0xb56   : > { %5406 = vadd.xlane.f32.xlu0 %v5405_v51 }
 0xb6c   : > { %5860 = vrot.lane.b32.xlu0 %v9145_v36, %s6494_s18 }
 0xb94   : > { %v5377_v56 = vpop.xlane.xlu0 %5376 }
 0xb95   : > { %v6208_v10 = vmul.f32 -0.00390625, %v5377_v56 }
 0xb97   : > { %v5380_v20 = vmul.f32 1.442695, %v6208_v10 }
 0xb99   : > { %6413 = vpow2.f32 %v5380_v20 }
 0xb9a   : > { %6415 = vpow2.f32 %v5365_v38 }
 0xba6   : > { %v6414_v13 = vpop.eup %6413 }
 0xba7   : > { %v6416_v60 = vpop.eup %6415  ;;  %v5382_v39 = vadd.f32 1.0, %v6414_v13 }
 0xba8   : > { %v5367_v47 = vadd.f32 1.0, %v6416_v60 }
 0xbb8   : > { %v5392_v41 = vpop.xlane.xlu0 %5391 }
 0xbb9   : > { %v6209_v62 = vmul.f32 -0.00390625, %v5392_v41 }
 0xbbb   : > { %v5395_v25 = vmul.f32 1.442695, %v6209_v62 }
 0xbbd   : > { %6417 = vpow2.f32 %v5395_v25 }
 0xbbe   : > { %6419 = vrcp.f32 %v5382_v39 }
 0xbbf   : > { %6421 = vrcp.f32 %v5367_v47 }
 0xbca   : > { %v6418_v18 = vpop.eup %6417 }
 0xbcb   : > { %v5397_v5 = vadd.f32 1.0, %v6418_v18  ;;  %v6420_v6 = vpop.eup %6419 }
 0xbcc   : > { %v6422_v27 = vpop.eup %6421  ;;  %v5385_v51 = vmul.f32 2.0, %v6420_v6 }
 0xbcd   : > { %6423 = vrcp.f32 %v5397_v5  ;;  %v5370_v0 = vmul.f32 2.0, %v6422_v27 }
 0xbce   : > { %v9317_v16 = vmul.f32 %v5385_v51, %v9196_v23  ;;  %v9320_v63 = vmul.f32 %v5385_v51, %v9198_v58 }
 0xbcf   : > { %v9323_v35 = vmul.f32 %v5370_v0, %v9908_v43  ;;  %v9326_v17 = vmul.f32 %v5370_v0, %v9910_v1 }
 0xbd0   : > { %v5432_v23 = vsel %vm9945_vm6, %v9317_v16, 0.0  ;;  %v5439_v58 = vsel %vm9946_vm13, %v9320_v63, 0.0  ;;  %vm9961_vm6 = vmmov %vm9943_vm0 }
 0xbd1   : > { %v5418_v43 = vsel %vm9947_vm4, %v9323_v35, 0.0  ;;  %v5425_v1 = vsel %vm9948_vm11, %v9326_v17, 0.0  ;;  %v5433_v54 = vrot.slane %v5432_v23, 4  ;;  %v5440_v26 = vrot.slane %v5439_v58, 4 }
 0xbd2   : > { %v5419_v28 = vrot.slane %v5418_v43, 4  ;;  %v5426_v42 = vrot.slane %v5425_v1, 4 }
 0xbd3   : > { %v5434_v40 = vadd.f32 %v5433_v54, %v5432_v23  ;;  %v5441_v24 = vadd.f32 %v5440_v26, %v5439_v58 }
 0xbd4   : > { %v5420_v19 = vadd.f32 %v5419_v28, %v5418_v43  ;;  %v5427_v57 = vadd.f32 %v5426_v42, %v5425_v1 }
 0xbd5   : > { %v5435_v48 = vrot.slane %v5434_v40, 2  ;;  %v5442_v49 = vrot.slane %v5441_v24, 2 }
 0xbd6   : > { %v5421_v8 = vrot.slane %v5420_v19, 2  ;;  %v5428_v9 = vrot.slane %v5427_v57, 2 }
 0xbd7   : > { %v5443_v14 = vadd.f32 %v5442_v49, %v5441_v24  ;;  %v5436_v3 = vadd.f32 %v5435_v48, %v5434_v40  ;;  %v5594_v40 = vld [vmem:[%s9953_s3 + $0x28] sm:$0xff]  ;;  %v5593_v24 = vld [vmem:[%s9953_s3 + $0x20] sm:$0xff] }
 0xbd8   : > { %v5429_v41 = vadd.f32 %v5428_v9, %v5427_v57  ;;  %v5422_v10 = vadd.f32 %v5421_v8, %v5420_v19  ;;  %v5592_v19 = vld [vmem:[%s9953_s3 + $0x18] sm:$0xff]  ;;  %v5591_v57 = vld [vmem:[%s9953_s3 + $0x10] sm:$0xff] }
 0xbd9   : > { %v5444_v13 = vrot.slane %v5443_v14, 1  ;;  %v5437_v18 = vrot.slane %v5436_v3, 1 }
 0xbda   : > { %v6424_v22 = vpop.eup %6423  ;;  %v5430_v39 = vrot.slane %v5429_v41, 1 }
 0xbdb   : > { %v5400_v4 = vmul.f32 2.0, %v6424_v22  ;;  %v5438_v6 = vadd.f32 %v5437_v18, %v5436_v3 }
 0xbdc   : > { %v5431_v22 = vadd.f32 %v5430_v39, %v5429_v41 }
 0xbdd   : > { %v9329_v52 = vmul.f32 %v5400_v4, %v9204_v12  ;;  %v9332_v55 = vmul.f32 %v5400_v4, %v9206_v34 }
 0xbdf   : > { %v5407_v46 = vpop.xlane.xlu0 %5406  ;;  %v5448_v12 = vsel %vm9949_vm14, %v9329_v52, 0.0  ;;  %v5455_v34 = vsel %vm9950_vm2, %v9332_v55, 0.0 }
 0xbe0   : > { %v6210_v7 = vmul.f32 -0.00390625, %v5407_v46  ;;  %v5449_v50 = vrot.slane %v5448_v12, 4  ;;  %v5456_v29 = vrot.slane %v5455_v34, 4 }
 0xbe2   : > { %v5410_v53 = vmul.f32 1.442695, %v6210_v7  ;;  %v5450_v59 = vadd.f32 %v5449_v50, %v5448_v12  ;;  %v5457_v30 = vadd.f32 %v5456_v29, %v5455_v34  ;;  %v5445_v7 = vadd.f32 %v5444_v13, %v5443_v14  ;;  %v5596_v50 = vld [vmem:[%s9953_s3 + $0x38] sm:$0xff]  ;;  %v5595_v29 = vld [vmem:[%s9953_s3 + $0x30] sm:$0xff] }
 0xbe3   : > { %5624 = vmatprep.subr.mxu0 %v5596_v50 }
 0xbe4   : > { %6425 = vpow2.f32 %v5410_v53  ;;  %v5458_v32 = vrot.slane %v5457_v30, 2  ;;  %v5451_v15 = vrot.slane %v5450_v59, 2  ;;  %v5447_v23 = vadd.f32 %v5445_v7, %v5431_v22 }
 0xbe6   : > { %v5459_v33 = vadd.f32 %v5458_v32, %v5457_v30  ;;  %v5452_v62 = vadd.f32 %v5451_v15, %v5450_v59  ;;  %v5590_v59 = vld [vmem:[%s9953_s3 + $0x8] sm:$0xff]  ;;  %v5589_v30 = vld [vmem:[%s9953_s3] sm:$0xff] }
 0xbe8   : > { %v5460_v47 = vrot.slane %v5459_v33, 1 }
 0xbea   : > { %v5461_v0 = vadd.f32 %v5460_v47, %v5459_v33  ;;  %v9954_v33 = vld [vmem:[#allocation7_spill] sm:$0xff]  ;;  %v9963_v47 = vld [vmem:[#allocation9_spill] sm:$0xff] }
 0xbec   : > { %v5463_v12 = vadd.f32 %v5461_v0, %v5447_v23 }
 0xbf1   : > { %v6426_v44 = vpop.eup %6425 }
 0xbf2   : > { %v5412_v45 = vadd.f32 1.0, %v6426_v44 }
 0xbf4   : > { %6427 = vrcp.f32 %v5412_v45 }
 0xc01   : > { %v6428_v31 = vpop.eup %6427 }
 0xc02   : > { %v5415_v2 = vmul.f32 2.0, %v6428_v31 }
 0xc04   : > { %v9347_v56 = vmul.f32 %v5415_v2, %v9212_v21  ;;  %v9350_v11 = vmul.f32 %v5415_v2, %v9214_v37  ;;  %v5423_v21 = vrot.slane %v5422_v10, 1  ;;  %v5453_v37 = vrot.slane %v5452_v62, 1 }
 0xc06   : > { %v5464_v20 = vsel %vm9951_vm7, %v9347_v56, 0.0  ;;  %v5471_v38 = vsel %vm9952_vm10, %v9350_v11, 0.0  ;;  %v5424_v51 = vadd.f32 %v5423_v21, %v5422_v10  ;;  %v5454_v44 = vadd.f32 %v5453_v37, %v5452_v62 }
 0xc07   : > { %v5465_v25 = vrot.slane %v5464_v20, 4  ;;  %v5472_v60 = vrot.slane %v5471_v38, 4 }
 0xc08   : > { %v5446_v43 = vadd.f32 %v5438_v6, %v5424_v51 }
 0xc09   : > { %v5473_v5 = vadd.f32 %v5472_v60, %v5471_v38  ;;  %v5466_v46 = vadd.f32 %v5465_v25, %v5464_v20 }
 0xc0a   : > { %v5462_v54 = vadd.f32 %v5454_v44, %v5446_v43 }
 0xc0b   : > { %v5474_v53 = vrot.slane %v5473_v5, 2  ;;  %v5467_v27 = vrot.slane %v5466_v46, 2 }
 0xc0d   : > { %v5475_v4 = vadd.f32 %v5474_v53, %v5473_v5  ;;  %v5468_v45 = vadd.f32 %v5467_v27, %v5466_v46  ;;  %v9964_v46 = vld [vmem:[#allocation10_spill] sm:$0xff] }
 0xc0f   : > { %v5476_v58 = vrot.slane %v5475_v4, 1  ;;  %v5469_v1 = vrot.slane %v5468_v45, 1 }
 0xc11   : > { %v5477_v34 = vadd.f32 %v5476_v58, %v5475_v4  ;;  %v5470_v26 = vadd.f32 %v5469_v1, %v5468_v45 }
 0xc13   : > { %v5479_v28 = vadd.f32 %v5477_v34, %v5463_v12  ;;  %v5478_v42 = vadd.f32 %v5470_v26, %v5462_v54 }
 0xc15   : > { %5576 = vmatprep.mubr.f32.mxu0 %v5479_v28 }
 0xc16   : > { %5577 = vmatmul.mubr.f32.vlgmr.msra.gmra.mxu0 %v5478_v42 }
 0xc17   : > { %5664 = vmatprep.mubr.f32.mxu0 %v9137_v61  ;;  %5625 = vmatpush1.msra.mxu0 %v5595_v29 }
 0xc18   : > { %5626 = vmatprep.subr.mxu0 %v5594_v40 }
 0xc19   : > { %5627 = vmatpush1.msra.mxu0 %v5593_v24 }
 0xc1a   : > { %5628 = vmatprep.subr.mxu0 %v5592_v19 }
 0xc1b   : > { %5629 = vmatpush1.msra.mxu0 %v5591_v57 }
 0xc1c   : > { %5630 = vmatprep.subr.mxu0 %v5590_v59 }
 0xc1d   : > { %5631 = vmatpush1.msra.mxu0 %v5589_v30 }
 0xcd6   : > { %v6263_v48 = vpop.f32.mrf.mxu0 }
 0xcd8   : > { %v6264_v49 = vpop.f32.mrf.mxu0 }
 0xcd9   : > { %v6265_v8 = vadd.f32 %v6264_v49, %v6263_v48 }
 0xcdb   : > { %v6211_v9 = vmul.f32 -1.442695, %v6265_v8 }
 0xcdd   : > { %6429 = vpow2.f32 %v6211_v9 }
 0xcea   : > { %v6430_v31 = vpop.eup %6429 }
 0xceb   : > { %v5585_v32 = vadd.f32 1.0, %v6430_v31 }
 0xced   : > { %6431 = vrcp.f32 %v5585_v32 }
 0xcfa   : > { %v6432_v15 = vpop.eup %6431 }
 0xcfb   : > { %v5588_v2 = vmul.f32 2.0, %v6432_v15 }
 0xcfd   : > { %6212 = vmatmul.mubr.msk.f32.vlgmr.msra.gmra.mxu0 %vm3500_vm9, %v5588_v2  ;;  %vm9956_vm9 = vmmov %vm9943_vm0 }
 0xdbd   : > { %v5666_v14 = vpop.f32.mrf.mxu0 }
 0xdbe   : > { %v5667_v3 = vadd.f32 1.0, %v5666_v14 }
 0xdbf   : > { %v5668_v41 = vpop.f32.mrf.mxu0 }
 0xdc0   : > { %v5669_v10 = vadd.f32 1.0, %v5668_v41  ;;  %v5683_v62 = vrot.slane %v5667_v3, %v9954_v33 }
 0xdc2   : > { %v5687_v20 = vrot.slane %v5669_v10, %v9954_v33  ;;  %v5688_v25 = vmul.f32 %v5683_v62, %v9323_v35  ;;  %v5773_v60 = vmul.f32 %v5683_v62, %v9317_v16  ;;  %v5776_v35 = vpop.permute.xlu1 %5775 }
 0xdc4   : > { %v5689_v38 = vmul.f32 %v5687_v20, %v9326_v17  ;;  %v5774_v13 = vmul.f32 %v5687_v20, %v9320_v63  ;;  %v5859_v18 = vmul.f32 %v5687_v20, %v9332_v55  ;;  %v5858_v63 = vmul.f32 %v5683_v62, %v9329_v52 }
 0xdc5   : > { %v5944_v16 = vmul.f32 %v5687_v20, %v9350_v11  ;;  %v5943_v17 = vmul.f32 %v5683_v62, %v9347_v56 }
 0xdc6   : > { %6213 = vmatprep.subr.msk.mxu1 %vm9955_vm5, %v5689_v38  ;;  %v5946_v52 = vpop.permute.xlu1 %5945 }
 0xdc7   : > { %6214 = vmatpush1.msk.msra.mxu1 %vm9956_vm9, %v5688_v25 }
 0xdc8   : > { %6215 = vmatmul.mubr.msk.f32.vlgmr.msra.gmra.mxu1 %vm5690_vm12, %v9145_v36  ;;  %6216 = vmatprep.subr.msk.mxu1 %vm9957_vm15, %v5774_v13  ;;  %v5861_v36 = vpop.permute.xlu0 %5860 }
 0xdc9   : > { %6217 = vmatpush1.msk.msra.mxu1 %vm9958_vm8, %v5773_v60  ;;  %5849 = vmatprep.mubr.f32.mxu1 %v9137_v61 }
 0xdca   : > { %6219 = vmatprep.subr.msk.mxu1 %vm9959_vm3, %v5859_v18  ;;  %v5675_v11 = vpop.permute.xlu1 %5674 }
 0xdcb   : > { %v5677_v5 = vadd.f32 %v5675_v11, %v9963_v47  ;;  %v5678_v7 = vadd.f32 %v5675_v11, %v9964_v46 }
 0xdcc   : > { %6218 = vmatmul.mubr.msk.f32.vlgmr.msra.gmra.mxu1 %vm5690_vm12, %v5776_v35 }
 0xdcd   : > { %6220 = vmatpush1.msk.msra.mxu1 %vm9960_vm1, %v5858_v63  ;;  %5934 = vmatprep.mubr.f32.mxu1 %v9137_v61 }
 0xdce   : > { %6222 = vmatprep.subr.msk.mxu1 %vm9943_vm0, %v5944_v16 }
 0xdd0   : > { %6221 = vmatmul.mubr.msk.f32.vlgmr.msra.gmra.mxu1 %vm5690_vm12, %v5861_v36 }
 0xdd1   : > { %6223 = vmatpush1.msk.msra.mxu1 %vm9961_vm6, %v5943_v17  ;;  %6019 = vmatprep.mubr.f32.mxu1 %v9137_v61 }
 0xdd4   : > { %6224 = vmatmul.mubr.msk.f32.vlgmr.msra.gmra.mxu1 %vm5690_vm12, %v5946_v52 }
 0xe88   : > { %v5766_v55 = vpop.f32.mrf.mxu1 }
 0xe89   : > { %v5771_v56 = vadd.f32 %v5766_v55, %v5677_v5 }
 0xe8a   : > { %v5768_v39 = vpop.f32.mrf.mxu1 }
 0xe8b   : > { %v5772_v6 = vadd.f32 %v5768_v39, %v5678_v7 }
 0xe8c   : > { %v5851_v21 = vpop.f32.mrf.mxu1 }
 0xe8d   : > { %v5856_v27 = vadd.f32 %v5851_v21, %v5771_v56 }
 0xe8e   : > { %v5853_v37 = vpop.f32.mrf.mxu1 }
 0xe8f   : > { %v5857_v51 = vadd.f32 %v5853_v37, %v5772_v6 }
 0xe90   : > { %v5936_v53 = vpop.f32.mrf.mxu1 }
 0xe91   : > { %v5941_v61 = vadd.f32 %v5936_v53, %v5856_v27 }
 0xe92   : > { %v5938_v22 = vpop.f32.mrf.mxu1 }
 0xe93   : > { %v5942_v4 = vadd.f32 %v5938_v22, %v5857_v51 }
 0xe94   : > { %v6021_v0 = vpop.f32.mrf.mxu1 }
 0xe95   : > { %v6026_v44 = vadd.f32 %v6021_v0, %v5941_v61 }
 0xe96   : > { %v6023_v45 = vpop.f32.mrf.mxu1 }
 0xe97   : > { %6028 = vst [vmem:[%s793_s20] sm:$0xff] %v6026_v44  ;;  %v6027_v23 = vadd.f32 %v6023_v45, %v5942_v4 }
 0xe99   : > { %6029 = vst [vmem:[%s793_s20 + $0x8] sm:$0xff] %v6027_v23 }
 0xe9a PF: > { %s9967_s6 = sld [smem:[#allocation6_spill]] }
 0xea0   : > { %s38_s7 = sadd.s32 1, %s9967_s6  }
 0xea1   : > { %p35_p4 = scmp.ge.s32.totalorder %s38_s7, 4  }
 0xea3   :  { %37 = sbr.rel (!%p35_p4) target bundleno = 26 (0x1a), region = 177 }

</bundles_post_ra>
